<compile_context>
chip_gen: v6e
topology: v6e:2x2x1
jax: 0.10.0
libtpu: 0.0.40
codegen_flags: <defaults>
</compile_context>

<pallas_src>
import functools

import jax
import jax.numpy as jnp
from jax.experimental import pallas as pl
from jax.experimental.pallas import tpu as pltpu


# Leaves headroom on v7x's 64 MiB physical VMEM; above the 32 MiB default.
_VMEM_LIMIT = 48 * 1024 * 1024


def _round_up(v, m):
    return (v + m - 1) // m * m


# --------------------------------------------------------------------------
# Kernel 1: conv-embedding frontend + hoisted x@W_ih for BOTH LSTM directions
# --------------------------------------------------------------------------
def _conv_tap_dots(x_ref, halo_ref, w_ref):
    """sum_k tap_k @ W[k*F:(k+1)*F]  for Conv1d(k=3, s=2, p=1) taps.

    x_ref:    (Tc, 2, B, F)  x_pad[2t + c] pairs for this chunk's output times
    halo_ref: (1, 2, B, F)   first frame-pair of the NEXT chunk (tap k=2 halo)
    w_ref:    (3F, N)
    """
    Tc, _, B, F = x_ref.shape
    rows = Tc * B
    xb = x_ref[...]                                   # (Tc, 2, B, F) bf16
    hl = halo_ref[...]                                # (1, 2, B, F)
    w = w_ref[...]                                    # (3F, N)      bf16
    tap0 = xb[:, 0].reshape(rows, F)                  # x_pad[2t]
    tap1 = xb[:, 1].reshape(rows, F)                  # x_pad[2t+1]
    tap2 = jnp.concatenate([xb[1:, 0], hl[:, 0]], axis=0).reshape(rows, F)
    acc = jnp.dot(tap0, w[0 * F:1 * F], preferred_element_type=jnp.float32)
    acc = acc + jnp.dot(tap1, w[1 * F:2 * F], preferred_element_type=jnp.float32)
    acc = acc + jnp.dot(tap2, w[2 * F:3 * F], preferred_element_type=jnp.float32)
    return acc


def _frontend_kernel(x_ref, halo_ref, wc_ref, bc_ref, wg_ref, bg_ref,
                     gf_ref, gb_ref):
    # emb = conv(x); gates = emb @ [W_ih_fwd | W_ih_bwd]  (one fused wide-N dot)
    emb = _conv_tap_dots(x_ref, halo_ref, wc_ref) + bc_ref[...]
    gates = jnp.dot(emb.astype(jnp.bfloat16), wg_ref[...],
                    preferred_element_type=jnp.float32) + bg_ref[...]
    G4 = gf_ref.shape[-1]
    gf_ref[...] = gates[:, :G4].astype(gf_ref.dtype)      # bf16 gate stream
    gb_ref[...] = gates[:, G4:].astype(gb_ref.dtype)


def _frontend_folded_kernel(x_ref, halo_ref, wg_ref, bg_ref, gf_ref, gb_ref):
    # Conv folded into the gate projection at prepare time: one dot per tap.
    gates = _conv_tap_dots(x_ref, halo_ref, wg_ref) + bg_ref[...]
    G4 = gf_ref.shape[-1]
    gf_ref[...] = gates[:, :G4].astype(gf_ref.dtype)
    gb_ref[...] = gates[:, G4:].astype(gb_ref.dtype)


def pallas_frontend(x_pairs, wg, bg, *, Tc, conv_w=None, conv_b=None):
    Tp1, _, B, F = x_pairs.shape              # Tp1 = T_pad + 1 frame pairs
    T_pad = Tp1 - 1
    n = T_pad // Tc
    G8 = wg.shape[-1]
    G4 = G8 // 2
    M = T_pad * B
    x_spec = pl.BlockSpec((Tc, 2, B, F), lambda i: (i, 0, 0, 0))
    halo_spec = pl.BlockSpec((1, 2, B, F), lambda i: ((i + 1) * Tc, 0, 0, 0))
    full2d = lambda a: pl.BlockSpec(a.shape, lambda i: (0, 0))
    out_shape = (jax.ShapeDtypeStruct((M, G4), jnp.bfloat16),
                 jax.ShapeDtypeStruct((M, G4), jnp.bfloat16))
    out_specs = (pl.BlockSpec((Tc * B, G4), lambda i: (i, 0)),
                 pl.BlockSpec((Tc * B, G4), lambda i: (i, 0)))
    cp = pltpu.CompilerParams(dimension_semantics=("parallel",),
                              vmem_limit_bytes=_VMEM_LIMIT)
    if conv_w is None:                        # conv folded into wg/bg
        return pl.pallas_call(
            _frontend_folded_kernel, out_shape=out_shape, grid=(n,),
            in_specs=[x_spec, halo_spec, full2d(wg), full2d(bg)],
            out_specs=out_specs, compiler_params=cp,
        )(x_pairs, x_pairs, wg, bg)
    return pl.pallas_call(
        _frontend_kernel, out_shape=out_shape, grid=(n,),
        in_specs=[x_spec, halo_spec, full2d(conv_w), full2d(conv_b),
                  full2d(wg), full2d(bg)],
        out_specs=out_specs, compiler_params=cp,
    )(x_pairs, x_pairs, conv_w, conv_b, wg, bg)


# --------------------------------------------------------------------------
# Kernel 2: fused bidirectional LSTM, chunked over time (recurrent half only)
# --------------------------------------------------------------------------
def _bilstm_kernel(gf_ref, gb_ref, whhf_ref, whhb_ref, mf_ref, mb_ref,
                   hf_ref, hb_ref, hf_s, cf_s, hb_s, cb_s):
    Tc = gf_ref.shape[0]
    Hp = hf_ref.shape[-1]
    ci = pl.program_id(0)

    @pl.when(ci == 0)
    def _():
        hf_s[...] = jnp.zeros_like(hf_s)
        cf_s[...] = jnp.zeros_like(cf_s)
        hb_s[...] = jnp.zeros_like(hb_s)
        cb_s[...] = jnp.zeros_like(cb_s)

    def cell(xg, h, c, whh_ref):
        # x@W_ih was hoisted to the frontend; only h@W_hh here.  The weight is
        # read from its VMEM ref inside the dot each step (NOT hoisted into
        # vregs above the unrolled loop -> no spill cliff for large Hp).
        g = xg.astype(jnp.float32) + jnp.dot(
            h.astype(jnp.bfloat16), whh_ref[...],
            preferred_element_type=jnp.float32)
        i_g = jax.nn.sigmoid(g[:, 0 * Hp:1 * Hp])     # 128-lane aligned slabs
        f_g = jax.nn.sigmoid(g[:, 1 * Hp:2 * Hp])
        g_g = jnp.tanh(g[:, 2 * Hp:3 * Hp])
        o_g = jax.nn.sigmoid(g[:, 3 * Hp:4 * Hp])
        c_new = f_g * c + i_g * g_g
        h_new = o_g * jnp.tanh(c_new)
        return h_new, c_new

    # Statically unrolled Tc-step window; fwd/bwd interleaved per step so the
    # MXU push of one direction overlaps the VPU/EUP gate math of the other.
    for s in range(Tc):
        # ---- forward direction: local step s
        h, c = hf_s[...], cf_s[...]
        h_new, c_new = cell(gf_ref[s], h, c, whhf_ref)
        valid = mf_ref[s] > 0                         # (B, 1) bool
        hf_s[...] = jnp.where(valid, h_new, h)        # freeze state on padding
        cf_s[...] = jnp.where(valid, c_new, c)
        hf_ref[s] = jnp.where(valid, h_new, 0.0).astype(hf_ref.dtype)

        # ---- backward direction: reversed chunk, reversed local step
        sl = Tc - 1 - s
        hb, cb = hb_s[...], cb_s[...]
        hbn, cbn = cell(gb_ref[sl], hb, cb, whhb_ref)
        validb = mb_ref[sl] > 0
        hb_s[...] = jnp.where(validb, hbn, hb)
        cb_s[...] = jnp.where(validb, cbn, cb)
        hb_ref[sl] = jnp.where(validb, hbn, 0.0).astype(hb_ref.dtype)


def pallas_bilstm(gf, gb, whh_f, whh_b, mask, *, Tc):
    T_pad, B, G = gf.shape
    Hp = G // 4
    n = T_pad // Tc
    wspec = pl.BlockSpec((Hp, G), lambda ci: (0, 0))
    return pl.pallas_call(
        _bilstm_kernel,
        out_shape=(jax.ShapeDtypeStruct((T_pad, B, Hp), jnp.bfloat16),
                   jax.ShapeDtypeStruct((T_pad, B, Hp), jnp.bfloat16)),
        grid=(n,),
        in_specs=[
            pl.BlockSpec((Tc, B, G), lambda ci: (ci, 0, 0)),          # gates fwd
            pl.BlockSpec((Tc, B, G), lambda ci: (n - 1 - ci, 0, 0)),  # gates bwd
            wspec, wspec,
            pl.BlockSpec((Tc, B, 1), lambda ci: (ci, 0, 0)),          # mask fwd
            pl.BlockSpec((Tc, B, 1), lambda ci: (n - 1 - ci, 0, 0)),  # mask bwd
        ],
        out_specs=(pl.BlockSpec((Tc, B, Hp), lambda ci: (ci, 0, 0)),
                   pl.BlockSpec((Tc, B, Hp), lambda ci: (n - 1 - ci, 0, 0))),
        scratch_shapes=[pltpu.VMEM((B, Hp), jnp.float32)] * 4,
        compiler_params=pltpu.CompilerParams(
            dimension_semantics=("arbitrary",),
            vmem_limit_bytes=_VMEM_LIMIT),
    )(gf, gb, whh_f, whh_b, mask, mask)


# --------------------------------------------------------------------------
# Kernel 3: decoder MLP + log_softmax (class dim padded to 128 lanes)
# --------------------------------------------------------------------------
def _decoder_kernel(hf_ref, hb_ref, w1f_ref, w1b_ref, b1_ref, w2_ref, b2_ref,
                    o_ref):
    h = (jnp.dot(hf_ref[...], w1f_ref[...], preferred_element_type=jnp.float32)
         + jnp.dot(hb_ref[...], w1b_ref[...], preferred_element_type=jnp.float32)
         + b1_ref[...])
    h = jnp.maximum(h, 0.0).astype(jnp.bfloat16)
    # Pad class lanes get logits == -1e30 (from the f32 bias) -> exp() == 0.
    logits = jnp.dot(h, w2_ref[...],
                     preferred_element_type=jnp.float32) + b2_ref[...]
    m = jnp.max(logits, axis=-1, keepdims=True)
    lse = m + jnp.log(jnp.sum(jnp.exp(logits - m), axis=-1, keepdims=True))
    o_ref[...] = (logits - lse).astype(o_ref.dtype)


def pallas_decoder(hf, hb, w1f, w1b, b1, w2, b2, *, tm=512):
    # tm=512 stays within v7x's smaller VMEM; v5e/v6e could raise to 1024.
    M, Hp = hf.shape
    Hdp = w1f.shape[1]
    Cp = w2.shape[1]
    tm = min(tm, _round_up(M, 8))
    const = lambda i: (0, 0)
    return pl.pallas_call(
        _decoder_kernel,
        out_shape=jax.ShapeDtypeStruct((M, Cp), jnp.float32),
        grid=(pl.cdiv(M, tm),),
        in_specs=[
            pl.BlockSpec((tm, Hp), lambda i: (i, 0)),
            pl.BlockSpec((tm, Hp), lambda i: (i, 0)),
            pl.BlockSpec((Hp, Hdp), const),
            pl.BlockSpec((Hp, Hdp), const),
            pl.BlockSpec((1, Hdp), const),
            pl.BlockSpec((Hdp, Cp), const),
            pl.BlockSpec((1, Cp), const),
        ],
        out_specs=pl.BlockSpec((tm, Cp), lambda i: (i, 0)),
        compiler_params=pltpu.CompilerParams(
            dimension_semantics=("parallel",),
            vmem_limit_bytes=_VMEM_LIMIT),
    )(hf, hb, w1f, w1b, b1, w2, b2)


# --------------------------------------------------------------------------
# Parameter preparation: lane-pad gates / hidden / classes (256-multiples for
# the v6e/v7x MXU when >128), fuse both directions' W_ih, optionally fold the
# conv into the gate projection, cast matmul operands to bf16 (f32 accum).
# --------------------------------------------------------------------------
def prepare_params(params, fold):
    H = params["whh_f"].shape[0]            # LSTM hidden (= embed)
    Hd = params["dec_w1"].shape[1]          # decoder hidden
    C = params["dec_w2"].shape[1]           # classes
    Hp = _round_up(H, 256 if H > 128 else 128)    # keep 128 on v5e if tuning
    Hdp = _round_up(Hd, 256 if Hd > 128 else 128)
    Cp = _round_up(C, 128)
    bf16 = jnp.bfloat16

    def pad_gate_cols(w):                   # (..., 4H) -> (..., 4Hp)
        parts = []
        for g in range(4):
            blk = w[..., g * H:(g + 1) * H]
            pad = [(0, 0)] * (w.ndim - 1) + [(0, Hp - H)]
            parts.append(jnp.pad(blk, pad))
        return jnp.concatenate(parts, axis=-1)

    # fused input-side gate weight / bias for BOTH directions: (E, 8Hp)
    wih = jnp.concatenate([pad_gate_cols(params["wih_f"]),
                           pad_gate_cols(params["wih_b"])], axis=-1)
    big = jnp.concatenate([pad_gate_cols(params["b_f"][None, :]),
                           pad_gate_cols(params["b_b"][None, :])], axis=-1)
    whh_f = jnp.pad(pad_gate_cols(params["whh_f"]), ((0, Hp - H), (0, 0)))
    whh_b = jnp.pad(pad_gate_cols(params["whh_b"]), ((0, Hp - H), (0, 0)))

    out = {"whh_f": whh_f.astype(bf16), "whh_b": whh_b.astype(bf16),
           "Hp": Hp, "Hdp": Hdp, "Cp": Cp, "C": C}
    if fold:
        # conv folded into the gate projection (computed in f32, cast once)
        out["wg"] = (params["conv_w"] @ wih).astype(bf16)          # (3F, 8Hp)
        out["bg"] = params["conv_b"][None, :] @ wih + big
    else:
        out["conv_w"] = params["conv_w"].astype(bf16)
        out["conv_b"] = params["conv_b"][None, :]
        out["wg"] = wih.astype(bf16)
        out["bg"] = big

    H_ = H
    w1 = params["dec_w1"]                   # (2H, Hd): rows [fwd | bwd]
    out["w1f"] = jnp.pad(w1[:H_], ((0, Hp - H_), (0, Hdp - Hd))).astype(bf16)
    out["w1b"] = jnp.pad(w1[H_:], ((0, Hp - H_), (0, Hdp - Hd))).astype(bf16)
    out["b1"] = jnp.pad(params["dec_b1"], (0, Hdp - Hd))[None, :]
    out["w2"] = jnp.pad(params["dec_w2"],
                        ((0, Hdp - Hd), (0, Cp - C))).astype(bf16)
    # pad-class bias stays f32 so exp(pad logit) == 0 exactly
    out["b2"] = jnp.pad(params["dec_b2"], (0, Cp - C),
                        constant_values=-1e30)[None, :]
    return out


# --------------------------------------------------------------------------
# ASRModel forward
# --------------------------------------------------------------------------
def asr_forward(x, lengths_x, params, *, Tc=32, fold_conv=None):
    """x: (B, T, F) float32, lengths_x: (B,) int32 -> (log_probs, encoder_lens)."""
    B, T, F = x.shape
    Bp = _round_up(B, 8)                    # sublane occupancy of (B, Hp) tiles
    T_out = (T - 1) // 2 + 1                # Conv1d(k=3, s=2, p=1) output length
    Tc = max(8, min(Tc, _round_up(T_out, 8)))
    n_chunks = pl.cdiv(T_out, Tc)
    T_pad = n_chunks * Tc

    E = params["wih_f"].shape[0]
    H = params["whh_f"].shape[0]
    Hp0 = _round_up(H, 256 if H > 128 else 128)
    if fold_conv is None:                   # fold only when it is fewer FLOPs
        fold_conv = 3 * F * 8 * Hp0 < 3 * F * E + E * 8 * Hp0
    prep = prepare_params(params, fold_conv)
    Hp, Cp, C = prep["Hp"], prep["Cp"], prep["C"]

    encoder_lens = jnp.minimum((lengths_x - 1) // 2 + 1, T_out).astype(jnp.int32)

    # ---- time-major, batch-padded, bf16 view of x grouped in frame PAIRS so
    #      the frontend builds the conv taps in-kernel (no 3x-wide im2col).
    x_tm = jnp.transpose(x, (1, 0, 2)).astype(jnp.bfloat16)        # (T, B, F)
    x_tm = jnp.pad(x_tm, ((1, 2 * T_pad + 1 - T), (0, Bp - B), (0, 0)))
    x_pairs = x_tm.reshape(T_pad + 1, 2, Bp, F)        # [t, c] = x_pad[2t + c]

    # ---- frontend: conv embedding (+optional fold) + hoisted x@W_ih (both dirs)
    if fold_conv:
        gf, gb = pallas_frontend(x_pairs, prep["wg"], prep["bg"], Tc=Tc)
    else:
        gf, gb = pallas_frontend(x_pairs, prep["wg"], prep["bg"], Tc=Tc,
                                 conv_w=prep["conv_w"], conv_b=prep["conv_b"])
    gf3 = gf.reshape(T_pad, Bp, 4 * Hp)
    gb3 = gb.reshape(T_pad, Bp, 4 * Hp)

    # ---- per-example validity mask at the downsampled frame rate (bf16)
    lens_p = jnp.pad(lengths_x, (0, Bp - B))
    enc_lens_p = jnp.minimum((lens_p - 1) // 2 + 1, T_out)
    mask = (jnp.arange(T_pad)[:, None] < enc_lens_p[None, :])
    mask = mask.astype(jnp.bfloat16)[..., None]                    # (T_pad, Bp, 1)

    # ---- fused bidirectional LSTM (recurrent half only)
    hf, hb = pallas_bilstm(gf3, gb3, prep["whh_f"], prep["whh_b"], mask, Tc=Tc)
    hf2 = hf.reshape(T_pad * Bp, Hp)
    hb2 = hb.reshape(T_pad * Bp, Hp)

    # ---- decoder MLP + log_softmax (lane-padded classes)
    logp = pallas_decoder(hf2, hb2, prep["w1f"], prep["w1b"], prep["b1"],
                          prep["w2"], prep["b2"])
    logp = logp.reshape(T_pad, Bp, Cp)[:T_out, :B, :C]
    log_probs = jnp.transpose(logp, (1, 0, 2))                     # (B, T_out, C)
    return log_probs, encoder_lens


# --------------------------------------------------------------------------
# Pure-JAX f32 reference (same math, same masking semantics)
# --------------------------------------------------------------------------
def asr_forward_ref(x, lengths_x, params):
    B, T, F = x.shape
    H = params["whh_f"].shape[0]
    T_out = (T - 1) // 2 + 1
    x_pad = jnp.pad(x, ((0, 0), (1, 1), (0, 0)))
    starts = jnp.arange(T_out) * 2
    patches = jnp.concatenate([x_pad[:, starts + k, :] for k in range(3)], axis=-1)
    emb = patches @ params["conv_w"] + params["conv_b"]            # (B, T_out, E)
    enc_lens = jnp.minimum((lengths_x - 1) // 2 + 1, T_out).astype(jnp.int32)
    mask = (jnp.arange(T_out)[None, :] < enc_lens[:, None]).astype(x.dtype)

    def lstm(wih, whh, b, reverse):
        def step(carry, inp):
            h, c = carry
            x_t, m_t = inp
            g = x_t @ wih + h @ whh + b
            i = jax.nn.sigmoid(g[:, 0 * H:1 * H])
            f = jax.nn.sigmoid(g[:, 1 * H:2 * H])
            gg = jnp.tanh(g[:, 2 * H:3 * H])
            o = jax.nn.sigmoid(g[:, 3 * H:4 * H])
            c_new = f * c + i * gg
            h_new = o * jnp.tanh(c_new)
            h_out = m_t * h_new
            return (h_out + (1 - m_t) * h, m_t * c_new + (1 - m_t) * c), h_out
        xs = (jnp.transpose(emb, (1, 0, 2)), jnp.transpose(mask)[..., None])
        init = (jnp.zeros((B, H), x.dtype), jnp.zeros((B, H), x.dtype))
        _, ys = jax.lax.scan(step, init, xs, reverse=reverse)
        return jnp.transpose(ys, (1, 0, 2))

    hf = lstm(params["wih_f"], params["whh_f"], params["b_f"], False)
    hb = lstm(params["wih_b"], params["whh_b"], params["b_b"], True)
    enc = jnp.concatenate([hf, hb], axis=-1)
    h1 = jnp.maximum(enc @ params["dec_w1"] + params["dec_b1"], 0.0)
    logits = h1 @ params["dec_w2"] + params["dec_b2"]
    return jax.nn.log_softmax(logits, axis=-1), enc_lens


def init_params(key, input_size, embed_size, output_size):
    ks = jax.random.split(key, 12)
    s = 0.1
    E, F, C = embed_size, input_size, output_size
    return {
        # Conv1d(F -> E, k=3) flattened: row index = k * F + f (matches taps)
        "conv_w": s * jax.random.normal(ks[0], (3 * F, E), jnp.float32),
        "conv_b": s * jax.random.normal(ks[1], (E,), jnp.float32),
        # Forward LSTM (PyTorch gate order i,f,g,o; W stored transposed: (in, 4H))
        "wih_f": s * jax.random.normal(ks[2], (E, 4 * E), jnp.float32),
        "whh_f": s * jax.random.normal(ks[3], (E, 4 * E), jnp.float32),
        "b_f":   s * jax.random.normal(ks[4], (4 * E,), jnp.float32),
        # Backward LSTM
        "wih_b": s * jax.random.normal(ks[5], (E, 4 * E), jnp.float32),
        "whh_b": s * jax.random.normal(ks[6], (E, 4 * E), jnp.float32),
        "b_b":   s * jax.random.normal(ks[7], (4 * E,), jnp.float32),
        # Decoder MLP
        "dec_w1": s * jax.random.normal(ks[8], (2 * E, E), jnp.float32),
        "dec_b1": s * jax.random.normal(ks[9], (E,), jnp.float32),
        "dec_w2": s * jax.random.normal(ks[10], (E, C), jnp.float32),
        "dec_b2": s * jax.random.normal(ks[11], (C,), jnp.float32),
    }


if __name__ == "__main__":
    key = jax.random.PRNGKey(0)
    k_x, k_p = jax.random.split(key)

    B, T, F = 2, 16, 16          # small test shapes
    embed_size = 32
    output_size = 41

    x = jax.random.normal(k_x, (B, T, F), jnp.float32)
    lengths_x = jnp.array([16, 12], dtype=jnp.int32)
    params = init_params(k_p, F, embed_size, output_size)

    ref_lp, ref_lens = asr_forward_ref(x, lengths_x, params)
    T_out = (T - 1) // 2 + 1

    def check(log_probs, encoder_lens):
        assert log_probs.shape == (B, T_out, output_size)
        assert encoder_lens.shape == (B,)
        assert bool(jnp.all(jnp.isfinite(log_probs)))
        assert jnp.allclose(jnp.sum(jnp.exp(log_probs), axis=-1), 1.0, atol=1e-4)
        assert bool(jnp.all(ref_lens == encoder_lens))
        max_err = float(jnp.max(jnp.abs(log_probs - ref_lp)))
        assert max_err < 3e-2, f"max abs err vs reference: {max_err}"

    # default (auto) path: conv matmul + fused gate matmul in the frontend
    fwd = jax.jit(asr_forward)
    log_probs, encoder_lens = fwd(x, lengths_x, params)
    jax.block_until_ready((log_probs, encoder_lens))
    check(log_probs, encoder_lens)

    # also exercise the conv-folded frontend path
    fwd_fold = jax.jit(functools.partial(asr_forward, fold_conv=True))
    lp2, lens2 = fwd_fold(x, lengths_x, params)
    jax.block_until_ready((lp2, lens2))
    check(lp2, lens2)

    print("KERNEL_OK")
</pallas_src>

<mosaic_0001>
module attributes {stable_mosaic.version = 11 : i64} {
  func.func @_frontend_kernel(%arg0: i32, %arg1: memref<8x2x8x16xbf16, #tpu.memory_space<vmem>>, %arg2: memref<1x2x8x16xbf16, #tpu.memory_space<vmem>>, %arg3: memref<48x32xbf16, #tpu.memory_space<vmem>>, %arg4: memref<1x32xf32, #tpu.memory_space<vmem>>, %arg5: memref<32x1024xbf16, #tpu.memory_space<vmem>>, %arg6: memref<1x1024xf32, #tpu.memory_space<vmem>>, %arg7: memref<64x512xbf16, #tpu.memory_space<vmem>>, %arg8: memref<64x512xbf16, #tpu.memory_space<vmem>>) attributes {dimension_semantics = [#tpu.dimension_semantics<parallel>], iteration_bounds = array<i64: 1>, scalar_prefetch = 0 : i64, scratch_operands = 0 : i64, tpu.core_type = #tpu.core_type<tc>, window_params = [{transform_indices = @transform_0, window_bounds = array<i64: 8, 2, 8, 16>}, {transform_indices = @transform_1, window_bounds = array<i64: 1, 2, 8, 16>}, {pipeline_mode = #tpu.pipeline_mode<synchronous>, transform_indices = @transform_2, window_bounds = array<i64: 48, 32>}, {pipeline_mode = #tpu.pipeline_mode<synchronous>, transform_indices = @transform_3, window_bounds = array<i64: 1, 32>}, {pipeline_mode = #tpu.pipeline_mode<synchronous>, transform_indices = @transform_4, window_bounds = array<i64: 32, 1024>}, {pipeline_mode = #tpu.pipeline_mode<synchronous>, transform_indices = @transform_5, window_bounds = array<i64: 1, 1024>}, {transform_indices = @transform_6, window_bounds = array<i64: 64, 512>}, {transform_indices = @transform_7, window_bounds = array<i64: 64, 512>}]} {
    %c0 = arith.constant 0 : index
    %c0_0 = arith.constant 0 : index
    %c0_1 = arith.constant 0 : index
    %c0_2 = arith.constant 0 : index
    %0 = vector.load %arg1[%c0, %c0_0, %c0_1, %c0_2] : memref<8x2x8x16xbf16, #tpu.memory_space<vmem>>, vector<8x2x8x16xbf16>
    %c0_3 = arith.constant 0 : index
    %c0_4 = arith.constant 0 : index
    %c0_5 = arith.constant 0 : index
    %c0_6 = arith.constant 0 : index
    %1 = vector.load %arg2[%c0_3, %c0_4, %c0_5, %c0_6] : memref<1x2x8x16xbf16, #tpu.memory_space<vmem>>, vector<1x2x8x16xbf16>
    %c0_7 = arith.constant 0 : index
    %c0_8 = arith.constant 0 : index
    %2 = vector.load %arg3[%c0_7, %c0_8] : memref<48x32xbf16, #tpu.memory_space<vmem>>, vector<48x32xbf16>
    %3 = vector.extract_strided_slice %0 {offsets = [0, 0, 0, 0], sizes = [8, 1, 8, 16], strides = [1, 1, 1, 1]} : vector<8x2x8x16xbf16> to vector<8x1x8x16xbf16>
    %4 = vector.shape_cast %3 : vector<8x1x8x16xbf16> to vector<8x8x16xbf16>
    %5 = vector.shape_cast %4 : vector<8x8x16xbf16> to vector<64x16xbf16>
    %6 = vector.extract_strided_slice %0 {offsets = [0, 1, 0, 0], sizes = [8, 1, 8, 16], strides = [1, 1, 1, 1]} : vector<8x2x8x16xbf16> to vector<8x1x8x16xbf16>
    %7 = vector.shape_cast %6 : vector<8x1x8x16xbf16> to vector<8x8x16xbf16>
    %8 = vector.shape_cast %7 : vector<8x8x16xbf16> to vector<64x16xbf16>
    %9 = vector.extract_strided_slice %0 {offsets = [1, 0, 0, 0], sizes = [7, 1, 8, 16], strides = [1, 1, 1, 1]} : vector<8x2x8x16xbf16> to vector<7x1x8x16xbf16>
    %10 = vector.shape_cast %9 : vector<7x1x8x16xbf16> to vector<7x8x16xbf16>
    %11 = vector.extract_strided_slice %1 {offsets = [0, 0, 0, 0], sizes = [1, 1, 8, 16], strides = [1, 1, 1, 1]} : vector<1x2x8x16xbf16> to vector<1x1x8x16xbf16>
    %12 = vector.shape_cast %11 : vector<1x1x8x16xbf16> to vector<1x8x16xbf16>
    %13 = tpu.concatenate %10, %12 in 0 : vector<7x8x16xbf16>, vector<1x8x16xbf16> -> vector<8x8x16xbf16>
    %14 = vector.shape_cast %13 : vector<8x8x16xbf16> to vector<64x16xbf16>
    %15 = vector.extract_strided_slice %2 {offsets = [0, 0], sizes = [16, 32], strides = [1, 1]} : vector<48x32xbf16> to vector<16x32xbf16>
    %cst = arith.constant dense<0.000000e+00> : vector<64x32xf32>
    %16 = tpu.matmul %5, %15, %cst {dimension_numbers = #tpu.dot_dimension_numbers<[1], [0], [0], [1], [0, 0, 1, 1], [], []>} : vector<64x16xbf16>, vector<16x32xbf16>, vector<64x32xf32> -> vector<64x32xf32>
    %17 = vector.extract_strided_slice %2 {offsets = [16, 0], sizes = [16, 32], strides = [1, 1]} : vector<48x32xbf16> to vector<16x32xbf16>
    %cst_9 = arith.constant dense<0.000000e+00> : vector<64x32xf32>
    %18 = tpu.matmul %8, %17, %cst_9 {dimension_numbers = #tpu.dot_dimension_numbers<[1], [0], [0], [1], [0, 0, 1, 1], [], []>} : vector<64x16xbf16>, vector<16x32xbf16>, vector<64x32xf32> -> vector<64x32xf32>
    %19 = arith.addf %16, %18 : vector<64x32xf32>
    %20 = vector.extract_strided_slice %2 {offsets = [32, 0], sizes = [16, 32], strides = [1, 1]} : vector<48x32xbf16> to vector<16x32xbf16>
    %cst_10 = arith.constant dense<0.000000e+00> : vector<64x32xf32>
    %21 = tpu.matmul %14, %20, %cst_10 {dimension_numbers = #tpu.dot_dimension_numbers<[1], [0], [0], [1], [0, 0, 1, 1], [], []>} : vector<64x16xbf16>, vector<16x32xbf16>, vector<64x32xf32> -> vector<64x32xf32>
    %22 = arith.addf %19, %21 : vector<64x32xf32>
    %c0_11 = arith.constant 0 : index
    %c0_12 = arith.constant 0 : index
    %23 = vector.load %arg4[%c0_11, %c0_12] : memref<1x32xf32, #tpu.memory_space<vmem>>, vector<1x32xf32>
    %24 = vector.broadcast %23 : vector<1x32xf32> to vector<64x32xf32>
    %25 = arith.addf %22, %24 : vector<64x32xf32>
    %26 = arith.truncf %25 : vector<64x32xf32> to vector<64x32xbf16>
    %c0_13 = arith.constant 0 : index
    %c0_14 = arith.constant 0 : index
    %27 = vector.load %arg5[%c0_13, %c0_14] : memref<32x1024xbf16, #tpu.memory_space<vmem>>, vector<32x1024xbf16>
    %cst_15 = arith.constant dense<0.000000e+00> : vector<64x1024xf32>
    %28 = tpu.matmul %26, %27, %cst_15 {dimension_numbers = #tpu.dot_dimension_numbers<[1], [0], [0], [1], [0, 0, 1, 1], [], []>} : vector<64x32xbf16>, vector<32x1024xbf16>, vector<64x1024xf32> -> vector<64x1024xf32>
    %c0_16 = arith.constant 0 : index
    %c0_17 = arith.constant 0 : index
    %29 = vector.load %arg6[%c0_16, %c0_17] : memref<1x1024xf32, #tpu.memory_space<vmem>>, vector<1x1024xf32>
    %30 = vector.broadcast %29 : vector<1x1024xf32> to vector<64x1024xf32>
    %31 = arith.addf %28, %30 : vector<64x1024xf32>
    %32 = vector.extract_strided_slice %31 {offsets = [0, 0], sizes = [64, 512], strides = [1, 1]} : vector<64x1024xf32> to vector<64x512xf32>
    %33 = arith.truncf %32 : vector<64x512xf32> to vector<64x512xbf16>
    %c0_18 = arith.constant 0 : index
    %c0_19 = arith.constant 0 : index
    %34 = vector.load %arg7[%c0_18, %c0_19] : memref<64x512xbf16, #tpu.memory_space<vmem>>, vector<64x512xbf16>
    tpu.vector_store %arg7[%c0_18, %c0_19], %33 {strides = array<i32>} : memref<64x512xbf16, #tpu.memory_space<vmem>>, vector<64x512xbf16>,
    %35 = vector.extract_strided_slice %31 {offsets = [0, 512], sizes = [64, 512], strides = [1, 1]} : vector<64x1024xf32> to vector<64x512xf32>
    %36 = arith.truncf %35 : vector<64x512xf32> to vector<64x512xbf16>
    %c0_20 = arith.constant 0 : index
    %c0_21 = arith.constant 0 : index
    %37 = vector.load %arg8[%c0_20, %c0_21] : memref<64x512xbf16, #tpu.memory_space<vmem>>, vector<64x512xbf16>
    tpu.vector_store %arg8[%c0_20, %c0_21], %36 {strides = array<i32>} : memref<64x512xbf16, #tpu.memory_space<vmem>>, vector<64x512xbf16>,
    return
  }
  func.func @transform_0(%arg0: i32) -> (i32, i32, i32, i32) {
    %c0_i32 = arith.constant 0 : i32
    %c0_i32_0 = arith.constant 0 : i32
    %c0_i32_1 = arith.constant 0 : i32
    %c0_i32_2 = arith.constant 0 : i32
    return %arg0, %c0_i32, %c0_i32_0, %c0_i32_1 : i32, i32, i32, i32
  }
  func.func @transform_1(%arg0: i32) -> (i32, i32, i32, i32) {
    %c1_i32 = arith.constant 1 : i32
    %0 = arith.addi %arg0, %c1_i32 : i32
    %c8_i32 = arith.constant 8 : i32
    %1 = arith.muli %0, %c8_i32 : i32
    %c0_i32 = arith.constant 0 : i32
    %c0_i32_0 = arith.constant 0 : i32
    %c0_i32_1 = arith.constant 0 : i32
    %c0_i32_2 = arith.constant 0 : i32
    return %1, %c0_i32, %c0_i32_0, %c0_i32_1 : i32, i32, i32, i32
  }
  func.func @transform_2(%arg0: i32) -> (i32, i32) {
    %c0_i32 = arith.constant 0 : i32
    %c0_i32_0 = arith.constant 0 : i32
    %c0_i32_1 = arith.constant 0 : i32
    return %c0_i32, %c0_i32_0 : i32, i32
  }
  func.func @transform_3(%arg0: i32) -> (i32, i32) {
    %c0_i32 = arith.constant 0 : i32
    %c0_i32_0 = arith.constant 0 : i32
    %c0_i32_1 = arith.constant 0 : i32
    return %c0_i32, %c0_i32_0 : i32, i32
  }
  func.func @transform_4(%arg0: i32) -> (i32, i32) {
    %c0_i32 = arith.constant 0 : i32
    %c0_i32_0 = arith.constant 0 : i32
    %c0_i32_1 = arith.constant 0 : i32
    return %c0_i32, %c0_i32_0 : i32, i32
  }
  func.func @transform_5(%arg0: i32) -> (i32, i32) {
    %c0_i32 = arith.constant 0 : i32
    %c0_i32_0 = arith.constant 0 : i32
    %c0_i32_1 = arith.constant 0 : i32
    return %c0_i32, %c0_i32_0 : i32, i32
  }
  func.func @transform_6(%arg0: i32) -> (i32, i32) {
    %c0_i32 = arith.constant 0 : i32
    %c0_i32_0 = arith.constant 0 : i32
    return %arg0, %c0_i32 : i32, i32
  }
  func.func @transform_7(%arg0: i32) -> (i32, i32) {
    %c0_i32 = arith.constant 0 : i32
    %c0_i32_0 = arith.constant 0 : i32
    return %arg0, %c0_i32 : i32, i32
  }
}

module attributes {stable_mosaic.version = 11 : i64} {
  func.func @_decoder_kernel(%arg0: i32, %arg1: memref<64x128xbf16, #tpu.memory_space<vmem>>, %arg2: memref<64x128xbf16, #tpu.memory_space<vmem>>, %arg3: memref<128x128xbf16, #tpu.memory_space<vmem>>, %arg4: memref<128x128xbf16, #tpu.memory_space<vmem>>, %arg5: memref<1x128xf32, #tpu.memory_space<vmem>>, %arg6: memref<128x128xbf16, #tpu.memory_space<vmem>>, %arg7: memref<1x128xf32, #tpu.memory_space<vmem>>, %arg8: memref<64x128xf32, #tpu.memory_space<vmem>>) attributes {dimension_semantics = [#tpu.dimension_semantics<parallel>], iteration_bounds = array<i64: 1>, scalar_prefetch = 0 : i64, scratch_operands = 0 : i64, tpu.core_type = #tpu.core_type<tc>, window_params = [{transform_indices = @transform_0, window_bounds = array<i64: 64, 128>}, {transform_indices = @transform_1, window_bounds = array<i64: 64, 128>}, {pipeline_mode = #tpu.pipeline_mode<synchronous>, transform_indices = @transform_2, window_bounds = array<i64: 128, 128>}, {pipeline_mode = #tpu.pipeline_mode<synchronous>, transform_indices = @transform_3, window_bounds = array<i64: 128, 128>}, {pipeline_mode = #tpu.pipeline_mode<synchronous>, transform_indices = @transform_4, window_bounds = array<i64: 1, 128>}, {pipeline_mode = #tpu.pipeline_mode<synchronous>, transform_indices = @transform_5, window_bounds = array<i64: 128, 128>}, {pipeline_mode = #tpu.pipeline_mode<synchronous>, transform_indices = @transform_6, window_bounds = array<i64: 1, 128>}, {transform_indices = @transform_7, window_bounds = array<i64: 64, 128>}]} {
    %c0 = arith.constant 0 : index
    %c0_0 = arith.constant 0 : index
    %0 = vector.load %arg1[%c0, %c0_0] : memref<64x128xbf16, #tpu.memory_space<vmem>>, vector<64x128xbf16>
    %c0_1 = arith.constant 0 : index
    %c0_2 = arith.constant 0 : index
    %1 = vector.load %arg3[%c0_1, %c0_2] : memref<128x128xbf16, #tpu.memory_space<vmem>>, vector<128x128xbf16>
    %cst = arith.constant dense<0.000000e+00> : vector<64x128xf32>
    %2 = tpu.matmul %0, %1, %cst {dimension_numbers = #tpu.dot_dimension_numbers<[1], [0], [0], [1], [0, 0, 1, 1], [], []>} : vector<64x128xbf16>, vector<128x128xbf16>, vector<64x128xf32> -> vector<64x128xf32>
    %c0_3 = arith.constant 0 : index
    %c0_4 = arith.constant 0 : index
    %3 = vector.load %arg2[%c0_3, %c0_4] : memref<64x128xbf16, #tpu.memory_space<vmem>>, vector<64x128xbf16>
    %c0_5 = arith.constant 0 : index
    %c0_6 = arith.constant 0 : index
    %4 = vector.load %arg4[%c0_5, %c0_6] : memref<128x128xbf16, #tpu.memory_space<vmem>>, vector<128x128xbf16>
    %cst_7 = arith.constant dense<0.000000e+00> : vector<64x128xf32>
    %5 = tpu.matmul %3, %4, %cst_7 {dimension_numbers = #tpu.dot_dimension_numbers<[1], [0], [0], [1], [0, 0, 1, 1], [], []>} : vector<64x128xbf16>, vector<128x128xbf16>, vector<64x128xf32> -> vector<64x128xf32>
    %6 = arith.addf %2, %5 : vector<64x128xf32>
    %c0_8 = arith.constant 0 : index
    %c0_9 = arith.constant 0 : index
    %7 = vector.load %arg5[%c0_8, %c0_9] : memref<1x128xf32, #tpu.memory_space<vmem>>, vector<1x128xf32>
    %8 = vector.broadcast %7 : vector<1x128xf32> to vector<64x128xf32>
    %9 = arith.addf %6, %8 : vector<64x128xf32>
    %cst_10 = arith.constant 0.000000e+00 : f32
    %10 = vector.broadcast %cst_10 : f32 to vector<64x128xf32>
    %11 = arith.maximumf %9, %10 : vector<64x128xf32>
    %12 = arith.truncf %11 : vector<64x128xf32> to vector<64x128xbf16>
    %c0_11 = arith.constant 0 : index
    %c0_12 = arith.constant 0 : index
    %13 = vector.load %arg6[%c0_11, %c0_12] : memref<128x128xbf16, #tpu.memory_space<vmem>>, vector<128x128xbf16>
    %cst_13 = arith.constant dense<0.000000e+00> : vector<64x128xf32>
    %14 = tpu.matmul %12, %13, %cst_13 {dimension_numbers = #tpu.dot_dimension_numbers<[1], [0], [0], [1], [0, 0, 1, 1], [], []>} : vector<64x128xbf16>, vector<128x128xbf16>, vector<64x128xf32> -> vector<64x128xf32>
    %c0_14 = arith.constant 0 : index
    %c0_15 = arith.constant 0 : index
    %15 = vector.load %arg7[%c0_14, %c0_15] : memref<1x128xf32, #tpu.memory_space<vmem>>, vector<1x128xf32>
    %16 = vector.broadcast %15 : vector<1x128xf32> to vector<64x128xf32>
    %17 = arith.addf %14, %16 : vector<64x128xf32>
    %cst_16 = arith.constant dense<0xFF800000> : vector<64xf32>
    %18 = vector.multi_reduction <maximumf>, %17, %cst_16 [1] : vector<64x128xf32> to vector<64xf32>
    %19 = vector.shape_cast %18 : vector<64xf32> to vector<64x1xf32>
    %20 = vector.broadcast %19 : vector<64x1xf32> to vector<64x128xf32>
    %21 = arith.subf %17, %20 : vector<64x128xf32>
    %22 = math.exp %21 : vector<64x128xf32>
    %cst_17 = arith.constant dense<0.000000e+00> : vector<64xf32>
    %23 = vector.multi_reduction <add>, %22, %cst_17 [1] : vector<64x128xf32> to vector<64xf32>
    %24 = vector.shape_cast %23 : vector<64xf32> to vector<64x1xf32>
    %25 = math.log %24 : vector<64x1xf32>
    %26 = arith.addf %19, %25 : vector<64x1xf32>
    %27 = vector.broadcast %26 : vector<64x1xf32> to vector<64x128xf32>
    %28 = arith.subf %17, %27 : vector<64x128xf32>
    %c0_18 = arith.constant 0 : index
    %c0_19 = arith.constant 0 : index
    %29 = vector.load %arg8[%c0_18, %c0_19] : memref<64x128xf32, #tpu.memory_space<vmem>>, vector<64x128xf32>
    tpu.vector_store %arg8[%c0_18, %c0_19], %28 {strides = array<i32>} : memref<64x128xf32, #tpu.memory_space<vmem>>, vector<64x128xf32>,
    return
  }
  func.func @transform_0(%arg0: i32) -> (i32, i32) {
    %c0_i32 = arith.constant 0 : i32
    %c0_i32_0 = arith.constant 0 : i32
    return %arg0, %c0_i32 : i32, i32
  }
  func.func @transform_1(%arg0: i32) -> (i32, i32) {
    %c0_i32 = arith.constant 0 : i32
    %c0_i32_0 = arith.constant 0 : i32
    return %arg0, %c0_i32 : i32, i32
  }
  func.func @transform_2(%arg0: i32) -> (i32, i32) {
    %c0_i32 = arith.constant 0 : i32
    %c0_i32_0 = arith.constant 0 : i32
    %c0_i32_1 = arith.constant 0 : i32
    return %c0_i32, %c0_i32_0 : i32, i32
  }
  func.func @transform_3(%arg0: i32) -> (i32, i32) {
    %c0_i32 = arith.constant 0 : i32
    %c0_i32_0 = arith.constant 0 : i32
    %c0_i32_1 = arith.constant 0 : i32
    return %c0_i32, %c0_i32_0 : i32, i32
  }
  func.func @transform_4(%arg0: i32) -> (i32, i32) {
    %c0_i32 = arith.constant 0 : i32
    %c0_i32_0 = arith.constant 0 : i32
    %c0_i32_1 = arith.constant 0 : i32
    return %c0_i32, %c0_i32_0 : i32, i32
  }
  func.func @transform_5(%arg0: i32) -> (i32, i32) {
    %c0_i32 = arith.constant 0 : i32
    %c0_i32_0 = arith.constant 0 : i32
    %c0_i32_1 = arith.constant 0 : i32
    return %c0_i32, %c0_i32_0 : i32, i32
  }
  func.func @transform_6(%arg0: i32) -> (i32, i32) {
    %c0_i32 = arith.constant 0 : i32
    %c0_i32_0 = arith.constant 0 : i32
    %c0_i32_1 = arith.constant 0 : i32
    return %c0_i32, %c0_i32_0 : i32, i32
  }
  func.func @transform_7(%arg0: i32) -> (i32, i32) {
    %c0_i32 = arith.constant 0 : i32
    %c0_i32_0 = arith.constant 0 : i32
    return %arg0, %c0_i32 : i32, i32
  }
}

module attributes {stable_mosaic.version = 11 : i64} {
  func.func @_bilstm_kernel(%arg0: i32, %arg1: memref<8x8x512xbf16, #tpu.memory_space<vmem>>, %arg2: memref<8x8x512xbf16, #tpu.memory_space<vmem>>, %arg3: memref<128x512xbf16, #tpu.memory_space<vmem>>, %arg4: memref<128x512xbf16, #tpu.memory_space<vmem>>, %arg5: memref<8x8x1xbf16, #tpu.memory_space<vmem>>, %arg6: memref<8x8x1xbf16, #tpu.memory_space<vmem>>, %arg7: memref<8x8x128xbf16, #tpu.memory_space<vmem>>, %arg8: memref<8x8x128xbf16, #tpu.memory_space<vmem>>, %arg9: memref<8x128xf32, #tpu.memory_space<vmem>>, %arg10: memref<8x128xf32, #tpu.memory_space<vmem>>, %arg11: memref<8x128xf32, #tpu.memory_space<vmem>>, %arg12: memref<8x128xf32, #tpu.memory_space<vmem>>) attributes {dimension_semantics = [#tpu.dimension_semantics<arbitrary>], iteration_bounds = array<i64: 1>, scalar_prefetch = 0 : i64, scratch_operands = 4 : i64, tpu.core_type = #tpu.core_type<tc>, window_params = [{transform_indices = @transform_0, window_bounds = array<i64: 8, 8, 512>}, {transform_indices = @transform_1, window_bounds = array<i64: 8, 8, 512>}, {pipeline_mode = #tpu.pipeline_mode<synchronous>, transform_indices = @transform_2, window_bounds = array<i64: 128, 512>}, {pipeline_mode = #tpu.pipeline_mode<synchronous>, transform_indices = @transform_3, window_bounds = array<i64: 128, 512>}, {transform_indices = @transform_4, window_bounds = array<i64: 8, 8, 1>}, {transform_indices = @transform_5, window_bounds = array<i64: 8, 8, 1>}, {transform_indices = @transform_6, window_bounds = array<i64: 8, 8, 128>}, {transform_indices = @transform_7, window_bounds = array<i64: 8, 8, 128>}]} {
    %c0_i32 = arith.constant 0 : i32
    %0 = arith.cmpi eq, %arg0, %c0_i32 : i32
    %1 = arith.extui %0 : i1 to i32
    %c0_i32_0 = arith.constant 0 : i32
    %2 = arith.cmpi ne, %1, %c0_i32_0 : i32
    scf.if %2 {
      %cst_392 = arith.constant 0.000000e+00 : f32
      %867 = vector.broadcast %cst_392 : f32 to vector<8x128xf32>
      %c0_393 = arith.constant 0 : index
      %c0_394 = arith.constant 0 : index
      %868 = vector.load %arg9[%c0_393, %c0_394] : memref<8x128xf32, #tpu.memory_space<vmem>>, vector<8x128xf32>
      tpu.vector_store %arg9[%c0_393, %c0_394], %867 {strides = array<i32>} : memref<8x128xf32, #tpu.memory_space<vmem>>, vector<8x128xf32>,
      %cst_395 = arith.constant 0.000000e+00 : f32
      %869 = vector.broadcast %cst_395 : f32 to vector<8x128xf32>
      %c0_396 = arith.constant 0 : index
      %c0_397 = arith.constant 0 : index
      %870 = vector.load %arg10[%c0_396, %c0_397] : memref<8x128xf32, #tpu.memory_space<vmem>>, vector<8x128xf32>
      tpu.vector_store %arg10[%c0_396, %c0_397], %869 {strides = array<i32>} : memref<8x128xf32, #tpu.memory_space<vmem>>, vector<8x128xf32>,
      %cst_398 = arith.constant 0.000000e+00 : f32
      %871 = vector.broadcast %cst_398 : f32 to vector<8x128xf32>
      %c0_399 = arith.constant 0 : index
      %c0_400 = arith.constant 0 : index
      %872 = vector.load %arg11[%c0_399, %c0_400] : memref<8x128xf32, #tpu.memory_space<vmem>>, vector<8x128xf32>
      tpu.vector_store %arg11[%c0_399, %c0_400], %871 {strides = array<i32>} : memref<8x128xf32, #tpu.memory_space<vmem>>, vector<8x128xf32>,
      %cst_401 = arith.constant 0.000000e+00 : f32
      %873 = vector.broadcast %cst_401 : f32 to vector<8x128xf32>
      %c0_402 = arith.constant 0 : index
      %c0_403 = arith.constant 0 : index
      %874 = vector.load %arg12[%c0_402, %c0_403] : memref<8x128xf32, #tpu.memory_space<vmem>>, vector<8x128xf32>
      tpu.vector_store %arg12[%c0_402, %c0_403], %873 {strides = array<i32>} : memref<8x128xf32, #tpu.memory_space<vmem>>, vector<8x128xf32>,
    } else {
    }
    %c0 = arith.constant 0 : index
    %c0_1 = arith.constant 0 : index
    %3 = vector.load %arg9[%c0, %c0_1] : memref<8x128xf32, #tpu.memory_space<vmem>>, vector<8x128xf32>
    %c0_2 = arith.constant 0 : index
    %c0_3 = arith.constant 0 : index
    %4 = vector.load %arg10[%c0_2, %c0_3] : memref<8x128xf32, #tpu.memory_space<vmem>>, vector<8x128xf32>
    %c0_4 = arith.constant 0 : index
    %c0_5 = arith.constant 0 : index
    %c0_6 = arith.constant 0 : index
    %5 = vector.load %arg1[%c0_4, %c0_5, %c0_6] : memref<8x8x512xbf16, #tpu.memory_space<vmem>>, vector<1x8x512xbf16>
    %6 = vector.shape_cast %5 : vector<1x8x512xbf16> to vector<8x512xbf16>
    %7 = arith.extf %6 : vector<8x512xbf16> to vector<8x512xf32>
    %8 = arith.truncf %3 : vector<8x128xf32> to vector<8x128xbf16>
    %c0_7 = arith.constant 0 : index
    %c0_8 = arith.constant 0 : index
    %9 = vector.load %arg3[%c0_7, %c0_8] : memref<128x512xbf16, #tpu.memory_space<vmem>>, vector<128x512xbf16>
    %cst = arith.constant dense<0.000000e+00> : vector<8x512xf32>
    %10 = tpu.matmul %8, %9, %cst {dimension_numbers = #tpu.dot_dimension_numbers<[1], [0], [0], [1], [0, 0, 1, 1], [], []>} : vector<8x128xbf16>, vector<128x512xbf16>, vector<8x512xf32> -> vector<8x512xf32>
    %11 = arith.addf %7, %10 : vector<8x512xf32>
    %12 = vector.extract_strided_slice %11 {offsets = [0, 0], sizes = [8, 128], strides = [1, 1]} : vector<8x512xf32> to vector<8x128xf32>
    %13 = arith.negf %12 : vector<8x128xf32>
    %14 = math.exp %13 : vector<8x128xf32>
    %cst_9 = arith.constant 1.000000e+00 : f32
    %15 = vector.broadcast %cst_9 : f32 to vector<8x128xf32>
    %16 = arith.addf %15, %14 : vector<8x128xf32>
    %17 = arith.divf %15, %16 : vector<8x128xf32>
    %18 = vector.extract_strided_slice %11 {offsets = [0, 128], sizes = [8, 128], strides = [1, 1]} : vector<8x512xf32> to vector<8x128xf32>
    %19 = arith.negf %18 : vector<8x128xf32>
    %20 = math.exp %19 : vector<8x128xf32>
    %cst_10 = arith.constant 1.000000e+00 : f32
    %21 = vector.broadcast %cst_10 : f32 to vector<8x128xf32>
    %22 = arith.addf %21, %20 : vector<8x128xf32>
    %23 = arith.divf %21, %22 : vector<8x128xf32>
    %24 = vector.extract_strided_slice %11 {offsets = [0, 256], sizes = [8, 128], strides = [1, 1]} : vector<8x512xf32> to vector<8x128xf32>
    %25 = math.tanh %24 : vector<8x128xf32>
    %26 = vector.extract_strided_slice %11 {offsets = [0, 384], sizes = [8, 128], strides = [1, 1]} : vector<8x512xf32> to vector<8x128xf32>
    %27 = arith.negf %26 : vector<8x128xf32>
    %28 = math.exp %27 : vector<8x128xf32>
    %cst_11 = arith.constant 1.000000e+00 : f32
    %29 = vector.broadcast %cst_11 : f32 to vector<8x128xf32>
    %30 = arith.addf %29, %28 : vector<8x128xf32>
    %31 = arith.divf %29, %30 : vector<8x128xf32>
    %32 = arith.mulf %23, %4 : vector<8x128xf32>
    %33 = arith.mulf %17, %25 : vector<8x128xf32>
    %34 = arith.addf %32, %33 : vector<8x128xf32>
    %35 = math.tanh %34 : vector<8x128xf32>
    %36 = arith.mulf %31, %35 : vector<8x128xf32>
    %c0_12 = arith.constant 0 : index
    %c0_13 = arith.constant 0 : index
    %c0_14 = arith.constant 0 : index
    %37 = vector.load %arg5[%c0_12, %c0_13, %c0_14] : memref<8x8x1xbf16, #tpu.memory_space<vmem>>, vector<1x8x1xbf16>
    %38 = vector.shape_cast %37 : vector<1x8x1xbf16> to vector<8x1xbf16>
    %cst_15 = arith.constant 0.000000e+00 : bf16
    %39 = vector.broadcast %cst_15 : bf16 to vector<8x1xbf16>
    %40 = arith.cmpf ogt, %38, %39 : vector<8x1xbf16>
    %41 = vector.shape_cast %40 : vector<8x1xi1> to vector<8x1xi1>
    %42 = vector.broadcast %41 : vector<8x1xi1> to vector<8x128xi1>
    %43 = arith.select %42, %36, %3 : vector<8x128xi1>, vector<8x128xf32>
    %c0_16 = arith.constant 0 : index
    %c0_17 = arith.constant 0 : index
    %44 = vector.load %arg9[%c0_16, %c0_17] : memref<8x128xf32, #tpu.memory_space<vmem>>, vector<8x128xf32>
    tpu.vector_store %arg9[%c0_16, %c0_17], %43 {strides = array<i32>} : memref<8x128xf32, #tpu.memory_space<vmem>>, vector<8x128xf32>,
    %45 = vector.shape_cast %40 : vector<8x1xi1> to vector<8x1xi1>
    %46 = vector.broadcast %45 : vector<8x1xi1> to vector<8x128xi1>
    %47 = arith.select %46, %34, %4 : vector<8x128xi1>, vector<8x128xf32>
    %c0_18 = arith.constant 0 : index
    %c0_19 = arith.constant 0 : index
    %48 = vector.load %arg10[%c0_18, %c0_19] : memref<8x128xf32, #tpu.memory_space<vmem>>, vector<8x128xf32>
    tpu.vector_store %arg10[%c0_18, %c0_19], %47 {strides = array<i32>} : memref<8x128xf32, #tpu.memory_space<vmem>>, vector<8x128xf32>,
    %cst_20 = arith.constant 0.000000e+00 : f32
    %49 = vector.shape_cast %40 : vector<8x1xi1> to vector<8x1xi1>
    %50 = vector.broadcast %49 : vector<8x1xi1> to vector<8x128xi1>
    %51 = vector.broadcast %cst_20 : f32 to vector<8x128xf32>
    %52 = arith.select %50, %36, %51 : vector<8x128xi1>, vector<8x128xf32>
    %53 = arith.truncf %52 : vector<8x128xf32> to vector<8x128xbf16>
    %c0_21 = arith.constant 0 : index
    %c0_22 = arith.constant 0 : index
    %c0_23 = arith.constant 0 : index
    %54 = vector.load %arg7[%c0_21, %c0_22, %c0_23] : memref<8x8x128xbf16, #tpu.memory_space<vmem>>, vector<1x8x128xbf16>
    %55 = vector.shape_cast %54 : vector<1x8x128xbf16> to vector<8x128xbf16>
    %56 = vector.shape_cast %53 : vector<8x128xbf16> to vector<1x8x128xbf16>
    tpu.vector_store %arg7[%c0_21, %c0_22, %c0_23], %56 {strides = array<i32>} : memref<8x8x128xbf16, #tpu.memory_space<vmem>>, vector<1x8x128xbf16>,
    %c0_24 = arith.constant 0 : index
    %c0_25 = arith.constant 0 : index
    %57 = vector.load %arg11[%c0_24, %c0_25] : memref<8x128xf32, #tpu.memory_space<vmem>>, vector<8x128xf32>
    %c0_26 = arith.constant 0 : index
    %c0_27 = arith.constant 0 : index
    %58 = vector.load %arg12[%c0_26, %c0_27] : memref<8x128xf32, #tpu.memory_space<vmem>>, vector<8x128xf32>
    %c7 = arith.constant 7 : index
    %c0_28 = arith.constant 0 : index
    %c0_29 = arith.constant 0 : index
    %59 = vector.load %arg2[%c7, %c0_28, %c0_29] : memref<8x8x512xbf16, #tpu.memory_space<vmem>>, vector<1x8x512xbf16>
    %60 = vector.shape_cast %59 : vector<1x8x512xbf16> to vector<8x512xbf16>
    %61 = arith.extf %60 : vector<8x512xbf16> to vector<8x512xf32>
    %62 = arith.truncf %57 : vector<8x128xf32> to vector<8x128xbf16>
    %c0_30 = arith.constant 0 : index
    %c0_31 = arith.constant 0 : index
    %63 = vector.load %arg4[%c0_30, %c0_31] : memref<128x512xbf16, #tpu.memory_space<vmem>>, vector<128x512xbf16>
    %cst_32 = arith.constant dense<0.000000e+00> : vector<8x512xf32>
    %64 = tpu.matmul %62, %63, %cst_32 {dimension_numbers = #tpu.dot_dimension_numbers<[1], [0], [0], [1], [0, 0, 1, 1], [], []>} : vector<8x128xbf16>, vector<128x512xbf16>, vector<8x512xf32> -> vector<8x512xf32>
    %65 = arith.addf %61, %64 : vector<8x512xf32>
    %66 = vector.extract_strided_slice %65 {offsets = [0, 0], sizes = [8, 128], strides = [1, 1]} : vector<8x512xf32> to vector<8x128xf32>
    %67 = arith.negf %66 : vector<8x128xf32>
    %68 = math.exp %67 : vector<8x128xf32>
    %cst_33 = arith.constant 1.000000e+00 : f32
    %69 = vector.broadcast %cst_33 : f32 to vector<8x128xf32>
    %70 = arith.addf %69, %68 : vector<8x128xf32>
    %71 = arith.divf %69, %70 : vector<8x128xf32>
    %72 = vector.extract_strided_slice %65 {offsets = [0, 128], sizes = [8, 128], strides = [1, 1]} : vector<8x512xf32> to vector<8x128xf32>
    %73 = arith.negf %72 : vector<8x128xf32>
    %74 = math.exp %73 : vector<8x128xf32>
    %cst_34 = arith.constant 1.000000e+00 : f32
    %75 = vector.broadcast %cst_34 : f32 to vector<8x128xf32>
    %76 = arith.addf %75, %74 : vector<8x128xf32>
    %77 = arith.divf %75, %76 : vector<8x128xf32>
    %78 = vector.extract_strided_slice %65 {offsets = [0, 256], sizes = [8, 128], strides = [1, 1]} : vector<8x512xf32> to vector<8x128xf32>
    %79 = math.tanh %78 : vector<8x128xf32>
    %80 = vector.extract_strided_slice %65 {offsets = [0, 384], sizes = [8, 128], strides = [1, 1]} : vector<8x512xf32> to vector<8x128xf32>
    %81 = arith.negf %80 : vector<8x128xf32>
    %82 = math.exp %81 : vector<8x128xf32>
    %cst_35 = arith.constant 1.000000e+00 : f32
    %83 = vector.broadcast %cst_35 : f32 to vector<8x128xf32>
    %84 = arith.addf %83, %82 : vector<8x128xf32>
    %85 = arith.divf %83, %84 : vector<8x128xf32>
    %86 = arith.mulf %77, %58 : vector<8x128xf32>
    %87 = arith.mulf %71, %79 : vector<8x128xf32>
    %88 = arith.addf %86, %87 : vector<8x128xf32>
    %89 = math.tanh %88 : vector<8x128xf32>
    %90 = arith.mulf %85, %89 : vector<8x128xf32>
    %c7_36 = arith.constant 7 : index
    %c0_37 = arith.constant 0 : index
    %c0_38 = arith.constant 0 : index
    %91 = vector.load %arg6[%c7_36, %c0_37, %c0_38] : memref<8x8x1xbf16, #tpu.memory_space<vmem>>, vector<1x8x1xbf16>
    %92 = vector.shape_cast %91 : vector<1x8x1xbf16> to vector<8x1xbf16>
    %cst_39 = arith.constant 0.000000e+00 : bf16
    %93 = vector.broadcast %cst_39 : bf16 to vector<8x1xbf16>
    %94 = arith.cmpf ogt, %92, %93 : vector<8x1xbf16>
    %95 = vector.shape_cast %94 : vector<8x1xi1> to vector<8x1xi1>
    %96 = vector.broadcast %95 : vector<8x1xi1> to vector<8x128xi1>
    %97 = arith.select %96, %90, %57 : vector<8x128xi1>, vector<8x128xf32>
    %c0_40 = arith.constant 0 : index
    %c0_41 = arith.constant 0 : index
    %98 = vector.load %arg11[%c0_40, %c0_41] : memref<8x128xf32, #tpu.memory_space<vmem>>, vector<8x128xf32>
    tpu.vector_store %arg11[%c0_40, %c0_41], %97 {strides = array<i32>} : memref<8x128xf32, #tpu.memory_space<vmem>>, vector<8x128xf32>,
    %99 = vector.shape_cast %94 : vector<8x1xi1> to vector<8x1xi1>
    %100 = vector.broadcast %99 : vector<8x1xi1> to vector<8x128xi1>
    %101 = arith.select %100, %88, %58 : vector<8x128xi1>, vector<8x128xf32>
    %c0_42 = arith.constant 0 : index
    %c0_43 = arith.constant 0 : index
    %102 = vector.load %arg12[%c0_42, %c0_43] : memref<8x128xf32, #tpu.memory_space<vmem>>, vector<8x128xf32>
    tpu.vector_store %arg12[%c0_42, %c0_43], %101 {strides = array<i32>} : memref<8x128xf32, #tpu.memory_space<vmem>>, vector<8x128xf32>,
    %cst_44 = arith.constant 0.000000e+00 : f32
    %103 = vector.shape_cast %94 : vector<8x1xi1> to vector<8x1xi1>
    %104 = vector.broadcast %103 : vector<8x1xi1> to vector<8x128xi1>
    %105 = vector.broadcast %cst_44 : f32 to vector<8x128xf32>
    %106 = arith.select %104, %90, %105 : vector<8x128xi1>, vector<8x128xf32>
    %107 = arith.truncf %106 : vector<8x128xf32> to vector<8x128xbf16>
    %c7_45 = arith.constant 7 : index
    %c0_46 = arith.constant 0 : index
    %c0_47 = arith.constant 0 : index
    %108 = vector.load %arg8[%c7_45, %c0_46, %c0_47] : memref<8x8x128xbf16, #tpu.memory_space<vmem>>, vector<1x8x128xbf16>
    %109 = vector.shape_cast %108 : vector<1x8x128xbf16> to vector<8x128xbf16>
    %110 = vector.shape_cast %107 : vector<8x128xbf16> to vector<1x8x128xbf16>
    tpu.vector_store %arg8[%c7_45, %c0_46, %c0_47], %110 {strides = array<i32>} : memref<8x8x128xbf16, #tpu.memory_space<vmem>>, vector<1x8x128xbf16>,
    %c0_48 = arith.constant 0 : index
    %c0_49 = arith.constant 0 : index
    %111 = vector.load %arg9[%c0_48, %c0_49] : memref<8x128xf32, #tpu.memory_space<vmem>>, vector<8x128xf32>
    %c0_50 = arith.constant 0 : index
    %c0_51 = arith.constant 0 : index
    %112 = vector.load %arg10[%c0_50, %c0_51] : memref<8x128xf32, #tpu.memory_space<vmem>>, vector<8x128xf32>
    %c1 = arith.constant 1 : index
    %c0_52 = arith.constant 0 : index
    %c0_53 = arith.constant 0 : index
    %113 = vector.load %arg1[%c1, %c0_52, %c0_53] : memref<8x8x512xbf16, #tpu.memory_space<vmem>>, vector<1x8x512xbf16>
    %114 = vector.shape_cast %113 : vector<1x8x512xbf16> to vector<8x512xbf16>
    %115 = arith.extf %114 : vector<8x512xbf16> to vector<8x512xf32>
    %116 = arith.truncf %111 : vector<8x128xf32> to vector<8x128xbf16>
    %c0_54 = arith.constant 0 : index
    %c0_55 = arith.constant 0 : index
    %117 = vector.load %arg3[%c0_54, %c0_55] : memref<128x512xbf16, #tpu.memory_space<vmem>>, vector<128x512xbf16>
    %cst_56 = arith.constant dense<0.000000e+00> : vector<8x512xf32>
    %118 = tpu.matmul %116, %117, %cst_56 {dimension_numbers = #tpu.dot_dimension_numbers<[1], [0], [0], [1], [0, 0, 1, 1], [], []>} : vector<8x128xbf16>, vector<128x512xbf16>, vector<8x512xf32> -> vector<8x512xf32>
    %119 = arith.addf %115, %118 : vector<8x512xf32>
    %120 = vector.extract_strided_slice %119 {offsets = [0, 0], sizes = [8, 128], strides = [1, 1]} : vector<8x512xf32> to vector<8x128xf32>
    %121 = arith.negf %120 : vector<8x128xf32>
    %122 = math.exp %121 : vector<8x128xf32>
    %cst_57 = arith.constant 1.000000e+00 : f32
    %123 = vector.broadcast %cst_57 : f32 to vector<8x128xf32>
    %124 = arith.addf %123, %122 : vector<8x128xf32>
    %125 = arith.divf %123, %124 : vector<8x128xf32>
    %126 = vector.extract_strided_slice %119 {offsets = [0, 128], sizes = [8, 128], strides = [1, 1]} : vector<8x512xf32> to vector<8x128xf32>
    %127 = arith.negf %126 : vector<8x128xf32>
    %128 = math.exp %127 : vector<8x128xf32>
    %cst_58 = arith.constant 1.000000e+00 : f32
    %129 = vector.broadcast %cst_58 : f32 to vector<8x128xf32>
    %130 = arith.addf %129, %128 : vector<8x128xf32>
    %131 = arith.divf %129, %130 : vector<8x128xf32>
    %132 = vector.extract_strided_slice %119 {offsets = [0, 256], sizes = [8, 128], strides = [1, 1]} : vector<8x512xf32> to vector<8x128xf32>
    %133 = math.tanh %132 : vector<8x128xf32>
    %134 = vector.extract_strided_slice %119 {offsets = [0, 384], sizes = [8, 128], strides = [1, 1]} : vector<8x512xf32> to vector<8x128xf32>
    %135 = arith.negf %134 : vector<8x128xf32>
    %136 = math.exp %135 : vector<8x128xf32>
    %cst_59 = arith.constant 1.000000e+00 : f32
    %137 = vector.broadcast %cst_59 : f32 to vector<8x128xf32>
    %138 = arith.addf %137, %136 : vector<8x128xf32>
    %139 = arith.divf %137, %138 : vector<8x128xf32>
    %140 = arith.mulf %131, %112 : vector<8x128xf32>
    %141 = arith.mulf %125, %133 : vector<8x128xf32>
    %142 = arith.addf %140, %141 : vector<8x128xf32>
    %143 = math.tanh %142 : vector<8x128xf32>
    %144 = arith.mulf %139, %143 : vector<8x128xf32>
    %c1_60 = arith.constant 1 : index
    %c0_61 = arith.constant 0 : index
    %c0_62 = arith.constant 0 : index
    %145 = vector.load %arg5[%c1_60, %c0_61, %c0_62] : memref<8x8x1xbf16, #tpu.memory_space<vmem>>, vector<1x8x1xbf16>
    %146 = vector.shape_cast %145 : vector<1x8x1xbf16> to vector<8x1xbf16>
    %cst_63 = arith.constant 0.000000e+00 : bf16
    %147 = vector.broadcast %cst_63 : bf16 to vector<8x1xbf16>
    %148 = arith.cmpf ogt, %146, %147 : vector<8x1xbf16>
    %149 = vector.shape_cast %148 : vector<8x1xi1> to vector<8x1xi1>
    %150 = vector.broadcast %149 : vector<8x1xi1> to vector<8x128xi1>
    %151 = arith.select %150, %144, %111 : vector<8x128xi1>, vector<8x128xf32>
    %c0_64 = arith.constant 0 : index
    %c0_65 = arith.constant 0 : index
    %152 = vector.load %arg9[%c0_64, %c0_65] : memref<8x128xf32, #tpu.memory_space<vmem>>, vector<8x128xf32>
    tpu.vector_store %arg9[%c0_64, %c0_65], %151 {strides = array<i32>} : memref<8x128xf32, #tpu.memory_space<vmem>>, vector<8x128xf32>,
    %153 = vector.shape_cast %148 : vector<8x1xi1> to vector<8x1xi1>
    %154 = vector.broadcast %153 : vector<8x1xi1> to vector<8x128xi1>
    %155 = arith.select %154, %142, %112 : vector<8x128xi1>, vector<8x128xf32>
    %c0_66 = arith.constant 0 : index
    %c0_67 = arith.constant 0 : index
    %156 = vector.load %arg10[%c0_66, %c0_67] : memref<8x128xf32, #tpu.memory_space<vmem>>, vector<8x128xf32>
    tpu.vector_store %arg10[%c0_66, %c0_67], %155 {strides = array<i32>} : memref<8x128xf32, #tpu.memory_space<vmem>>, vector<8x128xf32>,
    %cst_68 = arith.constant 0.000000e+00 : f32
    %157 = vector.shape_cast %148 : vector<8x1xi1> to vector<8x1xi1>
    %158 = vector.broadcast %157 : vector<8x1xi1> to vector<8x128xi1>
    %159 = vector.broadcast %cst_68 : f32 to vector<8x128xf32>
    %160 = arith.select %158, %144, %159 : vector<8x128xi1>, vector<8x128xf32>
    %161 = arith.truncf %160 : vector<8x128xf32> to vector<8x128xbf16>
    %c1_69 = arith.constant 1 : index
    %c0_70 = arith.constant 0 : index
    %c0_71 = arith.constant 0 : index
    %162 = vector.load %arg7[%c1_69, %c0_70, %c0_71] : memref<8x8x128xbf16, #tpu.memory_space<vmem>>, vector<1x8x128xbf16>
    %163 = vector.shape_cast %162 : vector<1x8x128xbf16> to vector<8x128xbf16>
    %164 = vector.shape_cast %161 : vector<8x128xbf16> to vector<1x8x128xbf16>
    tpu.vector_store %arg7[%c1_69, %c0_70, %c0_71], %164 {strides = array<i32>} : memref<8x8x128xbf16, #tpu.memory_space<vmem>>, vector<1x8x128xbf16>,
    %c0_72 = arith.constant 0 : index
    %c0_73 = arith.constant 0 : index
    %165 = vector.load %arg11[%c0_72, %c0_73] : memref<8x128xf32, #tpu.memory_space<vmem>>, vector<8x128xf32>
    %c0_74 = arith.constant 0 : index
    %c0_75 = arith.constant 0 : index
    %166 = vector.load %arg12[%c0_74, %c0_75] : memref<8x128xf32, #tpu.memory_space<vmem>>, vector<8x128xf32>
    %c6 = arith.constant 6 : index
    %c0_76 = arith.constant 0 : index
    %c0_77 = arith.constant 0 : index
    %167 = vector.load %arg2[%c6, %c0_76, %c0_77] : memref<8x8x512xbf16, #tpu.memory_space<vmem>>, vector<1x8x512xbf16>
    %168 = vector.shape_cast %167 : vector<1x8x512xbf16> to vector<8x512xbf16>
    %169 = arith.extf %168 : vector<8x512xbf16> to vector<8x512xf32>
    %170 = arith.truncf %165 : vector<8x128xf32> to vector<8x128xbf16>
    %c0_78 = arith.constant 0 : index
    %c0_79 = arith.constant 0 : index
    %171 = vector.load %arg4[%c0_78, %c0_79] : memref<128x512xbf16, #tpu.memory_space<vmem>>, vector<128x512xbf16>
    %cst_80 = arith.constant dense<0.000000e+00> : vector<8x512xf32>
    %172 = tpu.matmul %170, %171, %cst_80 {dimension_numbers = #tpu.dot_dimension_numbers<[1], [0], [0], [1], [0, 0, 1, 1], [], []>} : vector<8x128xbf16>, vector<128x512xbf16>, vector<8x512xf32> -> vector<8x512xf32>
    %173 = arith.addf %169, %172 : vector<8x512xf32>
    %174 = vector.extract_strided_slice %173 {offsets = [0, 0], sizes = [8, 128], strides = [1, 1]} : vector<8x512xf32> to vector<8x128xf32>
    %175 = arith.negf %174 : vector<8x128xf32>
    %176 = math.exp %175 : vector<8x128xf32>
    %cst_81 = arith.constant 1.000000e+00 : f32
    %177 = vector.broadcast %cst_81 : f32 to vector<8x128xf32>
    %178 = arith.addf %177, %176 : vector<8x128xf32>
    %179 = arith.divf %177, %178 : vector<8x128xf32>
    %180 = vector.extract_strided_slice %173 {offsets = [0, 128], sizes = [8, 128], strides = [1, 1]} : vector<8x512xf32> to vector<8x128xf32>
    %181 = arith.negf %180 : vector<8x128xf32>
    %182 = math.exp %181 : vector<8x128xf32>
    %cst_82 = arith.constant 1.000000e+00 : f32
    %183 = vector.broadcast %cst_82 : f32 to vector<8x128xf32>
    %184 = arith.addf %183, %182 : vector<8x128xf32>
    %185 = arith.divf %183, %184 : vector<8x128xf32>
    %186 = vector.extract_strided_slice %173 {offsets = [0, 256], sizes = [8, 128], strides = [1, 1]} : vector<8x512xf32> to vector<8x128xf32>
    %187 = math.tanh %186 : vector<8x128xf32>
    %188 = vector.extract_strided_slice %173 {offsets = [0, 384], sizes = [8, 128], strides = [1, 1]} : vector<8x512xf32> to vector<8x128xf32>
    %189 = arith.negf %188 : vector<8x128xf32>
    %190 = math.exp %189 : vector<8x128xf32>
    %cst_83 = arith.constant 1.000000e+00 : f32
    %191 = vector.broadcast %cst_83 : f32 to vector<8x128xf32>
    %192 = arith.addf %191, %190 : vector<8x128xf32>
    %193 = arith.divf %191, %192 : vector<8x128xf32>
    %194 = arith.mulf %185, %166 : vector<8x128xf32>
    %195 = arith.mulf %179, %187 : vector<8x128xf32>
    %196 = arith.addf %194, %195 : vector<8x128xf32>
    %197 = math.tanh %196 : vector<8x128xf32>
    %198 = arith.mulf %193, %197 : vector<8x128xf32>
    %c6_84 = arith.constant 6 : index
    %c0_85 = arith.constant 0 : index
    %c0_86 = arith.constant 0 : index
    %199 = vector.load %arg6[%c6_84, %c0_85, %c0_86] : memref<8x8x1xbf16, #tpu.memory_space<vmem>>, vector<1x8x1xbf16>
    %200 = vector.shape_cast %199 : vector<1x8x1xbf16> to vector<8x1xbf16>
    %cst_87 = arith.constant 0.000000e+00 : bf16
    %201 = vector.broadcast %cst_87 : bf16 to vector<8x1xbf16>
    %202 = arith.cmpf ogt, %200, %201 : vector<8x1xbf16>
    %203 = vector.shape_cast %202 : vector<8x1xi1> to vector<8x1xi1>
    %204 = vector.broadcast %203 : vector<8x1xi1> to vector<8x128xi1>
    %205 = arith.select %204, %198, %165 : vector<8x128xi1>, vector<8x128xf32>
    %c0_88 = arith.constant 0 : index
    %c0_89 = arith.constant 0 : index
    %206 = vector.load %arg11[%c0_88, %c0_89] : memref<8x128xf32, #tpu.memory_space<vmem>>, vector<8x128xf32>
    tpu.vector_store %arg11[%c0_88, %c0_89], %205 {strides = array<i32>} : memref<8x128xf32, #tpu.memory_space<vmem>>, vector<8x128xf32>,
    %207 = vector.shape_cast %202 : vector<8x1xi1> to vector<8x1xi1>
    %208 = vector.broadcast %207 : vector<8x1xi1> to vector<8x128xi1>
    %209 = arith.select %208, %196, %166 : vector<8x128xi1>, vector<8x128xf32>
    %c0_90 = arith.constant 0 : index
    %c0_91 = arith.constant 0 : index
    %210 = vector.load %arg12[%c0_90, %c0_91] : memref<8x128xf32, #tpu.memory_space<vmem>>, vector<8x128xf32>
    tpu.vector_store %arg12[%c0_90, %c0_91], %209 {strides = array<i32>} : memref<8x128xf32, #tpu.memory_space<vmem>>, vector<8x128xf32>,
    %cst_92 = arith.constant 0.000000e+00 : f32
    %211 = vector.shape_cast %202 : vector<8x1xi1> to vector<8x1xi1>
    %212 = vector.broadcast %211 : vector<8x1xi1> to vector<8x128xi1>
    %213 = vector.broadcast %cst_92 : f32 to vector<8x128xf32>
    %214 = arith.select %212, %198, %213 : vector<8x128xi1>, vector<8x128xf32>
    %215 = arith.truncf %214 : vector<8x128xf32> to vector<8x128xbf16>
    %c6_93 = arith.constant 6 : index
    %c0_94 = arith.constant 0 : index
    %c0_95 = arith.constant 0 : index
    %216 = vector.load %arg8[%c6_93, %c0_94, %c0_95] : memref<8x8x128xbf16, #tpu.memory_space<vmem>>, vector<1x8x128xbf16>
    %217 = vector.shape_cast %216 : vector<1x8x128xbf16> to vector<8x128xbf16>
    %218 = vector.shape_cast %215 : vector<8x128xbf16> to vector<1x8x128xbf16>
    tpu.vector_store %arg8[%c6_93, %c0_94, %c0_95], %218 {strides = array<i32>} : memref<8x8x128xbf16, #tpu.memory_space<vmem>>, vector<1x8x128xbf16>,
    %c0_96 = arith.constant 0 : index
    %c0_97 = arith.constant 0 : index
    %219 = vector.load %arg9[%c0_96, %c0_97] : memref<8x128xf32, #tpu.memory_space<vmem>>, vector<8x128xf32>
    %c0_98 = arith.constant 0 : index
    %c0_99 = arith.constant 0 : index
    %220 = vector.load %arg10[%c0_98, %c0_99] : memref<8x128xf32, #tpu.memory_space<vmem>>, vector<8x128xf32>
    %c2 = arith.constant 2 : index
    %c0_100 = arith.constant 0 : index
    %c0_101 = arith.constant 0 : index
    %221 = vector.load %arg1[%c2, %c0_100, %c0_101] : memref<8x8x512xbf16, #tpu.memory_space<vmem>>, vector<1x8x512xbf16>
    %222 = vector.shape_cast %221 : vector<1x8x512xbf16> to vector<8x512xbf16>
    %223 = arith.extf %222 : vector<8x512xbf16> to vector<8x512xf32>
    %224 = arith.truncf %219 : vector<8x128xf32> to vector<8x128xbf16>
    %c0_102 = arith.constant 0 : index
    %c0_103 = arith.constant 0 : index
    %225 = vector.load %arg3[%c0_102, %c0_103] : memref<128x512xbf16, #tpu.memory_space<vmem>>, vector<128x512xbf16>
    %cst_104 = arith.constant dense<0.000000e+00> : vector<8x512xf32>
    %226 = tpu.matmul %224, %225, %cst_104 {dimension_numbers = #tpu.dot_dimension_numbers<[1], [0], [0], [1], [0, 0, 1, 1], [], []>} : vector<8x128xbf16>, vector<128x512xbf16>, vector<8x512xf32> -> vector<8x512xf32>
    %227 = arith.addf %223, %226 : vector<8x512xf32>
    %228 = vector.extract_strided_slice %227 {offsets = [0, 0], sizes = [8, 128], strides = [1, 1]} : vector<8x512xf32> to vector<8x128xf32>
    %229 = arith.negf %228 : vector<8x128xf32>
    %230 = math.exp %229 : vector<8x128xf32>
    %cst_105 = arith.constant 1.000000e+00 : f32
    %231 = vector.broadcast %cst_105 : f32 to vector<8x128xf32>
    %232 = arith.addf %231, %230 : vector<8x128xf32>
    %233 = arith.divf %231, %232 : vector<8x128xf32>
    %234 = vector.extract_strided_slice %227 {offsets = [0, 128], sizes = [8, 128], strides = [1, 1]} : vector<8x512xf32> to vector<8x128xf32>
    %235 = arith.negf %234 : vector<8x128xf32>
    %236 = math.exp %235 : vector<8x128xf32>
    %cst_106 = arith.constant 1.000000e+00 : f32
    %237 = vector.broadcast %cst_106 : f32 to vector<8x128xf32>
    %238 = arith.addf %237, %236 : vector<8x128xf32>
    %239 = arith.divf %237, %238 : vector<8x128xf32>
    %240 = vector.extract_strided_slice %227 {offsets = [0, 256], sizes = [8, 128], strides = [1, 1]} : vector<8x512xf32> to vector<8x128xf32>
    %241 = math.tanh %240 : vector<8x128xf32>
    %242 = vector.extract_strided_slice %227 {offsets = [0, 384], sizes = [8, 128], strides = [1, 1]} : vector<8x512xf32> to vector<8x128xf32>
    %243 = arith.negf %242 : vector<8x128xf32>
    %244 = math.exp %243 : vector<8x128xf32>
    %cst_107 = arith.constant 1.000000e+00 : f32
    %245 = vector.broadcast %cst_107 : f32 to vector<8x128xf32>
    %246 = arith.addf %245, %244 : vector<8x128xf32>
    %247 = arith.divf %245, %246 : vector<8x128xf32>
    %248 = arith.mulf %239, %220 : vector<8x128xf32>
    %249 = arith.mulf %233, %241 : vector<8x128xf32>
    %250 = arith.addf %248, %249 : vector<8x128xf32>
    %251 = math.tanh %250 : vector<8x128xf32>
    %252 = arith.mulf %247, %251 : vector<8x128xf32>
    %c2_108 = arith.constant 2 : index
    %c0_109 = arith.constant 0 : index
    %c0_110 = arith.constant 0 : index
    %253 = vector.load %arg5[%c2_108, %c0_109, %c0_110] : memref<8x8x1xbf16, #tpu.memory_space<vmem>>, vector<1x8x1xbf16>
    %254 = vector.shape_cast %253 : vector<1x8x1xbf16> to vector<8x1xbf16>
    %cst_111 = arith.constant 0.000000e+00 : bf16
    %255 = vector.broadcast %cst_111 : bf16 to vector<8x1xbf16>
    %256 = arith.cmpf ogt, %254, %255 : vector<8x1xbf16>
    %257 = vector.shape_cast %256 : vector<8x1xi1> to vector<8x1xi1>
    %258 = vector.broadcast %257 : vector<8x1xi1> to vector<8x128xi1>
    %259 = arith.select %258, %252, %219 : vector<8x128xi1>, vector<8x128xf32>
    %c0_112 = arith.constant 0 : index
    %c0_113 = arith.constant 0 : index
    %260 = vector.load %arg9[%c0_112, %c0_113] : memref<8x128xf32, #tpu.memory_space<vmem>>, vector<8x128xf32>
    tpu.vector_store %arg9[%c0_112, %c0_113], %259 {strides = array<i32>} : memref<8x128xf32, #tpu.memory_space<vmem>>, vector<8x128xf32>,
    %261 = vector.shape_cast %256 : vector<8x1xi1> to vector<8x1xi1>
    %262 = vector.broadcast %261 : vector<8x1xi1> to vector<8x128xi1>
    %263 = arith.select %262, %250, %220 : vector<8x128xi1>, vector<8x128xf32>
    %c0_114 = arith.constant 0 : index
    %c0_115 = arith.constant 0 : index
    %264 = vector.load %arg10[%c0_114, %c0_115] : memref<8x128xf32, #tpu.memory_space<vmem>>, vector<8x128xf32>
    tpu.vector_store %arg10[%c0_114, %c0_115], %263 {strides = array<i32>} : memref<8x128xf32, #tpu.memory_space<vmem>>, vector<8x128xf32>,
    %cst_116 = arith.constant 0.000000e+00 : f32
    %265 = vector.shape_cast %256 : vector<8x1xi1> to vector<8x1xi1>
    %266 = vector.broadcast %265 : vector<8x1xi1> to vector<8x128xi1>
    %267 = vector.broadcast %cst_116 : f32 to vector<8x128xf32>
    %268 = arith.select %266, %252, %267 : vector<8x128xi1>, vector<8x128xf32>
    %269 = arith.truncf %268 : vector<8x128xf32> to vector<8x128xbf16>
    %c2_117 = arith.constant 2 : index
    %c0_118 = arith.constant 0 : index
    %c0_119 = arith.constant 0 : index
    %270 = vector.load %arg7[%c2_117, %c0_118, %c0_119] : memref<8x8x128xbf16, #tpu.memory_space<vmem>>, vector<1x8x128xbf16>
    %271 = vector.shape_cast %270 : vector<1x8x128xbf16> to vector<8x128xbf16>
    %272 = vector.shape_cast %269 : vector<8x128xbf16> to vector<1x8x128xbf16>
    tpu.vector_store %arg7[%c2_117, %c0_118, %c0_119], %272 {strides = array<i32>} : memref<8x8x128xbf16, #tpu.memory_space<vmem>>, vector<1x8x128xbf16>,
    %c0_120 = arith.constant 0 : index
    %c0_121 = arith.constant 0 : index
    %273 = vector.load %arg11[%c0_120, %c0_121] : memref<8x128xf32, #tpu.memory_space<vmem>>, vector<8x128xf32>
    %c0_122 = arith.constant 0 : index
    %c0_123 = arith.constant 0 : index
    %274 = vector.load %arg12[%c0_122, %c0_123] : memref<8x128xf32, #tpu.memory_space<vmem>>, vector<8x128xf32>
    %c5 = arith.constant 5 : index
    %c0_124 = arith.constant 0 : index
    %c0_125 = arith.constant 0 : index
    %275 = vector.load %arg2[%c5, %c0_124, %c0_125] : memref<8x8x512xbf16, #tpu.memory_space<vmem>>, vector<1x8x512xbf16>
    %276 = vector.shape_cast %275 : vector<1x8x512xbf16> to vector<8x512xbf16>
    %277 = arith.extf %276 : vector<8x512xbf16> to vector<8x512xf32>
    %278 = arith.truncf %273 : vector<8x128xf32> to vector<8x128xbf16>
    %c0_126 = arith.constant 0 : index
    %c0_127 = arith.constant 0 : index
    %279 = vector.load %arg4[%c0_126, %c0_127] : memref<128x512xbf16, #tpu.memory_space<vmem>>, vector<128x512xbf16>
    %cst_128 = arith.constant dense<0.000000e+00> : vector<8x512xf32>
    %280 = tpu.matmul %278, %279, %cst_128 {dimension_numbers = #tpu.dot_dimension_numbers<[1], [0], [0], [1], [0, 0, 1, 1], [], []>} : vector<8x128xbf16>, vector<128x512xbf16>, vector<8x512xf32> -> vector<8x512xf32>
    %281 = arith.addf %277, %280 : vector<8x512xf32>
    %282 = vector.extract_strided_slice %281 {offsets = [0, 0], sizes = [8, 128], strides = [1, 1]} : vector<8x512xf32> to vector<8x128xf32>
    %283 = arith.negf %282 : vector<8x128xf32>
    %284 = math.exp %283 : vector<8x128xf32>
    %cst_129 = arith.constant 1.000000e+00 : f32
    %285 = vector.broadcast %cst_129 : f32 to vector<8x128xf32>
    %286 = arith.addf %285, %284 : vector<8x128xf32>
    %287 = arith.divf %285, %286 : vector<8x128xf32>
    %288 = vector.extract_strided_slice %281 {offsets = [0, 128], sizes = [8, 128], strides = [1, 1]} : vector<8x512xf32> to vector<8x128xf32>
    %289 = arith.negf %288 : vector<8x128xf32>
    %290 = math.exp %289 : vector<8x128xf32>
    %cst_130 = arith.constant 1.000000e+00 : f32
    %291 = vector.broadcast %cst_130 : f32 to vector<8x128xf32>
    %292 = arith.addf %291, %290 : vector<8x128xf32>
    %293 = arith.divf %291, %292 : vector<8x128xf32>
    %294 = vector.extract_strided_slice %281 {offsets = [0, 256], sizes = [8, 128], strides = [1, 1]} : vector<8x512xf32> to vector<8x128xf32>
    %295 = math.tanh %294 : vector<8x128xf32>
    %296 = vector.extract_strided_slice %281 {offsets = [0, 384], sizes = [8, 128], strides = [1, 1]} : vector<8x512xf32> to vector<8x128xf32>
    %297 = arith.negf %296 : vector<8x128xf32>
    %298 = math.exp %297 : vector<8x128xf32>
    %cst_131 = arith.constant 1.000000e+00 : f32
    %299 = vector.broadcast %cst_131 : f32 to vector<8x128xf32>
    %300 = arith.addf %299, %298 : vector<8x128xf32>
    %301 = arith.divf %299, %300 : vector<8x128xf32>
    %302 = arith.mulf %293, %274 : vector<8x128xf32>
    %303 = arith.mulf %287, %295 : vector<8x128xf32>
    %304 = arith.addf %302, %303 : vector<8x128xf32>
    %305 = math.tanh %304 : vector<8x128xf32>
    %306 = arith.mulf %301, %305 : vector<8x128xf32>
    %c5_132 = arith.constant 5 : index
    %c0_133 = arith.constant 0 : index
    %c0_134 = arith.constant 0 : index
    %307 = vector.load %arg6[%c5_132, %c0_133, %c0_134] : memref<8x8x1xbf16, #tpu.memory_space<vmem>>, vector<1x8x1xbf16>
    %308 = vector.shape_cast %307 : vector<1x8x1xbf16> to vector<8x1xbf16>
    %cst_135 = arith.constant 0.000000e+00 : bf16
    %309 = vector.broadcast %cst_135 : bf16 to vector<8x1xbf16>
    %310 = arith.cmpf ogt, %308, %309 : vector<8x1xbf16>
    %311 = vector.shape_cast %310 : vector<8x1xi1> to vector<8x1xi1>
    %312 = vector.broadcast %311 : vector<8x1xi1> to vector<8x128xi1>
    %313 = arith.select %312, %306, %273 : vector<8x128xi1>, vector<8x128xf32>
    %c0_136 = arith.constant 0 : index
    %c0_137 = arith.constant 0 : index
    %314 = vector.load %arg11[%c0_136, %c0_137] : memref<8x128xf32, #tpu.memory_space<vmem>>, vector<8x128xf32>
    tpu.vector_store %arg11[%c0_136, %c0_137], %313 {strides = array<i32>} : memref<8x128xf32, #tpu.memory_space<vmem>>, vector<8x128xf32>,
    %315 = vector.shape_cast %310 : vector<8x1xi1> to vector<8x1xi1>
    %316 = vector.broadcast %315 : vector<8x1xi1> to vector<8x128xi1>
    %317 = arith.select %316, %304, %274 : vector<8x128xi1>, vector<8x128xf32>
    %c0_138 = arith.constant 0 : index
    %c0_139 = arith.constant 0 : index
    %318 = vector.load %arg12[%c0_138, %c0_139] : memref<8x128xf32, #tpu.memory_space<vmem>>, vector<8x128xf32>
    tpu.vector_store %arg12[%c0_138, %c0_139], %317 {strides = array<i32>} : memref<8x128xf32, #tpu.memory_space<vmem>>, vector<8x128xf32>,
    %cst_140 = arith.constant 0.000000e+00 : f32
    %319 = vector.shape_cast %310 : vector<8x1xi1> to vector<8x1xi1>
    %320 = vector.broadcast %319 : vector<8x1xi1> to vector<8x128xi1>
    %321 = vector.broadcast %cst_140 : f32 to vector<8x128xf32>
    %322 = arith.select %320, %306, %321 : vector<8x128xi1>, vector<8x128xf32>
    %323 = arith.truncf %322 : vector<8x128xf32> to vector<8x128xbf16>
    %c5_141 = arith.constant 5 : index
    %c0_142 = arith.constant 0 : index
    %c0_143 = arith.constant 0 : index
    %324 = vector.load %arg8[%c5_141, %c0_142, %c0_143] : memref<8x8x128xbf16, #tpu.memory_space<vmem>>, vector<1x8x128xbf16>
    %325 = vector.shape_cast %324 : vector<1x8x128xbf16> to vector<8x128xbf16>
    %326 = vector.shape_cast %323 : vector<8x128xbf16> to vector<1x8x128xbf16>
    tpu.vector_store %arg8[%c5_141, %c0_142, %c0_143], %326 {strides = array<i32>} : memref<8x8x128xbf16, #tpu.memory_space<vmem>>, vector<1x8x128xbf16>,
    %c0_144 = arith.constant 0 : index
    %c0_145 = arith.constant 0 : index
    %327 = vector.load %arg9[%c0_144, %c0_145] : memref<8x128xf32, #tpu.memory_space<vmem>>, vector<8x128xf32>
    %c0_146 = arith.constant 0 : index
    %c0_147 = arith.constant 0 : index
    %328 = vector.load %arg10[%c0_146, %c0_147] : memref<8x128xf32, #tpu.memory_space<vmem>>, vector<8x128xf32>
    %c3 = arith.constant 3 : index
    %c0_148 = arith.constant 0 : index
    %c0_149 = arith.constant 0 : index
    %329 = vector.load %arg1[%c3, %c0_148, %c0_149] : memref<8x8x512xbf16, #tpu.memory_space<vmem>>, vector<1x8x512xbf16>
    %330 = vector.shape_cast %329 : vector<1x8x512xbf16> to vector<8x512xbf16>
    %331 = arith.extf %330 : vector<8x512xbf16> to vector<8x512xf32>
    %332 = arith.truncf %327 : vector<8x128xf32> to vector<8x128xbf16>
    %c0_150 = arith.constant 0 : index
    %c0_151 = arith.constant 0 : index
    %333 = vector.load %arg3[%c0_150, %c0_151] : memref<128x512xbf16, #tpu.memory_space<vmem>>, vector<128x512xbf16>
    %cst_152 = arith.constant dense<0.000000e+00> : vector<8x512xf32>
    %334 = tpu.matmul %332, %333, %cst_152 {dimension_numbers = #tpu.dot_dimension_numbers<[1], [0], [0], [1], [0, 0, 1, 1], [], []>} : vector<8x128xbf16>, vector<128x512xbf16>, vector<8x512xf32> -> vector<8x512xf32>
    %335 = arith.addf %331, %334 : vector<8x512xf32>
    %336 = vector.extract_strided_slice %335 {offsets = [0, 0], sizes = [8, 128], strides = [1, 1]} : vector<8x512xf32> to vector<8x128xf32>
    %337 = arith.negf %336 : vector<8x128xf32>
    %338 = math.exp %337 : vector<8x128xf32>
    %cst_153 = arith.constant 1.000000e+00 : f32
    %339 = vector.broadcast %cst_153 : f32 to vector<8x128xf32>
    %340 = arith.addf %339, %338 : vector<8x128xf32>
    %341 = arith.divf %339, %340 : vector<8x128xf32>
    %342 = vector.extract_strided_slice %335 {offsets = [0, 128], sizes = [8, 128], strides = [1, 1]} : vector<8x512xf32> to vector<8x128xf32>
    %343 = arith.negf %342 : vector<8x128xf32>
    %344 = math.exp %343 : vector<8x128xf32>
    %cst_154 = arith.constant 1.000000e+00 : f32
    %345 = vector.broadcast %cst_154 : f32 to vector<8x128xf32>
    %346 = arith.addf %345, %344 : vector<8x128xf32>
    %347 = arith.divf %345, %346 : vector<8x128xf32>
    %348 = vector.extract_strided_slice %335 {offsets = [0, 256], sizes = [8, 128], strides = [1, 1]} : vector<8x512xf32> to vector<8x128xf32>
    %349 = math.tanh %348 : vector<8x128xf32>
    %350 = vector.extract_strided_slice %335 {offsets = [0, 384], sizes = [8, 128], strides = [1, 1]} : vector<8x512xf32> to vector<8x128xf32>
    %351 = arith.negf %350 : vector<8x128xf32>
    %352 = math.exp %351 : vector<8x128xf32>
    %cst_155 = arith.constant 1.000000e+00 : f32
    %353 = vector.broadcast %cst_155 : f32 to vector<8x128xf32>
    %354 = arith.addf %353, %352 : vector<8x128xf32>
    %355 = arith.divf %353, %354 : vector<8x128xf32>
    %356 = arith.mulf %347, %328 : vector<8x128xf32>
    %357 = arith.mulf %341, %349 : vector<8x128xf32>
    %358 = arith.addf %356, %357 : vector<8x128xf32>
    %359 = math.tanh %358 : vector<8x128xf32>
    %360 = arith.mulf %355, %359 : vector<8x128xf32>
    %c3_156 = arith.constant 3 : index
    %c0_157 = arith.constant 0 : index
    %c0_158 = arith.constant 0 : index
    %361 = vector.load %arg5[%c3_156, %c0_157, %c0_158] : memref<8x8x1xbf16, #tpu.memory_space<vmem>>, vector<1x8x1xbf16>
    %362 = vector.shape_cast %361 : vector<1x8x1xbf16> to vector<8x1xbf16>
    %cst_159 = arith.constant 0.000000e+00 : bf16
    %363 = vector.broadcast %cst_159 : bf16 to vector<8x1xbf16>
    %364 = arith.cmpf ogt, %362, %363 : vector<8x1xbf16>
    %365 = vector.shape_cast %364 : vector<8x1xi1> to vector<8x1xi1>
    %366 = vector.broadcast %365 : vector<8x1xi1> to vector<8x128xi1>
    %367 = arith.select %366, %360, %327 : vector<8x128xi1>, vector<8x128xf32>
    %c0_160 = arith.constant 0 : index
    %c0_161 = arith.constant 0 : index
    %368 = vector.load %arg9[%c0_160, %c0_161] : memref<8x128xf32, #tpu.memory_space<vmem>>, vector<8x128xf32>
    tpu.vector_store %arg9[%c0_160, %c0_161], %367 {strides = array<i32>} : memref<8x128xf32, #tpu.memory_space<vmem>>, vector<8x128xf32>,
    %369 = vector.shape_cast %364 : vector<8x1xi1> to vector<8x1xi1>
    %370 = vector.broadcast %369 : vector<8x1xi1> to vector<8x128xi1>
    %371 = arith.select %370, %358, %328 : vector<8x128xi1>, vector<8x128xf32>
    %c0_162 = arith.constant 0 : index
    %c0_163 = arith.constant 0 : index
    %372 = vector.load %arg10[%c0_162, %c0_163] : memref<8x128xf32, #tpu.memory_space<vmem>>, vector<8x128xf32>
    tpu.vector_store %arg10[%c0_162, %c0_163], %371 {strides = array<i32>} : memref<8x128xf32, #tpu.memory_space<vmem>>, vector<8x128xf32>,
    %cst_164 = arith.constant 0.000000e+00 : f32
    %373 = vector.shape_cast %364 : vector<8x1xi1> to vector<8x1xi1>
    %374 = vector.broadcast %373 : vector<8x1xi1> to vector<8x128xi1>
    %375 = vector.broadcast %cst_164 : f32 to vector<8x128xf32>
    %376 = arith.select %374, %360, %375 : vector<8x128xi1>, vector<8x128xf32>
    %377 = arith.truncf %376 : vector<8x128xf32> to vector<8x128xbf16>
    %c3_165 = arith.constant 3 : index
    %c0_166 = arith.constant 0 : index
    %c0_167 = arith.constant 0 : index
    %378 = vector.load %arg7[%c3_165, %c0_166, %c0_167] : memref<8x8x128xbf16, #tpu.memory_space<vmem>>, vector<1x8x128xbf16>
    %379 = vector.shape_cast %378 : vector<1x8x128xbf16> to vector<8x128xbf16>
    %380 = vector.shape_cast %377 : vector<8x128xbf16> to vector<1x8x128xbf16>
    tpu.vector_store %arg7[%c3_165, %c0_166, %c0_167], %380 {strides = array<i32>} : memref<8x8x128xbf16, #tpu.memory_space<vmem>>, vector<1x8x128xbf16>,
    %c0_168 = arith.constant 0 : index
    %c0_169 = arith.constant 0 : index
    %381 = vector.load %arg11[%c0_168, %c0_169] : memref<8x128xf32, #tpu.memory_space<vmem>>, vector<8x128xf32>
    %c0_170 = arith.constant 0 : index
    %c0_171 = arith.constant 0 : index
    %382 = vector.load %arg12[%c0_170, %c0_171] : memref<8x128xf32, #tpu.memory_space<vmem>>, vector<8x128xf32>
    %c4 = arith.constant 4 : index
    %c0_172 = arith.constant 0 : index
    %c0_173 = arith.constant 0 : index
    %383 = vector.load %arg2[%c4, %c0_172, %c0_173] : memref<8x8x512xbf16, #tpu.memory_space<vmem>>, vector<1x8x512xbf16>
    %384 = vector.shape_cast %383 : vector<1x8x512xbf16> to vector<8x512xbf16>
    %385 = arith.extf %384 : vector<8x512xbf16> to vector<8x512xf32>
    %386 = arith.truncf %381 : vector<8x128xf32> to vector<8x128xbf16>
    %c0_174 = arith.constant 0 : index
    %c0_175 = arith.constant 0 : index
    %387 = vector.load %arg4[%c0_174, %c0_175] : memref<128x512xbf16, #tpu.memory_space<vmem>>, vector<128x512xbf16>
    %cst_176 = arith.constant dense<0.000000e+00> : vector<8x512xf32>
    %388 = tpu.matmul %386, %387, %cst_176 {dimension_numbers = #tpu.dot_dimension_numbers<[1], [0], [0], [1], [0, 0, 1, 1], [], []>} : vector<8x128xbf16>, vector<128x512xbf16>, vector<8x512xf32> -> vector<8x512xf32>
    %389 = arith.addf %385, %388 : vector<8x512xf32>
    %390 = vector.extract_strided_slice %389 {offsets = [0, 0], sizes = [8, 128], strides = [1, 1]} : vector<8x512xf32> to vector<8x128xf32>
    %391 = arith.negf %390 : vector<8x128xf32>
    %392 = math.exp %391 : vector<8x128xf32>
    %cst_177 = arith.constant 1.000000e+00 : f32
    %393 = vector.broadcast %cst_177 : f32 to vector<8x128xf32>
    %394 = arith.addf %393, %392 : vector<8x128xf32>
    %395 = arith.divf %393, %394 : vector<8x128xf32>
    %396 = vector.extract_strided_slice %389 {offsets = [0, 128], sizes = [8, 128], strides = [1, 1]} : vector<8x512xf32> to vector<8x128xf32>
    %397 = arith.negf %396 : vector<8x128xf32>
    %398 = math.exp %397 : vector<8x128xf32>
    %cst_178 = arith.constant 1.000000e+00 : f32
    %399 = vector.broadcast %cst_178 : f32 to vector<8x128xf32>
    %400 = arith.addf %399, %398 : vector<8x128xf32>
    %401 = arith.divf %399, %400 : vector<8x128xf32>
    %402 = vector.extract_strided_slice %389 {offsets = [0, 256], sizes = [8, 128], strides = [1, 1]} : vector<8x512xf32> to vector<8x128xf32>
    %403 = math.tanh %402 : vector<8x128xf32>
    %404 = vector.extract_strided_slice %389 {offsets = [0, 384], sizes = [8, 128], strides = [1, 1]} : vector<8x512xf32> to vector<8x128xf32>
    %405 = arith.negf %404 : vector<8x128xf32>
    %406 = math.exp %405 : vector<8x128xf32>
    %cst_179 = arith.constant 1.000000e+00 : f32
    %407 = vector.broadcast %cst_179 : f32 to vector<8x128xf32>
    %408 = arith.addf %407, %406 : vector<8x128xf32>
    %409 = arith.divf %407, %408 : vector<8x128xf32>
    %410 = arith.mulf %401, %382 : vector<8x128xf32>
    %411 = arith.mulf %395, %403 : vector<8x128xf32>
    %412 = arith.addf %410, %411 : vector<8x128xf32>
    %413 = math.tanh %412 : vector<8x128xf32>
    %414 = arith.mulf %409, %413 : vector<8x128xf32>
    %c4_180 = arith.constant 4 : index
    %c0_181 = arith.constant 0 : index
    %c0_182 = arith.constant 0 : index
    %415 = vector.load %arg6[%c4_180, %c0_181, %c0_182] : memref<8x8x1xbf16, #tpu.memory_space<vmem>>, vector<1x8x1xbf16>
    %416 = vector.shape_cast %415 : vector<1x8x1xbf16> to vector<8x1xbf16>
    %cst_183 = arith.constant 0.000000e+00 : bf16
    %417 = vector.broadcast %cst_183 : bf16 to vector<8x1xbf16>
    %418 = arith.cmpf ogt, %416, %417 : vector<8x1xbf16>
    %419 = vector.shape_cast %418 : vector<8x1xi1> to vector<8x1xi1>
    %420 = vector.broadcast %419 : vector<8x1xi1> to vector<8x128xi1>
    %421 = arith.select %420, %414, %381 : vector<8x128xi1>, vector<8x128xf32>
    %c0_184 = arith.constant 0 : index
    %c0_185 = arith.constant 0 : index
    %422 = vector.load %arg11[%c0_184, %c0_185] : memref<8x128xf32, #tpu.memory_space<vmem>>, vector<8x128xf32>
    tpu.vector_store %arg11[%c0_184, %c0_185], %421 {strides = array<i32>} : memref<8x128xf32, #tpu.memory_space<vmem>>, vector<8x128xf32>,
    %423 = vector.shape_cast %418 : vector<8x1xi1> to vector<8x1xi1>
    %424 = vector.broadcast %423 : vector<8x1xi1> to vector<8x128xi1>
    %425 = arith.select %424, %412, %382 : vector<8x128xi1>, vector<8x128xf32>
    %c0_186 = arith.constant 0 : index
    %c0_187 = arith.constant 0 : index
    %426 = vector.load %arg12[%c0_186, %c0_187] : memref<8x128xf32, #tpu.memory_space<vmem>>, vector<8x128xf32>
    tpu.vector_store %arg12[%c0_186, %c0_187], %425 {strides = array<i32>} : memref<8x128xf32, #tpu.memory_space<vmem>>, vector<8x128xf32>,
    %cst_188 = arith.constant 0.000000e+00 : f32
    %427 = vector.shape_cast %418 : vector<8x1xi1> to vector<8x1xi1>
    %428 = vector.broadcast %427 : vector<8x1xi1> to vector<8x128xi1>
    %429 = vector.broadcast %cst_188 : f32 to vector<8x128xf32>
    %430 = arith.select %428, %414, %429 : vector<8x128xi1>, vector<8x128xf32>
    %431 = arith.truncf %430 : vector<8x128xf32> to vector<8x128xbf16>
    %c4_189 = arith.constant 4 : index
    %c0_190 = arith.constant 0 : index
    %c0_191 = arith.constant 0 : index
    %432 = vector.load %arg8[%c4_189, %c0_190, %c0_191] : memref<8x8x128xbf16, #tpu.memory_space<vmem>>, vector<1x8x128xbf16>
    %433 = vector.shape_cast %432 : vector<1x8x128xbf16> to vector<8x128xbf16>
    %434 = vector.shape_cast %431 : vector<8x128xbf16> to vector<1x8x128xbf16>
    tpu.vector_store %arg8[%c4_189, %c0_190, %c0_191], %434 {strides = array<i32>} : memref<8x8x128xbf16, #tpu.memory_space<vmem>>, vector<1x8x128xbf16>,
    %c0_192 = arith.constant 0 : index
    %c0_193 = arith.constant 0 : index
    %435 = vector.load %arg9[%c0_192, %c0_193] : memref<8x128xf32, #tpu.memory_space<vmem>>, vector<8x128xf32>
    %c0_194 = arith.constant 0 : index
    %c0_195 = arith.constant 0 : index
    %436 = vector.load %arg10[%c0_194, %c0_195] : memref<8x128xf32, #tpu.memory_space<vmem>>, vector<8x128xf32>
    %c4_196 = arith.constant 4 : index
    %c0_197 = arith.constant 0 : index
    %c0_198 = arith.constant 0 : index
    %437 = vector.load %arg1[%c4_196, %c0_197, %c0_198] : memref<8x8x512xbf16, #tpu.memory_space<vmem>>, vector<1x8x512xbf16>
    %438 = vector.shape_cast %437 : vector<1x8x512xbf16> to vector<8x512xbf16>
    %439 = arith.extf %438 : vector<8x512xbf16> to vector<8x512xf32>
    %440 = arith.truncf %435 : vector<8x128xf32> to vector<8x128xbf16>
    %c0_199 = arith.constant 0 : index
    %c0_200 = arith.constant 0 : index
    %441 = vector.load %arg3[%c0_199, %c0_200] : memref<128x512xbf16, #tpu.memory_space<vmem>>, vector<128x512xbf16>
    %cst_201 = arith.constant dense<0.000000e+00> : vector<8x512xf32>
    %442 = tpu.matmul %440, %441, %cst_201 {dimension_numbers = #tpu.dot_dimension_numbers<[1], [0], [0], [1], [0, 0, 1, 1], [], []>} : vector<8x128xbf16>, vector<128x512xbf16>, vector<8x512xf32> -> vector<8x512xf32>
    %443 = arith.addf %439, %442 : vector<8x512xf32>
    %444 = vector.extract_strided_slice %443 {offsets = [0, 0], sizes = [8, 128], strides = [1, 1]} : vector<8x512xf32> to vector<8x128xf32>
    %445 = arith.negf %444 : vector<8x128xf32>
    %446 = math.exp %445 : vector<8x128xf32>
    %cst_202 = arith.constant 1.000000e+00 : f32
    %447 = vector.broadcast %cst_202 : f32 to vector<8x128xf32>
    %448 = arith.addf %447, %446 : vector<8x128xf32>
    %449 = arith.divf %447, %448 : vector<8x128xf32>
    %450 = vector.extract_strided_slice %443 {offsets = [0, 128], sizes = [8, 128], strides = [1, 1]} : vector<8x512xf32> to vector<8x128xf32>
    %451 = arith.negf %450 : vector<8x128xf32>
    %452 = math.exp %451 : vector<8x128xf32>
    %cst_203 = arith.constant 1.000000e+00 : f32
    %453 = vector.broadcast %cst_203 : f32 to vector<8x128xf32>
    %454 = arith.addf %453, %452 : vector<8x128xf32>
    %455 = arith.divf %453, %454 : vector<8x128xf32>
    %456 = vector.extract_strided_slice %443 {offsets = [0, 256], sizes = [8, 128], strides = [1, 1]} : vector<8x512xf32> to vector<8x128xf32>
    %457 = math.tanh %456 : vector<8x128xf32>
    %458 = vector.extract_strided_slice %443 {offsets = [0, 384], sizes = [8, 128], strides = [1, 1]} : vector<8x512xf32> to vector<8x128xf32>
    %459 = arith.negf %458 : vector<8x128xf32>
    %460 = math.exp %459 : vector<8x128xf32>
    %cst_204 = arith.constant 1.000000e+00 : f32
    %461 = vector.broadcast %cst_204 : f32 to vector<8x128xf32>
    %462 = arith.addf %461, %460 : vector<8x128xf32>
    %463 = arith.divf %461, %462 : vector<8x128xf32>
    %464 = arith.mulf %455, %436 : vector<8x128xf32>
    %465 = arith.mulf %449, %457 : vector<8x128xf32>
    %466 = arith.addf %464, %465 : vector<8x128xf32>
    %467 = math.tanh %466 : vector<8x128xf32>
    %468 = arith.mulf %463, %467 : vector<8x128xf32>
    %c4_205 = arith.constant 4 : index
    %c0_206 = arith.constant 0 : index
    %c0_207 = arith.constant 0 : index
    %469 = vector.load %arg5[%c4_205, %c0_206, %c0_207] : memref<8x8x1xbf16, #tpu.memory_space<vmem>>, vector<1x8x1xbf16>
    %470 = vector.shape_cast %469 : vector<1x8x1xbf16> to vector<8x1xbf16>
    %cst_208 = arith.constant 0.000000e+00 : bf16
    %471 = vector.broadcast %cst_208 : bf16 to vector<8x1xbf16>
    %472 = arith.cmpf ogt, %470, %471 : vector<8x1xbf16>
    %473 = vector.shape_cast %472 : vector<8x1xi1> to vector<8x1xi1>
    %474 = vector.broadcast %473 : vector<8x1xi1> to vector<8x128xi1>
    %475 = arith.select %474, %468, %435 : vector<8x128xi1>, vector<8x128xf32>
    %c0_209 = arith.constant 0 : index
    %c0_210 = arith.constant 0 : index
    %476 = vector.load %arg9[%c0_209, %c0_210] : memref<8x128xf32, #tpu.memory_space<vmem>>, vector<8x128xf32>
    tpu.vector_store %arg9[%c0_209, %c0_210], %475 {strides = array<i32>} : memref<8x128xf32, #tpu.memory_space<vmem>>, vector<8x128xf32>,
    %477 = vector.shape_cast %472 : vector<8x1xi1> to vector<8x1xi1>
    %478 = vector.broadcast %477 : vector<8x1xi1> to vector<8x128xi1>
    %479 = arith.select %478, %466, %436 : vector<8x128xi1>, vector<8x128xf32>
    %c0_211 = arith.constant 0 : index
    %c0_212 = arith.constant 0 : index
    %480 = vector.load %arg10[%c0_211, %c0_212] : memref<8x128xf32, #tpu.memory_space<vmem>>, vector<8x128xf32>
    tpu.vector_store %arg10[%c0_211, %c0_212], %479 {strides = array<i32>} : memref<8x128xf32, #tpu.memory_space<vmem>>, vector<8x128xf32>,
    %cst_213 = arith.constant 0.000000e+00 : f32
    %481 = vector.shape_cast %472 : vector<8x1xi1> to vector<8x1xi1>
    %482 = vector.broadcast %481 : vector<8x1xi1> to vector<8x128xi1>
    %483 = vector.broadcast %cst_213 : f32 to vector<8x128xf32>
    %484 = arith.select %482, %468, %483 : vector<8x128xi1>, vector<8x128xf32>
    %485 = arith.truncf %484 : vector<8x128xf32> to vector<8x128xbf16>
    %c4_214 = arith.constant 4 : index
    %c0_215 = arith.constant 0 : index
    %c0_216 = arith.constant 0 : index
    %486 = vector.load %arg7[%c4_214, %c0_215, %c0_216] : memref<8x8x128xbf16, #tpu.memory_space<vmem>>, vector<1x8x128xbf16>
    %487 = vector.shape_cast %486 : vector<1x8x128xbf16> to vector<8x128xbf16>
    %488 = vector.shape_cast %485 : vector<8x128xbf16> to vector<1x8x128xbf16>
    tpu.vector_store %arg7[%c4_214, %c0_215, %c0_216], %488 {strides = array<i32>} : memref<8x8x128xbf16, #tpu.memory_space<vmem>>, vector<1x8x128xbf16>,
    %c0_217 = arith.constant 0 : index
    %c0_218 = arith.constant 0 : index
    %489 = vector.load %arg11[%c0_217, %c0_218] : memref<8x128xf32, #tpu.memory_space<vmem>>, vector<8x128xf32>
    %c0_219 = arith.constant 0 : index
    %c0_220 = arith.constant 0 : index
    %490 = vector.load %arg12[%c0_219, %c0_220] : memref<8x128xf32, #tpu.memory_space<vmem>>, vector<8x128xf32>
    %c3_221 = arith.constant 3 : index
    %c0_222 = arith.constant 0 : index
    %c0_223 = arith.constant 0 : index
    %491 = vector.load %arg2[%c3_221, %c0_222, %c0_223] : memref<8x8x512xbf16, #tpu.memory_space<vmem>>, vector<1x8x512xbf16>
    %492 = vector.shape_cast %491 : vector<1x8x512xbf16> to vector<8x512xbf16>
    %493 = arith.extf %492 : vector<8x512xbf16> to vector<8x512xf32>
    %494 = arith.truncf %489 : vector<8x128xf32> to vector<8x128xbf16>
    %c0_224 = arith.constant 0 : index
    %c0_225 = arith.constant 0 : index
    %495 = vector.load %arg4[%c0_224, %c0_225] : memref<128x512xbf16, #tpu.memory_space<vmem>>, vector<128x512xbf16>
    %cst_226 = arith.constant dense<0.000000e+00> : vector<8x512xf32>
    %496 = tpu.matmul %494, %495, %cst_226 {dimension_numbers = #tpu.dot_dimension_numbers<[1], [0], [0], [1], [0, 0, 1, 1], [], []>} : vector<8x128xbf16>, vector<128x512xbf16>, vector<8x512xf32> -> vector<8x512xf32>
    %497 = arith.addf %493, %496 : vector<8x512xf32>
    %498 = vector.extract_strided_slice %497 {offsets = [0, 0], sizes = [8, 128], strides = [1, 1]} : vector<8x512xf32> to vector<8x128xf32>
    %499 = arith.negf %498 : vector<8x128xf32>
    %500 = math.exp %499 : vector<8x128xf32>
    %cst_227 = arith.constant 1.000000e+00 : f32
    %501 = vector.broadcast %cst_227 : f32 to vector<8x128xf32>
    %502 = arith.addf %501, %500 : vector<8x128xf32>
    %503 = arith.divf %501, %502 : vector<8x128xf32>
    %504 = vector.extract_strided_slice %497 {offsets = [0, 128], sizes = [8, 128], strides = [1, 1]} : vector<8x512xf32> to vector<8x128xf32>
    %505 = arith.negf %504 : vector<8x128xf32>
    %506 = math.exp %505 : vector<8x128xf32>
    %cst_228 = arith.constant 1.000000e+00 : f32
    %507 = vector.broadcast %cst_228 : f32 to vector<8x128xf32>
    %508 = arith.addf %507, %506 : vector<8x128xf32>
    %509 = arith.divf %507, %508 : vector<8x128xf32>
    %510 = vector.extract_strided_slice %497 {offsets = [0, 256], sizes = [8, 128], strides = [1, 1]} : vector<8x512xf32> to vector<8x128xf32>
    %511 = math.tanh %510 : vector<8x128xf32>
    %512 = vector.extract_strided_slice %497 {offsets = [0, 384], sizes = [8, 128], strides = [1, 1]} : vector<8x512xf32> to vector<8x128xf32>
    %513 = arith.negf %512 : vector<8x128xf32>
    %514 = math.exp %513 : vector<8x128xf32>
    %cst_229 = arith.constant 1.000000e+00 : f32
    %515 = vector.broadcast %cst_229 : f32 to vector<8x128xf32>
    %516 = arith.addf %515, %514 : vector<8x128xf32>
    %517 = arith.divf %515, %516 : vector<8x128xf32>
    %518 = arith.mulf %509, %490 : vector<8x128xf32>
    %519 = arith.mulf %503, %511 : vector<8x128xf32>
    %520 = arith.addf %518, %519 : vector<8x128xf32>
    %521 = math.tanh %520 : vector<8x128xf32>
    %522 = arith.mulf %517, %521 : vector<8x128xf32>
    %c3_230 = arith.constant 3 : index
    %c0_231 = arith.constant 0 : index
    %c0_232 = arith.constant 0 : index
    %523 = vector.load %arg6[%c3_230, %c0_231, %c0_232] : memref<8x8x1xbf16, #tpu.memory_space<vmem>>, vector<1x8x1xbf16>
    %524 = vector.shape_cast %523 : vector<1x8x1xbf16> to vector<8x1xbf16>
    %cst_233 = arith.constant 0.000000e+00 : bf16
    %525 = vector.broadcast %cst_233 : bf16 to vector<8x1xbf16>
    %526 = arith.cmpf ogt, %524, %525 : vector<8x1xbf16>
    %527 = vector.shape_cast %526 : vector<8x1xi1> to vector<8x1xi1>
    %528 = vector.broadcast %527 : vector<8x1xi1> to vector<8x128xi1>
    %529 = arith.select %528, %522, %489 : vector<8x128xi1>, vector<8x128xf32>
    %c0_234 = arith.constant 0 : index
    %c0_235 = arith.constant 0 : index
    %530 = vector.load %arg11[%c0_234, %c0_235] : memref<8x128xf32, #tpu.memory_space<vmem>>, vector<8x128xf32>
    tpu.vector_store %arg11[%c0_234, %c0_235], %529 {strides = array<i32>} : memref<8x128xf32, #tpu.memory_space<vmem>>, vector<8x128xf32>,
    %531 = vector.shape_cast %526 : vector<8x1xi1> to vector<8x1xi1>
    %532 = vector.broadcast %531 : vector<8x1xi1> to vector<8x128xi1>
    %533 = arith.select %532, %520, %490 : vector<8x128xi1>, vector<8x128xf32>
    %c0_236 = arith.constant 0 : index
    %c0_237 = arith.constant 0 : index
    %534 = vector.load %arg12[%c0_236, %c0_237] : memref<8x128xf32, #tpu.memory_space<vmem>>, vector<8x128xf32>
    tpu.vector_store %arg12[%c0_236, %c0_237], %533 {strides = array<i32>} : memref<8x128xf32, #tpu.memory_space<vmem>>, vector<8x128xf32>,
    %cst_238 = arith.constant 0.000000e+00 : f32
    %535 = vector.shape_cast %526 : vector<8x1xi1> to vector<8x1xi1>
    %536 = vector.broadcast %535 : vector<8x1xi1> to vector<8x128xi1>
    %537 = vector.broadcast %cst_238 : f32 to vector<8x128xf32>
    %538 = arith.select %536, %522, %537 : vector<8x128xi1>, vector<8x128xf32>
    %539 = arith.truncf %538 : vector<8x128xf32> to vector<8x128xbf16>
    %c3_239 = arith.constant 3 : index
    %c0_240 = arith.constant 0 : index
    %c0_241 = arith.constant 0 : index
    %540 = vector.load %arg8[%c3_239, %c0_240, %c0_241] : memref<8x8x128xbf16, #tpu.memory_space<vmem>>, vector<1x8x128xbf16>
    %541 = vector.shape_cast %540 : vector<1x8x128xbf16> to vector<8x128xbf16>
    %542 = vector.shape_cast %539 : vector<8x128xbf16> to vector<1x8x128xbf16>
    tpu.vector_store %arg8[%c3_239, %c0_240, %c0_241], %542 {strides = array<i32>} : memref<8x8x128xbf16, #tpu.memory_space<vmem>>, vector<1x8x128xbf16>,
    %c0_242 = arith.constant 0 : index
    %c0_243 = arith.constant 0 : index
    %543 = vector.load %arg9[%c0_242, %c0_243] : memref<8x128xf32, #tpu.memory_space<vmem>>, vector<8x128xf32>
    %c0_244 = arith.constant 0 : index
    %c0_245 = arith.constant 0 : index
    %544 = vector.load %arg10[%c0_244, %c0_245] : memref<8x128xf32, #tpu.memory_space<vmem>>, vector<8x128xf32>
    %c5_246 = arith.constant 5 : index
    %c0_247 = arith.constant 0 : index
    %c0_248 = arith.constant 0 : index
    %545 = vector.load %arg1[%c5_246, %c0_247, %c0_248] : memref<8x8x512xbf16, #tpu.memory_space<vmem>>, vector<1x8x512xbf16>
    %546 = vector.shape_cast %545 : vector<1x8x512xbf16> to vector<8x512xbf16>
    %547 = arith.extf %546 : vector<8x512xbf16> to vector<8x512xf32>
    %548 = arith.truncf %543 : vector<8x128xf32> to vector<8x128xbf16>
    %c0_249 = arith.constant 0 : index
    %c0_250 = arith.constant 0 : index
    %549 = vector.load %arg3[%c0_249, %c0_250] : memref<128x512xbf16, #tpu.memory_space<vmem>>, vector<128x512xbf16>
    %cst_251 = arith.constant dense<0.000000e+00> : vector<8x512xf32>
    %550 = tpu.matmul %548, %549, %cst_251 {dimension_numbers = #tpu.dot_dimension_numbers<[1], [0], [0], [1], [0, 0, 1, 1], [], []>} : vector<8x128xbf16>, vector<128x512xbf16>, vector<8x512xf32> -> vector<8x512xf32>
    %551 = arith.addf %547, %550 : vector<8x512xf32>
    %552 = vector.extract_strided_slice %551 {offsets = [0, 0], sizes = [8, 128], strides = [1, 1]} : vector<8x512xf32> to vector<8x128xf32>
    %553 = arith.negf %552 : vector<8x128xf32>
    %554 = math.exp %553 : vector<8x128xf32>
    %cst_252 = arith.constant 1.000000e+00 : f32
    %555 = vector.broadcast %cst_252 : f32 to vector<8x128xf32>
    %556 = arith.addf %555, %554 : vector<8x128xf32>
    %557 = arith.divf %555, %556 : vector<8x128xf32>
    %558 = vector.extract_strided_slice %551 {offsets = [0, 128], sizes = [8, 128], strides = [1, 1]} : vector<8x512xf32> to vector<8x128xf32>
    %559 = arith.negf %558 : vector<8x128xf32>
    %560 = math.exp %559 : vector<8x128xf32>
    %cst_253 = arith.constant 1.000000e+00 : f32
    %561 = vector.broadcast %cst_253 : f32 to vector<8x128xf32>
    %562 = arith.addf %561, %560 : vector<8x128xf32>
    %563 = arith.divf %561, %562 : vector<8x128xf32>
    %564 = vector.extract_strided_slice %551 {offsets = [0, 256], sizes = [8, 128], strides = [1, 1]} : vector<8x512xf32> to vector<8x128xf32>
    %565 = math.tanh %564 : vector<8x128xf32>
    %566 = vector.extract_strided_slice %551 {offsets = [0, 384], sizes = [8, 128], strides = [1, 1]} : vector<8x512xf32> to vector<8x128xf32>
    %567 = arith.negf %566 : vector<8x128xf32>
    %568 = math.exp %567 : vector<8x128xf32>
    %cst_254 = arith.constant 1.000000e+00 : f32
    %569 = vector.broadcast %cst_254 : f32 to vector<8x128xf32>
    %570 = arith.addf %569, %568 : vector<8x128xf32>
    %571 = arith.divf %569, %570 : vector<8x128xf32>
    %572 = arith.mulf %563, %544 : vector<8x128xf32>
    %573 = arith.mulf %557, %565 : vector<8x128xf32>
    %574 = arith.addf %572, %573 : vector<8x128xf32>
    %575 = math.tanh %574 : vector<8x128xf32>
    %576 = arith.mulf %571, %575 : vector<8x128xf32>
    %c5_255 = arith.constant 5 : index
    %c0_256 = arith.constant 0 : index
    %c0_257 = arith.constant 0 : index
    %577 = vector.load %arg5[%c5_255, %c0_256, %c0_257] : memref<8x8x1xbf16, #tpu.memory_space<vmem>>, vector<1x8x1xbf16>
    %578 = vector.shape_cast %577 : vector<1x8x1xbf16> to vector<8x1xbf16>
    %cst_258 = arith.constant 0.000000e+00 : bf16
    %579 = vector.broadcast %cst_258 : bf16 to vector<8x1xbf16>
    %580 = arith.cmpf ogt, %578, %579 : vector<8x1xbf16>
    %581 = vector.shape_cast %580 : vector<8x1xi1> to vector<8x1xi1>
    %582 = vector.broadcast %581 : vector<8x1xi1> to vector<8x128xi1>
    %583 = arith.select %582, %576, %543 : vector<8x128xi1>, vector<8x128xf32>
    %c0_259 = arith.constant 0 : index
    %c0_260 = arith.constant 0 : index
    %584 = vector.load %arg9[%c0_259, %c0_260] : memref<8x128xf32, #tpu.memory_space<vmem>>, vector<8x128xf32>
    tpu.vector_store %arg9[%c0_259, %c0_260], %583 {strides = array<i32>} : memref<8x128xf32, #tpu.memory_space<vmem>>, vector<8x128xf32>,
    %585 = vector.shape_cast %580 : vector<8x1xi1> to vector<8x1xi1>
    %586 = vector.broadcast %585 : vector<8x1xi1> to vector<8x128xi1>
    %587 = arith.select %586, %574, %544 : vector<8x128xi1>, vector<8x128xf32>
    %c0_261 = arith.constant 0 : index
    %c0_262 = arith.constant 0 : index
    %588 = vector.load %arg10[%c0_261, %c0_262] : memref<8x128xf32, #tpu.memory_space<vmem>>, vector<8x128xf32>
    tpu.vector_store %arg10[%c0_261, %c0_262], %587 {strides = array<i32>} : memref<8x128xf32, #tpu.memory_space<vmem>>, vector<8x128xf32>,
    %cst_263 = arith.constant 0.000000e+00 : f32
    %589 = vector.shape_cast %580 : vector<8x1xi1> to vector<8x1xi1>
    %590 = vector.broadcast %589 : vector<8x1xi1> to vector<8x128xi1>
    %591 = vector.broadcast %cst_263 : f32 to vector<8x128xf32>
    %592 = arith.select %590, %576, %591 : vector<8x128xi1>, vector<8x128xf32>
    %593 = arith.truncf %592 : vector<8x128xf32> to vector<8x128xbf16>
    %c5_264 = arith.constant 5 : index
    %c0_265 = arith.constant 0 : index
    %c0_266 = arith.constant 0 : index
    %594 = vector.load %arg7[%c5_264, %c0_265, %c0_266] : memref<8x8x128xbf16, #tpu.memory_space<vmem>>, vector<1x8x128xbf16>
    %595 = vector.shape_cast %594 : vector<1x8x128xbf16> to vector<8x128xbf16>
    %596 = vector.shape_cast %593 : vector<8x128xbf16> to vector<1x8x128xbf16>
    tpu.vector_store %arg7[%c5_264, %c0_265, %c0_266], %596 {strides = array<i32>} : memref<8x8x128xbf16, #tpu.memory_space<vmem>>, vector<1x8x128xbf16>,
    %c0_267 = arith.constant 0 : index
    %c0_268 = arith.constant 0 : index
    %597 = vector.load %arg11[%c0_267, %c0_268] : memref<8x128xf32, #tpu.memory_space<vmem>>, vector<8x128xf32>
    %c0_269 = arith.constant 0 : index
    %c0_270 = arith.constant 0 : index
    %598 = vector.load %arg12[%c0_269, %c0_270] : memref<8x128xf32, #tpu.memory_space<vmem>>, vector<8x128xf32>
    %c2_271 = arith.constant 2 : index
    %c0_272 = arith.constant 0 : index
    %c0_273 = arith.constant 0 : index
    %599 = vector.load %arg2[%c2_271, %c0_272, %c0_273] : memref<8x8x512xbf16, #tpu.memory_space<vmem>>, vector<1x8x512xbf16>
    %600 = vector.shape_cast %599 : vector<1x8x512xbf16> to vector<8x512xbf16>
    %601 = arith.extf %600 : vector<8x512xbf16> to vector<8x512xf32>
    %602 = arith.truncf %597 : vector<8x128xf32> to vector<8x128xbf16>
    %c0_274 = arith.constant 0 : index
    %c0_275 = arith.constant 0 : index
    %603 = vector.load %arg4[%c0_274, %c0_275] : memref<128x512xbf16, #tpu.memory_space<vmem>>, vector<128x512xbf16>
    %cst_276 = arith.constant dense<0.000000e+00> : vector<8x512xf32>
    %604 = tpu.matmul %602, %603, %cst_276 {dimension_numbers = #tpu.dot_dimension_numbers<[1], [0], [0], [1], [0, 0, 1, 1], [], []>} : vector<8x128xbf16>, vector<128x512xbf16>, vector<8x512xf32> -> vector<8x512xf32>
    %605 = arith.addf %601, %604 : vector<8x512xf32>
    %606 = vector.extract_strided_slice %605 {offsets = [0, 0], sizes = [8, 128], strides = [1, 1]} : vector<8x512xf32> to vector<8x128xf32>
    %607 = arith.negf %606 : vector<8x128xf32>
    %608 = math.exp %607 : vector<8x128xf32>
    %cst_277 = arith.constant 1.000000e+00 : f32
    %609 = vector.broadcast %cst_277 : f32 to vector<8x128xf32>
    %610 = arith.addf %609, %608 : vector<8x128xf32>
    %611 = arith.divf %609, %610 : vector<8x128xf32>
    %612 = vector.extract_strided_slice %605 {offsets = [0, 128], sizes = [8, 128], strides = [1, 1]} : vector<8x512xf32> to vector<8x128xf32>
    %613 = arith.negf %612 : vector<8x128xf32>
    %614 = math.exp %613 : vector<8x128xf32>
    %cst_278 = arith.constant 1.000000e+00 : f32
    %615 = vector.broadcast %cst_278 : f32 to vector<8x128xf32>
    %616 = arith.addf %615, %614 : vector<8x128xf32>
    %617 = arith.divf %615, %616 : vector<8x128xf32>
    %618 = vector.extract_strided_slice %605 {offsets = [0, 256], sizes = [8, 128], strides = [1, 1]} : vector<8x512xf32> to vector<8x128xf32>
    %619 = math.tanh %618 : vector<8x128xf32>
    %620 = vector.extract_strided_slice %605 {offsets = [0, 384], sizes = [8, 128], strides = [1, 1]} : vector<8x512xf32> to vector<8x128xf32>
    %621 = arith.negf %620 : vector<8x128xf32>
    %622 = math.exp %621 : vector<8x128xf32>
    %cst_279 = arith.constant 1.000000e+00 : f32
    %623 = vector.broadcast %cst_279 : f32 to vector<8x128xf32>
    %624 = arith.addf %623, %622 : vector<8x128xf32>
    %625 = arith.divf %623, %624 : vector<8x128xf32>
    %626 = arith.mulf %617, %598 : vector<8x128xf32>
    %627 = arith.mulf %611, %619 : vector<8x128xf32>
    %628 = arith.addf %626, %627 : vector<8x128xf32>
    %629 = math.tanh %628 : vector<8x128xf32>
    %630 = arith.mulf %625, %629 : vector<8x128xf32>
    %c2_280 = arith.constant 2 : index
    %c0_281 = arith.constant 0 : index
    %c0_282 = arith.constant 0 : index
    %631 = vector.load %arg6[%c2_280, %c0_281, %c0_282] : memref<8x8x1xbf16, #tpu.memory_space<vmem>>, vector<1x8x1xbf16>
    %632 = vector.shape_cast %631 : vector<1x8x1xbf16> to vector<8x1xbf16>
    %cst_283 = arith.constant 0.000000e+00 : bf16
    %633 = vector.broadcast %cst_283 : bf16 to vector<8x1xbf16>
    %634 = arith.cmpf ogt, %632, %633 : vector<8x1xbf16>
    %635 = vector.shape_cast %634 : vector<8x1xi1> to vector<8x1xi1>
    %636 = vector.broadcast %635 : vector<8x1xi1> to vector<8x128xi1>
    %637 = arith.select %636, %630, %597 : vector<8x128xi1>, vector<8x128xf32>
    %c0_284 = arith.constant 0 : index
    %c0_285 = arith.constant 0 : index
    %638 = vector.load %arg11[%c0_284, %c0_285] : memref<8x128xf32, #tpu.memory_space<vmem>>, vector<8x128xf32>
    tpu.vector_store %arg11[%c0_284, %c0_285], %637 {strides = array<i32>} : memref<8x128xf32, #tpu.memory_space<vmem>>, vector<8x128xf32>,
    %639 = vector.shape_cast %634 : vector<8x1xi1> to vector<8x1xi1>
    %640 = vector.broadcast %639 : vector<8x1xi1> to vector<8x128xi1>
    %641 = arith.select %640, %628, %598 : vector<8x128xi1>, vector<8x128xf32>
    %c0_286 = arith.constant 0 : index
    %c0_287 = arith.constant 0 : index
    %642 = vector.load %arg12[%c0_286, %c0_287] : memref<8x128xf32, #tpu.memory_space<vmem>>, vector<8x128xf32>
    tpu.vector_store %arg12[%c0_286, %c0_287], %641 {strides = array<i32>} : memref<8x128xf32, #tpu.memory_space<vmem>>, vector<8x128xf32>,
    %cst_288 = arith.constant 0.000000e+00 : f32
    %643 = vector.shape_cast %634 : vector<8x1xi1> to vector<8x1xi1>
    %644 = vector.broadcast %643 : vector<8x1xi1> to vector<8x128xi1>
    %645 = vector.broadcast %cst_288 : f32 to vector<8x128xf32>
    %646 = arith.select %644, %630, %645 : vector<8x128xi1>, vector<8x128xf32>
    %647 = arith.truncf %646 : vector<8x128xf32> to vector<8x128xbf16>
    %c2_289 = arith.constant 2 : index
    %c0_290 = arith.constant 0 : index
    %c0_291 = arith.constant 0 : index
    %648 = vector.load %arg8[%c2_289, %c0_290, %c0_291] : memref<8x8x128xbf16, #tpu.memory_space<vmem>>, vector<1x8x128xbf16>
    %649 = vector.shape_cast %648 : vector<1x8x128xbf16> to vector<8x128xbf16>
    %650 = vector.shape_cast %647 : vector<8x128xbf16> to vector<1x8x128xbf16>
    tpu.vector_store %arg8[%c2_289, %c0_290, %c0_291], %650 {strides = array<i32>} : memref<8x8x128xbf16, #tpu.memory_space<vmem>>, vector<1x8x128xbf16>,
    %c0_292 = arith.constant 0 : index
    %c0_293 = arith.constant 0 : index
    %651 = vector.load %arg9[%c0_292, %c0_293] : memref<8x128xf32, #tpu.memory_space<vmem>>, vector<8x128xf32>
    %c0_294 = arith.constant 0 : index
    %c0_295 = arith.constant 0 : index
    %652 = vector.load %arg10[%c0_294, %c0_295] : memref<8x128xf32, #tpu.memory_space<vmem>>, vector<8x128xf32>
    %c6_296 = arith.constant 6 : index
    %c0_297 = arith.constant 0 : index
    %c0_298 = arith.constant 0 : index
    %653 = vector.load %arg1[%c6_296, %c0_297, %c0_298] : memref<8x8x512xbf16, #tpu.memory_space<vmem>>, vector<1x8x512xbf16>
    %654 = vector.shape_cast %653 : vector<1x8x512xbf16> to vector<8x512xbf16>
    %655 = arith.extf %654 : vector<8x512xbf16> to vector<8x512xf32>
    %656 = arith.truncf %651 : vector<8x128xf32> to vector<8x128xbf16>
    %c0_299 = arith.constant 0 : index
    %c0_300 = arith.constant 0 : index
    %657 = vector.load %arg3[%c0_299, %c0_300] : memref<128x512xbf16, #tpu.memory_space<vmem>>, vector<128x512xbf16>
    %cst_301 = arith.constant dense<0.000000e+00> : vector<8x512xf32>
    %658 = tpu.matmul %656, %657, %cst_301 {dimension_numbers = #tpu.dot_dimension_numbers<[1], [0], [0], [1], [0, 0, 1, 1], [], []>} : vector<8x128xbf16>, vector<128x512xbf16>, vector<8x512xf32> -> vector<8x512xf32>
    %659 = arith.addf %655, %658 : vector<8x512xf32>
    %660 = vector.extract_strided_slice %659 {offsets = [0, 0], sizes = [8, 128], strides = [1, 1]} : vector<8x512xf32> to vector<8x128xf32>
    %661 = arith.negf %660 : vector<8x128xf32>
    %662 = math.exp %661 : vector<8x128xf32>
    %cst_302 = arith.constant 1.000000e+00 : f32
    %663 = vector.broadcast %cst_302 : f32 to vector<8x128xf32>
    %664 = arith.addf %663, %662 : vector<8x128xf32>
    %665 = arith.divf %663, %664 : vector<8x128xf32>
    %666 = vector.extract_strided_slice %659 {offsets = [0, 128], sizes = [8, 128], strides = [1, 1]} : vector<8x512xf32> to vector<8x128xf32>
    %667 = arith.negf %666 : vector<8x128xf32>
    %668 = math.exp %667 : vector<8x128xf32>
    %cst_303 = arith.constant 1.000000e+00 : f32
    %669 = vector.broadcast %cst_303 : f32 to vector<8x128xf32>
    %670 = arith.addf %669, %668 : vector<8x128xf32>
    %671 = arith.divf %669, %670 : vector<8x128xf32>
    %672 = vector.extract_strided_slice %659 {offsets = [0, 256], sizes = [8, 128], strides = [1, 1]} : vector<8x512xf32> to vector<8x128xf32>
    %673 = math.tanh %672 : vector<8x128xf32>
    %674 = vector.extract_strided_slice %659 {offsets = [0, 384], sizes = [8, 128], strides = [1, 1]} : vector<8x512xf32> to vector<8x128xf32>
    %675 = arith.negf %674 : vector<8x128xf32>
    %676 = math.exp %675 : vector<8x128xf32>
    %cst_304 = arith.constant 1.000000e+00 : f32
    %677 = vector.broadcast %cst_304 : f32 to vector<8x128xf32>
    %678 = arith.addf %677, %676 : vector<8x128xf32>
    %679 = arith.divf %677, %678 : vector<8x128xf32>
    %680 = arith.mulf %671, %652 : vector<8x128xf32>
    %681 = arith.mulf %665, %673 : vector<8x128xf32>
    %682 = arith.addf %680, %681 : vector<8x128xf32>
    %683 = math.tanh %682 : vector<8x128xf32>
    %684 = arith.mulf %679, %683 : vector<8x128xf32>
    %c6_305 = arith.constant 6 : index
    %c0_306 = arith.constant 0 : index
    %c0_307 = arith.constant 0 : index
    %685 = vector.load %arg5[%c6_305, %c0_306, %c0_307] : memref<8x8x1xbf16, #tpu.memory_space<vmem>>, vector<1x8x1xbf16>
    %686 = vector.shape_cast %685 : vector<1x8x1xbf16> to vector<8x1xbf16>
    %cst_308 = arith.constant 0.000000e+00 : bf16
    %687 = vector.broadcast %cst_308 : bf16 to vector<8x1xbf16>
    %688 = arith.cmpf ogt, %686, %687 : vector<8x1xbf16>
    %689 = vector.shape_cast %688 : vector<8x1xi1> to vector<8x1xi1>
    %690 = vector.broadcast %689 : vector<8x1xi1> to vector<8x128xi1>
    %691 = arith.select %690, %684, %651 : vector<8x128xi1>, vector<8x128xf32>
    %c0_309 = arith.constant 0 : index
    %c0_310 = arith.constant 0 : index
    %692 = vector.load %arg9[%c0_309, %c0_310] : memref<8x128xf32, #tpu.memory_space<vmem>>, vector<8x128xf32>
    tpu.vector_store %arg9[%c0_309, %c0_310], %691 {strides = array<i32>} : memref<8x128xf32, #tpu.memory_space<vmem>>, vector<8x128xf32>,
    %693 = vector.shape_cast %688 : vector<8x1xi1> to vector<8x1xi1>
    %694 = vector.broadcast %693 : vector<8x1xi1> to vector<8x128xi1>
    %695 = arith.select %694, %682, %652 : vector<8x128xi1>, vector<8x128xf32>
    %c0_311 = arith.constant 0 : index
    %c0_312 = arith.constant 0 : index
    %696 = vector.load %arg10[%c0_311, %c0_312] : memref<8x128xf32, #tpu.memory_space<vmem>>, vector<8x128xf32>
    tpu.vector_store %arg10[%c0_311, %c0_312], %695 {strides = array<i32>} : memref<8x128xf32, #tpu.memory_space<vmem>>, vector<8x128xf32>,
    %cst_313 = arith.constant 0.000000e+00 : f32
    %697 = vector.shape_cast %688 : vector<8x1xi1> to vector<8x1xi1>
    %698 = vector.broadcast %697 : vector<8x1xi1> to vector<8x128xi1>
    %699 = vector.broadcast %cst_313 : f32 to vector<8x128xf32>
    %700 = arith.select %698, %684, %699 : vector<8x128xi1>, vector<8x128xf32>
    %701 = arith.truncf %700 : vector<8x128xf32> to vector<8x128xbf16>
    %c6_314 = arith.constant 6 : index
    %c0_315 = arith.constant 0 : index
    %c0_316 = arith.constant 0 : index
    %702 = vector.load %arg7[%c6_314, %c0_315, %c0_316] : memref<8x8x128xbf16, #tpu.memory_space<vmem>>, vector<1x8x128xbf16>
    %703 = vector.shape_cast %702 : vector<1x8x128xbf16> to vector<8x128xbf16>
    %704 = vector.shape_cast %701 : vector<8x128xbf16> to vector<1x8x128xbf16>
    tpu.vector_store %arg7[%c6_314, %c0_315, %c0_316], %704 {strides = array<i32>} : memref<8x8x128xbf16, #tpu.memory_space<vmem>>, vector<1x8x128xbf16>,
    %c0_317 = arith.constant 0 : index
    %c0_318 = arith.constant 0 : index
    %705 = vector.load %arg11[%c0_317, %c0_318] : memref<8x128xf32, #tpu.memory_space<vmem>>, vector<8x128xf32>
    %c0_319 = arith.constant 0 : index
    %c0_320 = arith.constant 0 : index
    %706 = vector.load %arg12[%c0_319, %c0_320] : memref<8x128xf32, #tpu.memory_space<vmem>>, vector<8x128xf32>
    %c1_321 = arith.constant 1 : index
    %c0_322 = arith.constant 0 : index
    %c0_323 = arith.constant 0 : index
    %707 = vector.load %arg2[%c1_321, %c0_322, %c0_323] : memref<8x8x512xbf16, #tpu.memory_space<vmem>>, vector<1x8x512xbf16>
    %708 = vector.shape_cast %707 : vector<1x8x512xbf16> to vector<8x512xbf16>
    %709 = arith.extf %708 : vector<8x512xbf16> to vector<8x512xf32>
    %710 = arith.truncf %705 : vector<8x128xf32> to vector<8x128xbf16>
    %c0_324 = arith.constant 0 : index
    %c0_325 = arith.constant 0 : index
    %711 = vector.load %arg4[%c0_324, %c0_325] : memref<128x512xbf16, #tpu.memory_space<vmem>>, vector<128x512xbf16>
    %cst_326 = arith.constant dense<0.000000e+00> : vector<8x512xf32>
    %712 = tpu.matmul %710, %711, %cst_326 {dimension_numbers = #tpu.dot_dimension_numbers<[1], [0], [0], [1], [0, 0, 1, 1], [], []>} : vector<8x128xbf16>, vector<128x512xbf16>, vector<8x512xf32> -> vector<8x512xf32>
    %713 = arith.addf %709, %712 : vector<8x512xf32>
    %714 = vector.extract_strided_slice %713 {offsets = [0, 0], sizes = [8, 128], strides = [1, 1]} : vector<8x512xf32> to vector<8x128xf32>
    %715 = arith.negf %714 : vector<8x128xf32>
    %716 = math.exp %715 : vector<8x128xf32>
    %cst_327 = arith.constant 1.000000e+00 : f32
    %717 = vector.broadcast %cst_327 : f32 to vector<8x128xf32>
    %718 = arith.addf %717, %716 : vector<8x128xf32>
    %719 = arith.divf %717, %718 : vector<8x128xf32>
    %720 = vector.extract_strided_slice %713 {offsets = [0, 128], sizes = [8, 128], strides = [1, 1]} : vector<8x512xf32> to vector<8x128xf32>
    %721 = arith.negf %720 : vector<8x128xf32>
    %722 = math.exp %721 : vector<8x128xf32>
    %cst_328 = arith.constant 1.000000e+00 : f32
    %723 = vector.broadcast %cst_328 : f32 to vector<8x128xf32>
    %724 = arith.addf %723, %722 : vector<8x128xf32>
    %725 = arith.divf %723, %724 : vector<8x128xf32>
    %726 = vector.extract_strided_slice %713 {offsets = [0, 256], sizes = [8, 128], strides = [1, 1]} : vector<8x512xf32> to vector<8x128xf32>
    %727 = math.tanh %726 : vector<8x128xf32>
    %728 = vector.extract_strided_slice %713 {offsets = [0, 384], sizes = [8, 128], strides = [1, 1]} : vector<8x512xf32> to vector<8x128xf32>
    %729 = arith.negf %728 : vector<8x128xf32>
    %730 = math.exp %729 : vector<8x128xf32>
    %cst_329 = arith.constant 1.000000e+00 : f32
    %731 = vector.broadcast %cst_329 : f32 to vector<8x128xf32>
    %732 = arith.addf %731, %730 : vector<8x128xf32>
    %733 = arith.divf %731, %732 : vector<8x128xf32>
    %734 = arith.mulf %725, %706 : vector<8x128xf32>
    %735 = arith.mulf %719, %727 : vector<8x128xf32>
    %736 = arith.addf %734, %735 : vector<8x128xf32>
    %737 = math.tanh %736 : vector<8x128xf32>
    %738 = arith.mulf %733, %737 : vector<8x128xf32>
    %c1_330 = arith.constant 1 : index
    %c0_331 = arith.constant 0 : index
    %c0_332 = arith.constant 0 : index
    %739 = vector.load %arg6[%c1_330, %c0_331, %c0_332] : memref<8x8x1xbf16, #tpu.memory_space<vmem>>, vector<1x8x1xbf16>
    %740 = vector.shape_cast %739 : vector<1x8x1xbf16> to vector<8x1xbf16>
    %cst_333 = arith.constant 0.000000e+00 : bf16
    %741 = vector.broadcast %cst_333 : bf16 to vector<8x1xbf16>
    %742 = arith.cmpf ogt, %740, %741 : vector<8x1xbf16>
    %743 = vector.shape_cast %742 : vector<8x1xi1> to vector<8x1xi1>
    %744 = vector.broadcast %743 : vector<8x1xi1> to vector<8x128xi1>
    %745 = arith.select %744, %738, %705 : vector<8x128xi1>, vector<8x128xf32>
    %c0_334 = arith.constant 0 : index
    %c0_335 = arith.constant 0 : index
    %746 = vector.load %arg11[%c0_334, %c0_335] : memref<8x128xf32, #tpu.memory_space<vmem>>, vector<8x128xf32>
    tpu.vector_store %arg11[%c0_334, %c0_335], %745 {strides = array<i32>} : memref<8x128xf32, #tpu.memory_space<vmem>>, vector<8x128xf32>,
    %747 = vector.shape_cast %742 : vector<8x1xi1> to vector<8x1xi1>
    %748 = vector.broadcast %747 : vector<8x1xi1> to vector<8x128xi1>
    %749 = arith.select %748, %736, %706 : vector<8x128xi1>, vector<8x128xf32>
    %c0_336 = arith.constant 0 : index
    %c0_337 = arith.constant 0 : index
    %750 = vector.load %arg12[%c0_336, %c0_337] : memref<8x128xf32, #tpu.memory_space<vmem>>, vector<8x128xf32>
    tpu.vector_store %arg12[%c0_336, %c0_337], %749 {strides = array<i32>} : memref<8x128xf32, #tpu.memory_space<vmem>>, vector<8x128xf32>,
    %cst_338 = arith.constant 0.000000e+00 : f32
    %751 = vector.shape_cast %742 : vector<8x1xi1> to vector<8x1xi1>
    %752 = vector.broadcast %751 : vector<8x1xi1> to vector<8x128xi1>
    %753 = vector.broadcast %cst_338 : f32 to vector<8x128xf32>
    %754 = arith.select %752, %738, %753 : vector<8x128xi1>, vector<8x128xf32>
    %755 = arith.truncf %754 : vector<8x128xf32> to vector<8x128xbf16>
    %c1_339 = arith.constant 1 : index
    %c0_340 = arith.constant 0 : index
    %c0_341 = arith.constant 0 : index
    %756 = vector.load %arg8[%c1_339, %c0_340, %c0_341] : memref<8x8x128xbf16, #tpu.memory_space<vmem>>, vector<1x8x128xbf16>
    %757 = vector.shape_cast %756 : vector<1x8x128xbf16> to vector<8x128xbf16>
    %758 = vector.shape_cast %755 : vector<8x128xbf16> to vector<1x8x128xbf16>
    tpu.vector_store %arg8[%c1_339, %c0_340, %c0_341], %758 {strides = array<i32>} : memref<8x8x128xbf16, #tpu.memory_space<vmem>>, vector<1x8x128xbf16>,
    %c0_342 = arith.constant 0 : index
    %c0_343 = arith.constant 0 : index
    %759 = vector.load %arg9[%c0_342, %c0_343] : memref<8x128xf32, #tpu.memory_space<vmem>>, vector<8x128xf32>
    %c0_344 = arith.constant 0 : index
    %c0_345 = arith.constant 0 : index
    %760 = vector.load %arg10[%c0_344, %c0_345] : memref<8x128xf32, #tpu.memory_space<vmem>>, vector<8x128xf32>
    %c7_346 = arith.constant 7 : index
    %c0_347 = arith.constant 0 : index
    %c0_348 = arith.constant 0 : index
    %761 = vector.load %arg1[%c7_346, %c0_347, %c0_348] : memref<8x8x512xbf16, #tpu.memory_space<vmem>>, vector<1x8x512xbf16>
    %762 = vector.shape_cast %761 : vector<1x8x512xbf16> to vector<8x512xbf16>
    %763 = arith.extf %762 : vector<8x512xbf16> to vector<8x512xf32>
    %764 = arith.truncf %759 : vector<8x128xf32> to vector<8x128xbf16>
    %c0_349 = arith.constant 0 : index
    %c0_350 = arith.constant 0 : index
    %765 = vector.load %arg3[%c0_349, %c0_350] : memref<128x512xbf16, #tpu.memory_space<vmem>>, vector<128x512xbf16>
    %cst_351 = arith.constant dense<0.000000e+00> : vector<8x512xf32>
    %766 = tpu.matmul %764, %765, %cst_351 {dimension_numbers = #tpu.dot_dimension_numbers<[1], [0], [0], [1], [0, 0, 1, 1], [], []>} : vector<8x128xbf16>, vector<128x512xbf16>, vector<8x512xf32> -> vector<8x512xf32>
    %767 = arith.addf %763, %766 : vector<8x512xf32>
    %768 = vector.extract_strided_slice %767 {offsets = [0, 0], sizes = [8, 128], strides = [1, 1]} : vector<8x512xf32> to vector<8x128xf32>
    %769 = arith.negf %768 : vector<8x128xf32>
    %770 = math.exp %769 : vector<8x128xf32>
    %cst_352 = arith.constant 1.000000e+00 : f32
    %771 = vector.broadcast %cst_352 : f32 to vector<8x128xf32>
    %772 = arith.addf %771, %770 : vector<8x128xf32>
    %773 = arith.divf %771, %772 : vector<8x128xf32>
    %774 = vector.extract_strided_slice %767 {offsets = [0, 128], sizes = [8, 128], strides = [1, 1]} : vector<8x512xf32> to vector<8x128xf32>
    %775 = arith.negf %774 : vector<8x128xf32>
    %776 = math.exp %775 : vector<8x128xf32>
    %cst_353 = arith.constant 1.000000e+00 : f32
    %777 = vector.broadcast %cst_353 : f32 to vector<8x128xf32>
    %778 = arith.addf %777, %776 : vector<8x128xf32>
    %779 = arith.divf %777, %778 : vector<8x128xf32>
    %780 = vector.extract_strided_slice %767 {offsets = [0, 256], sizes = [8, 128], strides = [1, 1]} : vector<8x512xf32> to vector<8x128xf32>
    %781 = math.tanh %780 : vector<8x128xf32>
    %782 = vector.extract_strided_slice %767 {offsets = [0, 384], sizes = [8, 128], strides = [1, 1]} : vector<8x512xf32> to vector<8x128xf32>
    %783 = arith.negf %782 : vector<8x128xf32>
    %784 = math.exp %783 : vector<8x128xf32>
    %cst_354 = arith.constant 1.000000e+00 : f32
    %785 = vector.broadcast %cst_354 : f32 to vector<8x128xf32>
    %786 = arith.addf %785, %784 : vector<8x128xf32>
    %787 = arith.divf %785, %786 : vector<8x128xf32>
    %788 = arith.mulf %779, %760 : vector<8x128xf32>
    %789 = arith.mulf %773, %781 : vector<8x128xf32>
    %790 = arith.addf %788, %789 : vector<8x128xf32>
    %791 = math.tanh %790 : vector<8x128xf32>
    %792 = arith.mulf %787, %791 : vector<8x128xf32>
    %c7_355 = arith.constant 7 : index
    %c0_356 = arith.constant 0 : index
    %c0_357 = arith.constant 0 : index
    %793 = vector.load %arg5[%c7_355, %c0_356, %c0_357] : memref<8x8x1xbf16, #tpu.memory_space<vmem>>, vector<1x8x1xbf16>
    %794 = vector.shape_cast %793 : vector<1x8x1xbf16> to vector<8x1xbf16>
    %cst_358 = arith.constant 0.000000e+00 : bf16
    %795 = vector.broadcast %cst_358 : bf16 to vector<8x1xbf16>
    %796 = arith.cmpf ogt, %794, %795 : vector<8x1xbf16>
    %797 = vector.shape_cast %796 : vector<8x1xi1> to vector<8x1xi1>
    %798 = vector.broadcast %797 : vector<8x1xi1> to vector<8x128xi1>
    %799 = arith.select %798, %792, %759 : vector<8x128xi1>, vector<8x128xf32>
    %c0_359 = arith.constant 0 : index
    %c0_360 = arith.constant 0 : index
    %800 = vector.load %arg9[%c0_359, %c0_360] : memref<8x128xf32, #tpu.memory_space<vmem>>, vector<8x128xf32>
    tpu.vector_store %arg9[%c0_359, %c0_360], %799 {strides = array<i32>} : memref<8x128xf32, #tpu.memory_space<vmem>>, vector<8x128xf32>,
    %801 = vector.shape_cast %796 : vector<8x1xi1> to vector<8x1xi1>
    %802 = vector.broadcast %801 : vector<8x1xi1> to vector<8x128xi1>
    %803 = arith.select %802, %790, %760 : vector<8x128xi1>, vector<8x128xf32>
    %c0_361 = arith.constant 0 : index
    %c0_362 = arith.constant 0 : index
    %804 = vector.load %arg10[%c0_361, %c0_362] : memref<8x128xf32, #tpu.memory_space<vmem>>, vector<8x128xf32>
    tpu.vector_store %arg10[%c0_361, %c0_362], %803 {strides = array<i32>} : memref<8x128xf32, #tpu.memory_space<vmem>>, vector<8x128xf32>,
    %cst_363 = arith.constant 0.000000e+00 : f32
    %805 = vector.shape_cast %796 : vector<8x1xi1> to vector<8x1xi1>
    %806 = vector.broadcast %805 : vector<8x1xi1> to vector<8x128xi1>
    %807 = vector.broadcast %cst_363 : f32 to vector<8x128xf32>
    %808 = arith.select %806, %792, %807 : vector<8x128xi1>, vector<8x128xf32>
    %809 = arith.truncf %808 : vector<8x128xf32> to vector<8x128xbf16>
    %c7_364 = arith.constant 7 : index
    %c0_365 = arith.constant 0 : index
    %c0_366 = arith.constant 0 : index
    %810 = vector.load %arg7[%c7_364, %c0_365, %c0_366] : memref<8x8x128xbf16, #tpu.memory_space<vmem>>, vector<1x8x128xbf16>
    %811 = vector.shape_cast %810 : vector<1x8x128xbf16> to vector<8x128xbf16>
    %812 = vector.shape_cast %809 : vector<8x128xbf16> to vector<1x8x128xbf16>
    tpu.vector_store %arg7[%c7_364, %c0_365, %c0_366], %812 {strides = array<i32>} : memref<8x8x128xbf16, #tpu.memory_space<vmem>>, vector<1x8x128xbf16>,
    %c0_367 = arith.constant 0 : index
    %c0_368 = arith.constant 0 : index
    %813 = vector.load %arg11[%c0_367, %c0_368] : memref<8x128xf32, #tpu.memory_space<vmem>>, vector<8x128xf32>
    %c0_369 = arith.constant 0 : index
    %c0_370 = arith.constant 0 : index
    %814 = vector.load %arg12[%c0_369, %c0_370] : memref<8x128xf32, #tpu.memory_space<vmem>>, vector<8x128xf32>
    %c0_371 = arith.constant 0 : index
    %c0_372 = arith.constant 0 : index
    %c0_373 = arith.constant 0 : index
    %815 = vector.load %arg2[%c0_371, %c0_372, %c0_373] : memref<8x8x512xbf16, #tpu.memory_space<vmem>>, vector<1x8x512xbf16>
    %816 = vector.shape_cast %815 : vector<1x8x512xbf16> to vector<8x512xbf16>
    %817 = arith.extf %816 : vector<8x512xbf16> to vector<8x512xf32>
    %818 = arith.truncf %813 : vector<8x128xf32> to vector<8x128xbf16>
    %c0_374 = arith.constant 0 : index
    %c0_375 = arith.constant 0 : index
    %819 = vector.load %arg4[%c0_374, %c0_375] : memref<128x512xbf16, #tpu.memory_space<vmem>>, vector<128x512xbf16>
    %cst_376 = arith.constant dense<0.000000e+00> : vector<8x512xf32>
    %820 = tpu.matmul %818, %819, %cst_376 {dimension_numbers = #tpu.dot_dimension_numbers<[1], [0], [0], [1], [0, 0, 1, 1], [], []>} : vector<8x128xbf16>, vector<128x512xbf16>, vector<8x512xf32> -> vector<8x512xf32>
    %821 = arith.addf %817, %820 : vector<8x512xf32>
    %822 = vector.extract_strided_slice %821 {offsets = [0, 0], sizes = [8, 128], strides = [1, 1]} : vector<8x512xf32> to vector<8x128xf32>
    %823 = arith.negf %822 : vector<8x128xf32>
    %824 = math.exp %823 : vector<8x128xf32>
    %cst_377 = arith.constant 1.000000e+00 : f32
    %825 = vector.broadcast %cst_377 : f32 to vector<8x128xf32>
    %826 = arith.addf %825, %824 : vector<8x128xf32>
    %827 = arith.divf %825, %826 : vector<8x128xf32>
    %828 = vector.extract_strided_slice %821 {offsets = [0, 128], sizes = [8, 128], strides = [1, 1]} : vector<8x512xf32> to vector<8x128xf32>
    %829 = arith.negf %828 : vector<8x128xf32>
    %830 = math.exp %829 : vector<8x128xf32>
    %cst_378 = arith.constant 1.000000e+00 : f32
    %831 = vector.broadcast %cst_378 : f32 to vector<8x128xf32>
    %832 = arith.addf %831, %830 : vector<8x128xf32>
    %833 = arith.divf %831, %832 : vector<8x128xf32>
    %834 = vector.extract_strided_slice %821 {offsets = [0, 256], sizes = [8, 128], strides = [1, 1]} : vector<8x512xf32> to vector<8x128xf32>
    %835 = math.tanh %834 : vector<8x128xf32>
    %836 = vector.extract_strided_slice %821 {offsets = [0, 384], sizes = [8, 128], strides = [1, 1]} : vector<8x512xf32> to vector<8x128xf32>
    %837 = arith.negf %836 : vector<8x128xf32>
    %838 = math.exp %837 : vector<8x128xf32>
    %cst_379 = arith.constant 1.000000e+00 : f32
    %839 = vector.broadcast %cst_379 : f32 to vector<8x128xf32>
    %840 = arith.addf %839, %838 : vector<8x128xf32>
    %841 = arith.divf %839, %840 : vector<8x128xf32>
    %842 = arith.mulf %833, %814 : vector<8x128xf32>
    %843 = arith.mulf %827, %835 : vector<8x128xf32>
    %844 = arith.addf %842, %843 : vector<8x128xf32>
    %845 = math.tanh %844 : vector<8x128xf32>
    %846 = arith.mulf %841, %845 : vector<8x128xf32>
    %c0_380 = arith.constant 0 : index
    %c0_381 = arith.constant 0 : index
    %c0_382 = arith.constant 0 : index
    %847 = vector.load %arg6[%c0_380, %c0_381, %c0_382] : memref<8x8x1xbf16, #tpu.memory_space<vmem>>, vector<1x8x1xbf16>
    %848 = vector.shape_cast %847 : vector<1x8x1xbf16> to vector<8x1xbf16>
    %cst_383 = arith.constant 0.000000e+00 : bf16
    %849 = vector.broadcast %cst_383 : bf16 to vector<8x1xbf16>
    %850 = arith.cmpf ogt, %848, %849 : vector<8x1xbf16>
    %851 = vector.shape_cast %850 : vector<8x1xi1> to vector<8x1xi1>
    %852 = vector.broadcast %851 : vector<8x1xi1> to vector<8x128xi1>
    %853 = arith.select %852, %846, %813 : vector<8x128xi1>, vector<8x128xf32>
    %c0_384 = arith.constant 0 : index
    %c0_385 = arith.constant 0 : index
    %854 = vector.load %arg11[%c0_384, %c0_385] : memref<8x128xf32, #tpu.memory_space<vmem>>, vector<8x128xf32>
    tpu.vector_store %arg11[%c0_384, %c0_385], %853 {strides = array<i32>} : memref<8x128xf32, #tpu.memory_space<vmem>>, vector<8x128xf32>,
    %855 = vector.shape_cast %850 : vector<8x1xi1> to vector<8x1xi1>
    %856 = vector.broadcast %855 : vector<8x1xi1> to vector<8x128xi1>
    %857 = arith.select %856, %844, %814 : vector<8x128xi1>, vector<8x128xf32>
    %c0_386 = arith.constant 0 : index
    %c0_387 = arith.constant 0 : index
    %858 = vector.load %arg12[%c0_386, %c0_387] : memref<8x128xf32, #tpu.memory_space<vmem>>, vector<8x128xf32>
    tpu.vector_store %arg12[%c0_386, %c0_387], %857 {strides = array<i32>} : memref<8x128xf32, #tpu.memory_space<vmem>>, vector<8x128xf32>,
    %cst_388 = arith.constant 0.000000e+00 : f32
    %859 = vector.shape_cast %850 : vector<8x1xi1> to vector<8x1xi1>
    %860 = vector.broadcast %859 : vector<8x1xi1> to vector<8x128xi1>
    %861 = vector.broadcast %cst_388 : f32 to vector<8x128xf32>
    %862 = arith.select %860, %846, %861 : vector<8x128xi1>, vector<8x128xf32>
    %863 = arith.truncf %862 : vector<8x128xf32> to vector<8x128xbf16>
    %c0_389 = arith.constant 0 : index
    %c0_390 = arith.constant 0 : index
    %c0_391 = arith.constant 0 : index
    %864 = vector.load %arg8[%c0_389, %c0_390, %c0_391] : memref<8x8x128xbf16, #tpu.memory_space<vmem>>, vector<1x8x128xbf16>
    %865 = vector.shape_cast %864 : vector<1x8x128xbf16> to vector<8x128xbf16>
    %866 = vector.shape_cast %863 : vector<8x128xbf16> to vector<1x8x128xbf16>
    tpu.vector_store %arg8[%c0_389, %c0_390, %c0_391], %866 {strides = array<i32>} : memref<8x8x128xbf16, #tpu.memory_space<vmem>>, vector<1x8x128xbf16>,
    return
  }
  func.func @transform_0(%arg0: i32) -> (i32, i32, i32) {
    %c0_i32 = arith.constant 0 : i32
    %c0_i32_0 = arith.constant 0 : i32
    %c0_i32_1 = arith.constant 0 : i32
    return %arg0, %c0_i32, %c0_i32_0 : i32, i32, i32
  }
  func.func @transform_1(%arg0: i32) -> (i32, i32, i32) {
    %c0_i32 = arith.constant 0 : i32
    %0 = arith.subi %c0_i32, %arg0 : i32
    %c0_i32_0 = arith.constant 0 : i32
    %c0_i32_1 = arith.constant 0 : i32
    %c0_i32_2 = arith.constant 0 : i32
    return %0, %c0_i32_0, %c0_i32_1 : i32, i32, i32
  }
  func.func @transform_2(%arg0: i32) -> (i32, i32) {
    %c0_i32 = arith.constant 0 : i32
    %c0_i32_0 = arith.constant 0 : i32
    %c0_i32_1 = arith.constant 0 : i32
    return %c0_i32, %c0_i32_0 : i32, i32
  }
  func.func @transform_3(%arg0: i32) -> (i32, i32) {
    %c0_i32 = arith.constant 0 : i32
    %c0_i32_0 = arith.constant 0 : i32
    %c0_i32_1 = arith.constant 0 : i32
    return %c0_i32, %c0_i32_0 : i32, i32
  }
  func.func @transform_4(%arg0: i32) -> (i32, i32, i32) {
    %c0_i32 = arith.constant 0 : i32
    %c0_i32_0 = arith.constant 0 : i32
    %c0_i32_1 = arith.constant 0 : i32
    return %arg0, %c0_i32, %c0_i32_0 : i32, i32, i32
  }
  func.func @transform_5(%arg0: i32) -> (i32, i32, i32) {
    %c0_i32 = arith.constant 0 : i32
    %0 = arith.subi %c0_i32, %arg0 : i32
    %c0_i32_0 = arith.constant 0 : i32
    %c0_i32_1 = arith.constant 0 : i32
    %c0_i32_2 = arith.constant 0 : i32
    return %0, %c0_i32_0, %c0_i32_1 : i32, i32, i32
  }
  func.func @transform_6(%arg0: i32) -> (i32, i32, i32) {
    %c0_i32 = arith.constant 0 : i32
    %c0_i32_0 = arith.constant 0 : i32
    %c0_i32_1 = arith.constant 0 : i32
    return %arg0, %c0_i32, %c0_i32_0 : i32, i32, i32
  }
  func.func @transform_7(%arg0: i32) -> (i32, i32, i32) {
    %c0_i32 = arith.constant 0 : i32
    %0 = arith.subi %c0_i32, %arg0 : i32
    %c0_i32_0 = arith.constant 0 : i32
    %c0_i32_1 = arith.constant 0 : i32
    %c0_i32_2 = arith.constant 0 : i32
    return %0, %c0_i32_0, %c0_i32_1 : i32, i32, i32
  }
}

</mosaic_0001>

<bundles_post_ra>
// kernel: asr_forward.5
= control target key start
LH: loop header
LB: loop body
LE: loop exit
PB: predicated region body
PF: predicated region fallthrough
CT: control target
= control target key end

     0   :  { %s1072_s3 = inlined_call_operand.vmem [shape: bf16[128,128], index: 3, kind: input, shape index: {}]   ;;  %s1073_s2 = inlined_call_operand.vmem [shape: bf16[128,128], index: 2, kind: input, shape index: {}]   ;;  %s1074_s1 = inlined_call_operand.vmem [shape: bf16[64,128], index: 1, kind: input, shape index: {}]   ;;  %s1075_s0 = inlined_call_operand.vmem [shape: bf16[64,128], index: 0, kind: input, shape index: {}]   ;;  %s1076_s5 = inlined_call_operand.vmem [shape: bf16[128,128], index: 5, kind: input, shape index: {}]   ;;  %s1077_s4 = inlined_call_operand.vmem [shape: f32[1,128], index: 4, kind: input, shape index: {}]   ;;  %s1078_s6 = inlined_call_operand.vmem [shape: f32[1,128], index: 6, kind: input, shape index: {}]   ;;  %s1079_s7 = inlined_call_operand.vmem [shape: f32[64,128], index: 7, kind: output, shape index: {}]  }
   0x1   :  { %v770_v0 = vld [vmem:[%s1072_s3 + $0x38] sm:$0xff]   ;;  %v772_v2 = vld [vmem:[%s1072_s3 + $0x30] sm:$0xff]   ;;  %v774_v4 = vld [vmem:[%s1072_s3 + $0x28] sm:$0xff]  }
   0x2   :  { %v771_v1 = vld [vmem:[%s1073_s2 + $0x38] sm:$0xff]   ;;  %682 = vmatprep.subr.bf16.mxu0 %v770_v0  ;;  %v773_v3 = vld [vmem:[%s1073_s2 + $0x30] sm:$0xff]   ;;  %v775_v5 = vld [vmem:[%s1073_s2 + $0x28] sm:$0xff]  }
   0x3   :  { %706 = vmatprep.subr.bf16.mxu1 %v771_v1  ;;  %683 = vmatpush3.bf16.msra.mxu0 %v770_v0  ;;  %v776_v6 = vld [vmem:[%s1072_s3 + $0x20] sm:$0xff]   ;;  %v778_v8 = vld [vmem:[%s1072_s3 + $0x18] sm:$0xff]   ;;  %v780_v10 = vld [vmem:[%s1072_s3 + $0x10] sm:$0xff]  }
   0x4   :  { %707 = vmatpush3.bf16.msra.mxu1 %v771_v1  ;;  %684 = vmatprep.subr.bf16.mxu0 %v772_v2  ;;  %v777_v7 = vld [vmem:[%s1073_s2 + $0x20] sm:$0xff]   ;;  %v779_v9 = vld [vmem:[%s1073_s2 + $0x18] sm:$0xff]   ;;  %v781_v11 = vld [vmem:[%s1073_s2 + $0x10] sm:$0xff]  }
   0x5   :  { %708 = vmatprep.subr.bf16.mxu1 %v773_v3  ;;  %v786_v12 = vld [vmem:[%s1074_s1] sm:$0xff]   ;;  %v782_v14 = vld [vmem:[%s1072_s3 + $0x8] sm:$0xff]   ;;  %v794_v18 = vld [vmem:[%s1076_s5 + $0x38] sm:$0xff]  }
   0x6   :  { %v787_v13 = vld [vmem:[%s1075_s0] sm:$0xff]   ;;  %698 = vmatprep.mubr.bf16.mxu0 %v786_v12  ;;  %v783_v15 = vld [vmem:[%s1073_s2 + $0x8] sm:$0xff]   ;;  %v790_v21 = vld [vmem:[%s1074_s1 + $0x10] sm:$0xff]  }
   0x7   :  { %685 = vmatpush3.bf16.msra.mxu0 %v772_v2  ;;  %722 = vmatprep.mubr.bf16.mxu1 %v787_v13  ;;  %v784_v16 = vld [vmem:[%s1072_s3] sm:$0xff]   ;;  %v788_v19 = vld [vmem:[%s1074_s1 + $0x8] sm:$0xff]   ;;  %v791_v22 = vld [vmem:[%s1075_s0 + $0x10] sm:$0xff]  }
   0x8   :  { %709 = vmatpush3.bf16.msra.mxu1 %v773_v3  ;;  %686 = vmatprep.subr.bf16.mxu0 %v774_v4  ;;  %v785_v17 = vld [vmem:[%s1073_s2] sm:$0xff]   ;;  %v789_v20 = vld [vmem:[%s1075_s0 + $0x8] sm:$0xff]   ;;  %v795_v23 = vld [vmem:[%s1076_s5 + $0x30] sm:$0xff]  }
   0x9   :  { %710 = vmatprep.subr.bf16.mxu1 %v775_v5  ;;  %v796_v24 = vld [vmem:[%s1076_s5 + $0x28] sm:$0xff]   ;;  %v792_v25 = vld [vmem:[%s1074_s1 + $0x18] sm:$0xff]   ;;  %v797_v27 = vld [vmem:[%s1076_s5 + $0x20] sm:$0xff]  }
   0xa   :  { %v793_v26 = vld [vmem:[%s1075_s0 + $0x18] sm:$0xff]   ;;  %v799_v29 = vld [vmem:[%s1076_s5 + $0x10] sm:$0xff]   ;;  %v800_v30 = vld [vmem:[%s1076_s5 + $0x8] sm:$0xff]  }
   0xb   :  { %687 = vmatpush3.bf16.msra.mxu0 %v774_v4  ;;  %v798_v28 = vld [vmem:[%s1076_s5 + $0x18] sm:$0xff]   ;;  %v801_v31 = vld [vmem:[%s1076_s5] sm:$0xff]  }
   0xc   :  { %711 = vmatpush3.bf16.msra.mxu1 %v775_v5  ;;  %688 = vmatprep.subr.bf16.mxu0 %v776_v6  ;;  %v636_v40 = vld [vmem:[%s1077_s4] ss:$0 sm:$0xff] }
   0xd   :  { %712 = vmatprep.subr.bf16.mxu1 %v777_v7  ;;  %v637_v13 = vld [vmem:[%s1078_s6] ss:$0 sm:$0xff] }
   0xf   :  { %689 = vmatpush3.bf16.msra.mxu0 %v776_v6 }
  0x10   :  { %713 = vmatpush3.bf16.msra.mxu1 %v777_v7  ;;  %690 = vmatprep.subr.bf16.mxu0 %v778_v8 }
  0x11   :  { %714 = vmatprep.subr.bf16.mxu1 %v779_v9 }
  0x13   :  { %691 = vmatpush3.bf16.msra.mxu0 %v778_v8 }
  0x14   :  { %715 = vmatpush3.bf16.msra.mxu1 %v779_v9  ;;  %692 = vmatprep.subr.bf16.mxu0 %v780_v10 }
  0x15   :  { %716 = vmatprep.subr.bf16.mxu1 %v781_v11 }
  0x17   :  { %693 = vmatpush3.bf16.msra.mxu0 %v780_v10 }
  0x18   :  { %717 = vmatpush3.bf16.msra.mxu1 %v781_v11  ;;  %694 = vmatprep.subr.bf16.mxu0 %v782_v14 }
  0x19   :  { %718 = vmatprep.subr.bf16.mxu1 %v783_v15 }
  0x1b   :  { %695 = vmatpush3.bf16.msra.mxu0 %v782_v14 }
  0x1c   :  { %719 = vmatpush3.bf16.msra.mxu1 %v783_v15  ;;  %696 = vmatprep.subr.bf16.mxu0 %v784_v16 }
  0x1d   :  { %720 = vmatprep.subr.bf16.mxu1 %v785_v17 }
  0x1f   :  { %697 = vmatpush3.bf16.msra.mxu0 %v784_v16 }
  0x20   :  { %721 = vmatpush3.bf16.msra.mxu1 %v785_v17  ;;  %730 = vmatprep.subr.bf16.mxu0 %v794_v18 }
  0x21   :  { %754 = vmatprep.subr.bf16.mxu1 %v794_v18 }
  0x22   :  { %699 = vmatmul.mubr.bf16.vlgmr.msra.gmra.mxu0 %v788_v19 }
  0x23   :  { %723 = vmatmul.mubr.bf16.vlgmr.msra.gmra.mxu1 %v789_v20  ;;  %702 = vmatprep.mubr.bf16.mxu0 %v790_v21 }
  0x24   :  { %726 = vmatprep.mubr.bf16.mxu1 %v791_v22  ;;  %731 = vmatpush3.bf16.msra.mxu0 %v794_v18 }
  0x25   :  { %732 = vmatprep.subr.bf16.mxu0 %v795_v23  ;;  %762 = vmatpush3.bf16.msra.mxu1 %v794_v18 }
  0x26   :  { %755 = vmatprep.subr.bf16.mxu1 %v795_v23 }
  0x28   :  { %733 = vmatpush3.bf16.msra.mxu0 %v795_v23 }
  0x29   :  { %734 = vmatprep.subr.bf16.mxu0 %v796_v24  ;;  %763 = vmatpush3.bf16.msra.mxu1 %v795_v23 }
  0x2a   :  { %703 = vmatmul.mubr.bf16.gmra.mxu0 %v792_v25  ;;  %756 = vmatprep.subr.bf16.mxu1 %v796_v24 }
  0x2b   :  { %727 = vmatmul.mubr.bf16.gmra.mxu1 %v793_v26 }
  0x2c   :  { %735 = vmatpush3.bf16.msra.mxu0 %v796_v24 }
  0x2d   :  { %736 = vmatprep.subr.bf16.mxu0 %v797_v27  ;;  %764 = vmatpush3.bf16.msra.mxu1 %v796_v24 }
  0x2e   :  { %757 = vmatprep.subr.bf16.mxu1 %v797_v27 }
  0x30   :  { %737 = vmatpush3.bf16.msra.mxu0 %v797_v27 }
  0x31   :  { %765 = vmatpush3.bf16.msra.mxu1 %v797_v27  ;;  %738 = vmatprep.subr.bf16.mxu0 %v798_v28 }
  0x32   :  { %758 = vmatprep.subr.bf16.mxu1 %v798_v28 }
  0x34   :  { %739 = vmatpush3.bf16.msra.mxu0 %v798_v28 }
  0x35   :  { %766 = vmatpush3.bf16.msra.mxu1 %v798_v28  ;;  %740 = vmatprep.subr.bf16.mxu0 %v799_v29 }
  0x36   :  { %759 = vmatprep.subr.bf16.mxu1 %v799_v29 }
  0x38   :  { %741 = vmatpush3.bf16.msra.mxu0 %v799_v29 }
  0x39   :  { %767 = vmatpush3.bf16.msra.mxu1 %v799_v29  ;;  %742 = vmatprep.subr.bf16.mxu0 %v800_v30 }
  0x3a   :  { %760 = vmatprep.subr.bf16.mxu1 %v800_v30 }
  0x3c   :  { %743 = vmatpush3.bf16.msra.mxu0 %v800_v30 }
  0x3d   :  { %768 = vmatpush3.bf16.msra.mxu1 %v800_v30  ;;  %744 = vmatprep.subr.bf16.mxu0 %v801_v31 }
  0x3e   :  { %761 = vmatprep.subr.bf16.mxu1 %v801_v31 }
  0x40   :  { %745 = vmatpush3.bf16.msra.mxu0 %v801_v31 }
  0x41   :  { %769 = vmatpush3.bf16.msra.mxu1 %v801_v31 }
  0xe2   :  { %v700_v32 = vpop.f32.mrf.mxu0 }
  0xe3   :  { %v724_v33 = vpop.f32.mrf.mxu1 }
  0xe4   :  { %v181_v34 = vpop.f32.mrf.mxu0  ;;  %v327_v38 = vadd.f32 %v724_v33, %v700_v32 }
  0xe5   :  { %v318_v35 = vpop.f32.mrf.mxu1 }
  0xe6   :  { %v319_v36 = vadd.f32 %v318_v35, %v181_v34  ;;  %v701_v37 = vpop.f32.mrf.mxu0  ;;  %v358_v48 = vadd.f32 %v636_v40, %v327_v38 }
  0xe7   :  { %v725_v39 = vpop.f32.mrf.mxu1 }
  0xe8   :  { %v330_v41 = vadd.f32 %v725_v39, %v701_v37  ;;  %v184_v42 = vpop.f32.mrf.mxu0  ;;  %v356_v44 = vadd.f32 %v636_v40, %v319_v36  ;;  %v366_v58 = vmax.f32 %v358_v48, 0.0 }
  0xe9   :  { %v321_v43 = vpop.f32.mrf.mxu1 }
  0xea   :  { %v359_v45 = vadd.f32 %v636_v40, %v330_v41  ;;  %v322_v46 = vadd.f32 %v321_v43, %v184_v42  ;;  %v704_v47 = vpop.f32.mrf.mxu0  ;;  %v364_v54 = vmax.f32 %v356_v44, 0.0 }
  0xeb   :  { %v728_v49 = vpop.f32.mrf.mxu1 }
  0xec   :  { %v357_v50 = vadd.f32 %v636_v40, %v322_v46  ;;  %v197_v51 = vpop.f32.mrf.mxu0  ;;  %v367_v52 = vmax.f32 %v359_v45, 0.0  ;;  %v343_v59 = vadd.f32 %v728_v49, %v704_v47 }
  0xed   :  { %v334_v53 = vpop.f32.mrf.mxu1 }
  0xee   :  { %v365_v55 = vmax.f32 %v357_v50, 0.0  ;;  %v335_v56 = vadd.f32 %v334_v53, %v197_v51  ;;  %v705_v57 = vpop.f32.mrf.mxu0  ;;  %v373_v0 = vpack.c.bf16 %v367_v52, %v366_v58  ;;  %v362_v5 = vadd.f32 %v636_v40, %v343_v59 }
  0xef   :  { %v729_v60 = vpop.f32.mrf.mxu1 }
  0xf0   :  { %v346_v61 = vadd.f32 %v729_v60, %v705_v57  ;;  %v200_v62 = vpop.f32.mrf.mxu0  ;;  %v372_v63 = vpack.c.bf16 %v365_v55, %v364_v54  ;;  %v360_v2 = vadd.f32 %v636_v40, %v335_v56  ;;  %v370_v10 = vmax.f32 %v362_v5, 0.0 }
  0xf1   :  { %v337_v1 = vpop.f32.mrf.mxu1 }
  0xf2   :  { %v363_v3 = vadd.f32 %v636_v40, %v346_v61  ;;  %v338_v4 = vadd.f32 %v337_v1, %v200_v62  ;;  %746 = vmatprep.mubr.bf16.mxu0 %v372_v63  ;;  %v368_v8 = vmax.f32 %v360_v2, 0.0 }
  0xf3   :  { %747 = vmatmul.mubr.bf16.vlgmr.msra.gmra.mxu0 %v373_v0 }
  0xf4   :  { %v361_v6 = vadd.f32 %v636_v40, %v338_v4  ;;  %v371_v7 = vmax.f32 %v363_v3, 0.0 }
  0xf6   :  { %v369_v9 = vmax.f32 %v361_v6, 0.0  ;;  %v375_v12 = vpack.c.bf16 %v371_v7, %v370_v10 }
  0xf8   :  { %v374_v11 = vpack.c.bf16 %v369_v9, %v368_v8 }
  0xfa   :  { %750 = vmatprep.mubr.bf16.mxu1 %v374_v11 }
  0xfb   :  { %751 = vmatmul.mubr.bf16.vlgmr.msra.gmra.mxu1 %v375_v12 }
 0x1b3   :  { %v748_v14 = vpop.f32.mrf.mxu0 }
 0x1b4   :  { %v976_v15 = vadd.f32 %v748_v14, %v637_v13 }
 0x1b5   :  { %v481_v16 = vpop.f32.mrf.mxu0 }
 0x1b6   :  { %v978_v17 = vadd.f32 %v637_v13, %v481_v16  ;;  %516 = vmax.xlane.f32.xlu1 %v976_v15 }
 0x1b7   :  { %v749_v18 = vpop.f32.mrf.mxu0 }
 0x1b8   :  { %v981_v19 = vadd.f32 %v749_v18, %v637_v13  ;;  %512 = vmax.xlane.f32.xlu0 %v978_v17 }
 0x1b9   :  { %v484_v20 = vpop.f32.mrf.mxu0 }
 0x1ba   :  { %v984_v21 = vadd.f32 %v637_v13, %v484_v20  ;;  %518 = vmax.xlane.f32.xlu1 %v981_v19 }
 0x1bb   :  { %v752_v22 = vpop.f32.mrf.mxu1 }
 0x1bc   :  { %514 = vmax.xlane.f32.xlu0 %v984_v21  ;;  %v991_v27 = vadd.f32 %v752_v22, %v637_v13 }
 0x1bd   :  { %v497_v23 = vpop.f32.mrf.mxu1 }
 0x1be   :  { %v988_v24 = vadd.f32 %v637_v13, %v497_v23 }
 0x1bf   :  { %v753_v25 = vpop.f32.mrf.mxu1 }
 0x1c0   :  { %520 = vmax.xlane.f32.xlu0 %v988_v24  ;;  %v997_v29 = vadd.f32 %v753_v25, %v637_v13 }
 0x1c1   :  { %v500_v26 = vpop.f32.mrf.mxu1 }
 0x1c2   :  { %v993_v28 = vadd.f32 %v637_v13, %v500_v26 }
 0x1c4   :  { %522 = vmax.xlane.f32.xlu1 %v993_v28  ;;  %524 = vmax.xlane.f32.xlu0 %v991_v27 }
 0x1c8   :  { %526 = vmax.xlane.f32.xlu1 %v997_v29 }
 0x23f   :  { %v1000_v30 = vpop.xlane.xlu1 %516 }
 0x240   :  { %v530_v31 = vsub.f32 %v976_v15, %v1000_v30 }
 0x241   :  { %v1004_v32 = vpop.xlane.xlu0 %512 }
 0x242   :  { %v540_v33 = vmul.f32 1.442695, %v530_v31  ;;  %v528_v34 = vsub.f32 %v978_v17, %v1004_v32 }
 0x243   :  { %v1008_v35 = vpop.xlane.xlu1 %518 }
 0x244   :  { %802 = vpow2.f32 %v540_v33  ;;  %v536_v36 = vmul.f32 1.442695, %v528_v34  ;;  %v531_v37 = vsub.f32 %v981_v19, %v1008_v35 }
 0x245   :  { %v1012_v38 = vpop.xlane.xlu0 %514 }
 0x246   :  { %v542_v39 = vmul.f32 1.442695, %v531_v37  ;;  %v529_v40 = vsub.f32 %v984_v21, %v1012_v38  ;;  %804 = vpow2.f32 %v536_v36 }
 0x248   :  { %806 = vpow2.f32 %v542_v39  ;;  %v538_v41 = vmul.f32 1.442695, %v529_v40 }
 0x249   :  { %v1016_v42 = vpop.xlane.xlu0 %520 }
 0x24a   :  { %v532_v43 = vsub.f32 %v988_v24, %v1016_v42  ;;  %808 = vpow2.f32 %v538_v41 }
 0x24c   :  { %v544_v44 = vmul.f32 1.442695, %v532_v43 }
 0x24d   :  { %v1020_v45 = vpop.xlane.xlu1 %522  ;;  %v1022_v46 = vpop.xlane.xlu0 %524 }
 0x24e   :  { %810 = vpow2.f32 %v544_v44  ;;  %v533_v47 = vsub.f32 %v993_v28, %v1020_v45  ;;  %v534_v48 = vsub.f32 %v991_v27, %v1022_v46 }
 0x250   :  { %v546_v49 = vmul.f32 1.442695, %v533_v47  ;;  %v548_v50 = vmul.f32 1.442695, %v534_v48 }
 0x251   :  { %v803_v51 = vpop.eup %802  ;;  %v1028_v52 = vpop.xlane.xlu1 %526 }
 0x252   :  { %812 = vpow2.f32 %v546_v49  ;;  %v535_v53 = vsub.f32 %v997_v29, %v1028_v52  ;;  %556 = vadd.xlane.f32.xlu0 %v803_v51 }
 0x253   :  { %814 = vpow2.f32 %v548_v50  ;;  %v805_v54 = vpop.eup %804 }
 0x254   :  { %v550_v55 = vmul.f32 1.442695, %v535_v53 }
 0x255   :  { %v807_v56 = vpop.eup %806 }
 0x256   :  { %816 = vpow2.f32 %v550_v55  ;;  %558 = vadd.xlane.f32.xlu1 %v807_v56  ;;  %552 = vadd.xlane.f32.xlu0 %v805_v54 }
 0x257   :  { %v809_v57 = vpop.eup %808 }
 0x25a   :  { %554 = vadd.xlane.f32.xlu1 %v809_v57 }
 0x25b   :  { %v811_v58 = vpop.eup %810 }
 0x25c   :  { %560 = vadd.xlane.f32.xlu0 %v811_v58 }
 0x25f   :  { %v813_v59 = vpop.eup %812 }
 0x260   :  { %v815_v60 = vpop.eup %814  ;;  %562 = vadd.xlane.f32.xlu1 %v813_v59 }
 0x261   :  { %564 = vadd.xlane.f32.xlu0 %v815_v60 }
 0x263   :  { %v817_v61 = vpop.eup %816 }
 0x264   :  { %566 = vadd.xlane.f32.xlu1 %v817_v61 }
 0x2db   :  { %v557_v62 = vpop.xlane.xlu0 %556 }
 0x2dc   :  { %818 = vlog2.f32 %v557_v62 }
 0x2df   :  { %v559_v63 = vpop.xlane.xlu1 %558  ;;  %v553_v0 = vpop.xlane.xlu0 %552 }
 0x2e0   :  { %820 = vlog2.f32 %v559_v63 }
 0x2e1   :  { %822 = vlog2.f32 %v553_v0 }
 0x2e3   :  { %v555_v1 = vpop.xlane.xlu1 %554 }
 0x2e4   :  { %824 = vlog2.f32 %v555_v1 }
 0x2e5   :  { %v561_v2 = vpop.xlane.xlu0 %560 }
 0x2e6   :  { %826 = vlog2.f32 %v561_v2 }
 0x2e9   :  { %v819_v3 = vpop.eup %818  ;;  %v563_v4 = vpop.xlane.xlu1 %562 }
 0x2ea   :  { %v573_v5 = vmul.f32 0.6931472, %v819_v3  ;;  %828 = vlog2.f32 %v563_v4  ;;  %v565_v6 = vpop.xlane.xlu0 %564 }
 0x2eb   :  { %830 = vlog2.f32 %v565_v6 }
 0x2ec   :  { %v586_v7 = vadd.f32 %v573_v5, %v1000_v30 }
 0x2ed   :  { %v821_v8 = vpop.eup %820  ;;  %v567_v9 = vpop.xlane.xlu1 %566 }
 0x2ee   :  { %v823_v10 = vpop.eup %822  ;;  %v594_v11 = vsub.f32 %v976_v15, %v586_v7  ;;  %v575_v12 = vmul.f32 0.6931472, %v821_v8  ;;  %832 = vlog2.f32 %v567_v9 }
 0x2ef   :  { %v569_v13 = vmul.f32 0.6931472, %v823_v10 }
 0x2f0   :  { %602 = vst [vmem:[%s1079_s7 + $0x10] sm:$0xff] %v594_v11  ;;  %v587_v14 = vadd.f32 %v575_v12, %v1008_v35 }
 0x2f1   :  { %v825_v16 = vpop.eup %824  ;;  %v584_v18 = vadd.f32 %v569_v13, %v1004_v32 }
 0x2f2   :  { %v595_v20 = vsub.f32 %v981_v19, %v587_v14  ;;  %v571_v22 = vmul.f32 0.6931472, %v825_v16 }
 0x2f3   :  { %v827_v23 = vpop.eup %826  ;;  %v592_v25 = vsub.f32 %v978_v17, %v584_v18 }
 0x2f4   :  { %603 = vst [vmem:[%s1079_s7 + $0x18] sm:$0xff] %v595_v20  ;;  %v585_v15 = vadd.f32 %v571_v22, %v1012_v38  ;;  %v577_v26 = vmul.f32 0.6931472, %v827_v23 }
 0x2f5   :  { %600 = vst [vmem:[%s1079_s7] sm:$0xff] %v592_v25 }
 0x2f6   :  { %v593_v30 = vsub.f32 %v984_v21, %v585_v15  ;;  %v588_v31 = vadd.f32 %v577_v26, %v1016_v42 }
 0x2f7   :  { %v829_v19 = vpop.eup %828 }
 0x2f8   :  { %v831_v32 = vpop.eup %830  ;;  %601 = vst [vmem:[%s1079_s7 + $0x8] sm:$0xff] %v593_v30  ;;  %v596_v17 = vsub.f32 %v988_v24, %v588_v31  ;;  %v579_v33 = vmul.f32 0.6931472, %v829_v19 }
 0x2f9   :  { %v581_v34 = vmul.f32 0.6931472, %v831_v32 }
 0x2fa   :  { %604 = vst [vmem:[%s1079_s7 + $0x20] sm:$0xff] %v596_v17  ;;  %v589_v35 = vadd.f32 %v579_v33, %v1020_v45 }
 0x2fb   :  { %v833_v36 = vpop.eup %832  ;;  %v590_v21 = vadd.f32 %v581_v34, %v1022_v46 }
 0x2fc   :  { %v597_v37 = vsub.f32 %v993_v28, %v589_v35  ;;  %v583_v38 = vmul.f32 0.6931472, %v833_v36 }
 0x2fd   :  { %v598_v39 = vsub.f32 %v991_v27, %v590_v21 }
 0x2fe   :  { %605 = vst [vmem:[%s1079_s7 + $0x28] sm:$0xff] %v597_v37  ;;  %v591_v24 = vadd.f32 %v583_v38, %v1028_v52 }
 0x2ff   :  { %606 = vst [vmem:[%s1079_s7 + $0x30] sm:$0xff] %v598_v39 }
 0x300   :  { %v599_v40 = vsub.f32 %v997_v29, %v591_v24 }
 0x302   :  { %607 = vst [vmem:[%s1079_s7 + $0x38] sm:$0xff] %v599_v40 }

// kernel: asr_forward.3
= control target key start
LH: loop header
LB: loop body
LE: loop exit
PB: predicated region body
PF: predicated region fallthrough
CT: control target
= control target key end

     0   :  { %vm100_vm0 = vcmask 130048   ;;  %v1265_v40 = vmov 0   ;;  %vm535_vm1 = vcmask 261120   ;;  %s1651_s2 = inlined_call_operand.vmem [shape: bf16[48,32], index: 2, kind: input, shape index: {}]   ;;  %s1652_s0 = inlined_call_operand.vmem [shape: bf16[9,2,8,16], index: 0, kind: input, shape index: {}, may-alias: {0,1}]   ;;  %s1653_s1 = inlined_call_operand.vmem [shape: bf16[9,2,8,16], index: 1, kind: input, shape index: {}, may-alias: {0,1}]   ;;  %s1654_s4 = inlined_call_operand.vmem [shape: bf16[32,1024], index: 4, kind: input, shape index: {}]   ;;  %s1655_s3 = inlined_call_operand.vmem [shape: f32[1,32], index: 3, kind: input, shape index: {}]   ;;  %s1656_s5 = inlined_call_operand.vmem [shape: f32[1,1024], index: 5, kind: input, shape index: {}]   ;;  %s1657_s6 = inlined_call_operand.vmem [shape: bf16[64,512], index: 6, kind: output, shape index: {0}]   ;;  %s1658_s7 = inlined_call_operand.vmem [shape: bf16[64,512], index: 7, kind: output, shape index: {1}]  }
   0x1   :  { %v1251_v0 = vld [vmem:[%s1651_s2 + $0x8] sm:$0xff]   ;;  %v1254_v3 = vld [vmem:[%s1652_s0 + $0x14] ss:$8 sps:$4 sm:$0xff]   ;;  %v1256_v5 = vld [vmem:[%s1651_s2] sm:$0xff]  }
   0x2   :  { %v1252_v1 = vld [vmem:[%s1652_s0 + $0x4] ss:$8 sps:$4 sm:$0xff]   ;;  %1218 = vmatprep.subr.bf16.mxu0 %v1251_v0  ;;  %1248 = vmatprep.subr.bf16.mxu1 %v1251_v0  ;;  %v1255_v4 = vld [vmem:[%s1652_s0 + $0x34] ss:$8 sps:$4 sm:$0xff]   ;;  %v51_v7 = vld [vmem:[%s1652_s0] sm:$0xf] }
   0x3   :  { %v1253_v2 = vld [vmem:[%s1652_s0 + $0x24] ss:$8 sps:$4 sm:$0xff]   ;;  %1219 = vmatpush3.bf16.msra.mxu0 %v1251_v0  ;;  %1249 = vmatpush3.bf16.msra.mxu1 %v1251_v0  ;;  %v1257_v6 = vld [vmem:[%s1651_s2 + $0x10] sm:$0xff]   ;;  %v53_v8 = vld [vmem:[%s1652_s0 + $0x8] sm:$0xf] }
   0x4   :  { %1220 = vmatprep.mubr.msk.bf16.mxu0 %vm100_vm0, %v1252_v1  ;;  %1224 = vmatprep.mubr.msk.bf16.mxu1 %vm100_vm0, %v1253_v2  ;;  %v55_v9 = vld [vmem:[%s1652_s0 + $0x10] sm:$0xf]  ;;  %v1088_v10 = vcombine.low %v51_v7, %v53_v8  ;;  %v57_v11 = vld [vmem:[%s1652_s0 + $0x18] sm:$0xf]  ;;  %v59_v12 = vld [vmem:[%s1652_s0 + $0x20] sm:$0xf] }
   0x5   :  { %1228 = vmatprep.subr.bf16.mxu1 %v1256_v5  ;;  %1238 = vmatprep.subr.bf16.mxu0 %v1257_v6  ;;  %v1097_v13 = vcombine.low %v53_v8, %v55_v9  ;;  %v61_v14 = vld [vmem:[%s1652_s0 + $0x28] sm:$0xf]  ;;  %v63_v15 = vld [vmem:[%s1652_s0 + $0x30] sm:$0xf]  ;;  %v1089_v16 = vcombine.low %v55_v9, %v57_v11  ;;  %v1098_v17 = vcombine.low %v57_v11, %v59_v12  ;;  %v65_v20 = vld [vmem:[%s1652_s0 + $0x38] sm:$0xf] }
   0x6   :  { %1221 = vmatmul.mubr.msk.bf16.vlgmr.msra.gmra.mxu0 %vm100_vm0, %v1254_v3  ;;  %1225 = vmatmul.mubr.msk.bf16.vlgmr.msra.gmra.mxu1 %vm100_vm0, %v1255_v4  ;;  %v1090_v18 = vcombine.low %v59_v12, %v61_v14  ;;  %v1099_v19 = vcombine.low %v61_v14, %v63_v15  ;;  %v1078_v21 = vld [vmem:[%s1653_s1 + $0x40] sm:$0xf]  ;;  %v1091_v22 = vcombine.low %v63_v15, %v65_v20  ;;  %v406_v26 = vld [vmem:[%s1654_s4 + $0x48] sm:$0xff]  ;;  %v407_v41 = vld [vmem:[%s1654_s4 + $0x50] sm:$0xff] }
   0x7   :  { %1229 = vmatpush3.bf16.msra.mxu1 %v1256_v5  ;;  %1239 = vmatpush3.bf16.msra.mxu0 %v1257_v6  ;;  %v1100_v23 = vcombine.low %v65_v20, %v1078_v21  ;;  %v405_v24 = vld [vmem:[%s1654_s4 + $0x40] sm:$0xff]  ;;  %v410_v29 = vld [vmem:[%s1654_s4 + $0x68] sm:$0xff]  ;;  %v411_v42 = vld [vmem:[%s1654_s4 + $0x70] sm:$0xff] }
   0x8   :  { %1230 = vmatprep.mubr.msk.bf16.mxu1 %vm100_vm0, %v1088_v10  ;;  %1240 = vmatprep.mubr.msk.bf16.mxu0 %vm100_vm0, %v1097_v13  ;;  %v409_v25 = vld [vmem:[%s1654_s4 + $0x60] sm:$0xff]  ;;  %v1117_v30 = vcombine.low %v406_v26, %v410_v29  ;;  %v1118_v31 = vcombine.high %v406_v26, %v410_v29  ;;  %v398_v34 = vld [vmem:[%s1654_s4 + $0x8] sm:$0xff]  ;;  %v408_v43 = vld [vmem:[%s1654_s4 + $0x58] sm:$0xff]  ;;  %v1119_v44 = vcombine.low %v407_v41, %v411_v42 }
   0x9   :  { %v1115_v27 = vcombine.low %v405_v24, %v409_v25  ;;  %v1116_v28 = vcombine.high %v405_v24, %v409_v25  ;;  %v397_v32 = vld [vmem:[%s1654_s4] sm:$0xff]  ;;  %v402_v36 = vld [vmem:[%s1654_s4 + $0x28] sm:$0xff]  ;;  %v1120_v45 = vcombine.high %v407_v41, %v411_v42  ;;  %v412_v46 = vld [vmem:[%s1654_s4 + $0x78] sm:$0xff] }
   0xa   :  { %633 = vmatprep.subr.bf16.mxu0 %v1118_v31  ;;  %v401_v33 = vld [vmem:[%s1654_s4 + $0x20] sm:$0xff]  ;;  %v1109_v38 = vcombine.low %v398_v34, %v402_v36  ;;  %v1110_v39 = vcombine.high %v398_v34, %v402_v36  ;;  %v1121_v47 = vcombine.low %v408_v43, %v412_v46  ;;  %v1122_v48 = vcombine.high %v408_v43, %v412_v46  ;;  %v399_v11 = vld [vmem:[%s1654_s4 + $0x10] sm:$0xff] }
   0xb   :  { %560 = vmatprep.subr.bf16.mxu1 %v1116_v28  ;;  %v1108_v35 = vcombine.high %v397_v32, %v401_v33  ;;  %v1107_v37 = vcombine.low %v397_v32, %v401_v33  ;;  %v1106_v8 = vld [vmem:[%s1655_s3] ss:$0 sm:$0xff]  ;;  %v403_v15 = vld [vmem:[%s1654_s4 + $0x30] sm:$0xff] }
   0xc   :  { %v1111_v26 = vcombine.low %v399_v11, %v403_v15 }
   0xe   :  { %1231 = vmatmul.mubr.msk.bf16.vlgmr.msra.gmra.mxu1 %vm100_vm0, %v1089_v16  ;;  %1241 = vmatmul.mubr.msk.bf16.vlgmr.msra.gmra.mxu0 %vm100_vm0, %v1098_v17  ;;  %v400_v16 = vld [vmem:[%s1654_s4 + $0x18] sm:$0xff] }
   0xf   :  { %1234 = vmatprep.mubr.msk.bf16.mxu1 %vm100_vm0, %v1090_v18  ;;  %1244 = vmatprep.mubr.msk.bf16.mxu0 %vm100_vm0, %v1099_v19  ;;  %v404_v17 = vld [vmem:[%s1654_s4 + $0x38] sm:$0xff] }
  0x10   :  { %561 = vmatpush1.bf16.msra.mxu1 %v1115_v27  ;;  %634 = vmatpush1.bf16.msra.mxu0 %v1117_v30  ;;  %v1114_v24 = vcombine.high %v400_v16, %v404_v17  ;;  %v1113_v27 = vcombine.low %v400_v16, %v404_v17 }
  0x11   :  { %562 = vmatprep.subr.bf16.mxu1 %v1108_v35  ;;  %635 = vmatprep.subr.bf16.mxu0 %v1110_v39 }
  0x14   :  { %563 = vmatpush1.bf16.msra.mxu1 %v1107_v37  ;;  %636 = vmatpush1.bf16.msra.mxu0 %v1109_v38 }
  0x15   :  { %706 = vmatprep.subr.bf16.mxu1 %v1120_v45  ;;  %779 = vmatprep.subr.bf16.mxu0 %v1122_v48 }
  0x16   :  { %1235 = vmatmul.mubr.msk.bf16.gmra.mxu1 %vm100_vm0, %v1091_v22  ;;  %1245 = vmatmul.mubr.msk.bf16.gmra.mxu0 %vm100_vm0, %v1100_v23  ;;  %v1112_v23 = vcombine.high %v399_v11, %v403_v15 }
  0x17   :  { %580 = vmatprep.mubr.bf16.mxu1 %v1265_v40  ;;  %653 = vmatprep.mubr.bf16.mxu0 %v1265_v40 }
  0xc6   :  { %v1222_v49 = vpop.f32.mrf.mxu0  ;;  %v1404_v50 = vpop.f32.mrf.mxu1 }
  0xc8   :  { %v147_v51 = vpop.f32.mrf.mxu0  ;;  %v163_v52 = vpop.f32.mrf.mxu1 }
  0xca   :  { %v1223_v53 = vpop.f32.mrf.mxu0  ;;  %v1227_v54 = vpop.f32.mrf.mxu1 }
  0xcc   :  { %v150_v55 = vpop.f32.mrf.mxu0  ;;  %v166_v56 = vpop.f32.mrf.mxu1 }
  0xce   :  { %v1232_v57 = vpop.f32.mrf.mxu1  ;;  %v1242_v58 = vpop.f32.mrf.mxu0 }
  0xcf   :  { %v259_v12 = vadd.f32 %v1232_v57, %v1222_v49 }
  0xd0   :  { %v250_v59 = vpop.f32.mrf.mxu1  ;;  %v339_v60 = vpop.f32.mrf.mxu0 }
  0xd1   :  { %v251_v61 = vadd.f32 %v250_v59, %v147_v51  ;;  %v372_v25 = vadd.f32 %v1242_v58, %v259_v12 }
  0xd2   :  { %v1233_v62 = vpop.f32.mrf.mxu1  ;;  %v1243_v63 = vpop.f32.mrf.mxu0 }
  0xd3   :  { %v370_v2 = vadd.f32 %v339_v60, %v251_v61  ;;  %v262_v6 = vadd.f32 %v1233_v62, %v1223_v53  ;;  %v387_v31 = vadd.f32 %v1106_v8, %v372_v25  ;;  %v1461_v53 = vld [vmem:[%s1656_s5] sm:$0xff] }
  0xd4   :  { %v253_v0 = vpop.f32.mrf.mxu1  ;;  %v342_v1 = vpop.f32.mrf.mxu0 }
  0xd5   :  { %v254_v3 = vadd.f32 %v253_v0, %v150_v55  ;;  %v385_v13 = vadd.f32 %v1106_v8, %v370_v2  ;;  %v373_v19 = vadd.f32 %v1243_v63, %v262_v6 }
  0xd6   :  { %v1236_v4 = vpop.f32.mrf.mxu1  ;;  %v1246_v5 = vpop.f32.mrf.mxu0 }
  0xd7   :  { %v371_v7 = vadd.f32 %v342_v1, %v254_v3  ;;  %v388_v28 = vadd.f32 %v1106_v8, %v373_v19  ;;  %v275_v38 = vadd.f32 %v1236_v4, %v1404_v50 }
  0xd8   :  { %v266_v9 = vpop.f32.mrf.mxu1  ;;  %v355_v10 = vpop.f32.mrf.mxu0 }
  0xd9   :  { %v386_v14 = vadd.f32 %v1106_v8, %v371_v7  ;;  %v267_v32 = vadd.f32 %v266_v9, %v163_v52  ;;  %v394_v33 = vpack.c.bf16 %v388_v28, %v387_v31  ;;  %v376_v43 = vadd.f32 %v1246_v5, %v275_v38 }
  0xda   :  { %v1237_v18 = vpop.f32.mrf.mxu1  ;;  %v1247_v22 = vpop.f32.mrf.mxu0 }
  0xdb   :  { %v393_v20 = vpack.c.bf16 %v386_v14, %v385_v13  ;;  %v374_v35 = vadd.f32 %v355_v10, %v267_v32  ;;  %v278_v36 = vadd.f32 %v1237_v18, %v1227_v54  ;;  %v391_v45 = vadd.f32 %v1106_v8, %v376_v43 }
  0xdc   :  { %v269_v21 = vpop.f32.mrf.mxu1  ;;  %v358_v30 = vpop.f32.mrf.mxu0 }
  0xdd   :  { %1123 = vmatmul.mubr.msk.bf16.vlgmr.msra.gmra.mxu1 %vm535_vm1, %v393_v20  ;;  %1127 = vmatmul.mubr.msk.bf16.vlgmr.msra.gmra.mxu0 %vm535_vm1, %v393_v20  ;;  %v270_v29 = vadd.f32 %v269_v21, %v166_v56  ;;  %v389_v39 = vadd.f32 %v1106_v8, %v374_v35  ;;  %v377_v41 = vadd.f32 %v1247_v22, %v278_v36 }
  0xde   :  { %707 = vmatpush1.bf16.msra.mxu1 %v1119_v44  ;;  %780 = vmatpush1.bf16.msra.mxu0 %v1121_v47  ;;  %v415_v47 = vlaneseq }
  0xdf   :  { %590 = vmatprep.mubr.bf16.mxu1 %v1265_v40  ;;  %663 = vmatprep.mubr.bf16.mxu0 %v1265_v40  ;;  %v375_v34 = vadd.f32 %v358_v30, %v270_v29  ;;  %v392_v44 = vadd.f32 %v1106_v8, %v377_v41 }
  0xe0   :  { %708 = vmatprep.subr.bf16.mxu1 %v1112_v23  ;;  %781 = vmatprep.subr.bf16.mxu0 %v1114_v24  ;;  %v1452_v48 = vshrl.u32 %v415_v47, 7 }
  0xe1   :  { %v390_v37 = vadd.f32 %v1106_v8, %v375_v34  ;;  %v396_v46 = vpack.c.bf16 %v392_v44, %v391_v45 }
  0xe2   :  { %709 = vmatpush1.bf16.msra.mxu1 %v1111_v26  ;;  %782 = vmatpush1.bf16.msra.mxu0 %v1113_v27  ;;  %v417_v49 = vsub.s32 0, %v1452_v48  ;;  %v425_v50 = vsub.s32 2, %v1452_v48  ;;  %v421_v51 = vsub.s32 1, %v1452_v48  ;;  %v429_v52 = vsub.s32 3, %v1452_v48 }
  0xe3   :  { %v395_v42 = vpack.c.bf16 %v390_v37, %v389_v39 }
  0xe4   :  { %v1467_v54 = vrot.slane %v1461_v53, %v425_v50  ;;  %v1470_v55 = vrot.slane %v1461_v53, %v421_v51  ;;  %v1473_v56 = vrot.slane %v1461_v53, %v429_v52 }
  0xe5   :  { %1124 = vmatmul.mubr.msk.bf16.gmra.mxu1 %vm535_vm1, %v394_v33  ;;  %1128 = vmatmul.mubr.msk.bf16.gmra.mxu0 %vm535_vm1, %v394_v33 }
  0xe6   :  { %600 = vmatprep.mubr.bf16.mxu1 %v1265_v40  ;;  %673 = vmatprep.mubr.bf16.mxu0 %v1265_v40 }
  0xed   :  { %1125 = vmatmul.mubr.msk.bf16.gmra.mxu1 %vm535_vm1, %v395_v42  ;;  %1129 = vmatmul.mubr.msk.bf16.gmra.mxu0 %vm535_vm1, %v395_v42 }
  0xee   :  { %610 = vmatprep.mubr.bf16.mxu1 %v1265_v40  ;;  %683 = vmatprep.mubr.bf16.mxu0 %v1265_v40 }
  0xf5   :  { %1126 = vmatmul.mubr.msk.bf16.gmra.mxu1 %vm535_vm1, %v396_v46  ;;  %1130 = vmatmul.mubr.msk.bf16.gmra.mxu0 %vm535_vm1, %v396_v46 }
  0xf6   :  { %726 = vmatprep.mubr.bf16.mxu1 %v1265_v40  ;;  %799 = vmatprep.mubr.bf16.mxu0 %v1265_v40 }
  0xfd   :  { %1131 = vmatmul.mubr.msk.bf16.vlgmr.msra.gmra.mxu1 %vm535_vm1, %v393_v20  ;;  %1135 = vmatmul.mubr.msk.bf16.vlgmr.msra.gmra.mxu0 %vm535_vm1, %v393_v20 }
  0xfe   :  { %736 = vmatprep.mubr.bf16.mxu1 %v1265_v40  ;;  %809 = vmatprep.mubr.bf16.mxu0 %v1265_v40 }
 0x105   :  { %1132 = vmatmul.mubr.msk.bf16.gmra.mxu1 %vm535_vm1, %v394_v33  ;;  %1136 = vmatmul.mubr.msk.bf16.gmra.mxu0 %vm535_vm1, %v394_v33 }
 0x106   :  { %746 = vmatprep.mubr.bf16.mxu1 %v1265_v40  ;;  %819 = vmatprep.mubr.bf16.mxu0 %v1265_v40 }
 0x10d   :  { %1133 = vmatmul.mubr.msk.bf16.gmra.mxu1 %vm535_vm1, %v395_v42  ;;  %1137 = vmatmul.mubr.msk.bf16.gmra.mxu0 %vm535_vm1, %v395_v42 }
 0x10e   :  { %756 = vmatprep.mubr.bf16.mxu1 %v1265_v40  ;;  %829 = vmatprep.mubr.bf16.mxu0 %v1265_v40  ;;  %v1464_v40 = vrot.slane %v1461_v53, %v417_v49 }
 0x115   :  { %1134 = vmatmul.mubr.msk.bf16.gmra.mxu1 %vm535_vm1, %v396_v46  ;;  %1138 = vmatmul.mubr.msk.bf16.gmra.mxu0 %vm535_vm1, %v396_v46 }
 0x19d   :  { %v582_v57 = vpop.f32.mrf.mxu1  ;;  %v655_v58 = vpop.f32.mrf.mxu0 }
 0x19e   :  { %v583_v61 = vadd.f32 %v582_v57, %v1464_v40  ;;  %v656_v62 = vadd.f32 %v655_v58, %v1467_v54 }
 0x19f   :  { %v584_v59 = vpop.f32.mrf.mxu1  ;;  %v657_v60 = vpop.f32.mrf.mxu0 }
 0x1a0   :  { %v585_v63 = vadd.f32 %v584_v59, %v1470_v55  ;;  %v658_v0 = vadd.f32 %v657_v60, %v1473_v56 }
 0x1a1   :  { %v586_v1 = vpop.f32.mrf.mxu1  ;;  %v659_v2 = vpop.f32.mrf.mxu0 }
 0x1a2   :  { %v1171_v3 = vpack.c.bf16 %v585_v63, %v583_v61  ;;  %v1172_v4 = vpack.c.bf16 %v658_v0, %v656_v62  ;;  %v587_v7 = vadd.f32 %v586_v1, %v1464_v40  ;;  %v660_v8 = vadd.f32 %v659_v2, %v1467_v54 }
 0x1a3   :  { %v588_v5 = vpop.f32.mrf.mxu1  ;;  %v661_v6 = vpop.f32.mrf.mxu0  ;;  %v433_v63 = vsub.s32 4, %v1452_v48  ;;  %v441_v0 = vsub.s32 6, %v1452_v48  ;;  %v437_v1 = vsub.s32 5, %v1452_v48  ;;  %v445_v2 = vsub.s32 7, %v1452_v48 }
 0x1a4   :  { %936 = vst [vmem:[%s1657_s6] sm:$0xff] %v1171_v3  ;;  %937 = vst [vmem:[%s1657_s6 + $0x8] sm:$0xff] %v1172_v4  ;;  %v589_v9 = vadd.f32 %v588_v5, %v1470_v55  ;;  %v662_v10 = vadd.f32 %v661_v6, %v1473_v56 }
 0x1a5   :  { %v592_v11 = vpop.f32.mrf.mxu1  ;;  %v665_v12 = vpop.f32.mrf.mxu0 }
 0x1a6   :  { %v1173_v13 = vpack.c.bf16 %v589_v9, %v587_v7  ;;  %v1174_v14 = vpack.c.bf16 %v662_v10, %v660_v8  ;;  %v593_v17 = vadd.f32 %v592_v11, %v1464_v40  ;;  %v666_v18 = vadd.f32 %v665_v12, %v1467_v54 }
 0x1a7   :  { %v594_v15 = vpop.f32.mrf.mxu1  ;;  %v667_v16 = vpop.f32.mrf.mxu0  ;;  %v1544_v12 = vrot.slane %v1461_v53, %v433_v63 }
 0x1a8   :  { %938 = vst [vmem:[%s1657_s6 + $0x10] sm:$0xff] %v1173_v13  ;;  %939 = vst [vmem:[%s1657_s6 + $0x18] sm:$0xff] %v1174_v14  ;;  %v595_v19 = vadd.f32 %v594_v15, %v1470_v55  ;;  %v668_v20 = vadd.f32 %v667_v16, %v1473_v56  ;;  %v1547_v13 = vrot.slane %v1461_v53, %v441_v0 }
 0x1a9   :  { %v596_v21 = vpop.f32.mrf.mxu1  ;;  %v669_v22 = vpop.f32.mrf.mxu0  ;;  %v1550_v14 = vrot.slane %v1461_v53, %v437_v1  ;;  %v1553_v15 = vrot.slane %v1461_v53, %v445_v2 }
 0x1aa   :  { %v1175_v23 = vpack.c.bf16 %v595_v19, %v593_v17  ;;  %v1176_v24 = vpack.c.bf16 %v668_v20, %v666_v18  ;;  %v597_v27 = vadd.f32 %v596_v21, %v1464_v40  ;;  %v670_v28 = vadd.f32 %v669_v22, %v1467_v54 }
 0x1ab   :  { %v598_v25 = vpop.f32.mrf.mxu1  ;;  %v671_v26 = vpop.f32.mrf.mxu0 }
 0x1ac   :  { %940 = vst [vmem:[%s1657_s6 + $0x20] sm:$0xff] %v1175_v23  ;;  %941 = vst [vmem:[%s1657_s6 + $0x28] sm:$0xff] %v1176_v24  ;;  %v599_v29 = vadd.f32 %v598_v25, %v1470_v55  ;;  %v672_v30 = vadd.f32 %v671_v26, %v1473_v56 }
 0x1ad   :  { %v602_v31 = vpop.f32.mrf.mxu1  ;;  %v675_v32 = vpop.f32.mrf.mxu0 }
 0x1ae   :  { %v1177_v33 = vpack.c.bf16 %v599_v29, %v597_v27  ;;  %v1178_v34 = vpack.c.bf16 %v672_v30, %v670_v28  ;;  %v603_v37 = vadd.f32 %v602_v31, %v1464_v40  ;;  %v676_v38 = vadd.f32 %v675_v32, %v1467_v54 }
 0x1af   :  { %v604_v35 = vpop.f32.mrf.mxu1  ;;  %v677_v36 = vpop.f32.mrf.mxu0 }
 0x1b0   :  { %942 = vst [vmem:[%s1657_s6 + $0x30] sm:$0xff] %v1177_v33  ;;  %943 = vst [vmem:[%s1657_s6 + $0x38] sm:$0xff] %v1178_v34  ;;  %v605_v39 = vadd.f32 %v604_v35, %v1470_v55  ;;  %v678_v41 = vadd.f32 %v677_v36, %v1473_v56 }
 0x1b1   :  { %v606_v42 = vpop.f32.mrf.mxu1  ;;  %v679_v43 = vpop.f32.mrf.mxu0 }
 0x1b2   :  { %v1179_v44 = vpack.c.bf16 %v605_v39, %v603_v37  ;;  %v1180_v45 = vpack.c.bf16 %v678_v41, %v676_v38  ;;  %v607_v49 = vadd.f32 %v606_v42, %v1464_v40  ;;  %v680_v50 = vadd.f32 %v679_v43, %v1467_v54 }
 0x1b3   :  { %v608_v46 = vpop.f32.mrf.mxu1  ;;  %v681_v47 = vpop.f32.mrf.mxu0 }
 0x1b4   :  { %944 = vst [vmem:[%s1657_s6 + $0x40] sm:$0xff] %v1179_v44  ;;  %945 = vst [vmem:[%s1657_s6 + $0x48] sm:$0xff] %v1180_v45  ;;  %v609_v51 = vadd.f32 %v608_v46, %v1470_v55  ;;  %v682_v52 = vadd.f32 %v681_v47, %v1473_v56 }
 0x1b5   :  { %v612_v57 = vpop.f32.mrf.mxu1  ;;  %v685_v58 = vpop.f32.mrf.mxu0 }
 0x1b6   :  { %v1181_v59 = vpack.c.bf16 %v609_v51, %v607_v49  ;;  %v1182_v60 = vpack.c.bf16 %v682_v52, %v680_v50  ;;  %v613_v3 = vadd.f32 %v612_v57, %v1464_v40  ;;  %v686_v4 = vadd.f32 %v685_v58, %v1467_v54 }
 0x1b7   :  { %v614_v61 = vpop.f32.mrf.mxu1  ;;  %v687_v62 = vpop.f32.mrf.mxu0 }
 0x1b8   :  { %946 = vst [vmem:[%s1657_s6 + $0x50] sm:$0xff] %v1181_v59  ;;  %947 = vst [vmem:[%s1657_s6 + $0x58] sm:$0xff] %v1182_v60  ;;  %v615_v5 = vadd.f32 %v614_v61, %v1470_v55  ;;  %v688_v6 = vadd.f32 %v687_v62, %v1473_v56 }
 0x1b9   :  { %v616_v7 = vpop.f32.mrf.mxu1  ;;  %v689_v8 = vpop.f32.mrf.mxu0 }
 0x1ba   :  { %v1183_v9 = vpack.c.bf16 %v615_v5, %v613_v3  ;;  %v1184_v48 = vpack.c.bf16 %v688_v6, %v686_v4  ;;  %v617_v16 = vadd.f32 %v616_v7, %v1464_v40  ;;  %v690_v17 = vadd.f32 %v689_v8, %v1467_v54 }
 0x1bb   :  { %v618_v10 = vpop.f32.mrf.mxu1  ;;  %v691_v11 = vpop.f32.mrf.mxu0 }
 0x1bc   :  { %948 = vst [vmem:[%s1657_s6 + $0x60] sm:$0xff] %v1183_v9  ;;  %949 = vst [vmem:[%s1657_s6 + $0x68] sm:$0xff] %v1184_v48  ;;  %v619_v18 = vadd.f32 %v618_v10, %v1470_v55  ;;  %v692_v19 = vadd.f32 %v691_v11, %v1473_v56 }
 0x1bd   :  { %v728_v20 = vpop.f32.mrf.mxu1  ;;  %v801_v21 = vpop.f32.mrf.mxu0 }
 0x1be   :  { %v1185_v53 = vpack.c.bf16 %v619_v18, %v617_v16  ;;  %v1186_v22 = vpack.c.bf16 %v692_v19, %v690_v17  ;;  %v729_v40 = vadd.f32 %v728_v20, %v1544_v12  ;;  %v802_v54 = vadd.f32 %v801_v21, %v1547_v13 }
 0x1bf   :  { %v730_v23 = vpop.f32.mrf.mxu1  ;;  %v803_v24 = vpop.f32.mrf.mxu0 }
 0x1c0   :  { %950 = vst [vmem:[%s1657_s6 + $0x70] sm:$0xff] %v1185_v53  ;;  %951 = vst [vmem:[%s1657_s6 + $0x78] sm:$0xff] %v1186_v22  ;;  %v731_v55 = vadd.f32 %v730_v23, %v1550_v14  ;;  %v804_v56 = vadd.f32 %v803_v24, %v1553_v15 }
 0x1c1   :  { %v732_v25 = vpop.f32.mrf.mxu1  ;;  %v805_v26 = vpop.f32.mrf.mxu0 }
 0x1c2   :  { %v1187_v27 = vpack.c.bf16 %v731_v55, %v729_v40  ;;  %v1188_v28 = vpack.c.bf16 %v804_v56, %v802_v54  ;;  %v733_v31 = vadd.f32 %v732_v25, %v1544_v12  ;;  %v806_v32 = vadd.f32 %v805_v26, %v1547_v13 }
 0x1c3   :  { %v734_v29 = vpop.f32.mrf.mxu1  ;;  %v807_v30 = vpop.f32.mrf.mxu0 }
 0x1c4   :  { %1048 = vst [vmem:[%s1658_s7] sm:$0xff] %v1187_v27  ;;  %1049 = vst [vmem:[%s1658_s7 + $0x8] sm:$0xff] %v1188_v28  ;;  %v735_v33 = vadd.f32 %v734_v29, %v1550_v14  ;;  %v808_v34 = vadd.f32 %v807_v30, %v1553_v15 }
 0x1c5   :  { %v738_v35 = vpop.f32.mrf.mxu1  ;;  %v811_v36 = vpop.f32.mrf.mxu0 }
 0x1c6   :  { %v1189_v37 = vpack.c.bf16 %v735_v33, %v733_v31  ;;  %v1190_v38 = vpack.c.bf16 %v808_v34, %v806_v32  ;;  %v739_v42 = vadd.f32 %v738_v35, %v1544_v12  ;;  %v812_v43 = vadd.f32 %v811_v36, %v1547_v13 }
 0x1c7   :  { %v740_v39 = vpop.f32.mrf.mxu1  ;;  %v813_v41 = vpop.f32.mrf.mxu0 }
 0x1c8   :  { %1050 = vst [vmem:[%s1658_s7 + $0x10] sm:$0xff] %v1189_v37  ;;  %1051 = vst [vmem:[%s1658_s7 + $0x18] sm:$0xff] %v1190_v38  ;;  %v741_v44 = vadd.f32 %v740_v39, %v1550_v14  ;;  %v814_v45 = vadd.f32 %v813_v41, %v1553_v15 }
 0x1c9   :  { %v742_v46 = vpop.f32.mrf.mxu1  ;;  %v815_v47 = vpop.f32.mrf.mxu0 }
 0x1ca   :  { %v1191_v49 = vpack.c.bf16 %v741_v44, %v739_v42  ;;  %v1192_v50 = vpack.c.bf16 %v814_v45, %v812_v43  ;;  %v743_v57 = vadd.f32 %v742_v46, %v1544_v12  ;;  %v816_v58 = vadd.f32 %v815_v47, %v1547_v13 }
 0x1cb   :  { %v744_v51 = vpop.f32.mrf.mxu1  ;;  %v817_v52 = vpop.f32.mrf.mxu0 }
 0x1cc   :  { %1052 = vst [vmem:[%s1658_s7 + $0x20] sm:$0xff] %v1191_v49  ;;  %1053 = vst [vmem:[%s1658_s7 + $0x28] sm:$0xff] %v1192_v50  ;;  %v745_v59 = vadd.f32 %v744_v51, %v1550_v14  ;;  %v818_v60 = vadd.f32 %v817_v52, %v1553_v15 }
 0x1cd   :  { %v748_v61 = vpop.f32.mrf.mxu1  ;;  %v821_v62 = vpop.f32.mrf.mxu0 }
 0x1ce   :  { %v1193_v63 = vpack.c.bf16 %v745_v59, %v743_v57  ;;  %v1194_v0 = vpack.c.bf16 %v818_v60, %v816_v58  ;;  %v749_v3 = vadd.f32 %v748_v61, %v1544_v12  ;;  %v822_v4 = vadd.f32 %v821_v62, %v1547_v13 }
 0x1cf   :  { %v750_v1 = vpop.f32.mrf.mxu1  ;;  %v823_v2 = vpop.f32.mrf.mxu0 }
 0x1d0   :  { %1054 = vst [vmem:[%s1658_s7 + $0x30] sm:$0xff] %v1193_v63  ;;  %1055 = vst [vmem:[%s1658_s7 + $0x38] sm:$0xff] %v1194_v0  ;;  %v751_v5 = vadd.f32 %v750_v1, %v1550_v14  ;;  %v824_v6 = vadd.f32 %v823_v2, %v1553_v15 }
 0x1d1   :  { %v752_v7 = vpop.f32.mrf.mxu1  ;;  %v825_v8 = vpop.f32.mrf.mxu0 }
 0x1d2   :  { %v1195_v9 = vpack.c.bf16 %v751_v5, %v749_v3  ;;  %v1196_v48 = vpack.c.bf16 %v824_v6, %v822_v4  ;;  %v753_v16 = vadd.f32 %v752_v7, %v1544_v12  ;;  %v826_v17 = vadd.f32 %v825_v8, %v1547_v13 }
 0x1d3   :  { %v754_v10 = vpop.f32.mrf.mxu1  ;;  %v827_v11 = vpop.f32.mrf.mxu0 }
 0x1d4   :  { %1056 = vst [vmem:[%s1658_s7 + $0x40] sm:$0xff] %v1195_v9  ;;  %1057 = vst [vmem:[%s1658_s7 + $0x48] sm:$0xff] %v1196_v48  ;;  %v755_v18 = vadd.f32 %v754_v10, %v1550_v14  ;;  %v828_v19 = vadd.f32 %v827_v11, %v1553_v15 }
 0x1d5   :  { %v758_v20 = vpop.f32.mrf.mxu1  ;;  %v831_v21 = vpop.f32.mrf.mxu0 }
 0x1d6   :  { %v1197_v53 = vpack.c.bf16 %v755_v18, %v753_v16  ;;  %v1198_v22 = vpack.c.bf16 %v828_v19, %v826_v17  ;;  %v759_v40 = vadd.f32 %v758_v20, %v1544_v12  ;;  %v832_v54 = vadd.f32 %v831_v21, %v1547_v13 }
 0x1d7   :  { %v760_v23 = vpop.f32.mrf.mxu1  ;;  %v833_v24 = vpop.f32.mrf.mxu0 }
 0x1d8   :  { %1058 = vst [vmem:[%s1658_s7 + $0x50] sm:$0xff] %v1197_v53  ;;  %1059 = vst [vmem:[%s1658_s7 + $0x58] sm:$0xff] %v1198_v22  ;;  %v761_v55 = vadd.f32 %v760_v23, %v1550_v14  ;;  %v834_v56 = vadd.f32 %v833_v24, %v1553_v15 }
 0x1d9   :  { %v762_v25 = vpop.f32.mrf.mxu1  ;;  %v835_v26 = vpop.f32.mrf.mxu0 }
 0x1da   :  { %v1199_v27 = vpack.c.bf16 %v761_v55, %v759_v40  ;;  %v1200_v28 = vpack.c.bf16 %v834_v56, %v832_v54  ;;  %v763_v31 = vadd.f32 %v762_v25, %v1544_v12  ;;  %v836_v32 = vadd.f32 %v835_v26, %v1547_v13 }
 0x1db   :  { %v764_v29 = vpop.f32.mrf.mxu1  ;;  %v837_v30 = vpop.f32.mrf.mxu0 }
 0x1dc   :  { %1060 = vst [vmem:[%s1658_s7 + $0x60] sm:$0xff] %v1199_v27  ;;  %1061 = vst [vmem:[%s1658_s7 + $0x68] sm:$0xff] %v1200_v28  ;;  %v765_v33 = vadd.f32 %v764_v29, %v1550_v14  ;;  %v838_v34 = vadd.f32 %v837_v30, %v1553_v15 }
 0x1de   :  { %v1201_v35 = vpack.c.bf16 %v765_v33, %v763_v31  ;;  %v1202_v36 = vpack.c.bf16 %v838_v34, %v836_v32 }
 0x1e0   :  { %1062 = vst [vmem:[%s1658_s7 + $0x70] sm:$0xff] %v1201_v35  ;;  %1063 = vst [vmem:[%s1658_s7 + $0x78] sm:$0xff] %v1202_v36 }

// kernel: asr_forward.4
= control target key start
LH: loop header
LB: loop body
LE: loop exit
PB: predicated region body
PF: predicated region fallthrough
CT: control target
= control target key end

     0   :  { %v8983_v1 = vmov 0   ;;  %v8975_v37 = vmov 0.0|0.0   ;;  %s8967_s2 = inlined_call_operand.vmem [shape: bf16[128,512], index: 2, kind: input, shape index: {}]   ;;  %s8968_s3 = inlined_call_operand.vmem [shape: bf16[128,512], index: 3, kind: input, shape index: {}]   ;;  %s8969_s4 = inlined_call_operand.vmem [shape: bf16[8,8,1], index: 4, kind: input, shape index: {}, may-alias: {4,5}]   ;;  %s8970_s5 = inlined_call_operand.vmem [shape: bf16[8,8,1], index: 5, kind: input, shape index: {}, may-alias: {4,5}]   ;;  %s8971_s0 = inlined_call_operand.vmem [shape: bf16[8,8,512], index: 0, kind: input, shape index: {}]   ;;  %s8972_s1 = inlined_call_operand.vmem [shape: bf16[8,8,512], index: 1, kind: input, shape index: {}]   ;;  %s8973_s6 = inlined_call_operand.vmem [shape: bf16[8,8,128], index: 6, kind: output, shape index: {0}]   ;;  %s8974_s7 = inlined_call_operand.vmem [shape: bf16[8,8,128], index: 7, kind: output, shape index: {1}]  }
   0x1   :  { %v6749_v0 = vld [vmem:[%s8967_s2 + $0xe4] ss:$16 sps:$4 sm:$0xff]   ;;  %330 = vmatprep.mubr.bf16.mxu0 %v8983_v1  ;;  %371 = vmatprep.mubr.bf16.mxu1 %v8983_v1  ;;  %v6756_v2 = vld [vmem:[%s8967_s2 + $0xe0] ss:$16 sps:$4 sm:$0xff]   ;;  %v6781_v6 = vld [vmem:[%s8967_s2 + $0xec] ss:$16 sps:$4 sm:$0xff]  }
   0x2   :  { %6059 = vset.pattern.permute.xlu0 %v8983_v1  ;;  %6060 = vset.pattern.permute.xlu1 %v8983_v1  ;;  %v6764_v3 = vld [vmem:[%s8967_s2 + $0xc4] ss:$16 sps:$4 sm:$0xff]   ;;  %v6770_v4 = vld [vmem:[%s8967_s2 + $0xc0] ss:$16 sps:$4 sm:$0xff]   ;;  %v6786_v7 = vld [vmem:[%s8967_s2 + $0xe8] ss:$16 sps:$4 sm:$0xff]  }
   0x3   :  { %298 = vmatprep.subr.bf16.mxu0 %v6749_v0  ;;  %v6776_v5 = vld [vmem:[%s8967_s2 + $0xa4] ss:$16 sps:$4 sm:$0xff]   ;;  %v6792_v8 = vld [vmem:[%s8967_s2 + $0xa0] ss:$16 sps:$4 sm:$0xff]   ;;  %339 = vmatprep.subr.bf16.mxu1 %v6781_v6  ;;  %v6805_v10 = vld [vmem:[%s8967_s2 + $0xcc] ss:$16 sps:$4 sm:$0xff]  }
   0x4   :  { %299 = vmatpush1.bf16.msra.mxu0 %v6756_v2  ;;  %v6799_v9 = vld [vmem:[%s8967_s2 + $0x84] ss:$16 sps:$4 sm:$0xff]   ;;  %340 = vmatpush1.bf16.msra.mxu1 %v6786_v7  ;;  %v6810_v11 = vld [vmem:[%s8967_s2 + $0xc8] ss:$16 sps:$4 sm:$0xff]   ;;  %v6817_v12 = vld [vmem:[%s8967_s2 + $0x80] ss:$16 sps:$4 sm:$0xff]  }
   0x5   :  { %300 = vmatprep.subr.bf16.mxu0 %v6764_v3  ;;  %341 = vmatprep.subr.bf16.mxu1 %v6805_v10  ;;  %v6822_v13 = vld [vmem:[%s8967_s2 + $0x64] ss:$16 sps:$4 sm:$0xff]   ;;  %v6827_v14 = vld [vmem:[%s8967_s2 + $0xac] ss:$16 sps:$4 sm:$0xff]   ;;  %v6834_v15 = vld [vmem:[%s8967_s2 + $0xa8] ss:$16 sps:$4 sm:$0xff]  }
   0x6   :  { %v6840_v16 = vld [vmem:[%s8967_s2 + $0x8c] ss:$16 sps:$4 sm:$0xff]   ;;  %v6846_v17 = vld [vmem:[%s8967_s2 + $0x60] ss:$16 sps:$4 sm:$0xff]   ;;  %v6852_v18 = vld [vmem:[%s8967_s2 + $0x44] ss:$16 sps:$4 sm:$0xff]  }
   0x7   :  { %v6858_v19 = vld [vmem:[%s8967_s2 + $0x88] ss:$16 sps:$4 sm:$0xff]   ;;  %v6864_v20 = vld [vmem:[%s8967_s2 + $0x6c] ss:$16 sps:$4 sm:$0xff]   ;;  %v6870_v21 = vld [vmem:[%s8967_s2 + $0x40] ss:$16 sps:$4 sm:$0xff]  }
   0x8   :  { %301 = vmatpush1.bf16.msra.mxu0 %v6770_v4  ;;  %342 = vmatpush1.bf16.msra.mxu1 %v6810_v11  ;;  %v6875_v22 = vld [vmem:[%s8967_s2 + $0x24] ss:$16 sps:$4 sm:$0xff]   ;;  %v6882_v23 = vld [vmem:[%s8967_s2 + $0x68] ss:$16 sps:$4 sm:$0xff]   ;;  %v6888_v24 = vld [vmem:[%s8967_s2 + $0x4c] ss:$16 sps:$4 sm:$0xff]  }
   0x9   :  { %302 = vmatprep.subr.bf16.mxu0 %v6776_v5  ;;  %343 = vmatprep.subr.bf16.mxu1 %v6827_v14  ;;  %v6894_v25 = vld [vmem:[%s8967_s2 + $0x20] ss:$16 sps:$4 sm:$0xff]   ;;  %v6900_v26 = vld [vmem:[%s8967_s2 + $0x4] ss:$16 sps:$4 sm:$0xff]   ;;  %v6906_v27 = vld [vmem:[%s8967_s2 + $0x48] ss:$16 sps:$4 sm:$0xff]  }
   0xa   :  { %v6912_v28 = vld [vmem:[%s8967_s2 + $0x2c] ss:$16 sps:$4 sm:$0xff]   ;;  %v6918_v29 = vld [vmem:[%s8967_s2] ss:$16 sps:$4 sm:$0xff]   ;;  %v6923_v30 = vld [vmem:[%s8968_s3 + $0xe4] ss:$16 sps:$4 sm:$0xff]  }
   0xb   :  { %v6930_v31 = vld [vmem:[%s8967_s2 + $0x28] ss:$16 sps:$4 sm:$0xff]   ;;  %v6936_v32 = vld [vmem:[%s8967_s2 + $0xc] ss:$16 sps:$4 sm:$0xff]   ;;  %v6102_v33 = vld [vmem:[%s8968_s3 + $0xe0] ss:$16 sps:$4 sm:$0xff]  }
   0xc   :  { %303 = vmatpush1.bf16.msra.mxu0 %v6792_v8  ;;  %344 = vmatpush1.bf16.msra.mxu1 %v6834_v15  ;;  %v6110_v34 = vld [vmem:[%s8968_s3 + $0xc4] ss:$16 sps:$4 sm:$0xff]   ;;  %v6950_v35 = vld [vmem:[%s8967_s2 + $0x8] ss:$16 sps:$4 sm:$0xff]   ;;  %v6956_v36 = vld [vmem:[%s8968_s3 + $0xec] ss:$16 sps:$4 sm:$0xff]  }
   0xd   :  { %304 = vmatprep.subr.bf16.mxu0 %v6799_v9  ;;  %345 = vmatprep.subr.bf16.mxu1 %v6840_v16  ;;  %v6962_v38 = vld [vmem:[%s8968_s3 + $0xc0] ss:$16 sps:$4 sm:$0xff]   ;;  %v6116_v39 = vld [vmem:[%s8968_s3 + $0xa4] ss:$16 sps:$4 sm:$0xff]   ;;  %v6972_v40 = vld [vmem:[%s8968_s3 + $0xe8] ss:$16 sps:$4 sm:$0xff]  }
   0xe   :  { %v6978_v41 = vld [vmem:[%s8968_s3 + $0xcc] ss:$16 sps:$4 sm:$0xff]   ;;  %v6984_v42 = vld [vmem:[%s8968_s3 + $0xa0] ss:$16 sps:$4 sm:$0xff]   ;;  %v6989_v43 = vld [vmem:[%s8968_s3 + $0x84] ss:$16 sps:$4 sm:$0xff]  }
   0xf   :  { %v6996_v44 = vld [vmem:[%s8968_s3 + $0xc8] ss:$16 sps:$4 sm:$0xff]   ;;  %v7001_v45 = vld [vmem:[%s8968_s3 + $0x80] ss:$16 sps:$4 sm:$0xff]   ;;  %v7007_v46 = vld [vmem:[%s8968_s3 + $0xac] ss:$16 sps:$4 sm:$0xff]  }
  0x10   :  { %305 = vmatpush1.bf16.msra.mxu0 %v6817_v12  ;;  %346 = vmatpush1.bf16.msra.mxu1 %v6858_v19  ;;  %v7013_v47 = vld [vmem:[%s8968_s3 + $0x64] ss:$16 sps:$4 sm:$0xff]   ;;  %v7018_v48 = vld [vmem:[%s8968_s3 + $0xa8] ss:$16 sps:$4 sm:$0xff]   ;;  %v408_v49 = vld [vmem:[%s8969_s4] sm:$0xf] }
  0x11   :  { %306 = vmatprep.subr.bf16.mxu0 %v6822_v13  ;;  %347 = vmatprep.subr.bf16.mxu1 %v6864_v20  ;;  %vm409_vm0 = vcmp.gt.bf16.partialorder %v408_v49, 0  ;;  %v5501_v50 = vld [vmem:[%s8970_s5 + $0x1c] sm:$0xf]  ;;  %v5618_v51 = vld [vmem:[%s8969_s4 + $0x8] sm:$0xf] }
  0x12   :  { %v410_v52 = vsel %vm409_vm0, 65537, %v8983_v1  ;;  %vm739_vm1 = vcmp.gt.bf16.partialorder %v5501_v50, 0  ;;  %vm1732_vm2 = vcmp.gt.bf16.partialorder %v5618_v51, 0  ;;  %v5696_v53 = vld [vmem:[%s8969_s4 + $0xc] sm:$0xf] }
  0x13   :  { %v7040_v54 = vld [vmem:[%s8968_s3 + $0x8c] ss:$16 sps:$4 sm:$0xff]   ;;  %v411_v55 = vunpack.c.l.b16 %v410_v52  ;;  %v740_v56 = vsel %vm739_vm1, 65537, %v8983_v1  ;;  %v1733_v57 = vsel %vm1732_vm2, 65537, %v8983_v1  ;;  %vm2394_vm3 = vcmp.gt.bf16.partialorder %v5696_v53, 0 }
  0x14   :  { %307 = vmatpush1.bf16.msra.mxu0 %v6846_v17  ;;  %348 = vmatpush1.bf16.msra.mxu1 %v6882_v23  ;;  %v7047_v58 = vld [vmem:[%s8968_s3 + $0x60] ss:$16 sps:$4 sm:$0xff]   ;;  %v7052_v59 = vld [vmem:[%s8968_s3 + $0x44] ss:$16 sps:$4 sm:$0xff]   ;;  %v741_v60 = vunpack.c.l.b16 %v740_v56  ;;  %v7061_v62 = vld [vmem:[%s8968_s3 + $0x88] ss:$16 sps:$4 sm:$0xff]  }
  0x15   :  { %308 = vmatprep.subr.bf16.mxu0 %v6852_v18  ;;  %349 = vmatprep.subr.bf16.mxu1 %v6888_v24  ;;  %9023 = vst [vmem:[#allocation6_spill] sm:$0xff] %v7052_v59  ;;  %v5774_v61 = vld [vmem:[%s8969_s4 + $0x10] sm:$0xf]  ;;  %v7066_v63 = vld [vmem:[%s8968_s3 + $0x6c] ss:$16 sps:$4 sm:$0xff]   ;;  %vm412_vm4 = vcmp.ne.s32.totalorder %v411_v55, 0 }
  0x16   :  { %vm742_vm5 = vcmp.ne.s32.totalorder %v741_v60, 0  ;;  %v7075_v49 = vld [vmem:[%s8968_s3 + $0x40] ss:$16 sps:$4 sm:$0xff]   ;;  %vm3056_vm6 = vcmp.gt.bf16.partialorder %v5774_v61, 0  ;;  %v5852_v50 = vld [vmem:[%s8969_s4 + $0x14] sm:$0xf] }
  0x17   :  { %9024 = vst [vmem:[#allocation7_spill] sm:$0xff] %v7075_v49  ;;  %v7084_v51 = vld [vmem:[%s8968_s3 + $0x24] ss:$16 sps:$4 sm:$0xff]   ;;  %v7089_v52 = vld [vmem:[%s8968_s3 + $0x68] ss:$16 sps:$4 sm:$0xff]   ;;  %v743_v53 = vsel %vm742_vm5, 1, %v8983_v1 }
  0x18   :  { %309 = vmatpush1.bf16.msra.mxu0 %v6870_v21  ;;  %350 = vmatpush1.bf16.msra.mxu1 %v6906_v27  ;;  %9025 = vst [vmem:[#allocation8_spill] sm:$0xff] %v7084_v51  ;;  %9026 = vst [vmem:[#allocation9_spill] sm:$0xff] %v7089_v52  ;;  %v7096_v55 = vld [vmem:[%s8968_s3 + $0x4c] ss:$16 sps:$4 sm:$0xff]   ;;  %v5930_v60 = vld [vmem:[%s8969_s4 + $0x18] sm:$0xf] }
  0x19   :  { %310 = vmatprep.subr.bf16.mxu0 %v6875_v22  ;;  %351 = vmatprep.subr.bf16.mxu1 %v6912_v28  ;;  %v7107_v61 = vld [vmem:[%s8968_s3 + $0x20] ss:$16 sps:$4 sm:$0xff]   ;;  %vm3718_vm8 = vcmp.gt.bf16.partialorder %v5852_v50, 0  ;;  %vm4380_vm10 = vcmp.gt.bf16.partialorder %v5930_v60, 0 }
  0x1a   :  { %9027 = vst [vmem:[#allocation10_spill] sm:$0xff] %v7107_v61  ;;  %v4381_v60 = vsel %vm4380_vm10, 65537, %v8983_v1 }
  0x1c   :  { %311 = vmatpush1.bf16.msra.mxu0 %v6894_v25  ;;  %352 = vmatpush1.bf16.msra.mxu1 %v6930_v31 }
  0x1d   :  { %312 = vmatprep.subr.bf16.mxu0 %v6900_v26  ;;  %353 = vmatprep.subr.bf16.mxu1 %v6936_v32 }
  0x20   :  { %313 = vmatpush1.bf16.msra.mxu0 %v6918_v29  ;;  %354 = vmatpush1.bf16.msra.mxu1 %v6950_v35 }
  0x21   :  { %627 = vmatprep.subr.bf16.mxu0 %v6923_v30  ;;  %668 = vmatprep.subr.bf16.mxu1 %v6956_v36 }
  0x23   :  { %331 = vmatmul.mubr.bf16.vlgmr.msra.gmra.mxu0 %v8975_v37  ;;  %372 = vmatmul.mubr.bf16.vlgmr.msra.gmra.mxu1 %v8975_v37  ;;  %v7125_v37 = vld [vmem:[%s8968_s3 + $0x2c] ss:$16 sps:$4 sm:$0xff]  }
  0x24   :  { %628 = vmatpush1.bf16.msra.mxu0 %v6102_v33  ;;  %659 = vmatprep.mubr.bf16.mxu0 %v8983_v1  ;;  %v1734_v33 = vunpack.c.l.b16 %v1733_v57  ;;  %v3057_v57 = vsel %vm3056_vm6, 65537, %v8983_v1 }
  0x25   :  { %629 = vmatprep.subr.bf16.mxu0 %v6110_v34  ;;  %669 = vmatpush1.bf16.msra.mxu1 %v6972_v40  ;;  %v413_v34 = vsel %vm412_vm4, 1, %v8983_v1  ;;  %v3058_v50 = vunpack.c.l.b16 %v3057_v57 }
  0x26   :  { %670 = vmatprep.subr.bf16.mxu1 %v6978_v41  ;;  %700 = vmatprep.mubr.bf16.mxu1 %v8983_v1  ;;  %vm1735_vm7 = vcmp.ne.s32.totalorder %v1734_v33, 0  ;;  %v7113_v33 = vld [vmem:[%s8968_s3 + $0x4] ss:$16 sps:$4 sm:$0xff]  }
  0x27   :  { %415 = vperm.xlu0 %6059, %v413_v34   ;;  %9028 = vst [vmem:[#allocation11_spill] sm:$0xff] %v7113_v33  ;;  %v7118_v34 = vld [vmem:[%s8968_s3 + $0x48] ss:$16 sps:$4 sm:$0xff]   ;;  %vm3059_vm11 = vcmp.ne.s32.totalorder %v3058_v50, 0  ;;  %v4382_v50 = vunpack.c.l.b16 %v4381_v60 }
  0x28   :  { %630 = vmatpush1.bf16.msra.mxu0 %v6962_v38 }
  0x29   :  { %631 = vmatprep.subr.bf16.mxu0 %v6116_v39  ;;  %671 = vmatpush1.bf16.msra.mxu1 %v6996_v44  ;;  %v2395_v39 = vsel %vm2394_vm3, 65537, %v8983_v1  ;;  %vm4383_vm14 = vcmp.ne.s32.totalorder %v4382_v50, 0 }
  0x2a   :  { %672 = vmatprep.subr.bf16.mxu1 %v7007_v46  ;;  %v2396_v56 = vunpack.c.l.b16 %v2395_v39  ;;  %v1736_v39 = vsel %vm1735_vm7, 1, %v8983_v1 }
  0x2b   :  { %745 = vperm.xlu0 %6059, %v743_v53   ;;  %v3719_v53 = vsel %vm3718_vm8, 65537, %v8983_v1 }
  0x2c   :  { %632 = vmatpush1.bf16.msra.mxu0 %v6984_v42  ;;  %vm2397_vm9 = vcmp.ne.s32.totalorder %v2396_v56, 0  ;;  %v7142_v56 = vld [vmem:[%s8968_s3 + $0x28] ss:$16 sps:$4 sm:$0xff]  }
  0x2d   :  { %633 = vmatprep.subr.bf16.mxu0 %v6989_v43  ;;  %673 = vmatpush1.bf16.msra.mxu1 %v7018_v48  ;;  %v2398_v57 = vsel %vm2397_vm9, 1, %v8983_v1 }
  0x2e   :  { %674 = vmatprep.subr.bf16.mxu1 %v7040_v54 }
  0x2f   :  { %1738 = vperm.xlu0 %6059, %v1736_v39   ;;  %v7158_v39 = vld [vmem:[%s8968_s3 + $0x8] ss:$16 sps:$4 sm:$0xff]  }
  0x30   :  { %634 = vmatpush1.bf16.msra.mxu0 %v7001_v45 }
  0x31   :  { %635 = vmatprep.subr.bf16.mxu0 %v7013_v47  ;;  %675 = vmatpush1.bf16.msra.mxu1 %v7061_v62 }
  0x32   :  { %676 = vmatprep.subr.bf16.mxu1 %v7066_v63 }
  0x33   :  { %2400 = vperm.xlu0 %6059, %v2398_v57  }
  0x34   :  { %636 = vmatpush1.bf16.msra.mxu0 %v7047_v58 }
  0x35   :  { %637 = vmatprep.subr.bf16.mxu0 %v7052_v59  ;;  %677 = vmatpush1.bf16.msra.mxu1 %v7089_v52  ;;  %v6008_v59 = vld [vmem:[%s8969_s4 + $0x1c] sm:$0xf]  ;;  %v3720_v52 = vunpack.c.l.b16 %v3719_v53 }
  0x36   :  { %678 = vmatprep.subr.bf16.mxu1 %v7096_v55  ;;  %vm5042_vm12 = vcmp.gt.bf16.partialorder %v6008_v59, 0  ;;  %v9029_v59 = vmov 0.0|0.0  }
  0x37   :  { %vm3721_vm13 = vcmp.ne.s32.totalorder %v3720_v52, 0  ;;  %v5043_v53 = vsel %vm5042_vm12, 65537, %v8983_v1 }
  0x38   :  { %638 = vmatpush1.bf16.msra.mxu0 %v7075_v49  ;;  %v7136_v49 = vld [vmem:[%s8968_s3] ss:$16 sps:$4 sm:$0xff]   ;;  %v3722_v57 = vsel %vm3721_vm13, 1, %v8983_v1 }
  0x39   :  { %639 = vmatprep.subr.bf16.mxu0 %v7084_v51  ;;  %v7149_v51 = vld [vmem:[%s8968_s3 + $0xc] ss:$16 sps:$4 sm:$0xff]   ;;  %679 = vmatpush1.bf16.msra.mxu1 %v7118_v34 }
  0x3a   :  { %680 = vmatprep.subr.bf16.mxu1 %v7125_v37 }
  0x3c   :  { %640 = vmatpush1.bf16.msra.mxu0 %v7107_v61  ;;  %v3060_v61 = vsel %vm3059_vm11, 1, %v8983_v1 }
  0x3d   :  { %641 = vmatprep.subr.bf16.mxu0 %v7113_v33  ;;  %681 = vmatpush1.bf16.msra.mxu1 %v7142_v56  ;;  %v5044_v33 = vunpack.c.l.b16 %v5043_v53 }
  0x3e   :  { %682 = vmatprep.subr.bf16.mxu1 %v7149_v51  ;;  %3062 = vperm.xlu0 %6059, %v3060_v61  }
  0x3f   :  { %vm5045_vm15 = vcmp.ne.s32.totalorder %v5044_v33, 0 }
  0x40   :  { %642 = vmatpush1.bf16.msra.mxu0 %v7136_v49 }
  0x41   :  { %958 = vmatprep.subr.bf16.mxu0 %v6749_v0  ;;  %683 = vmatpush1.bf16.msra.mxu1 %v7158_v39  ;;  %v4384_v0 = vsel %vm4383_vm14, 1, %v8983_v1 }
  0x42   :  { %3724 = vperm.xlu0 %6059, %v3722_v57   ;;  %999 = vmatprep.subr.bf16.mxu1 %v6781_v6  ;;  %v5735_v6 = vld [vmem:[%s8970_s5 + $0x10] sm:$0xf] }
  0x43   :  { %660 = vmatmul.mubr.bf16.vlgmr.msra.gmra.mxu0 %v9029_v59  ;;  %vm2725_vm3 = vcmp.gt.bf16.partialorder %v5735_v6, 0 }
  0x44   :  { %959 = vmatpush1.bf16.msra.mxu0 %v6756_v2  ;;  %990 = vmatprep.mubr.bf16.mxu0 %v8983_v1  ;;  %v5046_v2 = vsel %vm5045_vm15, 1, %v8983_v1 }
  0x45   :  { %960 = vmatprep.subr.bf16.mxu0 %v6764_v3  ;;  %701 = vmatmul.mubr.bf16.vlgmr.msra.gmra.mxu1 %v9029_v59  ;;  %v5540_v3 = vld [vmem:[%s8969_s4 + $0x4] sm:$0xf] }
  0x46   :  { %1000 = vmatpush1.bf16.msra.mxu1 %v6786_v7  ;;  %4386 = vperm.xlu0 %6059, %v4384_v0   ;;  %vm1070_vm0 = vcmp.gt.bf16.partialorder %v5540_v3, 0  ;;  %v100_v0 = vld [vmem:[%s8971_s0 + $0x8] sm:$0xff] }
  0x47   :  { %1001 = vmatprep.subr.bf16.mxu1 %v6805_v10  ;;  %1031 = vmatprep.mubr.bf16.mxu1 %v8983_v1  ;;  %v1071_v7 = vsel %vm1070_vm0, 65537, %v8983_v1  ;;  %v104_v6 = vunpack.c.h.bf16 %v100_v0 }
  0x48   :  { %961 = vmatpush1.bf16.msra.mxu0 %v6770_v4  ;;  %v5579_v4 = vld [vmem:[%s8970_s5 + $0x18] sm:$0xf] }
  0x49   :  { %962 = vmatprep.subr.bf16.mxu0 %v6776_v5  ;;  %vm1401_vm1 = vcmp.gt.bf16.partialorder %v5579_v4, 0  ;;  %v5657_v5 = vld [vmem:[%s8970_s5 + $0x14] sm:$0xf] }
  0x4a   :  { %1002 = vmatpush1.bf16.msra.mxu1 %v6810_v11  ;;  %5048 = vperm.xlu0 %6059, %v5046_v2   ;;  %vm2063_vm2 = vcmp.gt.bf16.partialorder %v5657_v5, 0 }
  0x4b   :  { %1003 = vmatprep.subr.bf16.mxu1 %v6827_v14  ;;  %v2064_v11 = vsel %vm2063_vm2, 65537, %v8983_v1 }
  0x4c   :  { %963 = vmatpush1.bf16.msra.mxu0 %v6792_v8  ;;  %v1402_v8 = vsel %vm1401_vm1, 65537, %v8983_v1 }
  0x4d   :  { %964 = vmatprep.subr.bf16.mxu0 %v6799_v9  ;;  %v1072_v9 = vunpack.c.l.b16 %v1071_v7  ;;  %v1403_v10 = vunpack.c.l.b16 %v1402_v8 }
  0x4e   :  { %1004 = vmatpush1.bf16.msra.mxu1 %v6834_v15  ;;  %v2726_v15 = vsel %vm2725_vm3, 65537, %v8983_v1 }
  0x4f   :  { %1005 = vmatprep.subr.bf16.mxu1 %v6840_v16  ;;  %vm1073_vm4 = vcmp.ne.s32.totalorder %v1072_v9, 0  ;;  %vm1404_vm5 = vcmp.ne.s32.totalorder %v1403_v10, 0  ;;  %v103_v10 = vunpack.c.l.bf16 %v100_v0 }
  0x50   :  { %965 = vmatpush1.bf16.msra.mxu0 %v6817_v12  ;;  %v5813_v12 = vld [vmem:[%s8970_s5 + $0xc] sm:$0xf]  ;;  %v1074_v14 = vsel %vm1073_vm4, 1, %v8983_v1  ;;  %v1405_v16 = vsel %vm1404_vm5, 1, %v8983_v1 }
  0x51   :  { %966 = vmatprep.subr.bf16.mxu0 %v6822_v13  ;;  %v2065_v13 = vunpack.c.l.b16 %v2064_v11  ;;  %1076 = vperm.xlu1 %6060, %v1074_v14   ;;  %vm3387_vm6 = vcmp.gt.bf16.partialorder %v5813_v12, 0 }
  0x52   :  { %1006 = vmatpush1.bf16.msra.mxu1 %v6858_v19  ;;  %v3388_v19 = vsel %vm3387_vm6, 65537, %v8983_v1 }
  0x53   :  { %1007 = vmatprep.subr.bf16.mxu1 %v6864_v20  ;;  %vm2066_vm7 = vcmp.ne.s32.totalorder %v2065_v13, 0 }
  0x54   :  { %967 = vmatpush1.bf16.msra.mxu0 %v6846_v17  ;;  %v5891_v17 = vld [vmem:[%s8970_s5 + $0x8] sm:$0xf]  ;;  %v2067_v20 = vsel %vm2066_vm7, 1, %v8983_v1 }
  0x55   :  { %968 = vmatprep.subr.bf16.mxu0 %v6852_v18  ;;  %v2727_v18 = vunpack.c.l.b16 %v2726_v15  ;;  %1407 = vperm.xlu1 %6060, %v1405_v16   ;;  %vm4049_vm8 = vcmp.gt.bf16.partialorder %v5891_v17, 0 }
  0x56   :  { %1008 = vmatpush1.bf16.msra.mxu1 %v6882_v23  ;;  %v4050_v23 = vsel %vm4049_vm8, 65537, %v8983_v1 }
  0x57   :  { %1009 = vmatprep.subr.bf16.mxu1 %v6888_v24  ;;  %vm2728_vm9 = vcmp.ne.s32.totalorder %v2727_v18, 0  ;;  %v5464_v18 = vld [vmem:[%s8972_s1 + $0x70] sm:$0xff] }
  0x58   :  { %969 = vmatpush1.bf16.msra.mxu0 %v6870_v21  ;;  %v5969_v21 = vld [vmem:[%s8970_s5 + $0x4] sm:$0xf]  ;;  %v2729_v24 = vsel %vm2728_vm9, 1, %v8983_v1 }
  0x59   :  { %970 = vmatprep.subr.bf16.mxu0 %v6875_v22  ;;  %v3389_v22 = vunpack.c.l.b16 %v3388_v19  ;;  %2069 = vperm.xlu1 %6060, %v2067_v20   ;;  %vm4711_vm10 = vcmp.gt.bf16.partialorder %v5969_v21, 0  ;;  %v430_v19 = vunpack.c.l.bf16 %v5464_v18  ;;  %v431_v21 = vunpack.c.h.bf16 %v5464_v18 }
  0x5a   :  { %1010 = vmatpush1.bf16.msra.mxu1 %v6906_v27  ;;  %v4712_v27 = vsel %vm4711_vm10, 65537, %v8983_v1 }
  0x5b   :  { %1011 = vmatprep.subr.bf16.mxu1 %v6912_v28  ;;  %vm3390_vm11 = vcmp.ne.s32.totalorder %v3389_v22, 0 }
  0x5c   :  { %971 = vmatpush1.bf16.msra.mxu0 %v6894_v25  ;;  %v5370_v25 = vld [vmem:[%s8970_s5] sm:$0xf]  ;;  %v3391_v28 = vsel %vm3390_vm11, 1, %v8983_v1 }
  0x5d   :  { %972 = vmatprep.subr.bf16.mxu0 %v6900_v26  ;;  %v4051_v26 = vunpack.c.l.b16 %v4050_v23  ;;  %2731 = vperm.xlu1 %6060, %v2729_v24   ;;  %vm5371_vm12 = vcmp.gt.bf16.partialorder %v5370_v25, 0 }
  0x5e   :  { %1012 = vmatpush1.bf16.msra.mxu1 %v6930_v31 }
  0x5f   :  { %1013 = vmatprep.subr.bf16.mxu1 %v6936_v32  ;;  %vm4052_vm13 = vcmp.ne.s32.totalorder %v4051_v26, 0 }
  0x60   :  { %973 = vmatpush1.bf16.msra.mxu0 %v6918_v29  ;;  %v4713_v29 = vunpack.c.l.b16 %v4712_v27  ;;  %v4053_v31 = vsel %vm4052_vm13, 1, %v8983_v1 }
  0x61   :  { %1289 = vmatprep.subr.bf16.mxu0 %v6923_v30  ;;  %v5372_v30 = vsel %vm5371_vm12, 65537, %v8983_v1  ;;  %3393 = vperm.xlu1 %6060, %v3391_v28  }
  0x62   :  { %1014 = vmatpush1.bf16.msra.mxu1 %v6950_v35  ;;  %vm4714_vm14 = vcmp.ne.s32.totalorder %v4713_v29, 0  ;;  %v5373_v32 = vunpack.c.l.b16 %v5372_v30 }
  0x63   :  { %1330 = vmatprep.subr.bf16.mxu1 %v6956_v36  ;;  %v4715_v35 = vsel %vm4714_vm14, 1, %v8983_v1  ;;  %v99_v36 = vld [vmem:[%s8971_s0] sm:$0xff] }
  0x64   :  { %vm5374_vm15 = vcmp.ne.s32.totalorder %v5373_v32, 0  ;;  %v101_v61 = vunpack.c.l.bf16 %v99_v36  ;;  %v102_v33 = vunpack.c.h.bf16 %v99_v36 }
  0x65   :  { %4055 = vperm.xlu1 %6060, %v4053_v31   ;;  %v5375_v52 = vsel %vm5374_vm15, 1, %v8983_v1 }
  0x69   :  { %4717 = vperm.xlu1 %6060, %v4715_v35  }
  0x6d   :  { %5377 = vperm.xlu1 %6060, %v5375_v52   ;;  %v5465_v52 = vld [vmem:[%s8972_s1 + $0x78] sm:$0xff] }
  0xe3   :  { %v332_v60 = vpop.f32.mrf.mxu0  ;;  %v373_v4 = vpop.f32.mrf.mxu1 }
  0xe4   :  { %v380_v50 = vadd.f32 %v332_v60, %v101_v61  ;;  %v382_v13 = vadd.f32 %v373_v4, %v103_v10 }
  0xe5   :  { %v334_v53 = vpop.f32.mrf.mxu0  ;;  %v375_v7 = vpop.f32.mrf.mxu1 }
  0xe6   :  { %v5461_v59 = vmul.f32 -1.442695, %v380_v50  ;;  %v381_v57 = vadd.f32 %v334_v53, %v102_v33  ;;  %v383_v9 = vadd.f32 %v375_v7, %v104_v6  ;;  %v433_v53 = vunpack.c.h.bf16 %v5465_v52 }
  0xe7   :  { %v336_v2 = vpop.f32.mrf.mxu0  ;;  %v377_v8 = vpop.f32.mrf.mxu1 }
  0xe8   :  { %6445 = vpow2.f32 %v5461_v59  ;;  %v5462_v3 = vmul.f32 -1.442695, %v381_v57  ;;  %v5463_v12 = vmul.f32 -1.442695, %v383_v9  ;;  %v432_v57 = vunpack.c.l.bf16 %v5465_v52  ;;  %v7434_v52 = vld [vmem:[%s8967_s2 + $0x64] ss:$16 sps:$4 sm:$0xff]  }
  0xe9   :  { %v337_v5 = vpop.f32.mrf.mxu0  ;;  %v378_v11 = vpop.f32.mrf.mxu1 }
  0xea   :  { %6447 = vpow2.f32 %v5462_v3  ;;  %v7262_v11 = vpop.permute.xlu0 %415 }
  0xeb   :  { %6449 = vpow2.f32 %v5463_v12  ;;  %vm417_vm0 = vcmp.eq.s32.totalorder %v7262_v11, 1 }
  0xec   :  { %6451 = vtanh.f32 %v382_v13  ;;  %vm6045_vm1 = vmpackc.low %vm417_vm0, %vm417_vm0 }
  0xf5   :  { %v6446_v14 = vpop.eup %6445 }
  0xf6   :  { %v387_v15 = vadd.f32 1.0, %v6446_v14 }
  0xf7   :  { %v6448_v16 = vpop.eup %6447 }
  0xf8   :  { %6453 = vrcp.f32 %v387_v15  ;;  %v393_v17 = vadd.f32 1.0, %v6448_v16  ;;  %v6450_v20 = vpop.eup %6449  ;;  %v6701_v16 = vld [vmem:[%s8968_s3 + $0xe0] ss:$16 sps:$4 sm:$0xff]  }
  0xf9   :  { %v6452_v22 = vpop.eup %6451  ;;  %v400_v26 = vadd.f32 1.0, %v6450_v20 }
  0xfa   :  { %6455 = vrcp.f32 %v393_v17  ;;  %v6702_v17 = vld [vmem:[%s8968_s3 + $0xc4] ss:$16 sps:$4 sm:$0xff]  }
 0x103   :  { %v661_v23 = vpop.f32.mrf.mxu0 }
 0x104   :  { %v709_v24 = vadd.f32 %v661_v23, %v430_v19 }
 0x105   :  { %v6454_v25 = vpop.eup %6453  ;;  %v663_v27 = vpop.f32.mrf.mxu0 }
 0x106   :  { %v404_v28 = vmul.f32 %v6454_v25, %v6452_v22  ;;  %v5498_v29 = vmul.f32 -1.442695, %v709_v24  ;;  %v710_v30 = vadd.f32 %v663_v27, %v431_v21  ;;  %v702_v61 = vpop.f32.mrf.mxu1  ;;  %v7367_v24 = vld [vmem:[%s8967_s2 + $0xc0] ss:$16 sps:$4 sm:$0xff]   ;;  %v7372_v25 = vld [vmem:[%s8967_s2 + $0xc8] ss:$16 sps:$4 sm:$0xff]  }
 0x107   :  { %v6456_v31 = vpop.eup %6455  ;;  %v665_v32 = vpop.f32.mrf.mxu0  ;;  %v711_v3 = vadd.f32 %v702_v61, %v432_v57  ;;  %v7386_v27 = vld [vmem:[%s8967_s2 + $0xa4] ss:$16 sps:$4 sm:$0xff]   ;;  %v7439_v61 = vld [vmem:[%s8967_s2 + $0x6c] ss:$16 sps:$4 sm:$0xff]   ;;  %v7468_v57 = vld [vmem:[%s8967_s2 + $0x40] ss:$16 sps:$4 sm:$0xff]  }
 0x108   :  { %v403_v35 = vmul.f32 0.0, %v6456_v31  ;;  %6457 = vpow2.f32 %v5498_v29  ;;  %v5499_v36 = vmul.f32 -1.442695, %v710_v30  ;;  %v704_v50 = vpop.f32.mrf.mxu1  ;;  %v7396_v29 = vld [vmem:[%s8967_s2 + $0xa0] ss:$16 sps:$4 sm:$0xff]  }
 0x109   :  { %6459 = vrcp.f32 %v400_v26  ;;  %v666_v33 = vpop.f32.mrf.mxu0  ;;  %v712_v2 = vadd.f32 %v704_v50, %v433_v53  ;;  %v7377_v26 = vld [vmem:[%s8967_s2 + $0xcc] ss:$16 sps:$4 sm:$0xff]   ;;  %v7401_v30 = vld [vmem:[%s8967_s2 + $0xa8] ss:$16 sps:$4 sm:$0xff]   ;;  %v7410_v31 = vld [vmem:[%s8967_s2 + $0x84] ss:$16 sps:$4 sm:$0xff]  }
 0x10a   :  { %v7259_v60 = vadd.f32 %v404_v28, %v403_v35  ;;  %6461 = vpow2.f32 %v5499_v36  ;;  %v706_v59 = vpop.f32.mrf.mxu1  ;;  %v7391_v28 = vld [vmem:[%s8967_s2 + $0xac] ss:$16 sps:$4 sm:$0xff]   ;;  %v7420_v35 = vld [vmem:[%s8967_s2 + $0x80] ss:$16 sps:$4 sm:$0xff]   ;;  %v7425_v36 = vld [vmem:[%s8967_s2 + $0x88] ss:$16 sps:$4 sm:$0xff]  }
 0x10b   :  { %v5500_v4 = vmul.f32 -1.442695, %v712_v2  ;;  %v7415_v32 = vld [vmem:[%s8967_s2 + $0x8c] ss:$16 sps:$4 sm:$0xff]   ;;  %v7444_v33 = vld [vmem:[%s8967_s2 + $0x60] ss:$16 sps:$4 sm:$0xff]  }
 0x10c   :  { %6463 = vtanh.f32 %v7259_v60  ;;  %v707_v0 = vpop.f32.mrf.mxu1  ;;  %v7449_v50 = vld [vmem:[%s8967_s2 + $0x68] ss:$16 sps:$4 sm:$0xff]   ;;  %v7458_v53 = vld [vmem:[%s8967_s2 + $0x44] ss:$16 sps:$4 sm:$0xff]   ;;  %v7463_v59 = vld [vmem:[%s8967_s2 + $0x4c] ss:$16 sps:$4 sm:$0xff]  }
 0x10d   :  { %6465 = vtanh.f32 %v711_v3  ;;  %v7473_v0 = vld [vmem:[%s8967_s2 + $0x48] ss:$16 sps:$4 sm:$0xff]   ;;  %v7482_v2 = vld [vmem:[%s8967_s2 + $0x24] ss:$16 sps:$4 sm:$0xff]   ;;  %v7487_v3 = vld [vmem:[%s8967_s2 + $0x2c] ss:$16 sps:$4 sm:$0xff]  }
 0x10e   :  { %6467 = vpow2.f32 %v5500_v4  ;;  %v7492_v4 = vld [vmem:[%s8967_s2 + $0x20] ss:$16 sps:$4 sm:$0xff]  }
 0x115   :  { %v6458_v5 = vpop.eup %6457 }
 0x116   :  { %v6460_v6 = vpop.eup %6459  ;;  %v716_v7 = vadd.f32 1.0, %v6458_v5  ;;  %v7497_v5 = vld [vmem:[%s8967_s2 + $0x28] ss:$16 sps:$4 sm:$0xff]  }
 0x117   :  { %v6462_v8 = vpop.eup %6461 }
 0x118   :  { %6469 = vrcp.f32 %v716_v7  ;;  %v722_v9 = vadd.f32 1.0, %v6462_v8  ;;  %v7511_v7 = vld [vmem:[%s8967_s2 + $0xc] ss:$16 sps:$4 sm:$0xff]   ;;  %v7516_v8 = vld [vmem:[%s8967_s2] ss:$16 sps:$4 sm:$0xff]  }
 0x119   :  { %v6464_v10 = vpop.eup %6463 }
 0x11a   :  { %v407_v12 = vmul.f32 %v6464_v10, %v6460_v6  ;;  %6471 = vrcp.f32 %v722_v9  ;;  %v6466_v18 = vpop.eup %6465  ;;  %v7506_v6 = vld [vmem:[%s8967_s2 + $0x4] ss:$16 sps:$4 sm:$0xff]   ;;  %v7521_v9 = vld [vmem:[%s8967_s2 + $0x8] ss:$16 sps:$4 sm:$0xff]  }
 0x11b   :  { %v6468_v19 = vpop.eup %6467  ;;  %v7530_v10 = vld [vmem:[%s8968_s3 + $0xe4] ss:$16 sps:$4 sm:$0xff]  }
 0x11c   :  { %v7270_v13 = vsel %vm417_vm0, %v407_v12, 0.0  ;;  %v6046_v14 = vpack.c.bf16 %v407_v12, %v407_v12  ;;  %v7535_v12 = vld [vmem:[%s8968_s3 + $0xec] ss:$16 sps:$4 sm:$0xff]  }
 0x11d   :  { %v423_v15 = vpack.c.bf16 %v7270_v13, %v7270_v13 }
 0x11e   :  { %6047 = vmatmul.mubr.msk.bf16.vlgmr.msra.gmra.mxu0 %vm6045_vm1, %v6046_v14  ;;  %6050 = vmatmul.mubr.msk.bf16.vlgmr.msra.gmra.mxu1 %vm6045_vm1, %v6046_v14  ;;  %v5503_v14 = vld [vmem:[%s8971_s0 + $0x10] sm:$0xff] }
 0x11f   :  { %424 = vst [vmem:[%s8973_s6] sm:$0xf] %v423_v15  ;;  %1290 = vmatpush1.bf16.msra.mxu0 %v6701_v16  ;;  %1331 = vmatpush1.bf16.msra.mxu1 %v6972_v40  ;;  %v6703_v40 = vld [vmem:[%s8968_s3 + $0xa4] ss:$16 sps:$4 sm:$0xff]   ;;  %v761_v15 = vunpack.c.l.bf16 %v5503_v14  ;;  %v762_v16 = vunpack.c.h.bf16 %v5503_v14 }
 0x120   :  { %1291 = vmatprep.subr.bf16.mxu0 %v6702_v17  ;;  %1332 = vmatprep.subr.bf16.mxu1 %v6978_v41  ;;  %v729_v41 = vadd.f32 1.0, %v6468_v19 }
 0x121   :  { %1321 = vmatprep.mubr.bf16.mxu0 %v8983_v1  ;;  %1362 = vmatprep.mubr.bf16.mxu1 %v8983_v1 }
 0x122   :  { %6473 = vrcp.f32 %v729_v41 }
 0x123   :  { %1292 = vmatpush1.bf16.msra.mxu0 %v6962_v38  ;;  %1333 = vmatpush1.bf16.msra.mxu1 %v6996_v44  ;;  %v9032_v44 = vld [vmem:[#allocation7_spill] sm:$0xff] }
 0x124   :  { %1293 = vmatprep.subr.bf16.mxu0 %v6703_v40  ;;  %1334 = vmatprep.subr.bf16.mxu1 %v7007_v46  ;;  %v9034_v46 = vld [vmem:[#allocation10_spill] sm:$0xff] }
 0x125   :  { %v6470_v20 = vpop.eup %6469 }
 0x126   :  { %v733_v23 = vmul.f32 %v6470_v20, %v6466_v18 }
 0x127   :  { %v6472_v21 = vpop.eup %6471  ;;  %1294 = vmatpush1.bf16.msra.mxu0 %v6984_v42  ;;  %1335 = vmatpush1.bf16.msra.mxu1 %v7018_v48  ;;  %v9030_v42 = vld [vmem:[#allocation9_spill] sm:$0xff]  ;;  %v9035_v48 = vld [vmem:[#allocation11_spill] sm:$0xff] }
 0x128   :  { %v732_v22 = vmul.f32 0.0, %v6472_v21  ;;  %1295 = vmatprep.subr.bf16.mxu0 %v6989_v43  ;;  %1336 = vmatprep.subr.bf16.mxu1 %v7040_v54  ;;  %v9031_v43 = vld [vmem:[#allocation6_spill] sm:$0xff] }
 0x12a   :  { %v7297_v38 = vadd.f32 %v733_v23, %v732_v22 }
 0x12b   :  { %1296 = vmatpush1.bf16.msra.mxu0 %v7001_v45  ;;  %1337 = vmatpush1.bf16.msra.mxu1 %v7061_v62  ;;  %v9033_v45 = vld [vmem:[#allocation8_spill] sm:$0xff] }
 0x12c   :  { %6475 = vtanh.f32 %v7297_v38  ;;  %1297 = vmatprep.subr.bf16.mxu0 %v7013_v47  ;;  %1338 = vmatprep.subr.bf16.mxu1 %v7066_v63 }
 0x12f   :  { %1298 = vmatpush1.bf16.msra.mxu0 %v7047_v58  ;;  %1339 = vmatpush1.bf16.msra.mxu1 %v9030_v42  ;;  %v6474_v47 = vpop.eup %6473  ;;  %v7316_v58 = vpop.permute.xlu0 %745 }
 0x130   :  { %1299 = vmatprep.subr.bf16.mxu0 %v9031_v43  ;;  %1340 = vmatprep.subr.bf16.mxu1 %v7096_v55  ;;  %vm747_vm2 = vcmp.eq.s32.totalorder %v7316_v58, 1  ;;  %v7343_v55 = vld [vmem:[%s8967_s2 + $0xec] ss:$16 sps:$4 sm:$0xff]  }
 0x131   :  { %vm6051_vm3 = vmpackc.low %vm747_vm2, %vm747_vm2  ;;  %v7662_v58 = vld [vmem:[%s8968_s3 + $0x6c] ss:$16 sps:$4 sm:$0xff]  }
 0x132   :  { %9037 = vst [vmem:[#allocation6_spill] sm:$0xff] %v7662_v58 }
 0x133   :  { %1300 = vmatpush1.bf16.msra.mxu0 %v9032_v44  ;;  %1341 = vmatpush1.bf16.msra.mxu1 %v7118_v34  ;;  %v7348_v34 = vld [vmem:[%s8967_s2 + $0xe0] ss:$16 sps:$4 sm:$0xff]  }
 0x134   :  { %1301 = vmatprep.subr.bf16.mxu0 %v9033_v45  ;;  %1342 = vmatprep.subr.bf16.mxu1 %v7125_v37  ;;  %v5504_v45 = vld [vmem:[%s8971_s0 + $0x18] sm:$0xff] }
 0x137   :  { %1302 = vmatpush1.bf16.msra.mxu0 %v9034_v46  ;;  %1343 = vmatpush1.bf16.msra.mxu1 %v7142_v56  ;;  %v7353_v56 = vld [vmem:[%s8967_s2 + $0xe8] ss:$16 sps:$4 sm:$0xff]   ;;  %v764_v46 = vunpack.c.h.bf16 %v5504_v45 }
 0x138   :  { %1303 = vmatprep.subr.bf16.mxu0 %v9035_v48  ;;  %1344 = vmatprep.subr.bf16.mxu1 %v7149_v51  ;;  %v763_v48 = vunpack.c.l.bf16 %v5504_v45 }
 0x139   :  { %v6476_v54 = vpop.eup %6475 }
 0x13a   :  { %v736_v62 = vmul.f32 %v6476_v54, %v6474_v47 }
 0x13b   :  { %1304 = vmatpush1.bf16.msra.mxu0 %v7136_v49  ;;  %1345 = vmatpush1.bf16.msra.mxu1 %v7158_v39  ;;  %v7338_v49 = vld [vmem:[%s8967_s2 + $0xe4] ss:$16 sps:$4 sm:$0xff]  }
 0x13c   :  { %v6052_v37 = vpack.c.bf16 %v736_v62, %v736_v62  ;;  %v7323_v63 = vsel %vm747_vm2, %v736_v62, 0.0  ;;  %1620 = vmatprep.subr.bf16.mxu0 %v7338_v49  ;;  %1661 = vmatprep.subr.bf16.mxu1 %v7343_v55  ;;  %v7362_v39 = vld [vmem:[%s8967_s2 + $0xc4] ss:$16 sps:$4 sm:$0xff]  }
 0x13d   :  { %v753_v51 = vpack.c.bf16 %v7323_v63, %v7323_v63 }
 0x13e   :  { %6053 = vmatmul.mubr.msk.bf16.vlgmr.msra.gmra.mxu0 %vm6051_vm3, %v6052_v37  ;;  %6056 = vmatmul.mubr.msk.bf16.vlgmr.msra.gmra.mxu1 %vm6051_vm3, %v6052_v37 }
 0x13f   :  { %1652 = vmatprep.mubr.bf16.mxu0 %v8983_v1  ;;  %1693 = vmatprep.mubr.bf16.mxu1 %v8983_v1  ;;  %5502 = vst [vmem:[%s8974_s7 + $0x1c] sm:$0xf] %v753_v51 }
 0x140   :  { %1621 = vmatpush1.bf16.msra.mxu0 %v7348_v34  ;;  %1662 = vmatpush1.bf16.msra.mxu1 %v7353_v56 }
 0x141   :  { %1622 = vmatprep.subr.bf16.mxu0 %v7362_v39  ;;  %1663 = vmatprep.subr.bf16.mxu1 %v7377_v26 }
 0x144   :  { %1623 = vmatpush1.bf16.msra.mxu0 %v7367_v24  ;;  %1664 = vmatpush1.bf16.msra.mxu1 %v7372_v25 }
 0x145   :  { %1624 = vmatprep.subr.bf16.mxu0 %v7386_v27  ;;  %1665 = vmatprep.subr.bf16.mxu1 %v7391_v28 }
 0x148   :  { %1625 = vmatpush1.bf16.msra.mxu0 %v7396_v29  ;;  %1666 = vmatpush1.bf16.msra.mxu1 %v7401_v30 }
 0x149   :  { %1626 = vmatprep.subr.bf16.mxu0 %v7410_v31  ;;  %1667 = vmatprep.subr.bf16.mxu1 %v7415_v32 }
 0x14c   :  { %1627 = vmatpush1.bf16.msra.mxu0 %v7420_v35  ;;  %1668 = vmatpush1.bf16.msra.mxu1 %v7425_v36 }
 0x14d   :  { %1628 = vmatprep.subr.bf16.mxu0 %v7434_v52  ;;  %1669 = vmatprep.subr.bf16.mxu1 %v7439_v61 }
 0x150   :  { %1629 = vmatpush1.bf16.msra.mxu0 %v7444_v33  ;;  %1670 = vmatpush1.bf16.msra.mxu1 %v7449_v50 }
 0x151   :  { %1630 = vmatprep.subr.bf16.mxu0 %v7458_v53  ;;  %1671 = vmatprep.subr.bf16.mxu1 %v7463_v59 }
 0x154   :  { %1631 = vmatpush1.bf16.msra.mxu0 %v7468_v57  ;;  %1672 = vmatpush1.bf16.msra.mxu1 %v7473_v0 }
 0x155   :  { %1632 = vmatprep.subr.bf16.mxu0 %v7482_v2  ;;  %1673 = vmatprep.subr.bf16.mxu1 %v7487_v3 }
 0x158   :  { %1633 = vmatpush1.bf16.msra.mxu0 %v7492_v4  ;;  %1674 = vmatpush1.bf16.msra.mxu1 %v7497_v5 }
 0x159   :  { %1634 = vmatprep.subr.bf16.mxu0 %v7506_v6  ;;  %1675 = vmatprep.subr.bf16.mxu1 %v7511_v7 }
 0x15c   :  { %1635 = vmatpush1.bf16.msra.mxu0 %v7516_v8  ;;  %1676 = vmatpush1.bf16.msra.mxu1 %v7521_v9 }
 0x15d   :  { %1951 = vmatprep.subr.bf16.mxu0 %v7530_v10  ;;  %1992 = vmatprep.subr.bf16.mxu1 %v7535_v12 }
 0x1de   :  { %v992_v17 = vpop.f32.mrf.mxu0  ;;  %v1033_v18 = vpop.f32.mrf.mxu1 }
 0x1df   :  { %v1040_v19 = vadd.f32 %v992_v17, %v761_v15  ;;  %v1042_v37 = vadd.f32 %v1033_v18, %v763_v48 }
 0x1e0   :  { %v994_v40 = vpop.f32.mrf.mxu0  ;;  %v1035_v20 = vpop.f32.mrf.mxu1 }
 0x1e1   :  { %v5537_v21 = vmul.f32 -1.442695, %v1040_v19  ;;  %v1041_v41 = vadd.f32 %v994_v40, %v762_v16  ;;  %v1043_v47 = vadd.f32 %v1035_v20, %v764_v46  ;;  %v5542_v16 = vld [vmem:[%s8972_s1 + $0x60] sm:$0xff]  ;;  %v420_v46 = vsel %vm417_vm0, %v7259_v60, 0.0 }
 0x1e2   :  { %v996_v22 = vpop.f32.mrf.mxu0  ;;  %v1037_v23 = vpop.f32.mrf.mxu1  ;;  %v1092_v17 = vunpack.c.l.bf16 %v5542_v16  ;;  %v1093_v19 = vunpack.c.h.bf16 %v5542_v16 }
 0x1e3   :  { %6477 = vpow2.f32 %v5537_v21  ;;  %v5538_v42 = vmul.f32 -1.442695, %v1041_v41  ;;  %v5539_v54 = vmul.f32 -1.442695, %v1043_v47 }
 0x1e4   :  { %v997_v43 = vpop.f32.mrf.mxu0  ;;  %v1038_v44 = vpop.f32.mrf.mxu1 }
 0x1e5   :  { %6479 = vpow2.f32 %v5538_v42 }
 0x1e6   :  { %6481 = vpow2.f32 %v5539_v54 }
 0x1f0   :  { %v6478_v62 = vpop.eup %6477 }
 0x1f1   :  { %v1047_v51 = vadd.f32 1.0, %v6478_v62  ;;  %v1077_v62 = vpop.permute.xlu1 %1076 }
 0x1f2   :  { %v6480_v14 = vpop.eup %6479  ;;  %vm1078_vm4 = vcmp.eq.s32.totalorder %v1077_v62, 1  ;;  %v7582_v62 = vld [vmem:[%s8968_s3 + $0xcc] ss:$16 sps:$4 sm:$0xff]  }
 0x1f3   :  { %6483 = vrcp.f32 %v1047_v51  ;;  %v1053_v15 = vadd.f32 1.0, %v6480_v14  ;;  %v6482_v20 = vpop.eup %6481 }
 0x1f4   :  { %6485 = vtanh.f32 %v1042_v37  ;;  %v1060_v47 = vadd.f32 1.0, %v6482_v20 }
 0x1f5   :  { %6487 = vrcp.f32 %v1053_v15 }
 0x1fe   :  { %v1323_v40 = vpop.f32.mrf.mxu0  ;;  %v1364_v21 = vpop.f32.mrf.mxu1 }
 0x1ff   :  { %v1371_v41 = vadd.f32 %v1323_v40, %v1092_v17 }
 0x200   :  { %v6484_v22 = vpop.eup %6483  ;;  %v1325_v23 = vpop.f32.mrf.mxu0 }
 0x201   :  { %v1366_v18 = vpop.f32.mrf.mxu1  ;;  %v6486_v42 = vpop.eup %6485  ;;  %v5576_v43 = vmul.f32 -1.442695, %v1371_v41  ;;  %v1372_v44 = vadd.f32 %v1325_v23, %v1093_v19  ;;  %v5543_v19 = vld [vmem:[%s8972_s1 + $0x68] sm:$0xff] }
 0x202   :  { %v6488_v45 = vpop.eup %6487  ;;  %v1327_v48 = vpop.f32.mrf.mxu0  ;;  %v1064_v51 = vmul.f32 %v6486_v42, %v6484_v22  ;;  %v1095_v11 = vunpack.c.h.bf16 %v5543_v19  ;;  %v1094_v20 = vunpack.c.l.bf16 %v5543_v19 }
 0x203   :  { %v1368_v54 = vpop.f32.mrf.mxu1  ;;  %v1063_v37 = vmul.f32 %v6488_v45, %v420_v46  ;;  %6489 = vpow2.f32 %v5576_v43  ;;  %v5577_v14 = vmul.f32 -1.442695, %v1372_v44 }
 0x204   :  { %v1328_v15 = vpop.f32.mrf.mxu0  ;;  %v1374_v40 = vadd.f32 %v1366_v18, %v1095_v11  ;;  %v1373_v23 = vadd.f32 %v1364_v21, %v1094_v20  ;;  %v7565_v21 = vld [vmem:[%s8968_s3 + $0xe0] ss:$16 sps:$4 sm:$0xff]  }
 0x205   :  { %v1369_v16 = vpop.f32.mrf.mxu1  ;;  %v1065_v17 = vadd.f32 %v1064_v51, %v1063_v37  ;;  %6491 = vpow2.f32 %v5577_v14  ;;  %v7592_v14 = vld [vmem:[%s8968_s3 + $0xc0] ss:$16 sps:$4 sm:$0xff]   ;;  %v7597_v15 = vld [vmem:[%s8968_s3 + $0xc8] ss:$16 sps:$4 sm:$0xff]  }
 0x206   :  { %6493 = vrcp.f32 %v1060_v47  ;;  %v5578_v41 = vmul.f32 -1.442695, %v1374_v40  ;;  %v7604_v16 = vld [vmem:[%s8968_s3 + $0xa4] ss:$16 sps:$4 sm:$0xff]   ;;  %v7618_v11 = vld [vmem:[%s8968_s3 + $0xa0] ss:$16 sps:$4 sm:$0xff]  }
 0x207   :  { %6495 = vtanh.f32 %v1065_v17  ;;  %v7555_v60 = vsel %vm1078_vm4, %v1065_v17, %v420_v46  ;;  %v7570_v46 = vld [vmem:[%s8968_s3 + $0xe8] ss:$16 sps:$4 sm:$0xff]   ;;  %v7609_v17 = vld [vmem:[%s8968_s3 + $0xac] ss:$16 sps:$4 sm:$0xff]  }
 0x208   :  { %6497 = vpow2.f32 %v5578_v41  ;;  %v7623_v40 = vld [vmem:[%s8968_s3 + $0xa8] ss:$16 sps:$4 sm:$0xff]   ;;  %v7630_v41 = vld [vmem:[%s8968_s3 + $0x84] ss:$16 sps:$4 sm:$0xff]  }
 0x210   :  { %v6490_v22 = vpop.eup %6489 }
 0x211   :  { %v1378_v42 = vadd.f32 1.0, %v6490_v22  ;;  %v7635_v22 = vld [vmem:[%s8968_s3 + $0x8c] ss:$16 sps:$4 sm:$0xff]  }
 0x212   :  { %v6492_v43 = vpop.eup %6491 }
 0x213   :  { %v6494_v44 = vpop.eup %6493  ;;  %6499 = vrcp.f32 %v1378_v42  ;;  %v1384_v45 = vadd.f32 1.0, %v6492_v43  ;;  %v750_v43 = vsel %vm747_vm2, %v7297_v38, 0.0  ;;  %v7657_v38 = vld [vmem:[%s8968_s3 + $0x64] ss:$16 sps:$4 sm:$0xff]  }
 0x214   :  { %v6496_v48 = vpop.eup %6495  ;;  %6501 = vtanh.f32 %v1373_v23  ;;  %9036 = vst [vmem:[#allocation9_spill] sm:$0xff] %v7657_v38 }
 0x215   :  { %v1067_v54 = vmul.f32 %v6496_v48, %v6494_v44  ;;  %6503 = vrcp.f32 %v1384_v45  ;;  %v6498_v19 = vpop.eup %6497 }
 0x216   :  { %v1391_v44 = vadd.f32 1.0, %v6498_v19  ;;  %v7669_v19 = vld [vmem:[%s8968_s3 + $0x60] ss:$16 sps:$4 sm:$0xff]  }
 0x217   :  { %v7559_v47 = vsel %vm1078_vm4, %v1067_v54, %v7270_v13  ;;  %v1083_v18 = vsel %vm1078_vm4, %v1067_v54, 0.0  ;;  %v7577_v13 = vld [vmem:[%s8968_s3 + $0xc4] ss:$16 sps:$4 sm:$0xff]   ;;  %v7645_v54 = vld [vmem:[%s8968_s3 + $0x80] ss:$16 sps:$4 sm:$0xff]   ;;  %9038 = vst [vmem:[#allocation7_spill] sm:$0xff] %v7669_v19 }
 0x218   :  { %v1084_v37 = vpack.c.bf16 %v1083_v18, %v1083_v18  ;;  %v1427_v51 = vpack.c.bf16 %v7559_v47, %v7559_v47  ;;  %v7650_v18 = vld [vmem:[%s8968_s3 + $0x88] ss:$16 sps:$4 sm:$0xff]   ;;  %6505 = vrcp.f32 %v1391_v44  ;;  %v7689_v44 = vld [vmem:[%s8968_s3 + $0x4c] ss:$16 sps:$4 sm:$0xff]  }
 0x219   :  { %9041 = vst [vmem:[#allocation11_spill] sm:$0xff] %v7689_v44 }
 0x21a   :  { %5541 = vst [vmem:[%s8973_s6 + $0x4] sm:$0xf] %v1084_v37  ;;  %1653 = vmatmul.mubr.bf16.vlgmr.msra.gmra.mxu0 %v1427_v51  ;;  %1694 = vmatmul.mubr.bf16.vlgmr.msra.gmra.mxu1 %v1427_v51  ;;  %v1408_v37 = vpop.permute.xlu1 %1407 }
 0x21b   :  { %1952 = vmatpush1.bf16.msra.mxu0 %v7565_v21  ;;  %1993 = vmatpush1.bf16.msra.mxu1 %v7570_v46  ;;  %vm1409_vm5 = vcmp.eq.s32.totalorder %v1408_v37, 1 }
 0x21c   :  { %1953 = vmatprep.subr.bf16.mxu0 %v7577_v13  ;;  %1994 = vmatprep.subr.bf16.mxu1 %v7582_v62 }
 0x21d   :  { %1983 = vmatprep.mubr.bf16.mxu0 %v8983_v1  ;;  %2024 = vmatprep.mubr.bf16.mxu1 %v8983_v1  ;;  %v7720_v1 = vld [vmem:[%s8968_s3 + $0x20] ss:$16 sps:$4 sm:$0xff]  }
 0x21e   :  { %9046 = vst [vmem:[#allocation16_spill] sm:$0xff] %v7720_v1 }
 0x21f   :  { %1954 = vmatpush1.bf16.msra.mxu0 %v7592_v14  ;;  %1995 = vmatpush1.bf16.msra.mxu1 %v7597_v15 }
 0x220   :  { %v6500_v20 = vpop.eup %6499  ;;  %1955 = vmatprep.subr.bf16.mxu0 %v7604_v16  ;;  %1996 = vmatprep.subr.bf16.mxu1 %v7609_v17 }
 0x221   :  { %v6502_v23 = vpop.eup %6501 }
 0x222   :  { %v6504_v42 = vpop.eup %6503  ;;  %v1395_v45 = vmul.f32 %v6502_v23, %v6500_v20  ;;  %v7674_v20 = vld [vmem:[%s8968_s3 + $0x68] ss:$16 sps:$4 sm:$0xff]  }
 0x223   :  { %v1394_v48 = vmul.f32 %v6504_v42, %v750_v43  ;;  %1956 = vmatpush1.bf16.msra.mxu0 %v7618_v11  ;;  %1997 = vmatpush1.bf16.msra.mxu1 %v7623_v40  ;;  %9039 = vst [vmem:[#allocation8_spill] sm:$0xff] %v7674_v20  ;;  %v7684_v42 = vld [vmem:[%s8968_s3 + $0x44] ss:$16 sps:$4 sm:$0xff]  }
 0x224   :  { %1957 = vmatprep.subr.bf16.mxu0 %v7630_v41  ;;  %1998 = vmatprep.subr.bf16.mxu1 %v7635_v22  ;;  %9040 = vst [vmem:[#allocation10_spill] sm:$0xff] %v7684_v42 }
 0x225   :  { %v1396_v51 = vadd.f32 %v1395_v45, %v1394_v48  ;;  %v7701_v45 = vld [vmem:[%s8968_s3 + $0x48] ss:$16 sps:$4 sm:$0xff]   ;;  %v7708_v48 = vld [vmem:[%s8968_s3 + $0x24] ss:$16 sps:$4 sm:$0xff]  }
 0x226   :  { %9043 = vst [vmem:[#allocation13_spill] sm:$0xff] %v7701_v45  ;;  %9044 = vst [vmem:[#allocation14_spill] sm:$0xff] %v7708_v48 }
 0x227   :  { %6507 = vtanh.f32 %v1396_v51  ;;  %1958 = vmatpush1.bf16.msra.mxu0 %v7645_v54  ;;  %1999 = vmatpush1.bf16.msra.mxu1 %v7650_v18  ;;  %v7677_v23 = vsel %vm1409_vm5, %v1396_v51, %v750_v43  ;;  %v7696_v43 = vld [vmem:[%s8968_s3 + $0x40] ss:$16 sps:$4 sm:$0xff]   ;;  %v7713_v51 = vld [vmem:[%s8968_s3 + $0x2c] ss:$16 sps:$4 sm:$0xff]  }
 0x228   :  { %1959 = vmatprep.subr.bf16.mxu0 %v7657_v38  ;;  %2000 = vmatprep.subr.bf16.mxu1 %v7662_v58  ;;  %9042 = vst [vmem:[#allocation12_spill] sm:$0xff] %v7696_v43  ;;  %9045 = vst [vmem:[#allocation15_spill] sm:$0xff] %v7713_v51 }
 0x22b   :  { %1960 = vmatpush1.bf16.msra.mxu0 %v7669_v19  ;;  %2001 = vmatpush1.bf16.msra.mxu1 %v7674_v20 }
 0x22c   :  { %1961 = vmatprep.subr.bf16.mxu0 %v7684_v42  ;;  %2002 = vmatprep.subr.bf16.mxu1 %v7689_v44  ;;  %v7725_v44 = vld [vmem:[%s8968_s3 + $0x28] ss:$16 sps:$4 sm:$0xff]   ;;  %v6506_v42 = vpop.eup %6505 }
 0x22d   :  { %9047 = vst [vmem:[#allocation17_spill] sm:$0xff] %v7725_v44 }
 0x22f   :  { %1962 = vmatpush1.bf16.msra.mxu0 %v7696_v43  ;;  %2003 = vmatpush1.bf16.msra.mxu1 %v7701_v45  ;;  %v7732_v43 = vld [vmem:[%s8968_s3 + $0x4] ss:$16 sps:$4 sm:$0xff]   ;;  %v7737_v45 = vld [vmem:[%s8968_s3 + $0xc] ss:$16 sps:$4 sm:$0xff]  }
 0x230   :  { %1963 = vmatprep.subr.bf16.mxu0 %v7708_v48  ;;  %2004 = vmatprep.subr.bf16.mxu1 %v7713_v51  ;;  %v7744_v48 = vld [vmem:[%s8968_s3] ss:$16 sps:$4 sm:$0xff]   ;;  %v7749_v51 = vld [vmem:[%s8968_s3 + $0x8] ss:$16 sps:$4 sm:$0xff]  }
 0x233   :  { %1964 = vmatpush1.bf16.msra.mxu0 %v7720_v1  ;;  %2005 = vmatpush1.bf16.msra.mxu1 %v7725_v44 }
 0x234   :  { %v6508_v20 = vpop.eup %6507  ;;  %1965 = vmatprep.subr.bf16.mxu0 %v7732_v43  ;;  %2006 = vmatprep.subr.bf16.mxu1 %v7737_v45 }
 0x235   :  { %v1398_v19 = vmul.f32 %v6508_v20, %v6506_v42 }
 0x237   :  { %1966 = vmatpush1.bf16.msra.mxu0 %v7744_v48  ;;  %2007 = vmatpush1.bf16.msra.mxu1 %v7749_v51  ;;  %v7757_v44 = vsel %vm1409_vm5, %v1398_v19, %v7323_v63  ;;  %v1414_v1 = vsel %vm1409_vm5, %v1398_v19, 0.0  ;;  %v5581_v63 = vld [vmem:[%s8971_s0 + $0x20] sm:$0xff] }
 0x238   :  { %v1415_v58 = vpack.c.bf16 %v1414_v1, %v1414_v1  ;;  %v1758_v38 = vpack.c.bf16 %v7757_v44, %v7757_v44  ;;  %2282 = vmatprep.subr.bf16.mxu0 %v7338_v49  ;;  %2323 = vmatprep.subr.bf16.mxu1 %v7343_v55  ;;  %v9048_v1 = vmov 0   ;;  %v1423_v49 = vunpack.c.l.bf16 %v5581_v63 }
 0x239   :  { %v1424_v55 = vunpack.c.h.bf16 %v5581_v63 }
 0x23a   :  { %5580 = vst [vmem:[%s8974_s7 + $0x18] sm:$0xf] %v1415_v58  ;;  %1984 = vmatmul.mubr.bf16.vlgmr.msra.gmra.mxu0 %v1758_v38  ;;  %2025 = vmatmul.mubr.bf16.vlgmr.msra.gmra.mxu1 %v1758_v38 }
 0x23b   :  { %2283 = vmatpush1.bf16.msra.mxu0 %v7348_v34  ;;  %2324 = vmatpush1.bf16.msra.mxu1 %v7353_v56 }
 0x23c   :  { %2284 = vmatprep.subr.bf16.mxu0 %v7362_v39  ;;  %2325 = vmatprep.subr.bf16.mxu1 %v7377_v26 }
 0x23d   :  { %2314 = vmatprep.mubr.bf16.mxu0 %v9048_v1  ;;  %2355 = vmatprep.mubr.bf16.mxu1 %v9048_v1 }
 0x23f   :  { %2285 = vmatpush1.bf16.msra.mxu0 %v7367_v24  ;;  %2326 = vmatpush1.bf16.msra.mxu1 %v7372_v25 }
 0x240   :  { %2286 = vmatprep.subr.bf16.mxu0 %v7386_v27  ;;  %2327 = vmatprep.subr.bf16.mxu1 %v7391_v28 }
 0x243   :  { %2287 = vmatpush1.bf16.msra.mxu0 %v7396_v29  ;;  %2328 = vmatpush1.bf16.msra.mxu1 %v7401_v30 }
 0x244   :  { %2288 = vmatprep.subr.bf16.mxu0 %v7410_v31  ;;  %2329 = vmatprep.subr.bf16.mxu1 %v7415_v32 }
 0x247   :  { %2289 = vmatpush1.bf16.msra.mxu0 %v7420_v35  ;;  %2330 = vmatpush1.bf16.msra.mxu1 %v7425_v36  ;;  %v5582_v35 = vld [vmem:[%s8971_s0 + $0x28] sm:$0xff] }
 0x248   :  { %2290 = vmatprep.subr.bf16.mxu0 %v7434_v52  ;;  %2331 = vmatprep.subr.bf16.mxu1 %v7439_v61  ;;  %v1426_v36 = vunpack.c.h.bf16 %v5582_v35  ;;  %v1425_v61 = vunpack.c.l.bf16 %v5582_v35 }
 0x24b   :  { %2291 = vmatpush1.bf16.msra.mxu0 %v7444_v33  ;;  %2332 = vmatpush1.bf16.msra.mxu1 %v7449_v50 }
 0x24c   :  { %2292 = vmatprep.subr.bf16.mxu0 %v7458_v53  ;;  %2333 = vmatprep.subr.bf16.mxu1 %v7463_v59 }
 0x24f   :  { %2293 = vmatpush1.bf16.msra.mxu0 %v7468_v57  ;;  %2334 = vmatpush1.bf16.msra.mxu1 %v7473_v0 }
 0x250   :  { %2294 = vmatprep.subr.bf16.mxu0 %v7482_v2  ;;  %2335 = vmatprep.subr.bf16.mxu1 %v7487_v3  ;;  %v5620_v2 = vld [vmem:[%s8972_s1 + $0x50] sm:$0xff] }
 0x251   :  { %v1754_v3 = vunpack.c.l.bf16 %v5620_v2 }
 0x253   :  { %2295 = vmatpush1.bf16.msra.mxu0 %v7492_v4  ;;  %2336 = vmatpush1.bf16.msra.mxu1 %v7497_v5  ;;  %v1755_v4 = vunpack.c.h.bf16 %v5620_v2 }
 0x254   :  { %2296 = vmatprep.subr.bf16.mxu0 %v7506_v6  ;;  %2337 = vmatprep.subr.bf16.mxu1 %v7511_v7 }
 0x257   :  { %2297 = vmatpush1.bf16.msra.mxu0 %v7516_v8  ;;  %2338 = vmatpush1.bf16.msra.mxu1 %v7521_v9 }
 0x258   :  { %2613 = vmatprep.subr.bf16.mxu0 %v7530_v10  ;;  %2654 = vmatprep.subr.bf16.mxu1 %v7535_v12 }
 0x2da   :  { %v1654_v34 = vpop.f32.mrf.mxu0  ;;  %v1695_v56 = vpop.f32.mrf.mxu1 }
 0x2db   :  { %v1702_v39 = vadd.f32 %v1654_v34, %v1423_v49  ;;  %v1704_v53 = vadd.f32 %v1695_v56, %v1425_v61 }
 0x2dc   :  { %v1656_v24 = vpop.f32.mrf.mxu0  ;;  %v1697_v25 = vpop.f32.mrf.mxu1 }
 0x2dd   :  { %v5615_v26 = vmul.f32 -1.442695, %v1702_v39  ;;  %v1703_v27 = vadd.f32 %v1656_v24, %v1424_v55  ;;  %v1705_v52 = vadd.f32 %v1697_v25, %v1426_v36  ;;  %v1739_v24 = vpop.permute.xlu0 %1738 }
 0x2de   :  { %v1658_v28 = vpop.f32.mrf.mxu0  ;;  %v1699_v29 = vpop.f32.mrf.mxu1  ;;  %vm1740_vm6 = vcmp.eq.s32.totalorder %v1739_v24, 1  ;;  %v7962_v24 = vld [vmem:[%s8967_s2 + $0x80] ss:$16 sps:$4 sm:$0xff]  }
 0x2df   :  { %6509 = vpow2.f32 %v5615_v26  ;;  %v5616_v30 = vmul.f32 -1.442695, %v1703_v27  ;;  %v5617_v33 = vmul.f32 -1.442695, %v1705_v52  ;;  %v5621_v26 = vld [vmem:[%s8972_s1 + $0x58] sm:$0xff] }
 0x2e0   :  { %v1659_v31 = vpop.f32.mrf.mxu0  ;;  %v1700_v32 = vpop.f32.mrf.mxu1  ;;  %v1757_v27 = vunpack.c.h.bf16 %v5621_v26 }
 0x2e1   :  { %6511 = vpow2.f32 %v5616_v30  ;;  %v1756_v30 = vunpack.c.l.bf16 %v5621_v26  ;;  %v7976_v26 = vld [vmem:[%s8967_s2 + $0x64] ss:$16 sps:$4 sm:$0xff]  }
 0x2e2   :  { %6513 = vpow2.f32 %v5617_v33 }
 0x2ec   :  { %v6510_v50 = vpop.eup %6509 }
 0x2ed   :  { %v1709_v59 = vadd.f32 1.0, %v6510_v50 }
 0x2ee   :  { %v6512_v57 = vpop.eup %6511 }
 0x2ef   :  { %6515 = vrcp.f32 %v1709_v59  ;;  %v1715_v0 = vadd.f32 1.0, %v6512_v57  ;;  %v6514_v7 = vpop.eup %6513 }
 0x2f0   :  { %6517 = vtanh.f32 %v1704_v53  ;;  %v1722_v20 = vadd.f32 1.0, %v6514_v7  ;;  %v9059_v7 = vld [vmem:[#allocation16_spill] sm:$0xff] }
 0x2f1   :  { %6519 = vrcp.f32 %v1715_v0 }
 0x2fa   :  { %v1985_v5 = vpop.f32.mrf.mxu0  ;;  %v2026_v6 = vpop.f32.mrf.mxu1 }
 0x2fb   :  { %v2033_v8 = vadd.f32 %v1985_v5, %v1754_v3  ;;  %v2035_v35 = vadd.f32 %v2026_v6, %v1756_v30  ;;  %v9055_v5 = vld [vmem:[#allocation12_spill] sm:$0xff]  ;;  %v7991_v30 = vld [vmem:[%s8967_s2 + $0x68] ss:$16 sps:$4 sm:$0xff]  }
 0x2fc   :  { %v6516_v9 = vpop.eup %6515  ;;  %v1987_v10 = vpop.f32.mrf.mxu0 }
 0x2fd   :  { %v2028_v12 = vpop.f32.mrf.mxu1  ;;  %v6518_v38 = vpop.eup %6517  ;;  %v5654_v58 = vmul.f32 -1.442695, %v2033_v8  ;;  %v2034_v37 = vadd.f32 %v1987_v10, %v1755_v4  ;;  %v9054_v4 = vld [vmem:[#allocation11_spill] sm:$0xff]  ;;  %v9060_v8 = vld [vmem:[#allocation17_spill] sm:$0xff] }
 0x2fe   :  { %v6520_v19 = vpop.eup %6519  ;;  %v1989_v42 = vpop.f32.mrf.mxu0  ;;  %v1726_v49 = vmul.f32 %v6518_v38, %v6516_v9  ;;  %v2036_v29 = vadd.f32 %v2028_v12, %v1757_v27  ;;  %v7981_v27 = vld [vmem:[%s8967_s2 + $0x6c] ss:$16 sps:$4 sm:$0xff]  }
 0x2ff   :  { %v2030_v63 = vpop.f32.mrf.mxu1  ;;  %v1725_v55 = vmul.f32 %v6520_v19, %v7555_v60  ;;  %6521 = vpow2.f32 %v5654_v58  ;;  %v5655_v34 = vmul.f32 -1.442695, %v2034_v37  ;;  %v7909_v19 = vld [vmem:[%s8967_s2 + $0xc0] ss:$16 sps:$4 sm:$0xff]   ;;  %v7919_v42 = vld [vmem:[%s8967_s2 + $0xcc] ss:$16 sps:$4 sm:$0xff]  }
 0x300   :  { %v1990_v56 = vpop.f32.mrf.mxu0  ;;  %v5656_v31 = vmul.f32 -1.442695, %v2036_v29  ;;  %v7928_v63 = vld [vmem:[%s8967_s2 + $0xa4] ss:$16 sps:$4 sm:$0xff]   ;;  %v7986_v29 = vld [vmem:[%s8967_s2 + $0x60] ss:$16 sps:$4 sm:$0xff]  }
 0x301   :  { %v2031_v39 = vpop.f32.mrf.mxu1  ;;  %v1727_v25 = vadd.f32 %v1726_v49, %v1725_v55  ;;  %6523 = vpow2.f32 %v5655_v34  ;;  %v7933_v49 = vld [vmem:[%s8967_s2 + $0xac] ss:$16 sps:$4 sm:$0xff]   ;;  %v7938_v55 = vld [vmem:[%s8967_s2 + $0xa0] ss:$16 sps:$4 sm:$0xff]   ;;  %v7943_v34 = vld [vmem:[%s8967_s2 + $0xa8] ss:$16 sps:$4 sm:$0xff]  }
 0x302   :  { %6525 = vrcp.f32 %v1722_v20  ;;  %v7914_v20 = vld [vmem:[%s8967_s2 + $0xc8] ss:$16 sps:$4 sm:$0xff]   ;;  %v7952_v56 = vld [vmem:[%s8967_s2 + $0x84] ss:$16 sps:$4 sm:$0xff]   ;;  %v7957_v39 = vld [vmem:[%s8967_s2 + $0x8c] ss:$16 sps:$4 sm:$0xff]  }
 0x303   :  { %6527 = vtanh.f32 %v1727_v25  ;;  %v7816_v28 = vsel %vm1740_vm6, %v1727_v25, %v7555_v60  ;;  %v7967_v25 = vld [vmem:[%s8967_s2 + $0x88] ss:$16 sps:$4 sm:$0xff]  }
 0x304   :  { %6529 = vpow2.f32 %v5656_v31  ;;  %v8000_v31 = vld [vmem:[%s8967_s2 + $0x44] ss:$16 sps:$4 sm:$0xff]  }
 0x30c   :  { %v6522_v32 = vpop.eup %6521 }
 0x30d   :  { %v2040_v36 = vadd.f32 1.0, %v6522_v32  ;;  %v8005_v32 = vld [vmem:[%s8967_s2 + $0x4c] ss:$16 sps:$4 sm:$0xff]  }
 0x30e   :  { %v6524_v52 = vpop.eup %6523 }
 0x30f   :  { %v6526_v61 = vpop.eup %6525  ;;  %6531 = vrcp.f32 %v2040_v36  ;;  %v2046_v33 = vadd.f32 1.0, %v6524_v52  ;;  %v8015_v36 = vld [vmem:[%s8967_s2 + $0x48] ss:$16 sps:$4 sm:$0xff]   ;;  %v8024_v52 = vld [vmem:[%s8967_s2 + $0x24] ss:$16 sps:$4 sm:$0xff]  }
 0x310   :  { %v6528_v50 = vpop.eup %6527  ;;  %6533 = vtanh.f32 %v2035_v35  ;;  %v8010_v35 = vld [vmem:[%s8967_s2 + $0x40] ss:$16 sps:$4 sm:$0xff]  }
 0x311   :  { %6535 = vrcp.f32 %v2046_v33  ;;  %v1729_v53 = vmul.f32 %v6528_v50, %v6526_v61  ;;  %v8029_v61 = vld [vmem:[%s8967_s2 + $0x2c] ss:$16 sps:$4 sm:$0xff]   ;;  %v8034_v33 = vld [vmem:[%s8967_s2 + $0x20] ss:$16 sps:$4 sm:$0xff]   ;;  %v8039_v50 = vld [vmem:[%s8967_s2 + $0x28] ss:$16 sps:$4 sm:$0xff]  }
 0x313   :  { %v7820_v59 = vsel %vm1740_vm6, %v1729_v53, %v7559_v47  ;;  %v1745_v60 = vsel %vm1740_vm6, %v1729_v53, 0.0  ;;  %v6530_v47 = vpop.eup %6529  ;;  %v8048_v53 = vld [vmem:[%s8967_s2 + $0x4] ss:$16 sps:$4 sm:$0xff]  }
 0x314   :  { %v1746_v57 = vpack.c.bf16 %v1745_v60, %v1745_v60  ;;  %v2089_v0 = vpack.c.bf16 %v7820_v59, %v7820_v59  ;;  %v2053_v3 = vadd.f32 1.0, %v6530_v47  ;;  %v8053_v60 = vld [vmem:[%s8967_s2 + $0xc] ss:$16 sps:$4 sm:$0xff]   ;;  %v8072_v47 = vld [vmem:[%s8968_s3 + $0xe4] ss:$16 sps:$4 sm:$0xff]  }
 0x316   :  { %5619 = vst [vmem:[%s8973_s6 + $0x8] sm:$0xf] %v1746_v57  ;;  %2315 = vmatmul.mubr.bf16.vlgmr.msra.gmra.mxu0 %v2089_v0  ;;  %2356 = vmatmul.mubr.bf16.vlgmr.msra.gmra.mxu1 %v2089_v0  ;;  %6537 = vrcp.f32 %v2053_v3  ;;  %v8058_v57 = vld [vmem:[%s8967_s2] ss:$16 sps:$4 sm:$0xff]   ;;  %v8063_v0 = vld [vmem:[%s8967_s2 + $0x8] ss:$16 sps:$4 sm:$0xff]  }
 0x317   :  { %2614 = vmatpush1.bf16.msra.mxu0 %v7565_v21  ;;  %2655 = vmatpush1.bf16.msra.mxu1 %v7570_v46 }
 0x318   :  { %2615 = vmatprep.subr.bf16.mxu0 %v7577_v13  ;;  %2656 = vmatprep.subr.bf16.mxu1 %v7582_v62 }
 0x319   :  { %2645 = vmatprep.mubr.bf16.mxu0 %v9048_v1  ;;  %2686 = vmatprep.mubr.bf16.mxu1 %v9048_v1 }
 0x31b   :  { %2616 = vmatpush1.bf16.msra.mxu0 %v7592_v14  ;;  %2657 = vmatpush1.bf16.msra.mxu1 %v7597_v15  ;;  %v2070_v14 = vpop.permute.xlu1 %2069 }
 0x31c   :  { %v6532_v2 = vpop.eup %6531  ;;  %2617 = vmatprep.subr.bf16.mxu0 %v7604_v16  ;;  %2658 = vmatprep.subr.bf16.mxu1 %v7609_v17  ;;  %vm2071_vm7 = vcmp.eq.s32.totalorder %v2070_v14, 1  ;;  %v9049_v17 = vld [vmem:[#allocation9_spill] sm:$0xff] }
 0x31d   :  { %v6534_v21 = vpop.eup %6533 }
 0x31e   :  { %v6536_v46 = vpop.eup %6535  ;;  %v2057_v13 = vmul.f32 %v6534_v21, %v6532_v2  ;;  %v8077_v2 = vld [vmem:[%s8968_s3 + $0xec] ss:$16 sps:$4 sm:$0xff]   ;;  %v5659_v21 = vld [vmem:[%s8971_s0 + $0x30] sm:$0xff] }
 0x31f   :  { %v2056_v62 = vmul.f32 %v6536_v46, %v7677_v23  ;;  %2618 = vmatpush1.bf16.msra.mxu0 %v7618_v11  ;;  %2659 = vmatpush1.bf16.msra.mxu1 %v7623_v40  ;;  %v9050_v11 = vld [vmem:[#allocation6_spill] sm:$0xff]  ;;  %v9051_v40 = vld [vmem:[#allocation7_spill] sm:$0xff]  ;;  %v2085_v46 = vunpack.c.l.bf16 %v5659_v21  ;;  %v2086_v3 = vunpack.c.h.bf16 %v5659_v21 }
 0x320   :  { %2619 = vmatprep.subr.bf16.mxu0 %v7630_v41  ;;  %2660 = vmatprep.subr.bf16.mxu1 %v7635_v22  ;;  %v9052_v41 = vld [vmem:[#allocation8_spill] sm:$0xff]  ;;  %v9053_v22 = vld [vmem:[#allocation10_spill] sm:$0xff] }
 0x321   :  { %v2058_v15 = vadd.f32 %v2057_v13, %v2056_v62  ;;  %v5698_v21 = vld [vmem:[%s8972_s1 + $0x40] sm:$0xff] }
 0x323   :  { %6539 = vtanh.f32 %v2058_v15  ;;  %2620 = vmatpush1.bf16.msra.mxu0 %v7645_v54  ;;  %2661 = vmatpush1.bf16.msra.mxu1 %v7650_v18  ;;  %v7847_v16 = vsel %vm2071_vm7, %v2058_v15, %v7677_v23  ;;  %v9056_v54 = vld [vmem:[#allocation13_spill] sm:$0xff]  ;;  %v9057_v18 = vld [vmem:[#allocation14_spill] sm:$0xff]  ;;  %v9058_v23 = vld [vmem:[#allocation15_spill] sm:$0xff]  ;;  %v6538_v6 = vpop.eup %6537 }
 0x324   :  { %2621 = vmatprep.subr.bf16.mxu0 %v9049_v17  ;;  %2662 = vmatprep.subr.bf16.mxu1 %v9050_v11 }
 0x327   :  { %2622 = vmatpush1.bf16.msra.mxu0 %v9051_v40  ;;  %2663 = vmatpush1.bf16.msra.mxu1 %v9052_v41 }
 0x328   :  { %2623 = vmatprep.subr.bf16.mxu0 %v9053_v22  ;;  %2664 = vmatprep.subr.bf16.mxu1 %v9054_v4 }
 0x32b   :  { %2624 = vmatpush1.bf16.msra.mxu0 %v9055_v5  ;;  %2665 = vmatpush1.bf16.msra.mxu1 %v9056_v54 }
 0x32c   :  { %2625 = vmatprep.subr.bf16.mxu0 %v9057_v18  ;;  %2666 = vmatprep.subr.bf16.mxu1 %v9058_v23  ;;  %v5660_v18 = vld [vmem:[%s8971_s0 + $0x38] sm:$0xff] }
 0x32d   :  { %v2088_v23 = vunpack.c.h.bf16 %v5660_v18 }
 0x32f   :  { %2626 = vmatpush1.bf16.msra.mxu0 %v9059_v7  ;;  %2667 = vmatpush1.bf16.msra.mxu1 %v9060_v8  ;;  %v2087_v7 = vunpack.c.l.bf16 %v5660_v18 }
 0x330   :  { %v6540_v9 = vpop.eup %6539  ;;  %2627 = vmatprep.subr.bf16.mxu0 %v7732_v43  ;;  %2668 = vmatprep.subr.bf16.mxu1 %v7737_v45  ;;  %v7885_v43 = vld [vmem:[%s8967_s2 + $0xec] ss:$16 sps:$4 sm:$0xff]   ;;  %v7890_v45 = vld [vmem:[%s8967_s2 + $0xe0] ss:$16 sps:$4 sm:$0xff]  }
 0x331   :  { %v2060_v10 = vmul.f32 %v6540_v9, %v6538_v6 }
 0x333   :  { %2628 = vmatpush1.bf16.msra.mxu0 %v7744_v48  ;;  %2669 = vmatpush1.bf16.msra.mxu1 %v7749_v51  ;;  %v7867_v12 = vsel %vm2071_vm7, %v2060_v10, %v7757_v44  ;;  %v2076_v38 = vsel %vm2071_vm7, %v2060_v10, 0.0  ;;  %v7880_v44 = vld [vmem:[%s8967_s2 + $0xe4] ss:$16 sps:$4 sm:$0xff]   ;;  %v7895_v48 = vld [vmem:[%s8967_s2 + $0xe8] ss:$16 sps:$4 sm:$0xff]  }
 0x334   :  { %v2077_v58 = vpack.c.bf16 %v2076_v38, %v2076_v38  ;;  %v2420_v37 = vpack.c.bf16 %v7867_v12, %v7867_v12  ;;  %2944 = vmatprep.subr.bf16.mxu0 %v7880_v44  ;;  %2985 = vmatprep.subr.bf16.mxu1 %v7885_v43  ;;  %v7904_v51 = vld [vmem:[%s8967_s2 + $0xc4] ss:$16 sps:$4 sm:$0xff]  }
 0x336   :  { %5658 = vst [vmem:[%s8974_s7 + $0x14] sm:$0xf] %v2077_v58  ;;  %2646 = vmatmul.mubr.bf16.vlgmr.msra.gmra.mxu0 %v2420_v37  ;;  %2687 = vmatmul.mubr.bf16.vlgmr.msra.gmra.mxu1 %v2420_v37 }
 0x337   :  { %2976 = vmatprep.mubr.bf16.mxu0 %v9048_v1  ;;  %3017 = vmatprep.mubr.bf16.mxu1 %v9048_v1 }
 0x338   :  { %2945 = vmatpush1.bf16.msra.mxu0 %v7890_v45  ;;  %2986 = vmatpush1.bf16.msra.mxu1 %v7895_v48 }
 0x339   :  { %2946 = vmatprep.subr.bf16.mxu0 %v7904_v51  ;;  %2987 = vmatprep.subr.bf16.mxu1 %v7919_v42 }
 0x33c   :  { %2947 = vmatpush1.bf16.msra.mxu0 %v7909_v19  ;;  %2988 = vmatpush1.bf16.msra.mxu1 %v7914_v20 }
 0x33d   :  { %2948 = vmatprep.subr.bf16.mxu0 %v7928_v63  ;;  %2989 = vmatprep.subr.bf16.mxu1 %v7933_v49 }
 0x340   :  { %2949 = vmatpush1.bf16.msra.mxu0 %v7938_v55  ;;  %2990 = vmatpush1.bf16.msra.mxu1 %v7943_v34 }
 0x341   :  { %2950 = vmatprep.subr.bf16.mxu0 %v7952_v56  ;;  %2991 = vmatprep.subr.bf16.mxu1 %v7957_v39 }
 0x344   :  { %2951 = vmatpush1.bf16.msra.mxu0 %v7962_v24  ;;  %2992 = vmatpush1.bf16.msra.mxu1 %v7967_v25 }
 0x345   :  { %2952 = vmatprep.subr.bf16.mxu0 %v7976_v26  ;;  %2993 = vmatprep.subr.bf16.mxu1 %v7981_v27 }
 0x348   :  { %2953 = vmatpush1.bf16.msra.mxu0 %v7986_v29  ;;  %2994 = vmatpush1.bf16.msra.mxu1 %v7991_v30 }
 0x349   :  { %2954 = vmatprep.subr.bf16.mxu0 %v8000_v31  ;;  %2995 = vmatprep.subr.bf16.mxu1 %v8005_v32 }
 0x34c   :  { %2955 = vmatpush1.bf16.msra.mxu0 %v8010_v35  ;;  %2996 = vmatpush1.bf16.msra.mxu1 %v8015_v36 }
 0x34d   :  { %2956 = vmatprep.subr.bf16.mxu0 %v8024_v52  ;;  %2997 = vmatprep.subr.bf16.mxu1 %v8029_v61 }
 0x350   :  { %2957 = vmatpush1.bf16.msra.mxu0 %v8034_v33  ;;  %2998 = vmatpush1.bf16.msra.mxu1 %v8039_v50 }
 0x351   :  { %2958 = vmatprep.subr.bf16.mxu0 %v8048_v53  ;;  %2999 = vmatprep.subr.bf16.mxu1 %v8053_v60 }
 0x354   :  { %2959 = vmatpush1.bf16.msra.mxu0 %v8058_v57  ;;  %3000 = vmatpush1.bf16.msra.mxu1 %v8063_v0 }
 0x355   :  { %3275 = vmatprep.subr.bf16.mxu0 %v8072_v47  ;;  %3316 = vmatprep.subr.bf16.mxu1 %v8077_v2 }
 0x3d6   :  { %v2316_v13 = vpop.f32.mrf.mxu0  ;;  %v2357_v62 = vpop.f32.mrf.mxu1 }
 0x3d7   :  { %v2364_v14 = vadd.f32 %v2316_v13, %v2085_v46  ;;  %v2366_v10 = vadd.f32 %v2357_v62, %v2087_v7  ;;  %v2416_v46 = vunpack.c.l.bf16 %v5698_v21 }
 0x3d8   :  { %v2318_v15 = vpop.f32.mrf.mxu0  ;;  %v2359_v17 = vpop.f32.mrf.mxu1 }
 0x3d9   :  { %v5693_v11 = vmul.f32 -1.442695, %v2364_v14  ;;  %v2365_v40 = vadd.f32 %v2318_v15, %v2086_v3  ;;  %v2367_v6 = vadd.f32 %v2359_v17, %v2088_v23  ;;  %v2417_v3 = vunpack.c.h.bf16 %v5698_v21 }
 0x3da   :  { %v2320_v41 = vpop.f32.mrf.mxu0  ;;  %v2361_v22 = vpop.f32.mrf.mxu1 }
 0x3db   :  { %6541 = vpow2.f32 %v5693_v11  ;;  %v5694_v4 = vmul.f32 -1.442695, %v2365_v40  ;;  %v5695_v8 = vmul.f32 -1.442695, %v2367_v6 }
 0x3dc   :  { %v2321_v5 = vpop.f32.mrf.mxu0  ;;  %v2362_v54 = vpop.f32.mrf.mxu1 }
 0x3dd   :  { %6543 = vpow2.f32 %v5694_v4 }
 0x3de   :  { %6545 = vpow2.f32 %v5695_v8 }
 0x3e8   :  { %v6542_v9 = vpop.eup %6541 }
 0x3e9   :  { %v2371_v38 = vadd.f32 1.0, %v6542_v9 }
 0x3ea   :  { %v6544_v58 = vpop.eup %6543 }
 0x3eb   :  { %6547 = vrcp.f32 %v2371_v38  ;;  %v2377_v37 = vadd.f32 1.0, %v6544_v58  ;;  %v6546_v15 = vpop.eup %6545  ;;  %v2401_v38 = vpop.permute.xlu0 %2400 }
 0x3ec   :  { %6549 = vtanh.f32 %v2366_v10  ;;  %v2384_v54 = vadd.f32 1.0, %v6546_v15  ;;  %vm2402_vm8 = vcmp.eq.s32.totalorder %v2401_v38, 1  ;;  %v8150_v38 = vld [vmem:[%s8968_s3 + $0xac] ss:$16 sps:$4 sm:$0xff]  }
 0x3ed   :  { %6551 = vrcp.f32 %v2377_v37  ;;  %v5699_v37 = vld [vmem:[%s8972_s1 + $0x48] sm:$0xff] }
 0x3ee   :  { %v2419_v21 = vunpack.c.h.bf16 %v5699_v37 }
 0x3f6   :  { %v2647_v13 = vpop.f32.mrf.mxu0  ;;  %v2688_v14 = vpop.f32.mrf.mxu1 }
 0x3f7   :  { %v2695_v17 = vadd.f32 %v2647_v13, %v2416_v46  ;;  %v2418_v13 = vunpack.c.l.bf16 %v5699_v37  ;;  %v8159_v37 = vld [vmem:[%s8968_s3 + $0xa0] ss:$16 sps:$4 sm:$0xff]  }
 0x3f8   :  { %v6548_v11 = vpop.eup %6547  ;;  %v2649_v40 = vpop.f32.mrf.mxu0 }
 0x3f9   :  { %v2690_v62 = vpop.f32.mrf.mxu1  ;;  %v6550_v41 = vpop.eup %6549  ;;  %v5732_v22 = vmul.f32 -1.442695, %v2695_v17  ;;  %v2696_v4 = vadd.f32 %v2649_v40, %v2417_v3 }
 0x3fa   :  { %v6552_v5 = vpop.eup %6551  ;;  %v2651_v18 = vpop.f32.mrf.mxu0  ;;  %v2388_v6 = vmul.f32 %v6550_v41, %v6548_v11  ;;  %v2698_v3 = vadd.f32 %v2690_v62, %v2419_v21  ;;  %v2697_v11 = vadd.f32 %v2688_v14, %v2418_v13  ;;  %v8106_v14 = vld [vmem:[%s8968_s3 + $0xe0] ss:$16 sps:$4 sm:$0xff]   ;;  %v8111_v62 = vld [vmem:[%s8968_s3 + $0xe8] ss:$16 sps:$4 sm:$0xff]   ;;  %v8171_v13 = vld [vmem:[%s8968_s3 + $0x84] ss:$16 sps:$4 sm:$0xff]  }
 0x3fb   :  { %v2692_v23 = vpop.f32.mrf.mxu1  ;;  %v2387_v7 = vmul.f32 %v6552_v5, %v7816_v28  ;;  %6553 = vpow2.f32 %v5732_v22  ;;  %v5733_v8 = vmul.f32 -1.442695, %v2696_v4  ;;  %v8164_v21 = vld [vmem:[%s8968_s3 + $0xa8] ss:$16 sps:$4 sm:$0xff]  }
 0x3fc   :  { %v2652_v9 = vpop.f32.mrf.mxu0  ;;  %v5734_v15 = vmul.f32 -1.442695, %v2698_v3 }
 0x3fd   :  { %v2693_v10 = vpop.f32.mrf.mxu1  ;;  %v2389_v58 = vadd.f32 %v2388_v6, %v2387_v7  ;;  %6555 = vpow2.f32 %v5733_v8  ;;  %v8123_v7 = vld [vmem:[%s8968_s3 + $0xcc] ss:$16 sps:$4 sm:$0xff]   ;;  %v8133_v8 = vld [vmem:[%s8968_s3 + $0xc0] ss:$16 sps:$4 sm:$0xff]   ;;  %v8138_v9 = vld [vmem:[%s8968_s3 + $0xc8] ss:$16 sps:$4 sm:$0xff]  }
 0x3fe   :  { %6557 = vrcp.f32 %v2384_v54  ;;  %v8145_v10 = vld [vmem:[%s8968_s3 + $0xa4] ss:$16 sps:$4 sm:$0xff]  }
 0x3ff   :  { %6559 = vtanh.f32 %v2389_v58  ;;  %v8096_v46 = vsel %vm2402_vm8, %v2389_v58, %v7816_v28 }
 0x400   :  { %6561 = vpow2.f32 %v5734_v15  ;;  %v8176_v15 = vld [vmem:[%s8968_s3 + $0x8c] ss:$16 sps:$4 sm:$0xff]  }
 0x408   :  { %v6554_v17 = vpop.eup %6553 }
 0x409   :  { %v2702_v40 = vadd.f32 1.0, %v6554_v17 }
 0x40a   :  { %v6556_v41 = vpop.eup %6555 }
 0x40b   :  { %v6558_v22 = vpop.eup %6557  ;;  %6563 = vrcp.f32 %v2702_v40  ;;  %v2708_v4 = vadd.f32 1.0, %v6556_v41 }
 0x40c   :  { %v6560_v5 = vpop.eup %6559  ;;  %6565 = vtanh.f32 %v2697_v11 }
 0x40d   :  { %6567 = vrcp.f32 %v2708_v4  ;;  %v2391_v54 = vmul.f32 %v6560_v5, %v6558_v22  ;;  %v6562_v58 = vpop.eup %6561  ;;  %v8184_v4 = vld [vmem:[%s8968_s3 + $0x80] ss:$16 sps:$4 sm:$0xff]   ;;  %v8189_v5 = vld [vmem:[%s8968_s3 + $0x88] ss:$16 sps:$4 sm:$0xff]  }
 0x40e   :  { %v2715_v40 = vadd.f32 1.0, %v6562_v58  ;;  %9061 = vst [vmem:[#allocation9_spill] sm:$0xff] %v8189_v5  ;;  %v8208_v58 = vld [vmem:[%s8968_s3 + $0x60] ss:$16 sps:$4 sm:$0xff]  }
 0x40f   :  { %v8100_v18 = vsel %vm2402_vm8, %v2391_v54, %v7820_v59  ;;  %v2407_v28 = vsel %vm2402_vm8, %v2391_v54, 0.0  ;;  %v8118_v59 = vld [vmem:[%s8968_s3 + $0xc4] ss:$16 sps:$4 sm:$0xff]   ;;  %9064 = vst [vmem:[#allocation8_spill] sm:$0xff] %v8208_v58 }
 0x410   :  { %v2408_v23 = vpack.c.bf16 %v2407_v28, %v2407_v28  ;;  %v2751_v6 = vpack.c.bf16 %v8100_v18, %v8100_v18  ;;  %v8196_v54 = vld [vmem:[%s8968_s3 + $0x64] ss:$16 sps:$4 sm:$0xff]   ;;  %v8201_v28 = vld [vmem:[%s8968_s3 + $0x6c] ss:$16 sps:$4 sm:$0xff]   ;;  %6569 = vrcp.f32 %v2715_v40 }
 0x411   :  { %9062 = vst [vmem:[#allocation6_spill] sm:$0xff] %v8196_v54  ;;  %9063 = vst [vmem:[#allocation7_spill] sm:$0xff] %v8201_v28  ;;  %v8229_v40 = vld [vmem:[%s8968_s3 + $0x4c] ss:$16 sps:$4 sm:$0xff]  }
 0x412   :  { %5697 = vst [vmem:[%s8973_s6 + $0xc] sm:$0xf] %v2408_v23  ;;  %2977 = vmatmul.mubr.bf16.vlgmr.msra.gmra.mxu0 %v2751_v6  ;;  %3018 = vmatmul.mubr.bf16.vlgmr.msra.gmra.mxu1 %v2751_v6  ;;  %v2732_v23 = vpop.permute.xlu1 %2731  ;;  %9067 = vst [vmem:[#allocation12_spill] sm:$0xff] %v8229_v40 }
 0x413   :  { %3276 = vmatpush1.bf16.msra.mxu0 %v8106_v14  ;;  %3317 = vmatpush1.bf16.msra.mxu1 %v8111_v62  ;;  %vm2733_vm9 = vcmp.eq.s32.totalorder %v2732_v23, 1 }
 0x414   :  { %3277 = vmatprep.subr.bf16.mxu0 %v8118_v59  ;;  %3318 = vmatprep.subr.bf16.mxu1 %v8123_v7 }
 0x415   :  { %3307 = vmatprep.mubr.bf16.mxu0 %v9048_v1  ;;  %3348 = vmatprep.mubr.bf16.mxu1 %v9048_v1 }
 0x417   :  { %3278 = vmatpush1.bf16.msra.mxu0 %v8133_v8  ;;  %3319 = vmatpush1.bf16.msra.mxu1 %v8138_v9 }
 0x418   :  { %v6564_v3 = vpop.eup %6563  ;;  %3279 = vmatprep.subr.bf16.mxu0 %v8145_v10  ;;  %3320 = vmatprep.subr.bf16.mxu1 %v8150_v38 }
 0x419   :  { %v6566_v17 = vpop.eup %6565 }
 0x41a   :  { %v6568_v11 = vpop.eup %6567  ;;  %v2719_v41 = vmul.f32 %v6566_v17, %v6564_v3  ;;  %v8213_v3 = vld [vmem:[%s8968_s3 + $0x68] ss:$16 sps:$4 sm:$0xff]  }
 0x41b   :  { %v2718_v22 = vmul.f32 %v6568_v11, %v7847_v16  ;;  %3280 = vmatpush1.bf16.msra.mxu0 %v8159_v37  ;;  %3321 = vmatpush1.bf16.msra.mxu1 %v8164_v21  ;;  %9065 = vst [vmem:[#allocation10_spill] sm:$0xff] %v8213_v3  ;;  %v8224_v11 = vld [vmem:[%s8968_s3 + $0x44] ss:$16 sps:$4 sm:$0xff]  }
 0x41c   :  { %3281 = vmatprep.subr.bf16.mxu0 %v8171_v13  ;;  %3322 = vmatprep.subr.bf16.mxu1 %v8176_v15  ;;  %9066 = vst [vmem:[#allocation11_spill] sm:$0xff] %v8224_v11 }
 0x41d   :  { %v2720_v6 = vadd.f32 %v2719_v41, %v2718_v22  ;;  %v8241_v41 = vld [vmem:[%s8968_s3 + $0x48] ss:$16 sps:$4 sm:$0xff]   ;;  %v8248_v22 = vld [vmem:[%s8968_s3 + $0x24] ss:$16 sps:$4 sm:$0xff]  }
 0x41e   :  { %9069 = vst [vmem:[#allocation14_spill] sm:$0xff] %v8241_v41  ;;  %9070 = vst [vmem:[#allocation15_spill] sm:$0xff] %v8248_v22 }
 0x41f   :  { %6571 = vtanh.f32 %v2720_v6  ;;  %3282 = vmatpush1.bf16.msra.mxu0 %v8184_v4  ;;  %3323 = vmatpush1.bf16.msra.mxu1 %v8189_v5  ;;  %v8217_v17 = vsel %vm2733_vm9, %v2720_v6, %v7847_v16  ;;  %v8236_v16 = vld [vmem:[%s8968_s3 + $0x40] ss:$16 sps:$4 sm:$0xff]   ;;  %v8253_v6 = vld [vmem:[%s8968_s3 + $0x2c] ss:$16 sps:$4 sm:$0xff]  }
 0x420   :  { %3283 = vmatprep.subr.bf16.mxu0 %v8196_v54  ;;  %3324 = vmatprep.subr.bf16.mxu1 %v8201_v28  ;;  %9068 = vst [vmem:[#allocation13_spill] sm:$0xff] %v8236_v16  ;;  %9071 = vst [vmem:[#allocation16_spill] sm:$0xff] %v8253_v6 }
 0x423   :  { %3284 = vmatpush1.bf16.msra.mxu0 %v8208_v58  ;;  %3325 = vmatpush1.bf16.msra.mxu1 %v8213_v3  ;;  %v6570_v3 = vpop.eup %6569 }
 0x424   :  { %3285 = vmatprep.subr.bf16.mxu0 %v8224_v11  ;;  %3326 = vmatprep.subr.bf16.mxu1 %v8229_v40  ;;  %v8260_v11 = vld [vmem:[%s8968_s3 + $0x20] ss:$16 sps:$4 sm:$0xff]   ;;  %v8265_v40 = vld [vmem:[%s8968_s3 + $0x28] ss:$16 sps:$4 sm:$0xff]  }
 0x425   :  { %9072 = vst [vmem:[#allocation17_spill] sm:$0xff] %v8260_v11  ;;  %9073 = vst [vmem:[#allocation18_spill] sm:$0xff] %v8265_v40 }
 0x427   :  { %3286 = vmatpush1.bf16.msra.mxu0 %v8236_v16  ;;  %3327 = vmatpush1.bf16.msra.mxu1 %v8241_v41  ;;  %v8272_v16 = vld [vmem:[%s8968_s3 + $0x4] ss:$16 sps:$4 sm:$0xff]   ;;  %v8277_v41 = vld [vmem:[%s8968_s3 + $0xc] ss:$16 sps:$4 sm:$0xff]  }
 0x428   :  { %3287 = vmatprep.subr.bf16.mxu0 %v8248_v22  ;;  %3328 = vmatprep.subr.bf16.mxu1 %v8253_v6  ;;  %v8284_v22 = vld [vmem:[%s8968_s3] ss:$16 sps:$4 sm:$0xff]   ;;  %v8289_v6 = vld [vmem:[%s8968_s3 + $0x8] ss:$16 sps:$4 sm:$0xff]  }
 0x42b   :  { %3288 = vmatpush1.bf16.msra.mxu0 %v8260_v11  ;;  %3329 = vmatpush1.bf16.msra.mxu1 %v8265_v40 }
 0x42c   :  { %v6572_v58 = vpop.eup %6571  ;;  %3289 = vmatprep.subr.bf16.mxu0 %v8272_v16  ;;  %3330 = vmatprep.subr.bf16.mxu1 %v8277_v41 }
 0x42d   :  { %v2722_v28 = vmul.f32 %v6572_v58, %v6570_v3 }
 0x42f   :  { %3290 = vmatpush1.bf16.msra.mxu0 %v8284_v22  ;;  %3331 = vmatpush1.bf16.msra.mxu1 %v8289_v6  ;;  %v8297_v40 = vsel %vm2733_vm9, %v2722_v28, %v7867_v12  ;;  %v2738_v11 = vsel %vm2733_vm9, %v2722_v28, 0.0  ;;  %v5737_v12 = vld [vmem:[%s8971_s0 + $0x40] sm:$0xff] }
 0x430   :  { %v2739_v54 = vpack.c.bf16 %v2738_v11, %v2738_v11  ;;  %v3082_v5 = vpack.c.bf16 %v8297_v40, %v8297_v40  ;;  %3606 = vmatprep.subr.bf16.mxu0 %v7880_v44  ;;  %3647 = vmatprep.subr.bf16.mxu1 %v7885_v43  ;;  %v2747_v44 = vunpack.c.l.bf16 %v5737_v12  ;;  %v2748_v43 = vunpack.c.h.bf16 %v5737_v12 }
 0x432   :  { %5736 = vst [vmem:[%s8974_s7 + $0x10] sm:$0xf] %v2739_v54  ;;  %3308 = vmatmul.mubr.bf16.vlgmr.msra.gmra.mxu0 %v3082_v5  ;;  %3349 = vmatmul.mubr.bf16.vlgmr.msra.gmra.mxu1 %v3082_v5 }
 0x433   :  { %3607 = vmatpush1.bf16.msra.mxu0 %v7890_v45  ;;  %3648 = vmatpush1.bf16.msra.mxu1 %v7895_v48 }
 0x434   :  { %3608 = vmatprep.subr.bf16.mxu0 %v7904_v51  ;;  %3649 = vmatprep.subr.bf16.mxu1 %v7919_v42 }
 0x435   :  { %3638 = vmatprep.mubr.bf16.mxu0 %v9048_v1  ;;  %3679 = vmatprep.mubr.bf16.mxu1 %v9048_v1 }
 0x437   :  { %3609 = vmatpush1.bf16.msra.mxu0 %v7909_v19  ;;  %3650 = vmatpush1.bf16.msra.mxu1 %v7914_v20 }
 0x438   :  { %3610 = vmatprep.subr.bf16.mxu0 %v7928_v63  ;;  %3651 = vmatprep.subr.bf16.mxu1 %v7933_v49 }
 0x43b   :  { %3611 = vmatpush1.bf16.msra.mxu0 %v7938_v55  ;;  %3652 = vmatpush1.bf16.msra.mxu1 %v7943_v34 }
 0x43c   :  { %3612 = vmatprep.subr.bf16.mxu0 %v7952_v56  ;;  %3653 = vmatprep.subr.bf16.mxu1 %v7957_v39 }
 0x43f   :  { %3613 = vmatpush1.bf16.msra.mxu0 %v7962_v24  ;;  %3654 = vmatpush1.bf16.msra.mxu1 %v7967_v25  ;;  %v5738_v24 = vld [vmem:[%s8971_s0 + $0x48] sm:$0xff] }
 0x440   :  { %3614 = vmatprep.subr.bf16.mxu0 %v7976_v26  ;;  %3655 = vmatprep.subr.bf16.mxu1 %v7981_v27  ;;  %v2750_v25 = vunpack.c.h.bf16 %v5738_v24  ;;  %v2749_v27 = vunpack.c.l.bf16 %v5738_v24 }
 0x443   :  { %3615 = vmatpush1.bf16.msra.mxu0 %v7986_v29  ;;  %3656 = vmatpush1.bf16.msra.mxu1 %v7991_v30 }
 0x444   :  { %3616 = vmatprep.subr.bf16.mxu0 %v8000_v31  ;;  %3657 = vmatprep.subr.bf16.mxu1 %v8005_v32 }
 0x447   :  { %3617 = vmatpush1.bf16.msra.mxu0 %v8010_v35  ;;  %3658 = vmatpush1.bf16.msra.mxu1 %v8015_v36 }
 0x448   :  { %3618 = vmatprep.subr.bf16.mxu0 %v8024_v52  ;;  %3659 = vmatprep.subr.bf16.mxu1 %v8029_v61  ;;  %v5776_v52 = vld [vmem:[%s8972_s1 + $0x30] sm:$0xff] }
 0x449   :  { %v3078_v61 = vunpack.c.l.bf16 %v5776_v52 }
 0x44b   :  { %3619 = vmatpush1.bf16.msra.mxu0 %v8034_v33  ;;  %3660 = vmatpush1.bf16.msra.mxu1 %v8039_v50  ;;  %v3079_v33 = vunpack.c.h.bf16 %v5776_v52 }
 0x44c   :  { %3620 = vmatprep.subr.bf16.mxu0 %v8048_v53  ;;  %3661 = vmatprep.subr.bf16.mxu1 %v8053_v60 }
 0x44f   :  { %3621 = vmatpush1.bf16.msra.mxu0 %v8058_v57  ;;  %3662 = vmatpush1.bf16.msra.mxu1 %v8063_v0 }
 0x450   :  { %3937 = vmatprep.subr.bf16.mxu0 %v8072_v47  ;;  %3978 = vmatprep.subr.bf16.mxu1 %v8077_v2 }
 0x4d2   :  { %v2978_v45 = vpop.f32.mrf.mxu0  ;;  %v3019_v48 = vpop.f32.mrf.mxu1 }
 0x4d3   :  { %v3026_v51 = vadd.f32 %v2978_v45, %v2747_v44  ;;  %v3028_v31 = vadd.f32 %v3019_v48, %v2749_v27 }
 0x4d4   :  { %v2980_v19 = vpop.f32.mrf.mxu0  ;;  %v3021_v20 = vpop.f32.mrf.mxu1 }
 0x4d5   :  { %v5771_v42 = vmul.f32 -1.442695, %v3026_v51  ;;  %v3027_v63 = vadd.f32 %v2980_v19, %v2748_v43  ;;  %v3029_v26 = vadd.f32 %v3021_v20, %v2750_v25  ;;  %v3063_v51 = vpop.permute.xlu0 %3062  ;;  %v5777_v20 = vld [vmem:[%s8972_s1 + $0x38] sm:$0xff] }
 0x4d6   :  { %v2982_v49 = vpop.f32.mrf.mxu0  ;;  %v3023_v55 = vpop.f32.mrf.mxu1  ;;  %vm3064_vm10 = vcmp.eq.s32.totalorder %v3063_v51, 1  ;;  %v8497_v51 = vld [vmem:[%s8967_s2 + $0x8c] ss:$16 sps:$4 sm:$0xff]  }
 0x4d7   :  { %6573 = vpow2.f32 %v5771_v42  ;;  %v5772_v34 = vmul.f32 -1.442695, %v3027_v63  ;;  %v5773_v29 = vmul.f32 -1.442695, %v3029_v26  ;;  %v3081_v42 = vunpack.c.h.bf16 %v5777_v20 }
 0x4d8   :  { %v2983_v56 = vpop.f32.mrf.mxu0  ;;  %v3024_v39 = vpop.f32.mrf.mxu1  ;;  %v3080_v55 = vunpack.c.l.bf16 %v5777_v20  ;;  %v8507_v20 = vld [vmem:[%s8967_s2 + $0x88] ss:$16 sps:$4 sm:$0xff]  }
 0x4d9   :  { %6575 = vpow2.f32 %v5772_v34 }
 0x4da   :  { %6577 = vpow2.f32 %v5773_v29 }
 0x4e4   :  { %v6574_v30 = vpop.eup %6573 }
 0x4e5   :  { %v3033_v32 = vadd.f32 1.0, %v6574_v30 }
 0x4e6   :  { %v6576_v35 = vpop.eup %6575 }
 0x4e7   :  { %6579 = vrcp.f32 %v3033_v32  ;;  %v3039_v36 = vadd.f32 1.0, %v6576_v35  ;;  %v6578_v60 = vpop.eup %6577 }
 0x4e8   :  { %6581 = vtanh.f32 %v3028_v31  ;;  %v3046_v58 = vadd.f32 1.0, %v6578_v60 }
 0x4e9   :  { %6583 = vrcp.f32 %v3039_v36 }
 0x4f2   :  { %v3309_v50 = vpop.f32.mrf.mxu0  ;;  %v3350_v53 = vpop.f32.mrf.mxu1 }
 0x4f3   :  { %v3357_v57 = vadd.f32 %v3309_v50, %v3078_v61  ;;  %v3359_v39 = vadd.f32 %v3350_v53, %v3080_v55  ;;  %v9079_v61 = vld [vmem:[#allocation11_spill] sm:$0xff]  ;;  %v9081_v50 = vld [vmem:[#allocation13_spill] sm:$0xff]  ;;  %v8526_v55 = vld [vmem:[%s8967_s2 + $0x60] ss:$16 sps:$4 sm:$0xff]  }
 0x4f4   :  { %v6580_v0 = vpop.eup %6579  ;;  %v3311_v47 = vpop.f32.mrf.mxu0  ;;  %v9083_v53 = vld [vmem:[#allocation15_spill] sm:$0xff] }
 0x4f5   :  { %v3352_v2 = vpop.f32.mrf.mxu1  ;;  %v6582_v5 = vpop.eup %6581  ;;  %v5810_v54 = vmul.f32 -1.442695, %v3357_v57  ;;  %v3358_v28 = vadd.f32 %v3311_v47, %v3079_v33  ;;  %v9080_v33 = vld [vmem:[#allocation12_spill] sm:$0xff]  ;;  %v9085_v57 = vld [vmem:[#allocation17_spill] sm:$0xff] }
 0x4f6   :  { %v6584_v23 = vpop.eup %6583  ;;  %v3313_v3 = vpop.f32.mrf.mxu0  ;;  %v3050_v12 = vmul.f32 %v6582_v5, %v6580_v0  ;;  %v3360_v49 = vadd.f32 %v3352_v2, %v3081_v42  ;;  %v9086_v0 = vld [vmem:[#allocation18_spill] sm:$0xff] }
 0x4f7   :  { %v3354_v11 = vpop.f32.mrf.mxu1  ;;  %v3049_v44 = vmul.f32 %v6584_v23, %v8096_v46  ;;  %6585 = vpow2.f32 %v5810_v54  ;;  %v5811_v43 = vmul.f32 -1.442695, %v3358_v28  ;;  %v8454_v3 = vld [vmem:[%s8967_s2 + $0xc8] ss:$16 sps:$4 sm:$0xff]   ;;  %v8516_v42 = vld [vmem:[%s8967_s2 + $0x64] ss:$16 sps:$4 sm:$0xff]  }
 0x4f8   :  { %v3314_v45 = vpop.f32.mrf.mxu0  ;;  %v5812_v34 = vmul.f32 -1.442695, %v3360_v49  ;;  %v8459_v11 = vld [vmem:[%s8967_s2 + $0xcc] ss:$16 sps:$4 sm:$0xff]  }
 0x4f9   :  { %v3355_v48 = vpop.f32.mrf.mxu1  ;;  %v3051_v19 = vadd.f32 %v3050_v12, %v3049_v44  ;;  %6587 = vpow2.f32 %v5811_v43  ;;  %v8468_v12 = vld [vmem:[%s8967_s2 + $0xa4] ss:$16 sps:$4 sm:$0xff]   ;;  %v8473_v44 = vld [vmem:[%s8967_s2 + $0xac] ss:$16 sps:$4 sm:$0xff]   ;;  %v8478_v43 = vld [vmem:[%s8967_s2 + $0xa0] ss:$16 sps:$4 sm:$0xff]  }
 0x4fa   :  { %6589 = vrcp.f32 %v3046_v58  ;;  %v8449_v58 = vld [vmem:[%s8967_s2 + $0xc0] ss:$16 sps:$4 sm:$0xff]   ;;  %v8483_v45 = vld [vmem:[%s8967_s2 + $0xa8] ss:$16 sps:$4 sm:$0xff]   ;;  %v8492_v48 = vld [vmem:[%s8967_s2 + $0x84] ss:$16 sps:$4 sm:$0xff]  }
 0x4fb   :  { %6591 = vtanh.f32 %v3051_v19  ;;  %v8356_v63 = vsel %vm3064_vm10, %v3051_v19, %v8096_v46  ;;  %v8502_v19 = vld [vmem:[%s8967_s2 + $0x80] ss:$16 sps:$4 sm:$0xff]   ;;  %v8521_v49 = vld [vmem:[%s8967_s2 + $0x6c] ss:$16 sps:$4 sm:$0xff]  }
 0x4fc   :  { %6593 = vpow2.f32 %v5812_v34  ;;  %v8531_v34 = vld [vmem:[%s8967_s2 + $0x68] ss:$16 sps:$4 sm:$0xff]  }
 0x504   :  { %v6586_v56 = vpop.eup %6585 }
 0x505   :  { %v3364_v24 = vadd.f32 1.0, %v6586_v56  ;;  %v8540_v56 = vld [vmem:[%s8967_s2 + $0x44] ss:$16 sps:$4 sm:$0xff]  }
 0x506   :  { %v6588_v25 = vpop.eup %6587 }
 0x507   :  { %v6590_v26 = vpop.eup %6589  ;;  %6595 = vrcp.f32 %v3364_v24  ;;  %v3370_v27 = vadd.f32 1.0, %v6588_v25  ;;  %v8550_v24 = vld [vmem:[%s8967_s2 + $0x40] ss:$16 sps:$4 sm:$0xff]   ;;  %v8555_v25 = vld [vmem:[%s8967_s2 + $0x48] ss:$16 sps:$4 sm:$0xff]  }
 0x508   :  { %v6592_v29 = vpop.eup %6591  ;;  %6597 = vtanh.f32 %v3359_v39  ;;  %v8545_v39 = vld [vmem:[%s8967_s2 + $0x4c] ss:$16 sps:$4 sm:$0xff]  }
 0x509   :  { %6599 = vrcp.f32 %v3370_v27  ;;  %v3053_v30 = vmul.f32 %v6592_v29, %v6590_v26  ;;  %v8564_v26 = vld [vmem:[%s8967_s2 + $0x24] ss:$16 sps:$4 sm:$0xff]   ;;  %v8569_v27 = vld [vmem:[%s8967_s2 + $0x2c] ss:$16 sps:$4 sm:$0xff]   ;;  %v8574_v29 = vld [vmem:[%s8967_s2 + $0x20] ss:$16 sps:$4 sm:$0xff]  }
 0x50b   :  { %v8360_v31 = vsel %vm3064_vm10, %v3053_v30, %v8100_v18  ;;  %v3069_v46 = vsel %vm3064_vm10, %v3053_v30, 0.0  ;;  %v6594_v18 = vpop.eup %6593  ;;  %v8579_v30 = vld [vmem:[%s8967_s2 + $0x28] ss:$16 sps:$4 sm:$0xff]  }
 0x50c   :  { %v3070_v32 = vpack.c.bf16 %v3069_v46, %v3069_v46  ;;  %v3413_v35 = vpack.c.bf16 %v8360_v31, %v8360_v31  ;;  %v3377_v52 = vadd.f32 1.0, %v6594_v18  ;;  %v8588_v46 = vld [vmem:[%s8967_s2 + $0x4] ss:$16 sps:$4 sm:$0xff]   ;;  %v8603_v18 = vld [vmem:[%s8967_s2 + $0x8] ss:$16 sps:$4 sm:$0xff]  }
 0x50e   :  { %5775 = vst [vmem:[%s8973_s6 + $0x10] sm:$0xf] %v3070_v32  ;;  %3639 = vmatmul.mubr.bf16.vlgmr.msra.gmra.mxu0 %v3413_v35  ;;  %3680 = vmatmul.mubr.bf16.vlgmr.msra.gmra.mxu1 %v3413_v35  ;;  %6601 = vrcp.f32 %v3377_v52  ;;  %v8593_v32 = vld [vmem:[%s8967_s2 + $0xc] ss:$16 sps:$4 sm:$0xff]   ;;  %v8598_v35 = vld [vmem:[%s8967_s2] ss:$16 sps:$4 sm:$0xff]  }
 0x50f   :  { %3938 = vmatpush1.bf16.msra.mxu0 %v8106_v14  ;;  %3979 = vmatpush1.bf16.msra.mxu1 %v8111_v62 }
 0x510   :  { %3939 = vmatprep.subr.bf16.mxu0 %v8118_v59  ;;  %3980 = vmatprep.subr.bf16.mxu1 %v8123_v7 }
 0x511   :  { %3969 = vmatprep.mubr.bf16.mxu0 %v9048_v1  ;;  %4010 = vmatprep.mubr.bf16.mxu1 %v9048_v1 }
 0x513   :  { %3940 = vmatpush1.bf16.msra.mxu0 %v8133_v8  ;;  %3981 = vmatpush1.bf16.msra.mxu1 %v8138_v9  ;;  %v3394_v8 = vpop.permute.xlu1 %3393 }
 0x514   :  { %v6596_v36 = vpop.eup %6595  ;;  %3941 = vmatprep.subr.bf16.mxu0 %v8145_v10  ;;  %3982 = vmatprep.subr.bf16.mxu1 %v8150_v38  ;;  %vm3395_vm11 = vcmp.eq.s32.totalorder %v3394_v8, 1  ;;  %v9074_v10 = vld [vmem:[#allocation9_spill] sm:$0xff] }
 0x515   :  { %v6598_v14 = vpop.eup %6597 }
 0x516   :  { %v6600_v62 = vpop.eup %6599  ;;  %v3381_v59 = vmul.f32 %v6598_v14, %v6596_v36  ;;  %v8612_v36 = vld [vmem:[%s8968_s3 + $0xe4] ss:$16 sps:$4 sm:$0xff]   ;;  %v8617_v14 = vld [vmem:[%s8968_s3 + $0xec] ss:$16 sps:$4 sm:$0xff]  }
 0x517   :  { %v3380_v7 = vmul.f32 %v6600_v62, %v8217_v17  ;;  %3942 = vmatpush1.bf16.msra.mxu0 %v8159_v37  ;;  %3983 = vmatpush1.bf16.msra.mxu1 %v8164_v21  ;;  %v9075_v37 = vld [vmem:[#allocation6_spill] sm:$0xff]  ;;  %v9076_v21 = vld [vmem:[#allocation7_spill] sm:$0xff]  ;;  %v5815_v62 = vld [vmem:[%s8971_s0 + $0x50] sm:$0xff] }
 0x518   :  { %3943 = vmatprep.subr.bf16.mxu0 %v8171_v13  ;;  %3984 = vmatprep.subr.bf16.mxu1 %v8176_v15  ;;  %v9077_v13 = vld [vmem:[#allocation8_spill] sm:$0xff]  ;;  %v9078_v15 = vld [vmem:[#allocation10_spill] sm:$0xff]  ;;  %v3409_v52 = vunpack.c.l.bf16 %v5815_v62 }
 0x519   :  { %v3382_v9 = vadd.f32 %v3381_v59, %v3380_v7  ;;  %v3410_v59 = vunpack.c.h.bf16 %v5815_v62  ;;  %v5854_v62 = vld [vmem:[%s8972_s1 + $0x20] sm:$0xff] }
 0x51b   :  { %6603 = vtanh.f32 %v3382_v9  ;;  %3944 = vmatpush1.bf16.msra.mxu0 %v8184_v4  ;;  %3985 = vmatpush1.bf16.msra.mxu1 %v9074_v10  ;;  %v8387_v38 = vsel %vm3395_vm11, %v3382_v9, %v8217_v17  ;;  %v9082_v4 = vld [vmem:[#allocation14_spill] sm:$0xff]  ;;  %v9084_v17 = vld [vmem:[#allocation16_spill] sm:$0xff]  ;;  %v6602_v60 = vpop.eup %6601 }
 0x51c   :  { %3945 = vmatprep.subr.bf16.mxu0 %v9075_v37  ;;  %3986 = vmatprep.subr.bf16.mxu1 %v9076_v21 }
 0x51f   :  { %3946 = vmatpush1.bf16.msra.mxu0 %v9077_v13  ;;  %3987 = vmatpush1.bf16.msra.mxu1 %v9078_v15 }
 0x520   :  { %3947 = vmatprep.subr.bf16.mxu0 %v9079_v61  ;;  %3988 = vmatprep.subr.bf16.mxu1 %v9080_v33 }
 0x523   :  { %3948 = vmatpush1.bf16.msra.mxu0 %v9081_v50  ;;  %3989 = vmatpush1.bf16.msra.mxu1 %v9082_v4 }
 0x524   :  { %3949 = vmatprep.subr.bf16.mxu0 %v9083_v53  ;;  %3990 = vmatprep.subr.bf16.mxu1 %v9084_v17  ;;  %v5816_v53 = vld [vmem:[%s8971_s0 + $0x58] sm:$0xff] }
 0x525   :  { %v3412_v17 = vunpack.c.h.bf16 %v5816_v53 }
 0x527   :  { %3950 = vmatpush1.bf16.msra.mxu0 %v9085_v57  ;;  %3991 = vmatpush1.bf16.msra.mxu1 %v9086_v0  ;;  %v3411_v57 = vunpack.c.l.bf16 %v5816_v53 }
 0x528   :  { %v6604_v47 = vpop.eup %6603  ;;  %3951 = vmatprep.subr.bf16.mxu0 %v8272_v16  ;;  %3992 = vmatprep.subr.bf16.mxu1 %v8277_v41  ;;  %v8425_v16 = vld [vmem:[%s8967_s2 + $0xec] ss:$16 sps:$4 sm:$0xff]   ;;  %v8430_v41 = vld [vmem:[%s8967_s2 + $0xe0] ss:$16 sps:$4 sm:$0xff]  }
 0x529   :  { %v3384_v2 = vmul.f32 %v6604_v47, %v6602_v60 }
 0x52b   :  { %3952 = vmatpush1.bf16.msra.mxu0 %v8284_v22  ;;  %3993 = vmatpush1.bf16.msra.mxu1 %v8289_v6  ;;  %v8407_v5 = vsel %vm3395_vm11, %v3384_v2, %v8297_v40  ;;  %v3400_v54 = vsel %vm3395_vm11, %v3384_v2, 0.0  ;;  %v8420_v40 = vld [vmem:[%s8967_s2 + $0xe4] ss:$16 sps:$4 sm:$0xff]   ;;  %v8435_v22 = vld [vmem:[%s8967_s2 + $0xe8] ss:$16 sps:$4 sm:$0xff]  }
 0x52c   :  { %v3401_v28 = vpack.c.bf16 %v3400_v54, %v3400_v54  ;;  %v3744_v23 = vpack.c.bf16 %v8407_v5, %v8407_v5  ;;  %4268 = vmatprep.subr.bf16.mxu0 %v8420_v40  ;;  %4309 = vmatprep.subr.bf16.mxu1 %v8425_v16  ;;  %v8444_v6 = vld [vmem:[%s8967_s2 + $0xc4] ss:$16 sps:$4 sm:$0xff]  }
 0x52e   :  { %5814 = vst [vmem:[%s8974_s7 + $0xc] sm:$0xf] %v3401_v28  ;;  %3970 = vmatmul.mubr.bf16.vlgmr.msra.gmra.mxu0 %v3744_v23  ;;  %4011 = vmatmul.mubr.bf16.vlgmr.msra.gmra.mxu1 %v3744_v23 }
 0x52f   :  { %4300 = vmatprep.mubr.bf16.mxu0 %v9048_v1  ;;  %4341 = vmatprep.mubr.bf16.mxu1 %v9048_v1 }
 0x530   :  { %4269 = vmatpush1.bf16.msra.mxu0 %v8430_v41  ;;  %4310 = vmatpush1.bf16.msra.mxu1 %v8435_v22 }
 0x531   :  { %4270 = vmatprep.subr.bf16.mxu0 %v8444_v6  ;;  %4311 = vmatprep.subr.bf16.mxu1 %v8459_v11 }
 0x534   :  { %4271 = vmatpush1.bf16.msra.mxu0 %v8449_v58  ;;  %4312 = vmatpush1.bf16.msra.mxu1 %v8454_v3 }
 0x535   :  { %4272 = vmatprep.subr.bf16.mxu0 %v8468_v12  ;;  %4313 = vmatprep.subr.bf16.mxu1 %v8473_v44 }
 0x538   :  { %4273 = vmatpush1.bf16.msra.mxu0 %v8478_v43  ;;  %4314 = vmatpush1.bf16.msra.mxu1 %v8483_v45 }
 0x539   :  { %4274 = vmatprep.subr.bf16.mxu0 %v8492_v48  ;;  %4315 = vmatprep.subr.bf16.mxu1 %v8497_v51 }
 0x53c   :  { %4275 = vmatpush1.bf16.msra.mxu0 %v8502_v19  ;;  %4316 = vmatpush1.bf16.msra.mxu1 %v8507_v20 }
 0x53d   :  { %4276 = vmatprep.subr.bf16.mxu0 %v8516_v42  ;;  %4317 = vmatprep.subr.bf16.mxu1 %v8521_v49 }
 0x540   :  { %4277 = vmatpush1.bf16.msra.mxu0 %v8526_v55  ;;  %4318 = vmatpush1.bf16.msra.mxu1 %v8531_v34 }
 0x541   :  { %4278 = vmatprep.subr.bf16.mxu0 %v8540_v56  ;;  %4319 = vmatprep.subr.bf16.mxu1 %v8545_v39 }
 0x544   :  { %4279 = vmatpush1.bf16.msra.mxu0 %v8550_v24  ;;  %4320 = vmatpush1.bf16.msra.mxu1 %v8555_v25 }
 0x545   :  { %4280 = vmatprep.subr.bf16.mxu0 %v8564_v26  ;;  %4321 = vmatprep.subr.bf16.mxu1 %v8569_v27 }
 0x548   :  { %4281 = vmatpush1.bf16.msra.mxu0 %v8574_v29  ;;  %4322 = vmatpush1.bf16.msra.mxu1 %v8579_v30 }
 0x549   :  { %4282 = vmatprep.subr.bf16.mxu0 %v8588_v46  ;;  %4323 = vmatprep.subr.bf16.mxu1 %v8593_v32 }
 0x54c   :  { %4283 = vmatpush1.bf16.msra.mxu0 %v8598_v35  ;;  %4324 = vmatpush1.bf16.msra.mxu1 %v8603_v18 }
 0x54d   :  { %4599 = vmatprep.subr.bf16.mxu0 %v8612_v36  ;;  %4640 = vmatprep.subr.bf16.mxu1 %v8617_v14 }
 0x5ce   :  { %v3640_v7 = vpop.f32.mrf.mxu0  ;;  %v3681_v8 = vpop.f32.mrf.mxu1 }
 0x5cf   :  { %v3688_v9 = vadd.f32 %v3640_v7, %v3409_v52  ;;  %v3690_v2 = vadd.f32 %v3681_v8, %v3411_v57  ;;  %v3740_v52 = vunpack.c.l.bf16 %v5854_v62 }
 0x5d0   :  { %v3642_v10 = vpop.f32.mrf.mxu0  ;;  %v3683_v37 = vpop.f32.mrf.mxu1 }
 0x5d1   :  { %v5849_v21 = vmul.f32 -1.442695, %v3688_v9  ;;  %v3689_v13 = vadd.f32 %v3642_v10, %v3410_v59  ;;  %v3691_v60 = vadd.f32 %v3683_v37, %v3412_v17  ;;  %v3741_v59 = vunpack.c.h.bf16 %v5854_v62 }
 0x5d2   :  { %v3644_v15 = vpop.f32.mrf.mxu0  ;;  %v3685_v61 = vpop.f32.mrf.mxu1 }
 0x5d3   :  { %6605 = vpow2.f32 %v5849_v21  ;;  %v5850_v33 = vmul.f32 -1.442695, %v3689_v13  ;;  %v5851_v0 = vmul.f32 -1.442695, %v3691_v60 }
 0x5d4   :  { %v3645_v50 = vpop.f32.mrf.mxu0  ;;  %v3686_v4 = vpop.f32.mrf.mxu1 }
 0x5d5   :  { %6607 = vpow2.f32 %v5850_v33 }
 0x5d6   :  { %6609 = vpow2.f32 %v5851_v0 }
 0x5e0   :  { %v6606_v47 = vpop.eup %6605 }
 0x5e1   :  { %v3695_v54 = vadd.f32 1.0, %v6606_v47 }
 0x5e2   :  { %v6608_v28 = vpop.eup %6607 }
 0x5e3   :  { %6611 = vrcp.f32 %v3695_v54  ;;  %v3701_v23 = vadd.f32 1.0, %v6608_v28  ;;  %v6610_v10 = vpop.eup %6609  ;;  %v3725_v54 = vpop.permute.xlu0 %3724 }
 0x5e4   :  { %6613 = vtanh.f32 %v3690_v2  ;;  %v3708_v4 = vadd.f32 1.0, %v6610_v10  ;;  %vm3726_vm12 = vcmp.eq.s32.totalorder %v3725_v54, 1  ;;  %v8690_v54 = vld [vmem:[%s8968_s3 + $0xac] ss:$16 sps:$4 sm:$0xff]  }
 0x5e5   :  { %6615 = vrcp.f32 %v3701_v23  ;;  %v5855_v23 = vld [vmem:[%s8972_s1 + $0x28] sm:$0xff] }
 0x5e6   :  { %v3743_v62 = vunpack.c.h.bf16 %v5855_v23 }
 0x5ee   :  { %v3971_v7 = vpop.f32.mrf.mxu0  ;;  %v4012_v9 = vpop.f32.mrf.mxu1 }
 0x5ef   :  { %v4019_v37 = vadd.f32 %v3971_v7, %v3740_v52  ;;  %v3742_v7 = vunpack.c.l.bf16 %v5855_v23  ;;  %v8699_v23 = vld [vmem:[%s8968_s3 + $0xa0] ss:$16 sps:$4 sm:$0xff]  }
 0x5f0   :  { %v6612_v21 = vpop.eup %6611  ;;  %v3973_v13 = vpop.f32.mrf.mxu0 }
 0x5f1   :  { %v4014_v8 = vpop.f32.mrf.mxu1  ;;  %v6614_v15 = vpop.eup %6613  ;;  %v5888_v61 = vmul.f32 -1.442695, %v4019_v37  ;;  %v4020_v33 = vadd.f32 %v3973_v13, %v3741_v59 }
 0x5f2   :  { %v6616_v50 = vpop.eup %6615  ;;  %v3975_v53 = vpop.f32.mrf.mxu0  ;;  %v3712_v60 = vmul.f32 %v6614_v15, %v6612_v21  ;;  %v4022_v59 = vadd.f32 %v4014_v8, %v3743_v62  ;;  %v4021_v21 = vadd.f32 %v4012_v9, %v3742_v7  ;;  %v8646_v9 = vld [vmem:[%s8968_s3 + $0xe0] ss:$16 sps:$4 sm:$0xff]   ;;  %v8651_v8 = vld [vmem:[%s8968_s3 + $0xe8] ss:$16 sps:$4 sm:$0xff]   ;;  %v8711_v7 = vld [vmem:[%s8968_s3 + $0x84] ss:$16 sps:$4 sm:$0xff]  }
 0x5f3   :  { %v4016_v17 = vpop.f32.mrf.mxu1  ;;  %v3711_v57 = vmul.f32 %v6616_v50, %v8356_v63  ;;  %6617 = vpow2.f32 %v5888_v61  ;;  %v5889_v0 = vmul.f32 -1.442695, %v4020_v33  ;;  %v8704_v62 = vld [vmem:[%s8968_s3 + $0xa8] ss:$16 sps:$4 sm:$0xff]  }
 0x5f4   :  { %v3976_v47 = vpop.f32.mrf.mxu0  ;;  %v5890_v10 = vmul.f32 -1.442695, %v4022_v59 }
 0x5f5   :  { %v4017_v2 = vpop.f32.mrf.mxu1  ;;  %v3713_v28 = vadd.f32 %v3712_v60, %v3711_v57  ;;  %6619 = vpow2.f32 %v5889_v0  ;;  %v8663_v57 = vld [vmem:[%s8968_s3 + $0xcc] ss:$16 sps:$4 sm:$0xff]   ;;  %v8673_v0 = vld [vmem:[%s8968_s3 + $0xc0] ss:$16 sps:$4 sm:$0xff]   ;;  %v8678_v47 = vld [vmem:[%s8968_s3 + $0xc8] ss:$16 sps:$4 sm:$0xff]  }
 0x5f6   :  { %6621 = vrcp.f32 %v3708_v4  ;;  %v8685_v2 = vld [vmem:[%s8968_s3 + $0xa4] ss:$16 sps:$4 sm:$0xff]  }
 0x5f7   :  { %6623 = vtanh.f32 %v3713_v28  ;;  %v8636_v52 = vsel %vm3726_vm12, %v3713_v28, %v8356_v63 }
 0x5f8   :  { %6625 = vpow2.f32 %v5890_v10  ;;  %v8716_v10 = vld [vmem:[%s8968_s3 + $0x8c] ss:$16 sps:$4 sm:$0xff]  }
 0x600   :  { %v6618_v37 = vpop.eup %6617 }
 0x601   :  { %v4026_v13 = vadd.f32 1.0, %v6618_v37 }
 0x602   :  { %v6620_v15 = vpop.eup %6619 }
 0x603   :  { %v6622_v61 = vpop.eup %6621  ;;  %6627 = vrcp.f32 %v4026_v13  ;;  %v4032_v33 = vadd.f32 1.0, %v6620_v15 }
 0x604   :  { %v6624_v50 = vpop.eup %6623  ;;  %6629 = vtanh.f32 %v4021_v21 }
 0x605   :  { %6631 = vrcp.f32 %v4032_v33  ;;  %v3715_v4 = vmul.f32 %v6624_v50, %v6622_v61  ;;  %v6626_v28 = vpop.eup %6625  ;;  %v8724_v33 = vld [vmem:[%s8968_s3 + $0x80] ss:$16 sps:$4 sm:$0xff]   ;;  %v8729_v50 = vld [vmem:[%s8968_s3 + $0x88] ss:$16 sps:$4 sm:$0xff]  }
 0x606   :  { %v4039_v13 = vadd.f32 1.0, %v6626_v28  ;;  %9087 = vst [vmem:[#allocation9_spill] sm:$0xff] %v8729_v50  ;;  %v8748_v28 = vld [vmem:[%s8968_s3 + $0x60] ss:$16 sps:$4 sm:$0xff]  }
 0x607   :  { %v8640_v53 = vsel %vm3726_vm12, %v3715_v4, %v8360_v31  ;;  %v3731_v63 = vsel %vm3726_vm12, %v3715_v4, 0.0  ;;  %v8658_v31 = vld [vmem:[%s8968_s3 + $0xc4] ss:$16 sps:$4 sm:$0xff]   ;;  %9090 = vst [vmem:[#allocation8_spill] sm:$0xff] %v8748_v28 }
 0x608   :  { %v3732_v17 = vpack.c.bf16 %v3731_v63, %v3731_v63  ;;  %v4075_v60 = vpack.c.bf16 %v8640_v53, %v8640_v53  ;;  %v8736_v4 = vld [vmem:[%s8968_s3 + $0x64] ss:$16 sps:$4 sm:$0xff]   ;;  %v8741_v63 = vld [vmem:[%s8968_s3 + $0x6c] ss:$16 sps:$4 sm:$0xff]   ;;  %6633 = vrcp.f32 %v4039_v13 }
 0x609   :  { %9088 = vst [vmem:[#allocation6_spill] sm:$0xff] %v8736_v4  ;;  %9089 = vst [vmem:[#allocation7_spill] sm:$0xff] %v8741_v63  ;;  %v8769_v13 = vld [vmem:[%s8968_s3 + $0x4c] ss:$16 sps:$4 sm:$0xff]  }
 0x60a   :  { %5853 = vst [vmem:[%s8973_s6 + $0x14] sm:$0xf] %v3732_v17  ;;  %4301 = vmatmul.mubr.bf16.vlgmr.msra.gmra.mxu0 %v4075_v60  ;;  %4342 = vmatmul.mubr.bf16.vlgmr.msra.gmra.mxu1 %v4075_v60  ;;  %v4056_v17 = vpop.permute.xlu1 %4055  ;;  %9093 = vst [vmem:[#allocation12_spill] sm:$0xff] %v8769_v13 }
 0x60b   :  { %4600 = vmatpush1.bf16.msra.mxu0 %v8646_v9  ;;  %4641 = vmatpush1.bf16.msra.mxu1 %v8651_v8  ;;  %vm4057_vm13 = vcmp.eq.s32.totalorder %v4056_v17, 1 }
 0x60c   :  { %4601 = vmatprep.subr.bf16.mxu0 %v8658_v31  ;;  %4642 = vmatprep.subr.bf16.mxu1 %v8663_v57 }
 0x60d   :  { %4631 = vmatprep.mubr.bf16.mxu0 %v9048_v1  ;;  %4672 = vmatprep.mubr.bf16.mxu1 %v9048_v1 }
 0x60f   :  { %4602 = vmatpush1.bf16.msra.mxu0 %v8673_v0  ;;  %4643 = vmatpush1.bf16.msra.mxu1 %v8678_v47 }
 0x610   :  { %v6628_v59 = vpop.eup %6627  ;;  %4603 = vmatprep.subr.bf16.mxu0 %v8685_v2  ;;  %4644 = vmatprep.subr.bf16.mxu1 %v8690_v54 }
 0x611   :  { %v6630_v37 = vpop.eup %6629 }
 0x612   :  { %v6632_v21 = vpop.eup %6631  ;;  %v4043_v15 = vmul.f32 %v6630_v37, %v6628_v59  ;;  %v8753_v59 = vld [vmem:[%s8968_s3 + $0x68] ss:$16 sps:$4 sm:$0xff]  }
 0x613   :  { %v4042_v61 = vmul.f32 %v6632_v21, %v8387_v38  ;;  %4604 = vmatpush1.bf16.msra.mxu0 %v8699_v23  ;;  %4645 = vmatpush1.bf16.msra.mxu1 %v8704_v62  ;;  %9091 = vst [vmem:[#allocation10_spill] sm:$0xff] %v8753_v59  ;;  %v8764_v21 = vld [vmem:[%s8968_s3 + $0x44] ss:$16 sps:$4 sm:$0xff]  }
 0x614   :  { %4605 = vmatprep.subr.bf16.mxu0 %v8711_v7  ;;  %4646 = vmatprep.subr.bf16.mxu1 %v8716_v10  ;;  %9092 = vst [vmem:[#allocation11_spill] sm:$0xff] %v8764_v21 }
 0x615   :  { %v4044_v60 = vadd.f32 %v4043_v15, %v4042_v61  ;;  %v8781_v15 = vld [vmem:[%s8968_s3 + $0x48] ss:$16 sps:$4 sm:$0xff]   ;;  %v8788_v61 = vld [vmem:[%s8968_s3 + $0x24] ss:$16 sps:$4 sm:$0xff]  }
 0x616   :  { %9095 = vst [vmem:[#allocation14_spill] sm:$0xff] %v8781_v15  ;;  %9096 = vst [vmem:[#allocation15_spill] sm:$0xff] %v8788_v61 }
 0x617   :  { %6635 = vtanh.f32 %v4044_v60  ;;  %4606 = vmatpush1.bf16.msra.mxu0 %v8724_v33  ;;  %4647 = vmatpush1.bf16.msra.mxu1 %v8729_v50  ;;  %v8757_v37 = vsel %vm4057_vm13, %v4044_v60, %v8387_v38  ;;  %v8776_v38 = vld [vmem:[%s8968_s3 + $0x40] ss:$16 sps:$4 sm:$0xff]   ;;  %v8793_v60 = vld [vmem:[%s8968_s3 + $0x2c] ss:$16 sps:$4 sm:$0xff]  }
 0x618   :  { %4607 = vmatprep.subr.bf16.mxu0 %v8736_v4  ;;  %4648 = vmatprep.subr.bf16.mxu1 %v8741_v63  ;;  %9094 = vst [vmem:[#allocation13_spill] sm:$0xff] %v8776_v38  ;;  %9097 = vst [vmem:[#allocation16_spill] sm:$0xff] %v8793_v60 }
 0x61b   :  { %4608 = vmatpush1.bf16.msra.mxu0 %v8748_v28  ;;  %4649 = vmatpush1.bf16.msra.mxu1 %v8753_v59  ;;  %v6634_v59 = vpop.eup %6633 }
 0x61c   :  { %4609 = vmatprep.subr.bf16.mxu0 %v8764_v21  ;;  %4650 = vmatprep.subr.bf16.mxu1 %v8769_v13  ;;  %v8800_v21 = vld [vmem:[%s8968_s3 + $0x20] ss:$16 sps:$4 sm:$0xff]   ;;  %v8805_v13 = vld [vmem:[%s8968_s3 + $0x28] ss:$16 sps:$4 sm:$0xff]  }
 0x61d   :  { %9098 = vst [vmem:[#allocation17_spill] sm:$0xff] %v8800_v21  ;;  %9099 = vst [vmem:[#allocation18_spill] sm:$0xff] %v8805_v13 }
 0x61f   :  { %4610 = vmatpush1.bf16.msra.mxu0 %v8776_v38  ;;  %4651 = vmatpush1.bf16.msra.mxu1 %v8781_v15  ;;  %v8812_v38 = vld [vmem:[%s8968_s3 + $0x4] ss:$16 sps:$4 sm:$0xff]   ;;  %v8817_v15 = vld [vmem:[%s8968_s3 + $0xc] ss:$16 sps:$4 sm:$0xff]  }
 0x620   :  { %4611 = vmatprep.subr.bf16.mxu0 %v8788_v61  ;;  %4652 = vmatprep.subr.bf16.mxu1 %v8793_v60  ;;  %v8824_v61 = vld [vmem:[%s8968_s3] ss:$16 sps:$4 sm:$0xff]   ;;  %v8829_v60 = vld [vmem:[%s8968_s3 + $0x8] ss:$16 sps:$4 sm:$0xff]  }
 0x623   :  { %4612 = vmatpush1.bf16.msra.mxu0 %v8800_v21  ;;  %4653 = vmatpush1.bf16.msra.mxu1 %v8805_v13 }
 0x624   :  { %v6636_v28 = vpop.eup %6635  ;;  %4613 = vmatprep.subr.bf16.mxu0 %v8812_v38  ;;  %4654 = vmatprep.subr.bf16.mxu1 %v8817_v15 }
 0x625   :  { %v4046_v63 = vmul.f32 %v6636_v28, %v6634_v59 }
 0x627   :  { %4614 = vmatpush1.bf16.msra.mxu0 %v8824_v61  ;;  %4655 = vmatpush1.bf16.msra.mxu1 %v8829_v60  ;;  %v8837_v13 = vsel %vm4057_vm13, %v4046_v63, %v8407_v5  ;;  %v4062_v21 = vsel %vm4057_vm13, %v4046_v63, 0.0  ;;  %v5893_v5 = vld [vmem:[%s8971_s0 + $0x60] sm:$0xff] }
 0x628   :  { %v4063_v4 = vpack.c.bf16 %v4062_v21, %v4062_v21  ;;  %v4406_v50 = vpack.c.bf16 %v8837_v13, %v8837_v13  ;;  %4930 = vmatprep.subr.bf16.mxu0 %v8420_v40  ;;  %4971 = vmatprep.subr.bf16.mxu1 %v8425_v16  ;;  %v4071_v40 = vunpack.c.l.bf16 %v5893_v5  ;;  %v4072_v16 = vunpack.c.h.bf16 %v5893_v5 }
 0x62a   :  { %5892 = vst [vmem:[%s8974_s7 + $0x8] sm:$0xf] %v4063_v4  ;;  %4632 = vmatmul.mubr.bf16.vlgmr.msra.gmra.mxu0 %v4406_v50  ;;  %4673 = vmatmul.mubr.bf16.vlgmr.msra.gmra.mxu1 %v4406_v50 }
 0x62b   :  { %4931 = vmatpush1.bf16.msra.mxu0 %v8430_v41  ;;  %4972 = vmatpush1.bf16.msra.mxu1 %v8435_v22 }
 0x62c   :  { %4932 = vmatprep.subr.bf16.mxu0 %v8444_v6  ;;  %4973 = vmatprep.subr.bf16.mxu1 %v8459_v11 }
 0x62d   :  { %4962 = vmatprep.mubr.bf16.mxu0 %v9048_v1  ;;  %5003 = vmatprep.mubr.bf16.mxu1 %v9048_v1 }
 0x62f   :  { %4933 = vmatpush1.bf16.msra.mxu0 %v8449_v58  ;;  %4974 = vmatpush1.bf16.msra.mxu1 %v8454_v3 }
 0x630   :  { %4934 = vmatprep.subr.bf16.mxu0 %v8468_v12  ;;  %4975 = vmatprep.subr.bf16.mxu1 %v8473_v44 }
 0x633   :  { %4935 = vmatpush1.bf16.msra.mxu0 %v8478_v43  ;;  %4976 = vmatpush1.bf16.msra.mxu1 %v8483_v45 }
 0x634   :  { %4936 = vmatprep.subr.bf16.mxu0 %v8492_v48  ;;  %4977 = vmatprep.subr.bf16.mxu1 %v8497_v51 }
 0x637   :  { %4937 = vmatpush1.bf16.msra.mxu0 %v8502_v19  ;;  %4978 = vmatpush1.bf16.msra.mxu1 %v8507_v20  ;;  %v5894_v19 = vld [vmem:[%s8971_s0 + $0x68] sm:$0xff] }
 0x638   :  { %4938 = vmatprep.subr.bf16.mxu0 %v8516_v42  ;;  %4979 = vmatprep.subr.bf16.mxu1 %v8521_v49  ;;  %v4074_v20 = vunpack.c.h.bf16 %v5894_v19  ;;  %v4073_v49 = vunpack.c.l.bf16 %v5894_v19 }
 0x63b   :  { %4939 = vmatpush1.bf16.msra.mxu0 %v8526_v55  ;;  %4980 = vmatpush1.bf16.msra.mxu1 %v8531_v34 }
 0x63c   :  { %4940 = vmatprep.subr.bf16.mxu0 %v8540_v56  ;;  %4981 = vmatprep.subr.bf16.mxu1 %v8545_v39 }
 0x63f   :  { %4941 = vmatpush1.bf16.msra.mxu0 %v8550_v24  ;;  %4982 = vmatpush1.bf16.msra.mxu1 %v8555_v25 }
 0x640   :  { %4942 = vmatprep.subr.bf16.mxu0 %v8564_v26  ;;  %4983 = vmatprep.subr.bf16.mxu1 %v8569_v27  ;;  %v5932_v26 = vld [vmem:[%s8972_s1 + $0x10] sm:$0xff] }
 0x641   :  { %v4402_v27 = vunpack.c.l.bf16 %v5932_v26 }
 0x643   :  { %4943 = vmatpush1.bf16.msra.mxu0 %v8574_v29  ;;  %4984 = vmatpush1.bf16.msra.mxu1 %v8579_v30  ;;  %v4403_v29 = vunpack.c.h.bf16 %v5932_v26 }
 0x644   :  { %4944 = vmatprep.subr.bf16.mxu0 %v8588_v46  ;;  %4985 = vmatprep.subr.bf16.mxu1 %v8593_v32 }
 0x647   :  { %4945 = vmatpush1.bf16.msra.mxu0 %v8598_v35  ;;  %4986 = vmatpush1.bf16.msra.mxu1 %v8603_v18 }
 0x648   :  { %5260 = vmatprep.subr.bf16.mxu0 %v8612_v36  ;;  %5301 = vmatprep.subr.bf16.mxu1 %v8617_v14 }
 0x6ca   :  { %v4302_v41 = vpop.f32.mrf.mxu0  ;;  %v4343_v22 = vpop.f32.mrf.mxu1 }
 0x6cb   :  { %v4350_v6 = vadd.f32 %v4302_v41, %v4071_v40  ;;  %v4352_v56 = vadd.f32 %v4343_v22, %v4073_v49 }
 0x6cc   :  { %v4304_v58 = vpop.f32.mrf.mxu0  ;;  %v4345_v3 = vpop.f32.mrf.mxu1 }
 0x6cd   :  { %v5927_v11 = vmul.f32 -1.442695, %v4350_v6  ;;  %v4351_v12 = vadd.f32 %v4304_v58, %v4072_v16  ;;  %v4353_v42 = vadd.f32 %v4345_v3, %v4074_v20  ;;  %v4387_v6 = vpop.permute.xlu0 %4386  ;;  %v5933_v3 = vld [vmem:[%s8972_s1 + $0x18] sm:$0xff] }
 0x6ce   :  { %v4306_v44 = vpop.f32.mrf.mxu0  ;;  %v4347_v43 = vpop.f32.mrf.mxu1  ;;  %vm4388_vm14 = vcmp.eq.s32.totalorder %v4387_v6, 1 }
 0x6cf   :  { %6637 = vpow2.f32 %v5927_v11  ;;  %v5928_v45 = vmul.f32 -1.442695, %v4351_v12  ;;  %v5929_v55 = vmul.f32 -1.442695, %v4353_v42  ;;  %v4405_v11 = vunpack.c.h.bf16 %v5933_v3 }
 0x6d0   :  { %v4307_v48 = vpop.f32.mrf.mxu0  ;;  %v4348_v51 = vpop.f32.mrf.mxu1  ;;  %v4404_v43 = vunpack.c.l.bf16 %v5933_v3 }
 0x6d1   :  { %6639 = vpow2.f32 %v5928_v45 }
 0x6d2   :  { %6641 = vpow2.f32 %v5929_v55 }
 0x6dc   :  { %v6638_v34 = vpop.eup %6637 }
 0x6dd   :  { %v4357_v39 = vadd.f32 1.0, %v6638_v34 }
 0x6de   :  { %v6640_v24 = vpop.eup %6639 }
 0x6df   :  { %6643 = vrcp.f32 %v4357_v39  ;;  %v4363_v25 = vadd.f32 1.0, %v6640_v24  ;;  %v6642_v32 = vpop.eup %6641 }
 0x6e0   :  { %6645 = vtanh.f32 %v4352_v56  ;;  %v4370_v28 = vadd.f32 1.0, %v6642_v32  ;;  %v9111_v32 = vld [vmem:[#allocation17_spill] sm:$0xff] }
 0x6e1   :  { %6647 = vrcp.f32 %v4363_v25 }
 0x6ea   :  { %v4633_v30 = vpop.f32.mrf.mxu0  ;;  %v4674_v46 = vpop.f32.mrf.mxu1 }
 0x6eb   :  { %v4681_v35 = vadd.f32 %v4633_v30, %v4402_v27  ;;  %v4683_v51 = vadd.f32 %v4674_v46, %v4404_v43  ;;  %v9106_v27 = vld [vmem:[#allocation12_spill] sm:$0xff]  ;;  %v9109_v30 = vld [vmem:[#allocation15_spill] sm:$0xff] }
 0x6ec   :  { %v6644_v18 = vpop.eup %6643  ;;  %v4635_v36 = vpop.f32.mrf.mxu0 }
 0x6ed   :  { %v4676_v14 = vpop.f32.mrf.mxu1  ;;  %v6646_v50 = vpop.eup %6645  ;;  %v5966_v4 = vmul.f32 -1.442695, %v4681_v35  ;;  %v4682_v63 = vadd.f32 %v4635_v36, %v4403_v29  ;;  %v9107_v29 = vld [vmem:[#allocation13_spill] sm:$0xff]  ;;  %v9112_v35 = vld [vmem:[#allocation18_spill] sm:$0xff] }
 0x6ee   :  { %v6648_v17 = vpop.eup %6647  ;;  %v4637_v59 = vpop.f32.mrf.mxu0  ;;  %v4374_v5 = vmul.f32 %v6646_v50, %v6644_v18  ;;  %v4684_v44 = vadd.f32 %v4676_v14, %v4405_v11 }
 0x6ef   :  { %v4678_v21 = vpop.f32.mrf.mxu1  ;;  %v4373_v40 = vmul.f32 %v6648_v17, %v8636_v52  ;;  %6649 = vpow2.f32 %v5966_v4  ;;  %v5967_v16 = vmul.f32 -1.442695, %v4682_v63 }
 0x6f0   :  { %v4638_v41 = vpop.f32.mrf.mxu0  ;;  %v5968_v45 = vmul.f32 -1.442695, %v4684_v44 }
 0x6f1   :  { %v4679_v22 = vpop.f32.mrf.mxu1  ;;  %v4375_v58 = vadd.f32 %v4374_v5, %v4373_v40  ;;  %6651 = vpow2.f32 %v5967_v16 }
 0x6f2   :  { %6653 = vrcp.f32 %v4370_v28 }
 0x6f3   :  { %6655 = vtanh.f32 %v4375_v58  ;;  %v8896_v12 = vsel %vm4388_vm14, %v4375_v58, %v8636_v52  ;;  %v5972_v58 = vld [vmem:[%s8971_s0 + $0x78] sm:$0xff] }
 0x6f4   :  { %6657 = vpow2.f32 %v5968_v45  ;;  %v4736_v3 = vunpack.c.h.bf16 %v5972_v58  ;;  %v4735_v44 = vunpack.c.l.bf16 %v5972_v58 }
 0x6fc   :  { %v6650_v48 = vpop.eup %6649 }
 0x6fd   :  { %v4688_v19 = vadd.f32 1.0, %v6650_v48 }
 0x6fe   :  { %v6652_v20 = vpop.eup %6651 }
 0x6ff   :  { %v6654_v42 = vpop.eup %6653  ;;  %6659 = vrcp.f32 %v4688_v19  ;;  %v4694_v49 = vadd.f32 1.0, %v6652_v20 }
 0x700   :  { %v6656_v55 = vpop.eup %6655  ;;  %6661 = vtanh.f32 %v4683_v51 }
 0x701   :  { %6663 = vrcp.f32 %v4694_v49  ;;  %v4377_v34 = vmul.f32 %v6656_v55, %v6654_v42  ;;  %v5061_v42 = vld [vmem:[%s8972_s1] sm:$0xff] }
 0x702   :  { %v5063_v49 = vunpack.c.l.bf16 %v5061_v42  ;;  %v5064_v55 = vunpack.c.h.bf16 %v5061_v42 }
 0x703   :  { %v4389_v56 = vsel %vm4388_vm14, %v4377_v34, %v8640_v53  ;;  %v4393_v52 = vsel %vm4388_vm14, %v4377_v34, 0.0  ;;  %v6658_v53 = vpop.eup %6657 }
 0x704   :  { %v4394_v39 = vpack.c.bf16 %v4393_v52, %v4393_v52  ;;  %v4737_v24 = vpack.c.bf16 %v4389_v56, %v4389_v56  ;;  %v4701_v26 = vadd.f32 1.0, %v6658_v53 }
 0x706   :  { %5931 = vst [vmem:[%s8973_s6 + $0x18] sm:$0xf] %v4394_v39  ;;  %4963 = vmatmul.mubr.bf16.vlgmr.msra.gmra.mxu0 %v4737_v24  ;;  %5004 = vmatmul.mubr.bf16.vlgmr.msra.gmra.mxu1 %v4737_v24  ;;  %6665 = vrcp.f32 %v4701_v26 }
 0x707   :  { %5261 = vmatpush1.bf16.msra.mxu0 %v8646_v9  ;;  %5302 = vmatpush1.bf16.msra.mxu1 %v8651_v8 }
 0x708   :  { %5262 = vmatprep.subr.bf16.mxu0 %v8658_v31  ;;  %5303 = vmatprep.subr.bf16.mxu1 %v8663_v57 }
 0x709   :  { %5292 = vmatprep.mubr.bf16.mxu0 %v9048_v1  ;;  %5333 = vmatprep.mubr.bf16.mxu1 %v9048_v1  ;;  %v4718_v1 = vpop.permute.xlu1 %4717 }
 0x70a   :  { %vm4719_vm15 = vcmp.eq.s32.totalorder %v4718_v1, 1 }
 0x70b   :  { %5263 = vmatpush1.bf16.msra.mxu0 %v8673_v0  ;;  %5304 = vmatpush1.bf16.msra.mxu1 %v8678_v47  ;;  %v9100_v47 = vld [vmem:[#allocation9_spill] sm:$0xff] }
 0x70c   :  { %v6660_v25 = vpop.eup %6659  ;;  %5264 = vmatprep.subr.bf16.mxu0 %v8685_v2  ;;  %5305 = vmatprep.subr.bf16.mxu1 %v8690_v54  ;;  %v9101_v54 = vld [vmem:[#allocation6_spill] sm:$0xff] }
 0x70d   :  { %v6662_v9 = vpop.eup %6661 }
 0x70e   :  { %v6664_v8 = vpop.eup %6663  ;;  %v4705_v31 = vmul.f32 %v6662_v9, %v6660_v25 }
 0x70f   :  { %v4704_v57 = vmul.f32 %v6664_v8, %v8757_v37  ;;  %5265 = vmatpush1.bf16.msra.mxu0 %v8699_v23  ;;  %5306 = vmatpush1.bf16.msra.mxu1 %v8704_v62  ;;  %v9102_v23 = vld [vmem:[#allocation7_spill] sm:$0xff]  ;;  %v9103_v62 = vld [vmem:[#allocation8_spill] sm:$0xff] }
 0x710   :  { %5266 = vmatprep.subr.bf16.mxu0 %v8711_v7  ;;  %5307 = vmatprep.subr.bf16.mxu1 %v8716_v10  ;;  %v9104_v7 = vld [vmem:[#allocation10_spill] sm:$0xff]  ;;  %v9105_v10 = vld [vmem:[#allocation11_spill] sm:$0xff] }
 0x711   :  { %v4706_v0 = vadd.f32 %v4705_v31, %v4704_v57 }
 0x713   :  { %6667 = vtanh.f32 %v4706_v0  ;;  %5267 = vmatpush1.bf16.msra.mxu0 %v8724_v33  ;;  %5308 = vmatpush1.bf16.msra.mxu1 %v9100_v47  ;;  %v8923_v2 = vsel %vm4719_vm15, %v4706_v0, %v8757_v37  ;;  %v9108_v33 = vld [vmem:[#allocation14_spill] sm:$0xff]  ;;  %v9110_v37 = vld [vmem:[#allocation16_spill] sm:$0xff]  ;;  %v6666_v46 = vpop.eup %6665 }
 0x714   :  { %5268 = vmatprep.subr.bf16.mxu0 %v9101_v54  ;;  %5309 = vmatprep.subr.bf16.mxu1 %v9102_v23 }
 0x717   :  { %5269 = vmatpush1.bf16.msra.mxu0 %v9103_v62  ;;  %5310 = vmatpush1.bf16.msra.mxu1 %v9104_v7 }
 0x718   :  { %5270 = vmatprep.subr.bf16.mxu0 %v9105_v10  ;;  %5311 = vmatprep.subr.bf16.mxu1 %v9106_v27  ;;  %v5062_v27 = vld [vmem:[%s8972_s1 + $0x8] sm:$0xff] }
 0x71b   :  { %5271 = vmatpush1.bf16.msra.mxu0 %v9107_v29  ;;  %5312 = vmatpush1.bf16.msra.mxu1 %v9108_v33  ;;  %v5066_v29 = vunpack.c.h.bf16 %v5062_v27 }
 0x71c   :  { %5272 = vmatprep.subr.bf16.mxu0 %v9109_v30  ;;  %5313 = vmatprep.subr.bf16.mxu1 %v9110_v37  ;;  %v5065_v30 = vunpack.c.l.bf16 %v5062_v27 }
 0x71f   :  { %5273 = vmatpush1.bf16.msra.mxu0 %v9111_v32  ;;  %5314 = vmatpush1.bf16.msra.mxu1 %v9112_v35 }
 0x720   :  { %v6668_v18 = vpop.eup %6667  ;;  %5274 = vmatprep.subr.bf16.mxu0 %v8812_v38  ;;  %5315 = vmatprep.subr.bf16.mxu1 %v8817_v15  ;;  %v5971_v38 = vld [vmem:[%s8971_s0 + $0x70] sm:$0xff] }
 0x721   :  { %v4708_v36 = vmul.f32 %v6668_v18, %v6666_v46  ;;  %v4733_v15 = vunpack.c.l.bf16 %v5971_v38 }
 0x723   :  { %5275 = vmatpush1.bf16.msra.mxu0 %v8824_v61  ;;  %5316 = vmatpush1.bf16.msra.mxu1 %v8829_v60  ;;  %v4720_v14 = vsel %vm4719_vm15, %v4708_v36, %v8837_v13  ;;  %v4724_v50 = vsel %vm4719_vm15, %v4708_v36, 0.0  ;;  %v4734_v61 = vunpack.c.h.bf16 %v5971_v38  ;;  %v5049_v36 = vpop.permute.xlu0 %5048 }
 0x724   :  { %v4725_v4 = vpack.c.bf16 %v4724_v50, %v4724_v50  ;;  %v5067_v63 = vpack.c.bf16 %v4720_v14, %v4720_v14  ;;  %vm5050_vm0 = vcmp.eq.s32.totalorder %v5049_v36, 1 }
 0x726   :  { %5970 = vst [vmem:[%s8974_s7 + $0x4] sm:$0xf] %v4725_v4  ;;  %5293 = vmatmul.mubr.bf16.vlgmr.msra.gmra.mxu0 %v5067_v63  ;;  %5334 = vmatmul.mubr.bf16.vlgmr.msra.gmra.mxu1 %v5067_v63 }
 0x7c6   :  { %v4964_v60 = vpop.f32.mrf.mxu0  ;;  %v5005_v17 = vpop.f32.mrf.mxu1 }
 0x7c7   :  { %v5012_v28 = vadd.f32 %v4964_v60, %v4733_v15  ;;  %v5014_v48 = vadd.f32 %v5005_v17, %v4735_v44 }
 0x7c8   :  { %v4966_v13 = vpop.f32.mrf.mxu0  ;;  %v5007_v59 = vpop.f32.mrf.mxu1 }
 0x7c9   :  { %v6005_v21 = vmul.f32 -1.442695, %v5012_v28  ;;  %v5013_v5 = vadd.f32 %v4966_v13, %v4734_v61  ;;  %v5015_v11 = vadd.f32 %v5007_v59, %v4736_v3 }
 0x7ca   :  { %v4968_v40 = vpop.f32.mrf.mxu0  ;;  %v5009_v16 = vpop.f32.mrf.mxu1 }
 0x7cb   :  { %6669 = vpow2.f32 %v6005_v21  ;;  %v6006_v41 = vmul.f32 -1.442695, %v5013_v5  ;;  %v6007_v43 = vmul.f32 -1.442695, %v5015_v11  ;;  %v5378_v40 = vpop.permute.xlu1 %5377 }
 0x7cc   :  { %v4969_v22 = vpop.f32.mrf.mxu0  ;;  %v5010_v6 = vpop.f32.mrf.mxu1  ;;  %vm5379_vm1 = vcmp.eq.s32.totalorder %v5378_v40, 1 }
 0x7cd   :  { %6671 = vpow2.f32 %v6006_v41 }
 0x7ce   :  { %6673 = vpow2.f32 %v6007_v43 }
 0x7d8   :  { %v6670_v45 = vpop.eup %6669 }
 0x7d9   :  { %v5019_v51 = vadd.f32 1.0, %v6670_v45 }
 0x7da   :  { %v6672_v19 = vpop.eup %6671 }
 0x7db   :  { %6675 = vrcp.f32 %v5019_v51  ;;  %v5025_v20 = vadd.f32 1.0, %v6672_v19  ;;  %v6674_v52 = vpop.eup %6673 }
 0x7dc   :  { %6677 = vtanh.f32 %v5014_v48  ;;  %v5032_v57 = vadd.f32 1.0, %v6674_v52 }
 0x7dd   :  { %6679 = vrcp.f32 %v5025_v20 }
 0x7e6   :  { %v5294_v34 = vpop.f32.mrf.mxu0  ;;  %v5335_v56 = vpop.f32.mrf.mxu1 }
 0x7e7   :  { %v5342_v39 = vadd.f32 %v5294_v34, %v5063_v49  ;;  %v5344_v32 = vadd.f32 %v5335_v56, %v5065_v30 }
 0x7e8   :  { %v6676_v24 = vpop.eup %6675  ;;  %v5296_v53 = vpop.f32.mrf.mxu0 }
 0x7e9   :  { %v5337_v25 = vpop.f32.mrf.mxu1  ;;  %v6678_v9 = vpop.eup %6677  ;;  %v6042_v8 = vmul.f32 -1.442695, %v5342_v39  ;;  %v5343_v26 = vadd.f32 %v5296_v53, %v5064_v55 }
 0x7ea   :  { %v6680_v31 = vpop.eup %6679  ;;  %v5298_v1 = vpop.f32.mrf.mxu0  ;;  %v5036_v47 = vmul.f32 %v6678_v9, %v6676_v24  ;;  %v5345_v33 = vadd.f32 %v5337_v25, %v5066_v29 }
 0x7eb   :  { %v5339_v0 = vpop.f32.mrf.mxu1  ;;  %v5035_v54 = vmul.f32 %v6680_v31, %v8896_v12  ;;  %6681 = vpow2.f32 %v6042_v8  ;;  %v6043_v23 = vmul.f32 -1.442695, %v5343_v26 }
 0x7ec   :  { %v5299_v62 = vpop.f32.mrf.mxu0  ;;  %v6044_v37 = vmul.f32 -1.442695, %v5345_v33 }
 0x7ed   :  { %v5340_v7 = vpop.f32.mrf.mxu1  ;;  %v5037_v10 = vadd.f32 %v5036_v47, %v5035_v54  ;;  %6683 = vpow2.f32 %v6043_v23 }
 0x7ee   :  { %6685 = vrcp.f32 %v5032_v57 }
 0x7ef   :  { %6687 = vtanh.f32 %v5037_v10 }
 0x7f0   :  { %6689 = vpow2.f32 %v6044_v37 }
 0x7f8   :  { %v6682_v46 = vpop.eup %6681 }
 0x7f9   :  { %v5349_v35 = vadd.f32 1.0, %v6682_v46 }
 0x7fa   :  { %v6684_v12 = vpop.eup %6683 }
 0x7fb   :  { %v6686_v18 = vpop.eup %6685  ;;  %6691 = vrcp.f32 %v5349_v35  ;;  %v5355_v14 = vadd.f32 1.0, %v6684_v12 }
 0x7fc   :  { %v6688_v50 = vpop.eup %6687  ;;  %6693 = vtanh.f32 %v5344_v32 }
 0x7fd   :  { %v5039_v4 = vmul.f32 %v6688_v50, %v6686_v18  ;;  %6695 = vrcp.f32 %v5355_v14  ;;  %v6690_v15 = vpop.eup %6689 }
 0x7fe   :  { %v5362_v28 = vadd.f32 1.0, %v6690_v15 }
 0x7ff   :  { %v5055_v63 = vsel %vm5050_vm0, %v5039_v4, 0.0 }
 0x800   :  { %v5056_v38 = vpack.c.bf16 %v5055_v63, %v5055_v63  ;;  %6697 = vrcp.f32 %v5362_v28 }
 0x802   :  { %6009 = vst [vmem:[%s8973_s6 + $0x1c] sm:$0xf] %v5056_v38 }
 0x808   :  { %v6692_v61 = vpop.eup %6691 }
 0x809   :  { %v6694_v60 = vpop.eup %6693 }
 0x80a   :  { %v6696_v17 = vpop.eup %6695  ;;  %v5366_v13 = vmul.f32 %v6694_v60, %v6692_v61 }
 0x80b   :  { %v5365_v59 = vmul.f32 %v6696_v17, %v8923_v2 }
 0x80d   :  { %v5367_v21 = vadd.f32 %v5366_v13, %v5365_v59  ;;  %v6698_v5 = vpop.eup %6697 }
 0x80f   :  { %6699 = vtanh.f32 %v5367_v21 }
 0x81c   :  { %v6700_v16 = vpop.eup %6699 }
 0x81d   :  { %v5369_v41 = vmul.f32 %v6700_v16, %v6698_v5 }
 0x81f   :  { %v5384_v22 = vsel %vm5379_vm1, %v5369_v41, 0.0 }
 0x820   :  { %v5385_v6 = vpack.c.bf16 %v5384_v22, %v5384_v22 }
 0x822   :  { %5386 = vst [vmem:[%s8974_s7] sm:$0xf] %v5385_v6 }

</bundles_post_ra>
